<compile_context>
chip_gen: v6e
topology: v6e:2x2x1
jax: 0.10.0
libtpu: 0.0.40
codegen_flags: <defaults>
</compile_context>

<pallas_src>
import functools
import math

import jax
import jax.numpy as jnp
from jax import lax
from jax.experimental import pallas as pl
from jax.experimental.pallas import tpu as pltpu

PAD_ID, SOS_ID, EOS_ID, UNK_ID = 0, 1, 2, 3
LANE = 128
SUBLANE_PACK = 16        # batch padded to a bf16 (16, 128) tile's sublane count
NEG_LOGIT = -1e9


def _round_up(x, m):
    return ((x + m - 1) // m) * m


# ---------------------------------------------------------------------------
# Fused kernel: BiGRU encoder + bridge + decoder GRU + vocab projection + CE
# ---------------------------------------------------------------------------

def seq2seq_kernel(x_ref, src_mask_ref,
                   enc_wih_ref, enc_bih_ref,
                   enc_whhf_ref, enc_bhhf_ref, enc_whhb_ref, enc_bhhb_ref,
                   wb_ref, bb_ref,
                   y_ref, gold_ref,
                   dec_wih_ref, dec_bih_ref, dec_whh_ref, dec_bhh_ref,
                   out_w_ref, out_b_ref,
                   loss_ref,
                   gi_enc_ref, gi_dec_ref, h_hist_ref,
                   *, S, T, Bp, B, Hp, Dhp, Vpad, pad_id,
                   unroll_enc, unroll_dec):
    """Whole seq2seq forward pass in one kernel.

    x_ref:      (S*Bp, E)    bf16 time-major embedded source (row = t*Bp + b)
    src_mask:   (S*Bp, 1)    f32, 1.0 where t < length[b], 0 on pad rows
    enc_wih:    (E, 6*Hp)    bf16 [fwd r,z,n | bwd r,z,n], lane-aligned gates
    wb/bb:      bridge (2*Hp, Dhp) / (1, Dhp)
    y_ref:      (T*Bp, Ed)   bf16 embedded decoder inputs tgt[:, :-1]
    gold_ref:   (T*Bp, 1)    int32 gold ids tgt[:, 1:]   (PAD on pad rows)
    out_w/b:    (Dhp, Vpad) bf16 / (1, Vpad) f32 (padded vocab bias = -1e9)
    loss_ref:   (1, 1)       f32 sum-CE / batch_size
    gi_enc:     (S*Bp, 6*Hp) bf16 scratch (hoisted encoder input projection)
    gi_dec:     (T*Bp, 3*Dhp) bf16 scratch (hoisted decoder input projection)
    h_hist:     (T*Bp, Dhp)  bf16 scratch (decoder hidden history for phase-2)
    """
    f32 = jnp.float32
    bf16 = jnp.bfloat16

    def gru_cell(gi, h, whh, bhh, hd):
        # PyTorch GRU cell with the input projection (gi, incl. b_ih) precomputed.
        gh = jnp.dot(h.astype(bf16), whh, preferred_element_type=f32) + bhh
        r = jax.nn.sigmoid(gi[:, :hd] + gh[:, :hd])
        z = jax.nn.sigmoid(gi[:, hd:2 * hd] + gh[:, hd:2 * hd])
        n = jnp.tanh(gi[:, 2 * hd:3 * hd] + r * gh[:, 2 * hd:3 * hd])
        return (1.0 - z) * n + z * h

    # ---- encoder phase 1: one MXU matmul for all timesteps of both dirs ----
    gi_enc_ref[...] = (jnp.dot(x_ref[...], enc_wih_ref[...],
                               preferred_element_type=f32)
                       + enc_bih_ref[...]).astype(bf16)

    # hoisted loop invariants (biases stay (1, 3*Hp): sublane-broadcast add)
    whh_f = enc_whhf_ref[...]
    whh_b = enc_whhb_ref[...]
    bhh_f = enc_bhhf_ref[...]
    bhh_b = enc_bhhb_ref[...]

    # ---- encoder phase 2: serial recurrence, fwd and bwd fused in one body ----
    def enc_step(i, carry):
        h_f, h_b = carry
        row_f = pl.multiple_of(i * Bp, Bp)
        gi_f = gi_enc_ref[pl.ds(row_f, Bp), pl.ds(0, 3 * Hp)].astype(f32)
        m_f = src_mask_ref[pl.ds(row_f, Bp), :]
        h_f = jnp.where(m_f > 0.0, gru_cell(gi_f, h_f, whh_f, bhh_f, Hp), h_f)

        row_b = pl.multiple_of((S - 1 - i) * Bp, Bp)
        gi_b = gi_enc_ref[pl.ds(row_b, Bp), pl.ds(3 * Hp, 3 * Hp)].astype(f32)
        m_b = src_mask_ref[pl.ds(row_b, Bp), :]
        h_b = jnp.where(m_b > 0.0, gru_cell(gi_b, h_b, whh_b, bhh_b, Hp), h_b)
        return h_f, h_b

    h0e = jnp.zeros((Bp, Hp), f32)
    h_f, h_b = lax.fori_loop(0, S, enc_step, (h0e, h0e), unroll=unroll_enc)

    # ---- MLPBridger ('mapping'): linear enc_dim -> dec_hidden ----
    h = (jnp.dot(h_f.astype(bf16), wb_ref[pl.ds(0, Hp), :],
                 preferred_element_type=f32)
         + jnp.dot(h_b.astype(bf16), wb_ref[pl.ds(Hp, Hp), :],
                   preferred_element_type=f32)
         + bb_ref[...])                                            # (Bp, Dhp)

    # ---- decoder phase 1: hoisted input projection for all timesteps ----
    gi_dec_ref[...] = (jnp.dot(y_ref[...], dec_wih_ref[...],
                               preferred_element_type=f32)
                       + dec_bih_ref[...]).astype(bf16)

    dwhh = dec_whh_ref[...]
    dbhh = dec_bhh_ref[...]

    # ---- decoder phase 2: serial recurrence only; store h_t history ----
    def dec_step(t, hh):
        row = pl.multiple_of(t * Bp, Bp)
        gi = gi_dec_ref[pl.ds(row, Bp), :].astype(f32)
        hh = gru_cell(gi, hh, dwhh, dbhh, Dhp)
        h_hist_ref[pl.ds(row, Bp), :] = hh.astype(bf16)
        return hh

    lax.fori_loop(0, T, dec_step, h, unroll=unroll_dec)

    # ---- decoder phase 3: one big vocab projection + vectorized CE ----
    logits = (jnp.dot(h_hist_ref[...], out_w_ref[...],
                      preferred_element_type=f32)
              + out_b_ref[...])                                    # (T*Bp, Vpad)
    m = jnp.max(logits, axis=-1, keepdims=True)
    logz = m + jnp.log(jnp.sum(jnp.exp(logits - m), axis=-1, keepdims=True))

    gold = gold_ref[...]                                           # (T*Bp, 1)
    vocab_iota = lax.broadcasted_iota(jnp.int32, (T * Bp, Vpad), 1)
    gold_logit = jnp.sum(jnp.where(vocab_iota == gold, logits, 0.0),
                         axis=-1, keepdims=True)                   # (T*Bp, 1)
    pad_m = (gold != pad_id).astype(f32)                           # ignore_index
    nll = (logz - gold_logit) * pad_m
    loss_ref[...] = jnp.sum(nll, keepdims=True) / f32(B)


# ---------------------------------------------------------------------------
# Parameters (logical, PyTorch-like shapes) and lane-aligned padding
# ---------------------------------------------------------------------------

def init_params(key, Vw, Vp, E, Ed, H, Dh):
    keys = jax.random.split(key, 16)
    s_enc = float(1.0 / (H ** 0.5))
    s_dec = float(1.0 / (Dh ** 0.5))

    def u(k, shape, s):
        return jax.random.uniform(k, shape, jnp.float32, -s, s)

    word_emb = 0.1 * jax.random.normal(keys[0], (Vw, E), jnp.float32)
    word_emb = word_emb.at[PAD_ID].set(0.0)        # padding_idx=0
    parse_emb = 0.1 * jax.random.normal(keys[1], (Vp, Ed), jnp.float32)
    parse_emb = parse_emb.at[PAD_ID].set(0.0)

    return dict(
        word_emb=word_emb, parse_emb=parse_emb,
        enc_wih_f=u(keys[2], (E, 3 * H), s_enc), enc_whh_f=u(keys[3], (H, 3 * H), s_enc),
        enc_bih_f=u(keys[4], (1, 3 * H), s_enc), enc_bhh_f=u(keys[5], (1, 3 * H), s_enc),
        enc_wih_b=u(keys[6], (E, 3 * H), s_enc), enc_whh_b=u(keys[7], (H, 3 * H), s_enc),
        enc_bih_b=u(keys[8], (1, 3 * H), s_enc), enc_bhh_b=u(keys[9], (1, 3 * H), s_enc),
        bridge_w=u(keys[10], (2 * H, Dh), s_dec),
        bridge_b=jnp.zeros((1, Dh), jnp.float32),
        dec_wih=u(keys[11], (Ed, 3 * Dh), s_dec), dec_whh=u(keys[12], (Dh, 3 * Dh), s_dec),
        dec_bih=u(keys[13], (1, 3 * Dh), s_dec), dec_bhh=u(keys[14], (1, 3 * Dh), s_dec),
        out_w=u(keys[15], (Dh, Vp), s_dec),
        out_b=jnp.zeros((1, Vp), jnp.float32),
    )


def _pad_gates(w, h, hp):
    """(..., 3*h) -> (..., 3*hp): each gate block at the start of a lane-aligned slot."""
    # TODO(synk): for genuinely small hidden sizes consider padding only the
    # concatenated 3H block (accepting in-lane gate slices) to avoid 0-FLOP padding.
    parts = []
    for g in range(3):
        blk = w[..., g * h:(g + 1) * h]
        pad = [(0, 0)] * (w.ndim - 1) + [(0, hp - h)]
        parts.append(jnp.pad(blk, pad))
    return jnp.concatenate(parts, axis=-1)


def _pad_params(p, H, Hp, Dh, Dhp, Vp, Vpad):
    bf16, f32 = jnp.bfloat16, jnp.float32

    def whh_pad(w, h, hp):
        return jnp.pad(_pad_gates(w, h, hp), ((0, hp - h), (0, 0)))

    enc_wih = jnp.concatenate(
        [_pad_gates(p['enc_wih_f'], H, Hp), _pad_gates(p['enc_wih_b'], H, Hp)], axis=-1)
    enc_bih = jnp.concatenate(
        [_pad_gates(p['enc_bih_f'], H, Hp), _pad_gates(p['enc_bih_b'], H, Hp)], axis=-1)

    # bridge: rows laid out to match the padded [fwd | bwd] encoder hidden.
    bw = jnp.zeros((2 * Hp, Dhp), f32)
    bw = bw.at[:H, :Dh].set(p['bridge_w'][:H])
    bw = bw.at[Hp:Hp + H, :Dh].set(p['bridge_w'][H:])

    out_w = jnp.pad(p['out_w'], ((0, Dhp - Dh), (0, Vpad - Vp)))
    out_b = jnp.pad(p['out_b'], ((0, 0), (0, Vpad - Vp)), constant_values=NEG_LOGIT)

    return dict(
        enc_wih=enc_wih.astype(bf16),
        enc_bih=enc_bih.astype(f32),
        enc_whh_f=whh_pad(p['enc_whh_f'], H, Hp).astype(bf16),
        enc_bhh_f=_pad_gates(p['enc_bhh_f'], H, Hp).astype(f32),
        enc_whh_b=whh_pad(p['enc_whh_b'], H, Hp).astype(bf16),
        enc_bhh_b=_pad_gates(p['enc_bhh_b'], H, Hp).astype(f32),
        bridge_w=bw.astype(bf16),
        bridge_b=jnp.pad(p['bridge_b'], ((0, 0), (0, Dhp - Dh))).astype(f32),
        dec_wih=_pad_gates(p['dec_wih'], Dh, Dhp).astype(bf16),
        dec_bih=_pad_gates(p['dec_bih'], Dh, Dhp).astype(f32),
        dec_whh=whh_pad(p['dec_whh'], Dh, Dhp).astype(bf16),
        dec_bhh=_pad_gates(p['dec_bhh'], Dh, Dhp).astype(f32),
        out_w=out_w.astype(bf16),
        out_b=out_b.astype(f32),
    )


# ---------------------------------------------------------------------------
# Forward wrapper
# ---------------------------------------------------------------------------

def seq2seq_forward(params, src_seq, src_lengths, src_recover, tgt_seq):
    B, S = src_seq.shape
    Tt = tgt_seq.shape[1]
    Td = Tt - 1
    E = params['word_emb'].shape[1]
    Ed = params['parse_emb'].shape[1]
    H = params['enc_whh_f'].shape[0]
    Dh = params['bridge_w'].shape[1]
    Vp = params['out_w'].shape[1]

    Hp = _round_up(H, LANE)
    Dhp = _round_up(Dh, LANE)
    Vpad = _round_up(Vp, LANE)
    Bp = _round_up(B, SUBLANE_PACK)     # per-step slices land on bf16-tile-aligned rows

    pp = _pad_params(params, H, Hp, Dh, Dhp, Vp, Vpad)
    vmem = pl.BlockSpec(memory_space=pltpu.MemorySpace.VMEM)

    # --- glue: embedding lookups, time-major flatten, batch padding, masks ---
    x_emb = params['word_emb'][src_seq]                              # (B, S, E)
    x_tm = jnp.pad(jnp.transpose(x_emb, (1, 0, 2)), ((0, 0), (0, Bp - B), (0, 0)))
    x_flat = x_tm.reshape(S * Bp, E).astype(jnp.bfloat16)            # row = t*Bp + b
    src_mask = (jnp.arange(S)[:, None] < src_lengths[None, :]).astype(jnp.float32)
    src_mask = jnp.pad(src_mask, ((0, 0), (0, Bp - B)))              # pad rows: mask=0
    src_mask = src_mask.reshape(S * Bp, 1)

    # Keep the encoder hidden in its (length-sorted) order and permute the
    # targets to match instead of un-sorting enc_h: the summed CE is invariant
    # to the batch permutation, so the loss equals the reference value while
    # the in-kernel gather / extra XLA gather is avoided.
    sort_idx = jnp.argsort(src_recover)
    tgt_sorted = tgt_seq[sort_idx]
    inp_ids = tgt_sorted[:, :-1]                                     # (B, Td)
    gold = tgt_sorted[:, 1:]                                         # (B, Td)
    y_emb = params['parse_emb'][inp_ids]                             # (B, Td, Ed)
    y_tm = jnp.pad(jnp.transpose(y_emb, (1, 0, 2)), ((0, 0), (0, Bp - B), (0, 0)))
    y_flat = y_tm.reshape(Td * Bp, Ed).astype(jnp.bfloat16)
    gold_tm = jnp.pad(jnp.transpose(gold, (1, 0)), ((0, 0), (0, Bp - B)),
                      constant_values=PAD_ID)                        # pad rows: gold=PAD
    gold_flat = gold_tm.reshape(Td * Bp, 1).astype(jnp.int32)

    operands = (x_flat, src_mask,
                pp['enc_wih'], pp['enc_bih'],
                pp['enc_whh_f'], pp['enc_bhh_f'], pp['enc_whh_b'], pp['enc_bhh_b'],
                pp['bridge_w'], pp['bridge_b'],
                y_flat, gold_flat,
                pp['dec_wih'], pp['dec_bih'], pp['dec_whh'], pp['dec_bhh'],
                pp['out_w'], pp['out_b'])

    # Size the scoped VMEM to the actual buffers (+ headroom), capped at the
    # smallest physical VMEM (v7x, 64 MiB).
    op_bytes = sum(int(math.prod(a.shape)) * jnp.dtype(a.dtype).itemsize
                   for a in operands)
    scr_bytes = 2 * (S * Bp * 6 * Hp + Td * Bp * 3 * Dhp + Td * Bp * Dhp)   # bf16
    live_bytes = 3 * 4 * Td * Bp * Vpad                # phase-2 f32 logits temporaries
    vmem_limit = min(2 * (op_bytes + scr_bytes + live_bytes) + (4 << 20), 64 << 20)

    unroll_enc = True if S <= 32 else 4
    unroll_dec = True if Td <= 32 else 4

    loss = pl.pallas_call(
        functools.partial(seq2seq_kernel, S=S, T=Td, Bp=Bp, B=B, Hp=Hp, Dhp=Dhp,
                          Vpad=Vpad, pad_id=PAD_ID,
                          unroll_enc=unroll_enc, unroll_dec=unroll_dec),
        out_shape=jax.ShapeDtypeStruct((1, 1), jnp.float32),
        in_specs=[vmem] * len(operands),
        out_specs=vmem,
        scratch_shapes=[pltpu.VMEM((S * Bp, 6 * Hp), jnp.bfloat16),    # gi_enc
                        pltpu.VMEM((Td * Bp, 3 * Dhp), jnp.bfloat16),  # gi_dec
                        pltpu.VMEM((Td * Bp, Dhp), jnp.bfloat16)],     # h history
        compiler_params=pltpu.CompilerParams(vmem_limit_bytes=int(vmem_limit)),
    )(*operands)

    return {'loss': loss[0, 0]}


if __name__ == "__main__":
    # small shapes consistent with the module
    B, S, Tt = 2, 8, 9
    Vw, Vp = 64, 64          # len(word_vocab), len(parse_vocab)
    E, Ed, H = 32, 32, 32    # enc_embed_dim, tree_embed_size, enc_hidden_dim
    Dh = 2 * H               # bidirectional + mapper_type='mapping' -> dec_hidden = enc_dim

    params = init_params(jax.random.PRNGKey(0), Vw, Vp, E, Ed, H, Dh)

    k1, k2 = jax.random.split(jax.random.PRNGKey(0))

    # source batch, already sorted by length (descending) as pack_padded expects
    src_lengths = jnp.array([8, 5], dtype=jnp.int32)
    src_seq = jax.random.randint(k1, (B, S), 4, Vw).astype(jnp.int32)
    src_seq = jnp.where(jnp.arange(S)[None, :] < src_lengths[:, None], src_seq, PAD_ID)
    src_recover = jnp.array([1, 0], dtype=jnp.int32)   # permutation back to original order

    # target batch (original, un-sorted order): <s> tokens </s> PAD...
    tgt_lens = jnp.array([9, 6], dtype=jnp.int32)
    rand_tok = jax.random.randint(k2, (B, Tt), 4, Vp)
    pos_t = jnp.arange(Tt)[None, :]
    tgt_seq = jnp.where(
        pos_t == 0, SOS_ID,
        jnp.where(pos_t == tgt_lens[:, None] - 1, EOS_ID,
                  jnp.where(pos_t < tgt_lens[:, None] - 1, rand_tok, PAD_ID))
    ).astype(jnp.int32)

    out = seq2seq_forward(params, src_seq, src_lengths, src_recover, tgt_seq)
    loss = jax.block_until_ready(out['loss'])
    assert bool(jnp.isfinite(loss))
    print("KERNEL_OK")
</pallas_src>

<mosaic_0001>
module attributes {stable_mosaic.version = 11 : i64} {
  func.func @seq2seq_kernel(%arg0: memref<128x32xbf16, #tpu.memory_space<vmem>>, %arg1: memref<128x1xf32, #tpu.memory_space<vmem>>, %arg2: memref<32x768xbf16, #tpu.memory_space<vmem>>, %arg3: memref<1x768xf32, #tpu.memory_space<vmem>>, %arg4: memref<128x384xbf16, #tpu.memory_space<vmem>>, %arg5: memref<1x384xf32, #tpu.memory_space<vmem>>, %arg6: memref<128x384xbf16, #tpu.memory_space<vmem>>, %arg7: memref<1x384xf32, #tpu.memory_space<vmem>>, %arg8: memref<256x128xbf16, #tpu.memory_space<vmem>>, %arg9: memref<1x128xf32, #tpu.memory_space<vmem>>, %arg10: memref<128x32xbf16, #tpu.memory_space<vmem>>, %arg11: memref<128x1xi32, #tpu.memory_space<vmem>>, %arg12: memref<32x384xbf16, #tpu.memory_space<vmem>>, %arg13: memref<1x384xf32, #tpu.memory_space<vmem>>, %arg14: memref<128x384xbf16, #tpu.memory_space<vmem>>, %arg15: memref<1x384xf32, #tpu.memory_space<vmem>>, %arg16: memref<128x128xbf16, #tpu.memory_space<vmem>>, %arg17: memref<1x128xf32, #tpu.memory_space<vmem>>, %arg18: memref<1x1xf32, #tpu.memory_space<vmem>>, %arg19: memref<128x768xbf16, #tpu.memory_space<vmem>>, %arg20: memref<128x384xbf16, #tpu.memory_space<vmem>>, %arg21: memref<128x128xbf16, #tpu.memory_space<vmem>>) attributes {dimension_semantics = [], scalar_prefetch = 0 : i64, scratch_operands = 3 : i64, tpu.core_type = #tpu.core_type<tc>} {
    %c0 = arith.constant 0 : index
    %c0_0 = arith.constant 0 : index
    %0 = vector.load %arg0[%c0, %c0_0] : memref<128x32xbf16, #tpu.memory_space<vmem>>, vector<128x32xbf16>
    %c0_1 = arith.constant 0 : index
    %c0_2 = arith.constant 0 : index
    %1 = vector.load %arg2[%c0_1, %c0_2] : memref<32x768xbf16, #tpu.memory_space<vmem>>, vector<32x768xbf16>
    %cst = arith.constant dense<0.000000e+00> : vector<128x768xf32>
    %2 = tpu.matmul %0, %1, %cst {dimension_numbers = #tpu.dot_dimension_numbers<[1], [0], [0], [1], [0, 0, 1, 1], [], []>} : vector<128x32xbf16>, vector<32x768xbf16>, vector<128x768xf32> -> vector<128x768xf32>
    %c0_3 = arith.constant 0 : index
    %c0_4 = arith.constant 0 : index
    %3 = vector.load %arg3[%c0_3, %c0_4] : memref<1x768xf32, #tpu.memory_space<vmem>>, vector<1x768xf32>
    %4 = vector.broadcast %3 : vector<1x768xf32> to vector<128x768xf32>
    %5 = arith.addf %2, %4 : vector<128x768xf32>
    %6 = arith.truncf %5 : vector<128x768xf32> to vector<128x768xbf16>
    %c0_5 = arith.constant 0 : index
    %c0_6 = arith.constant 0 : index
    %7 = vector.load %arg19[%c0_5, %c0_6] : memref<128x768xbf16, #tpu.memory_space<vmem>>, vector<128x768xbf16>
    tpu.vector_store %arg19[%c0_5, %c0_6], %6 {strides = array<i32>} : memref<128x768xbf16, #tpu.memory_space<vmem>>, vector<128x768xbf16>,
    %c0_7 = arith.constant 0 : index
    %c0_8 = arith.constant 0 : index
    %8 = vector.load %arg4[%c0_7, %c0_8] : memref<128x384xbf16, #tpu.memory_space<vmem>>, vector<128x384xbf16>
    %c0_9 = arith.constant 0 : index
    %c0_10 = arith.constant 0 : index
    %9 = vector.load %arg6[%c0_9, %c0_10] : memref<128x384xbf16, #tpu.memory_space<vmem>>, vector<128x384xbf16>
    %c0_11 = arith.constant 0 : index
    %c0_12 = arith.constant 0 : index
    %10 = vector.load %arg5[%c0_11, %c0_12] : memref<1x384xf32, #tpu.memory_space<vmem>>, vector<1x384xf32>
    %c0_13 = arith.constant 0 : index
    %c0_14 = arith.constant 0 : index
    %11 = vector.load %arg7[%c0_13, %c0_14] : memref<1x384xf32, #tpu.memory_space<vmem>>, vector<1x384xf32>
    %cst_15 = arith.constant 0.000000e+00 : f32
    %12 = vector.broadcast %cst_15 : f32 to vector<16x128xf32>
    %c0_i32 = arith.constant 0 : i32
    %c16_i32 = arith.constant 16 : i32
    %13 = arith.muli %c0_i32, %c16_i32 : i32
    %14 = tpu.assume_multiple %13, 16 : i32
    %15 = arith.index_cast %14 : i32 to index
    %c0_16 = arith.constant 0 : index
    %16 = vector.load %arg19[%15, %c0_16] : memref<128x768xbf16, #tpu.memory_space<vmem>>, vector<16x384xbf16>
    %17 = arith.extf %16 : vector<16x384xbf16> to vector<16x384xf32>
    %18 = arith.index_cast %14 : i32 to index
    %c0_17 = arith.constant 0 : index
    %19 = vector.load %arg1[%18, %c0_17] : memref<128x1xf32, #tpu.memory_space<vmem>>, vector<16x1xf32>
    %cst_18 = arith.constant 0.000000e+00 : f32
    %20 = vector.broadcast %cst_18 : f32 to vector<16x1xf32>
    %21 = arith.cmpf ogt, %19, %20 : vector<16x1xf32>
    %22 = arith.truncf %12 : vector<16x128xf32> to vector<16x128xbf16>
    %cst_19 = arith.constant dense<0.000000e+00> : vector<16x384xf32>
    %23 = tpu.matmul %22, %8, %cst_19 {dimension_numbers = #tpu.dot_dimension_numbers<[1], [0], [0], [1], [0, 0, 1, 1], [], []>} : vector<16x128xbf16>, vector<128x384xbf16>, vector<16x384xf32> -> vector<16x384xf32>
    %24 = vector.broadcast %10 : vector<1x384xf32> to vector<16x384xf32>
    %25 = arith.addf %23, %24 : vector<16x384xf32>
    %26 = vector.extract_strided_slice %17 {offsets = [0, 0], sizes = [16, 128], strides = [1, 1]} : vector<16x384xf32> to vector<16x128xf32>
    %27 = vector.extract_strided_slice %25 {offsets = [0, 0], sizes = [16, 128], strides = [1, 1]} : vector<16x384xf32> to vector<16x128xf32>
    %28 = arith.addf %26, %27 : vector<16x128xf32>
    %29 = arith.negf %28 : vector<16x128xf32>
    %30 = math.exp %29 : vector<16x128xf32>
    %cst_20 = arith.constant 1.000000e+00 : f32
    %31 = vector.broadcast %cst_20 : f32 to vector<16x128xf32>
    %32 = arith.addf %31, %30 : vector<16x128xf32>
    %33 = arith.divf %31, %32 : vector<16x128xf32>
    %34 = vector.extract_strided_slice %17 {offsets = [0, 128], sizes = [16, 128], strides = [1, 1]} : vector<16x384xf32> to vector<16x128xf32>
    %35 = vector.extract_strided_slice %25 {offsets = [0, 128], sizes = [16, 128], strides = [1, 1]} : vector<16x384xf32> to vector<16x128xf32>
    %36 = arith.addf %34, %35 : vector<16x128xf32>
    %37 = arith.negf %36 : vector<16x128xf32>
    %38 = math.exp %37 : vector<16x128xf32>
    %cst_21 = arith.constant 1.000000e+00 : f32
    %39 = vector.broadcast %cst_21 : f32 to vector<16x128xf32>
    %40 = arith.addf %39, %38 : vector<16x128xf32>
    %41 = arith.divf %39, %40 : vector<16x128xf32>
    %42 = vector.extract_strided_slice %17 {offsets = [0, 256], sizes = [16, 128], strides = [1, 1]} : vector<16x384xf32> to vector<16x128xf32>
    %43 = vector.extract_strided_slice %25 {offsets = [0, 256], sizes = [16, 128], strides = [1, 1]} : vector<16x384xf32> to vector<16x128xf32>
    %44 = arith.mulf %33, %43 : vector<16x128xf32>
    %45 = arith.addf %42, %44 : vector<16x128xf32>
    %46 = math.tanh %45 : vector<16x128xf32>
    %cst_22 = arith.constant 1.000000e+00 : f32
    %47 = vector.broadcast %cst_22 : f32 to vector<16x128xf32>
    %48 = arith.subf %47, %41 : vector<16x128xf32>
    %49 = arith.mulf %48, %46 : vector<16x128xf32>
    %50 = arith.mulf %41, %12 : vector<16x128xf32>
    %51 = arith.addf %49, %50 : vector<16x128xf32>
    %52 = vector.shape_cast %21 : vector<16x1xi1> to vector<16x1xi1>
    %53 = vector.broadcast %52 : vector<16x1xi1> to vector<16x128xi1>
    %54 = arith.select %53, %51, %12 : vector<16x128xi1>, vector<16x128xf32>
    %c7_i32 = arith.constant 7 : i32
    %55 = arith.subi %c7_i32, %c0_i32 : i32
    %c16_i32_23 = arith.constant 16 : i32
    %56 = arith.muli %55, %c16_i32_23 : i32
    %57 = tpu.assume_multiple %56, 16 : i32
    %58 = arith.index_cast %57 : i32 to index
    %c384 = arith.constant 384 : index
    %59 = vector.load %arg19[%58, %c384] : memref<128x768xbf16, #tpu.memory_space<vmem>>, vector<16x384xbf16>
    %60 = arith.extf %59 : vector<16x384xbf16> to vector<16x384xf32>
    %61 = arith.index_cast %57 : i32 to index
    %c0_24 = arith.constant 0 : index
    %62 = vector.load %arg1[%61, %c0_24] : memref<128x1xf32, #tpu.memory_space<vmem>>, vector<16x1xf32>
    %cst_25 = arith.constant 0.000000e+00 : f32
    %63 = vector.broadcast %cst_25 : f32 to vector<16x1xf32>
    %64 = arith.cmpf ogt, %62, %63 : vector<16x1xf32>
    %65 = arith.truncf %12 : vector<16x128xf32> to vector<16x128xbf16>
    %cst_26 = arith.constant dense<0.000000e+00> : vector<16x384xf32>
    %66 = tpu.matmul %65, %9, %cst_26 {dimension_numbers = #tpu.dot_dimension_numbers<[1], [0], [0], [1], [0, 0, 1, 1], [], []>} : vector<16x128xbf16>, vector<128x384xbf16>, vector<16x384xf32> -> vector<16x384xf32>
    %67 = vector.broadcast %11 : vector<1x384xf32> to vector<16x384xf32>
    %68 = arith.addf %66, %67 : vector<16x384xf32>
    %69 = vector.extract_strided_slice %60 {offsets = [0, 0], sizes = [16, 128], strides = [1, 1]} : vector<16x384xf32> to vector<16x128xf32>
    %70 = vector.extract_strided_slice %68 {offsets = [0, 0], sizes = [16, 128], strides = [1, 1]} : vector<16x384xf32> to vector<16x128xf32>
    %71 = arith.addf %69, %70 : vector<16x128xf32>
    %72 = arith.negf %71 : vector<16x128xf32>
    %73 = math.exp %72 : vector<16x128xf32>
    %cst_27 = arith.constant 1.000000e+00 : f32
    %74 = vector.broadcast %cst_27 : f32 to vector<16x128xf32>
    %75 = arith.addf %74, %73 : vector<16x128xf32>
    %76 = arith.divf %74, %75 : vector<16x128xf32>
    %77 = vector.extract_strided_slice %60 {offsets = [0, 128], sizes = [16, 128], strides = [1, 1]} : vector<16x384xf32> to vector<16x128xf32>
    %78 = vector.extract_strided_slice %68 {offsets = [0, 128], sizes = [16, 128], strides = [1, 1]} : vector<16x384xf32> to vector<16x128xf32>
    %79 = arith.addf %77, %78 : vector<16x128xf32>
    %80 = arith.negf %79 : vector<16x128xf32>
    %81 = math.exp %80 : vector<16x128xf32>
    %cst_28 = arith.constant 1.000000e+00 : f32
    %82 = vector.broadcast %cst_28 : f32 to vector<16x128xf32>
    %83 = arith.addf %82, %81 : vector<16x128xf32>
    %84 = arith.divf %82, %83 : vector<16x128xf32>
    %85 = vector.extract_strided_slice %60 {offsets = [0, 256], sizes = [16, 128], strides = [1, 1]} : vector<16x384xf32> to vector<16x128xf32>
    %86 = vector.extract_strided_slice %68 {offsets = [0, 256], sizes = [16, 128], strides = [1, 1]} : vector<16x384xf32> to vector<16x128xf32>
    %87 = arith.mulf %76, %86 : vector<16x128xf32>
    %88 = arith.addf %85, %87 : vector<16x128xf32>
    %89 = math.tanh %88 : vector<16x128xf32>
    %cst_29 = arith.constant 1.000000e+00 : f32
    %90 = vector.broadcast %cst_29 : f32 to vector<16x128xf32>
    %91 = arith.subf %90, %84 : vector<16x128xf32>
    %92 = arith.mulf %91, %89 : vector<16x128xf32>
    %93 = arith.mulf %84, %12 : vector<16x128xf32>
    %94 = arith.addf %92, %93 : vector<16x128xf32>
    %95 = vector.shape_cast %64 : vector<16x1xi1> to vector<16x1xi1>
    %96 = vector.broadcast %95 : vector<16x1xi1> to vector<16x128xi1>
    %97 = arith.select %96, %94, %12 : vector<16x128xi1>, vector<16x128xf32>
    %c1_i32 = arith.constant 1 : i32
    %c16_i32_30 = arith.constant 16 : i32
    %98 = arith.muli %c1_i32, %c16_i32_30 : i32
    %99 = tpu.assume_multiple %98, 16 : i32
    %100 = arith.index_cast %99 : i32 to index
    %c0_31 = arith.constant 0 : index
    %101 = vector.load %arg19[%100, %c0_31] : memref<128x768xbf16, #tpu.memory_space<vmem>>, vector<16x384xbf16>
    %102 = arith.extf %101 : vector<16x384xbf16> to vector<16x384xf32>
    %103 = arith.index_cast %99 : i32 to index
    %c0_32 = arith.constant 0 : index
    %104 = vector.load %arg1[%103, %c0_32] : memref<128x1xf32, #tpu.memory_space<vmem>>, vector<16x1xf32>
    %cst_33 = arith.constant 0.000000e+00 : f32
    %105 = vector.broadcast %cst_33 : f32 to vector<16x1xf32>
    %106 = arith.cmpf ogt, %104, %105 : vector<16x1xf32>
    %107 = arith.truncf %54 : vector<16x128xf32> to vector<16x128xbf16>
    %cst_34 = arith.constant dense<0.000000e+00> : vector<16x384xf32>
    %108 = tpu.matmul %107, %8, %cst_34 {dimension_numbers = #tpu.dot_dimension_numbers<[1], [0], [0], [1], [0, 0, 1, 1], [], []>} : vector<16x128xbf16>, vector<128x384xbf16>, vector<16x384xf32> -> vector<16x384xf32>
    %109 = vector.broadcast %10 : vector<1x384xf32> to vector<16x384xf32>
    %110 = arith.addf %108, %109 : vector<16x384xf32>
    %111 = vector.extract_strided_slice %102 {offsets = [0, 0], sizes = [16, 128], strides = [1, 1]} : vector<16x384xf32> to vector<16x128xf32>
    %112 = vector.extract_strided_slice %110 {offsets = [0, 0], sizes = [16, 128], strides = [1, 1]} : vector<16x384xf32> to vector<16x128xf32>
    %113 = arith.addf %111, %112 : vector<16x128xf32>
    %114 = arith.negf %113 : vector<16x128xf32>
    %115 = math.exp %114 : vector<16x128xf32>
    %cst_35 = arith.constant 1.000000e+00 : f32
    %116 = vector.broadcast %cst_35 : f32 to vector<16x128xf32>
    %117 = arith.addf %116, %115 : vector<16x128xf32>
    %118 = arith.divf %116, %117 : vector<16x128xf32>
    %119 = vector.extract_strided_slice %102 {offsets = [0, 128], sizes = [16, 128], strides = [1, 1]} : vector<16x384xf32> to vector<16x128xf32>
    %120 = vector.extract_strided_slice %110 {offsets = [0, 128], sizes = [16, 128], strides = [1, 1]} : vector<16x384xf32> to vector<16x128xf32>
    %121 = arith.addf %119, %120 : vector<16x128xf32>
    %122 = arith.negf %121 : vector<16x128xf32>
    %123 = math.exp %122 : vector<16x128xf32>
    %cst_36 = arith.constant 1.000000e+00 : f32
    %124 = vector.broadcast %cst_36 : f32 to vector<16x128xf32>
    %125 = arith.addf %124, %123 : vector<16x128xf32>
    %126 = arith.divf %124, %125 : vector<16x128xf32>
    %127 = vector.extract_strided_slice %102 {offsets = [0, 256], sizes = [16, 128], strides = [1, 1]} : vector<16x384xf32> to vector<16x128xf32>
    %128 = vector.extract_strided_slice %110 {offsets = [0, 256], sizes = [16, 128], strides = [1, 1]} : vector<16x384xf32> to vector<16x128xf32>
    %129 = arith.mulf %118, %128 : vector<16x128xf32>
    %130 = arith.addf %127, %129 : vector<16x128xf32>
    %131 = math.tanh %130 : vector<16x128xf32>
    %cst_37 = arith.constant 1.000000e+00 : f32
    %132 = vector.broadcast %cst_37 : f32 to vector<16x128xf32>
    %133 = arith.subf %132, %126 : vector<16x128xf32>
    %134 = arith.mulf %133, %131 : vector<16x128xf32>
    %135 = arith.mulf %126, %54 : vector<16x128xf32>
    %136 = arith.addf %134, %135 : vector<16x128xf32>
    %137 = vector.shape_cast %106 : vector<16x1xi1> to vector<16x1xi1>
    %138 = vector.broadcast %137 : vector<16x1xi1> to vector<16x128xi1>
    %139 = arith.select %138, %136, %54 : vector<16x128xi1>, vector<16x128xf32>
    %c7_i32_38 = arith.constant 7 : i32
    %140 = arith.subi %c7_i32_38, %c1_i32 : i32
    %c16_i32_39 = arith.constant 16 : i32
    %141 = arith.muli %140, %c16_i32_39 : i32
    %142 = tpu.assume_multiple %141, 16 : i32
    %143 = arith.index_cast %142 : i32 to index
    %c384_40 = arith.constant 384 : index
    %144 = vector.load %arg19[%143, %c384_40] : memref<128x768xbf16, #tpu.memory_space<vmem>>, vector<16x384xbf16>
    %145 = arith.extf %144 : vector<16x384xbf16> to vector<16x384xf32>
    %146 = arith.index_cast %142 : i32 to index
    %c0_41 = arith.constant 0 : index
    %147 = vector.load %arg1[%146, %c0_41] : memref<128x1xf32, #tpu.memory_space<vmem>>, vector<16x1xf32>
    %cst_42 = arith.constant 0.000000e+00 : f32
    %148 = vector.broadcast %cst_42 : f32 to vector<16x1xf32>
    %149 = arith.cmpf ogt, %147, %148 : vector<16x1xf32>
    %150 = arith.truncf %97 : vector<16x128xf32> to vector<16x128xbf16>
    %cst_43 = arith.constant dense<0.000000e+00> : vector<16x384xf32>
    %151 = tpu.matmul %150, %9, %cst_43 {dimension_numbers = #tpu.dot_dimension_numbers<[1], [0], [0], [1], [0, 0, 1, 1], [], []>} : vector<16x128xbf16>, vector<128x384xbf16>, vector<16x384xf32> -> vector<16x384xf32>
    %152 = vector.broadcast %11 : vector<1x384xf32> to vector<16x384xf32>
    %153 = arith.addf %151, %152 : vector<16x384xf32>
    %154 = vector.extract_strided_slice %145 {offsets = [0, 0], sizes = [16, 128], strides = [1, 1]} : vector<16x384xf32> to vector<16x128xf32>
    %155 = vector.extract_strided_slice %153 {offsets = [0, 0], sizes = [16, 128], strides = [1, 1]} : vector<16x384xf32> to vector<16x128xf32>
    %156 = arith.addf %154, %155 : vector<16x128xf32>
    %157 = arith.negf %156 : vector<16x128xf32>
    %158 = math.exp %157 : vector<16x128xf32>
    %cst_44 = arith.constant 1.000000e+00 : f32
    %159 = vector.broadcast %cst_44 : f32 to vector<16x128xf32>
    %160 = arith.addf %159, %158 : vector<16x128xf32>
    %161 = arith.divf %159, %160 : vector<16x128xf32>
    %162 = vector.extract_strided_slice %145 {offsets = [0, 128], sizes = [16, 128], strides = [1, 1]} : vector<16x384xf32> to vector<16x128xf32>
    %163 = vector.extract_strided_slice %153 {offsets = [0, 128], sizes = [16, 128], strides = [1, 1]} : vector<16x384xf32> to vector<16x128xf32>
    %164 = arith.addf %162, %163 : vector<16x128xf32>
    %165 = arith.negf %164 : vector<16x128xf32>
    %166 = math.exp %165 : vector<16x128xf32>
    %cst_45 = arith.constant 1.000000e+00 : f32
    %167 = vector.broadcast %cst_45 : f32 to vector<16x128xf32>
    %168 = arith.addf %167, %166 : vector<16x128xf32>
    %169 = arith.divf %167, %168 : vector<16x128xf32>
    %170 = vector.extract_strided_slice %145 {offsets = [0, 256], sizes = [16, 128], strides = [1, 1]} : vector<16x384xf32> to vector<16x128xf32>
    %171 = vector.extract_strided_slice %153 {offsets = [0, 256], sizes = [16, 128], strides = [1, 1]} : vector<16x384xf32> to vector<16x128xf32>
    %172 = arith.mulf %161, %171 : vector<16x128xf32>
    %173 = arith.addf %170, %172 : vector<16x128xf32>
    %174 = math.tanh %173 : vector<16x128xf32>
    %cst_46 = arith.constant 1.000000e+00 : f32
    %175 = vector.broadcast %cst_46 : f32 to vector<16x128xf32>
    %176 = arith.subf %175, %169 : vector<16x128xf32>
    %177 = arith.mulf %176, %174 : vector<16x128xf32>
    %178 = arith.mulf %169, %97 : vector<16x128xf32>
    %179 = arith.addf %177, %178 : vector<16x128xf32>
    %180 = vector.shape_cast %149 : vector<16x1xi1> to vector<16x1xi1>
    %181 = vector.broadcast %180 : vector<16x1xi1> to vector<16x128xi1>
    %182 = arith.select %181, %179, %97 : vector<16x128xi1>, vector<16x128xf32>
    %c2_i32 = arith.constant 2 : i32
    %c16_i32_47 = arith.constant 16 : i32
    %183 = arith.muli %c2_i32, %c16_i32_47 : i32
    %184 = tpu.assume_multiple %183, 16 : i32
    %185 = arith.index_cast %184 : i32 to index
    %c0_48 = arith.constant 0 : index
    %186 = vector.load %arg19[%185, %c0_48] : memref<128x768xbf16, #tpu.memory_space<vmem>>, vector<16x384xbf16>
    %187 = arith.extf %186 : vector<16x384xbf16> to vector<16x384xf32>
    %188 = arith.index_cast %184 : i32 to index
    %c0_49 = arith.constant 0 : index
    %189 = vector.load %arg1[%188, %c0_49] : memref<128x1xf32, #tpu.memory_space<vmem>>, vector<16x1xf32>
    %cst_50 = arith.constant 0.000000e+00 : f32
    %190 = vector.broadcast %cst_50 : f32 to vector<16x1xf32>
    %191 = arith.cmpf ogt, %189, %190 : vector<16x1xf32>
    %192 = arith.truncf %139 : vector<16x128xf32> to vector<16x128xbf16>
    %cst_51 = arith.constant dense<0.000000e+00> : vector<16x384xf32>
    %193 = tpu.matmul %192, %8, %cst_51 {dimension_numbers = #tpu.dot_dimension_numbers<[1], [0], [0], [1], [0, 0, 1, 1], [], []>} : vector<16x128xbf16>, vector<128x384xbf16>, vector<16x384xf32> -> vector<16x384xf32>
    %194 = vector.broadcast %10 : vector<1x384xf32> to vector<16x384xf32>
    %195 = arith.addf %193, %194 : vector<16x384xf32>
    %196 = vector.extract_strided_slice %187 {offsets = [0, 0], sizes = [16, 128], strides = [1, 1]} : vector<16x384xf32> to vector<16x128xf32>
    %197 = vector.extract_strided_slice %195 {offsets = [0, 0], sizes = [16, 128], strides = [1, 1]} : vector<16x384xf32> to vector<16x128xf32>
    %198 = arith.addf %196, %197 : vector<16x128xf32>
    %199 = arith.negf %198 : vector<16x128xf32>
    %200 = math.exp %199 : vector<16x128xf32>
    %cst_52 = arith.constant 1.000000e+00 : f32
    %201 = vector.broadcast %cst_52 : f32 to vector<16x128xf32>
    %202 = arith.addf %201, %200 : vector<16x128xf32>
    %203 = arith.divf %201, %202 : vector<16x128xf32>
    %204 = vector.extract_strided_slice %187 {offsets = [0, 128], sizes = [16, 128], strides = [1, 1]} : vector<16x384xf32> to vector<16x128xf32>
    %205 = vector.extract_strided_slice %195 {offsets = [0, 128], sizes = [16, 128], strides = [1, 1]} : vector<16x384xf32> to vector<16x128xf32>
    %206 = arith.addf %204, %205 : vector<16x128xf32>
    %207 = arith.negf %206 : vector<16x128xf32>
    %208 = math.exp %207 : vector<16x128xf32>
    %cst_53 = arith.constant 1.000000e+00 : f32
    %209 = vector.broadcast %cst_53 : f32 to vector<16x128xf32>
    %210 = arith.addf %209, %208 : vector<16x128xf32>
    %211 = arith.divf %209, %210 : vector<16x128xf32>
    %212 = vector.extract_strided_slice %187 {offsets = [0, 256], sizes = [16, 128], strides = [1, 1]} : vector<16x384xf32> to vector<16x128xf32>
    %213 = vector.extract_strided_slice %195 {offsets = [0, 256], sizes = [16, 128], strides = [1, 1]} : vector<16x384xf32> to vector<16x128xf32>
    %214 = arith.mulf %203, %213 : vector<16x128xf32>
    %215 = arith.addf %212, %214 : vector<16x128xf32>
    %216 = math.tanh %215 : vector<16x128xf32>
    %cst_54 = arith.constant 1.000000e+00 : f32
    %217 = vector.broadcast %cst_54 : f32 to vector<16x128xf32>
    %218 = arith.subf %217, %211 : vector<16x128xf32>
    %219 = arith.mulf %218, %216 : vector<16x128xf32>
    %220 = arith.mulf %211, %139 : vector<16x128xf32>
    %221 = arith.addf %219, %220 : vector<16x128xf32>
    %222 = vector.shape_cast %191 : vector<16x1xi1> to vector<16x1xi1>
    %223 = vector.broadcast %222 : vector<16x1xi1> to vector<16x128xi1>
    %224 = arith.select %223, %221, %139 : vector<16x128xi1>, vector<16x128xf32>
    %c7_i32_55 = arith.constant 7 : i32
    %225 = arith.subi %c7_i32_55, %c2_i32 : i32
    %c16_i32_56 = arith.constant 16 : i32
    %226 = arith.muli %225, %c16_i32_56 : i32
    %227 = tpu.assume_multiple %226, 16 : i32
    %228 = arith.index_cast %227 : i32 to index
    %c384_57 = arith.constant 384 : index
    %229 = vector.load %arg19[%228, %c384_57] : memref<128x768xbf16, #tpu.memory_space<vmem>>, vector<16x384xbf16>
    %230 = arith.extf %229 : vector<16x384xbf16> to vector<16x384xf32>
    %231 = arith.index_cast %227 : i32 to index
    %c0_58 = arith.constant 0 : index
    %232 = vector.load %arg1[%231, %c0_58] : memref<128x1xf32, #tpu.memory_space<vmem>>, vector<16x1xf32>
    %cst_59 = arith.constant 0.000000e+00 : f32
    %233 = vector.broadcast %cst_59 : f32 to vector<16x1xf32>
    %234 = arith.cmpf ogt, %232, %233 : vector<16x1xf32>
    %235 = arith.truncf %182 : vector<16x128xf32> to vector<16x128xbf16>
    %cst_60 = arith.constant dense<0.000000e+00> : vector<16x384xf32>
    %236 = tpu.matmul %235, %9, %cst_60 {dimension_numbers = #tpu.dot_dimension_numbers<[1], [0], [0], [1], [0, 0, 1, 1], [], []>} : vector<16x128xbf16>, vector<128x384xbf16>, vector<16x384xf32> -> vector<16x384xf32>
    %237 = vector.broadcast %11 : vector<1x384xf32> to vector<16x384xf32>
    %238 = arith.addf %236, %237 : vector<16x384xf32>
    %239 = vector.extract_strided_slice %230 {offsets = [0, 0], sizes = [16, 128], strides = [1, 1]} : vector<16x384xf32> to vector<16x128xf32>
    %240 = vector.extract_strided_slice %238 {offsets = [0, 0], sizes = [16, 128], strides = [1, 1]} : vector<16x384xf32> to vector<16x128xf32>
    %241 = arith.addf %239, %240 : vector<16x128xf32>
    %242 = arith.negf %241 : vector<16x128xf32>
    %243 = math.exp %242 : vector<16x128xf32>
    %cst_61 = arith.constant 1.000000e+00 : f32
    %244 = vector.broadcast %cst_61 : f32 to vector<16x128xf32>
    %245 = arith.addf %244, %243 : vector<16x128xf32>
    %246 = arith.divf %244, %245 : vector<16x128xf32>
    %247 = vector.extract_strided_slice %230 {offsets = [0, 128], sizes = [16, 128], strides = [1, 1]} : vector<16x384xf32> to vector<16x128xf32>
    %248 = vector.extract_strided_slice %238 {offsets = [0, 128], sizes = [16, 128], strides = [1, 1]} : vector<16x384xf32> to vector<16x128xf32>
    %249 = arith.addf %247, %248 : vector<16x128xf32>
    %250 = arith.negf %249 : vector<16x128xf32>
    %251 = math.exp %250 : vector<16x128xf32>
    %cst_62 = arith.constant 1.000000e+00 : f32
    %252 = vector.broadcast %cst_62 : f32 to vector<16x128xf32>
    %253 = arith.addf %252, %251 : vector<16x128xf32>
    %254 = arith.divf %252, %253 : vector<16x128xf32>
    %255 = vector.extract_strided_slice %230 {offsets = [0, 256], sizes = [16, 128], strides = [1, 1]} : vector<16x384xf32> to vector<16x128xf32>
    %256 = vector.extract_strided_slice %238 {offsets = [0, 256], sizes = [16, 128], strides = [1, 1]} : vector<16x384xf32> to vector<16x128xf32>
    %257 = arith.mulf %246, %256 : vector<16x128xf32>
    %258 = arith.addf %255, %257 : vector<16x128xf32>
    %259 = math.tanh %258 : vector<16x128xf32>
    %cst_63 = arith.constant 1.000000e+00 : f32
    %260 = vector.broadcast %cst_63 : f32 to vector<16x128xf32>
    %261 = arith.subf %260, %254 : vector<16x128xf32>
    %262 = arith.mulf %261, %259 : vector<16x128xf32>
    %263 = arith.mulf %254, %182 : vector<16x128xf32>
    %264 = arith.addf %262, %263 : vector<16x128xf32>
    %265 = vector.shape_cast %234 : vector<16x1xi1> to vector<16x1xi1>
    %266 = vector.broadcast %265 : vector<16x1xi1> to vector<16x128xi1>
    %267 = arith.select %266, %264, %182 : vector<16x128xi1>, vector<16x128xf32>
    %c3_i32 = arith.constant 3 : i32
    %c16_i32_64 = arith.constant 16 : i32
    %268 = arith.muli %c3_i32, %c16_i32_64 : i32
    %269 = tpu.assume_multiple %268, 16 : i32
    %270 = arith.index_cast %269 : i32 to index
    %c0_65 = arith.constant 0 : index
    %271 = vector.load %arg19[%270, %c0_65] : memref<128x768xbf16, #tpu.memory_space<vmem>>, vector<16x384xbf16>
    %272 = arith.extf %271 : vector<16x384xbf16> to vector<16x384xf32>
    %273 = arith.index_cast %269 : i32 to index
    %c0_66 = arith.constant 0 : index
    %274 = vector.load %arg1[%273, %c0_66] : memref<128x1xf32, #tpu.memory_space<vmem>>, vector<16x1xf32>
    %cst_67 = arith.constant 0.000000e+00 : f32
    %275 = vector.broadcast %cst_67 : f32 to vector<16x1xf32>
    %276 = arith.cmpf ogt, %274, %275 : vector<16x1xf32>
    %277 = arith.truncf %224 : vector<16x128xf32> to vector<16x128xbf16>
    %cst_68 = arith.constant dense<0.000000e+00> : vector<16x384xf32>
    %278 = tpu.matmul %277, %8, %cst_68 {dimension_numbers = #tpu.dot_dimension_numbers<[1], [0], [0], [1], [0, 0, 1, 1], [], []>} : vector<16x128xbf16>, vector<128x384xbf16>, vector<16x384xf32> -> vector<16x384xf32>
    %279 = vector.broadcast %10 : vector<1x384xf32> to vector<16x384xf32>
    %280 = arith.addf %278, %279 : vector<16x384xf32>
    %281 = vector.extract_strided_slice %272 {offsets = [0, 0], sizes = [16, 128], strides = [1, 1]} : vector<16x384xf32> to vector<16x128xf32>
    %282 = vector.extract_strided_slice %280 {offsets = [0, 0], sizes = [16, 128], strides = [1, 1]} : vector<16x384xf32> to vector<16x128xf32>
    %283 = arith.addf %281, %282 : vector<16x128xf32>
    %284 = arith.negf %283 : vector<16x128xf32>
    %285 = math.exp %284 : vector<16x128xf32>
    %cst_69 = arith.constant 1.000000e+00 : f32
    %286 = vector.broadcast %cst_69 : f32 to vector<16x128xf32>
    %287 = arith.addf %286, %285 : vector<16x128xf32>
    %288 = arith.divf %286, %287 : vector<16x128xf32>
    %289 = vector.extract_strided_slice %272 {offsets = [0, 128], sizes = [16, 128], strides = [1, 1]} : vector<16x384xf32> to vector<16x128xf32>
    %290 = vector.extract_strided_slice %280 {offsets = [0, 128], sizes = [16, 128], strides = [1, 1]} : vector<16x384xf32> to vector<16x128xf32>
    %291 = arith.addf %289, %290 : vector<16x128xf32>
    %292 = arith.negf %291 : vector<16x128xf32>
    %293 = math.exp %292 : vector<16x128xf32>
    %cst_70 = arith.constant 1.000000e+00 : f32
    %294 = vector.broadcast %cst_70 : f32 to vector<16x128xf32>
    %295 = arith.addf %294, %293 : vector<16x128xf32>
    %296 = arith.divf %294, %295 : vector<16x128xf32>
    %297 = vector.extract_strided_slice %272 {offsets = [0, 256], sizes = [16, 128], strides = [1, 1]} : vector<16x384xf32> to vector<16x128xf32>
    %298 = vector.extract_strided_slice %280 {offsets = [0, 256], sizes = [16, 128], strides = [1, 1]} : vector<16x384xf32> to vector<16x128xf32>
    %299 = arith.mulf %288, %298 : vector<16x128xf32>
    %300 = arith.addf %297, %299 : vector<16x128xf32>
    %301 = math.tanh %300 : vector<16x128xf32>
    %cst_71 = arith.constant 1.000000e+00 : f32
    %302 = vector.broadcast %cst_71 : f32 to vector<16x128xf32>
    %303 = arith.subf %302, %296 : vector<16x128xf32>
    %304 = arith.mulf %303, %301 : vector<16x128xf32>
    %305 = arith.mulf %296, %224 : vector<16x128xf32>
    %306 = arith.addf %304, %305 : vector<16x128xf32>
    %307 = vector.shape_cast %276 : vector<16x1xi1> to vector<16x1xi1>
    %308 = vector.broadcast %307 : vector<16x1xi1> to vector<16x128xi1>
    %309 = arith.select %308, %306, %224 : vector<16x128xi1>, vector<16x128xf32>
    %c7_i32_72 = arith.constant 7 : i32
    %310 = arith.subi %c7_i32_72, %c3_i32 : i32
    %c16_i32_73 = arith.constant 16 : i32
    %311 = arith.muli %310, %c16_i32_73 : i32
    %312 = tpu.assume_multiple %311, 16 : i32
    %313 = arith.index_cast %312 : i32 to index
    %c384_74 = arith.constant 384 : index
    %314 = vector.load %arg19[%313, %c384_74] : memref<128x768xbf16, #tpu.memory_space<vmem>>, vector<16x384xbf16>
    %315 = arith.extf %314 : vector<16x384xbf16> to vector<16x384xf32>
    %316 = arith.index_cast %312 : i32 to index
    %c0_75 = arith.constant 0 : index
    %317 = vector.load %arg1[%316, %c0_75] : memref<128x1xf32, #tpu.memory_space<vmem>>, vector<16x1xf32>
    %cst_76 = arith.constant 0.000000e+00 : f32
    %318 = vector.broadcast %cst_76 : f32 to vector<16x1xf32>
    %319 = arith.cmpf ogt, %317, %318 : vector<16x1xf32>
    %320 = arith.truncf %267 : vector<16x128xf32> to vector<16x128xbf16>
    %cst_77 = arith.constant dense<0.000000e+00> : vector<16x384xf32>
    %321 = tpu.matmul %320, %9, %cst_77 {dimension_numbers = #tpu.dot_dimension_numbers<[1], [0], [0], [1], [0, 0, 1, 1], [], []>} : vector<16x128xbf16>, vector<128x384xbf16>, vector<16x384xf32> -> vector<16x384xf32>
    %322 = vector.broadcast %11 : vector<1x384xf32> to vector<16x384xf32>
    %323 = arith.addf %321, %322 : vector<16x384xf32>
    %324 = vector.extract_strided_slice %315 {offsets = [0, 0], sizes = [16, 128], strides = [1, 1]} : vector<16x384xf32> to vector<16x128xf32>
    %325 = vector.extract_strided_slice %323 {offsets = [0, 0], sizes = [16, 128], strides = [1, 1]} : vector<16x384xf32> to vector<16x128xf32>
    %326 = arith.addf %324, %325 : vector<16x128xf32>
    %327 = arith.negf %326 : vector<16x128xf32>
    %328 = math.exp %327 : vector<16x128xf32>
    %cst_78 = arith.constant 1.000000e+00 : f32
    %329 = vector.broadcast %cst_78 : f32 to vector<16x128xf32>
    %330 = arith.addf %329, %328 : vector<16x128xf32>
    %331 = arith.divf %329, %330 : vector<16x128xf32>
    %332 = vector.extract_strided_slice %315 {offsets = [0, 128], sizes = [16, 128], strides = [1, 1]} : vector<16x384xf32> to vector<16x128xf32>
    %333 = vector.extract_strided_slice %323 {offsets = [0, 128], sizes = [16, 128], strides = [1, 1]} : vector<16x384xf32> to vector<16x128xf32>
    %334 = arith.addf %332, %333 : vector<16x128xf32>
    %335 = arith.negf %334 : vector<16x128xf32>
    %336 = math.exp %335 : vector<16x128xf32>
    %cst_79 = arith.constant 1.000000e+00 : f32
    %337 = vector.broadcast %cst_79 : f32 to vector<16x128xf32>
    %338 = arith.addf %337, %336 : vector<16x128xf32>
    %339 = arith.divf %337, %338 : vector<16x128xf32>
    %340 = vector.extract_strided_slice %315 {offsets = [0, 256], sizes = [16, 128], strides = [1, 1]} : vector<16x384xf32> to vector<16x128xf32>
    %341 = vector.extract_strided_slice %323 {offsets = [0, 256], sizes = [16, 128], strides = [1, 1]} : vector<16x384xf32> to vector<16x128xf32>
    %342 = arith.mulf %331, %341 : vector<16x128xf32>
    %343 = arith.addf %340, %342 : vector<16x128xf32>
    %344 = math.tanh %343 : vector<16x128xf32>
    %cst_80 = arith.constant 1.000000e+00 : f32
    %345 = vector.broadcast %cst_80 : f32 to vector<16x128xf32>
    %346 = arith.subf %345, %339 : vector<16x128xf32>
    %347 = arith.mulf %346, %344 : vector<16x128xf32>
    %348 = arith.mulf %339, %267 : vector<16x128xf32>
    %349 = arith.addf %347, %348 : vector<16x128xf32>
    %350 = vector.shape_cast %319 : vector<16x1xi1> to vector<16x1xi1>
    %351 = vector.broadcast %350 : vector<16x1xi1> to vector<16x128xi1>
    %352 = arith.select %351, %349, %267 : vector<16x128xi1>, vector<16x128xf32>
    %c4_i32 = arith.constant 4 : i32
    %c16_i32_81 = arith.constant 16 : i32
    %353 = arith.muli %c4_i32, %c16_i32_81 : i32
    %354 = tpu.assume_multiple %353, 16 : i32
    %355 = arith.index_cast %354 : i32 to index
    %c0_82 = arith.constant 0 : index
    %356 = vector.load %arg19[%355, %c0_82] : memref<128x768xbf16, #tpu.memory_space<vmem>>, vector<16x384xbf16>
    %357 = arith.extf %356 : vector<16x384xbf16> to vector<16x384xf32>
    %358 = arith.index_cast %354 : i32 to index
    %c0_83 = arith.constant 0 : index
    %359 = vector.load %arg1[%358, %c0_83] : memref<128x1xf32, #tpu.memory_space<vmem>>, vector<16x1xf32>
    %cst_84 = arith.constant 0.000000e+00 : f32
    %360 = vector.broadcast %cst_84 : f32 to vector<16x1xf32>
    %361 = arith.cmpf ogt, %359, %360 : vector<16x1xf32>
    %362 = arith.truncf %309 : vector<16x128xf32> to vector<16x128xbf16>
    %cst_85 = arith.constant dense<0.000000e+00> : vector<16x384xf32>
    %363 = tpu.matmul %362, %8, %cst_85 {dimension_numbers = #tpu.dot_dimension_numbers<[1], [0], [0], [1], [0, 0, 1, 1], [], []>} : vector<16x128xbf16>, vector<128x384xbf16>, vector<16x384xf32> -> vector<16x384xf32>
    %364 = vector.broadcast %10 : vector<1x384xf32> to vector<16x384xf32>
    %365 = arith.addf %363, %364 : vector<16x384xf32>
    %366 = vector.extract_strided_slice %357 {offsets = [0, 0], sizes = [16, 128], strides = [1, 1]} : vector<16x384xf32> to vector<16x128xf32>
    %367 = vector.extract_strided_slice %365 {offsets = [0, 0], sizes = [16, 128], strides = [1, 1]} : vector<16x384xf32> to vector<16x128xf32>
    %368 = arith.addf %366, %367 : vector<16x128xf32>
    %369 = arith.negf %368 : vector<16x128xf32>
    %370 = math.exp %369 : vector<16x128xf32>
    %cst_86 = arith.constant 1.000000e+00 : f32
    %371 = vector.broadcast %cst_86 : f32 to vector<16x128xf32>
    %372 = arith.addf %371, %370 : vector<16x128xf32>
    %373 = arith.divf %371, %372 : vector<16x128xf32>
    %374 = vector.extract_strided_slice %357 {offsets = [0, 128], sizes = [16, 128], strides = [1, 1]} : vector<16x384xf32> to vector<16x128xf32>
    %375 = vector.extract_strided_slice %365 {offsets = [0, 128], sizes = [16, 128], strides = [1, 1]} : vector<16x384xf32> to vector<16x128xf32>
    %376 = arith.addf %374, %375 : vector<16x128xf32>
    %377 = arith.negf %376 : vector<16x128xf32>
    %378 = math.exp %377 : vector<16x128xf32>
    %cst_87 = arith.constant 1.000000e+00 : f32
    %379 = vector.broadcast %cst_87 : f32 to vector<16x128xf32>
    %380 = arith.addf %379, %378 : vector<16x128xf32>
    %381 = arith.divf %379, %380 : vector<16x128xf32>
    %382 = vector.extract_strided_slice %357 {offsets = [0, 256], sizes = [16, 128], strides = [1, 1]} : vector<16x384xf32> to vector<16x128xf32>
    %383 = vector.extract_strided_slice %365 {offsets = [0, 256], sizes = [16, 128], strides = [1, 1]} : vector<16x384xf32> to vector<16x128xf32>
    %384 = arith.mulf %373, %383 : vector<16x128xf32>
    %385 = arith.addf %382, %384 : vector<16x128xf32>
    %386 = math.tanh %385 : vector<16x128xf32>
    %cst_88 = arith.constant 1.000000e+00 : f32
    %387 = vector.broadcast %cst_88 : f32 to vector<16x128xf32>
    %388 = arith.subf %387, %381 : vector<16x128xf32>
    %389 = arith.mulf %388, %386 : vector<16x128xf32>
    %390 = arith.mulf %381, %309 : vector<16x128xf32>
    %391 = arith.addf %389, %390 : vector<16x128xf32>
    %392 = vector.shape_cast %361 : vector<16x1xi1> to vector<16x1xi1>
    %393 = vector.broadcast %392 : vector<16x1xi1> to vector<16x128xi1>
    %394 = arith.select %393, %391, %309 : vector<16x128xi1>, vector<16x128xf32>
    %c7_i32_89 = arith.constant 7 : i32
    %395 = arith.subi %c7_i32_89, %c4_i32 : i32
    %c16_i32_90 = arith.constant 16 : i32
    %396 = arith.muli %395, %c16_i32_90 : i32
    %397 = tpu.assume_multiple %396, 16 : i32
    %398 = arith.index_cast %397 : i32 to index
    %c384_91 = arith.constant 384 : index
    %399 = vector.load %arg19[%398, %c384_91] : memref<128x768xbf16, #tpu.memory_space<vmem>>, vector<16x384xbf16>
    %400 = arith.extf %399 : vector<16x384xbf16> to vector<16x384xf32>
    %401 = arith.index_cast %397 : i32 to index
    %c0_92 = arith.constant 0 : index
    %402 = vector.load %arg1[%401, %c0_92] : memref<128x1xf32, #tpu.memory_space<vmem>>, vector<16x1xf32>
    %cst_93 = arith.constant 0.000000e+00 : f32
    %403 = vector.broadcast %cst_93 : f32 to vector<16x1xf32>
    %404 = arith.cmpf ogt, %402, %403 : vector<16x1xf32>
    %405 = arith.truncf %352 : vector<16x128xf32> to vector<16x128xbf16>
    %cst_94 = arith.constant dense<0.000000e+00> : vector<16x384xf32>
    %406 = tpu.matmul %405, %9, %cst_94 {dimension_numbers = #tpu.dot_dimension_numbers<[1], [0], [0], [1], [0, 0, 1, 1], [], []>} : vector<16x128xbf16>, vector<128x384xbf16>, vector<16x384xf32> -> vector<16x384xf32>
    %407 = vector.broadcast %11 : vector<1x384xf32> to vector<16x384xf32>
    %408 = arith.addf %406, %407 : vector<16x384xf32>
    %409 = vector.extract_strided_slice %400 {offsets = [0, 0], sizes = [16, 128], strides = [1, 1]} : vector<16x384xf32> to vector<16x128xf32>
    %410 = vector.extract_strided_slice %408 {offsets = [0, 0], sizes = [16, 128], strides = [1, 1]} : vector<16x384xf32> to vector<16x128xf32>
    %411 = arith.addf %409, %410 : vector<16x128xf32>
    %412 = arith.negf %411 : vector<16x128xf32>
    %413 = math.exp %412 : vector<16x128xf32>
    %cst_95 = arith.constant 1.000000e+00 : f32
    %414 = vector.broadcast %cst_95 : f32 to vector<16x128xf32>
    %415 = arith.addf %414, %413 : vector<16x128xf32>
    %416 = arith.divf %414, %415 : vector<16x128xf32>
    %417 = vector.extract_strided_slice %400 {offsets = [0, 128], sizes = [16, 128], strides = [1, 1]} : vector<16x384xf32> to vector<16x128xf32>
    %418 = vector.extract_strided_slice %408 {offsets = [0, 128], sizes = [16, 128], strides = [1, 1]} : vector<16x384xf32> to vector<16x128xf32>
    %419 = arith.addf %417, %418 : vector<16x128xf32>
    %420 = arith.negf %419 : vector<16x128xf32>
    %421 = math.exp %420 : vector<16x128xf32>
    %cst_96 = arith.constant 1.000000e+00 : f32
    %422 = vector.broadcast %cst_96 : f32 to vector<16x128xf32>
    %423 = arith.addf %422, %421 : vector<16x128xf32>
    %424 = arith.divf %422, %423 : vector<16x128xf32>
    %425 = vector.extract_strided_slice %400 {offsets = [0, 256], sizes = [16, 128], strides = [1, 1]} : vector<16x384xf32> to vector<16x128xf32>
    %426 = vector.extract_strided_slice %408 {offsets = [0, 256], sizes = [16, 128], strides = [1, 1]} : vector<16x384xf32> to vector<16x128xf32>
    %427 = arith.mulf %416, %426 : vector<16x128xf32>
    %428 = arith.addf %425, %427 : vector<16x128xf32>
    %429 = math.tanh %428 : vector<16x128xf32>
    %cst_97 = arith.constant 1.000000e+00 : f32
    %430 = vector.broadcast %cst_97 : f32 to vector<16x128xf32>
    %431 = arith.subf %430, %424 : vector<16x128xf32>
    %432 = arith.mulf %431, %429 : vector<16x128xf32>
    %433 = arith.mulf %424, %352 : vector<16x128xf32>
    %434 = arith.addf %432, %433 : vector<16x128xf32>
    %435 = vector.shape_cast %404 : vector<16x1xi1> to vector<16x1xi1>
    %436 = vector.broadcast %435 : vector<16x1xi1> to vector<16x128xi1>
    %437 = arith.select %436, %434, %352 : vector<16x128xi1>, vector<16x128xf32>
    %c5_i32 = arith.constant 5 : i32
    %c16_i32_98 = arith.constant 16 : i32
    %438 = arith.muli %c5_i32, %c16_i32_98 : i32
    %439 = tpu.assume_multiple %438, 16 : i32
    %440 = arith.index_cast %439 : i32 to index
    %c0_99 = arith.constant 0 : index
    %441 = vector.load %arg19[%440, %c0_99] : memref<128x768xbf16, #tpu.memory_space<vmem>>, vector<16x384xbf16>
    %442 = arith.extf %441 : vector<16x384xbf16> to vector<16x384xf32>
    %443 = arith.index_cast %439 : i32 to index
    %c0_100 = arith.constant 0 : index
    %444 = vector.load %arg1[%443, %c0_100] : memref<128x1xf32, #tpu.memory_space<vmem>>, vector<16x1xf32>
    %cst_101 = arith.constant 0.000000e+00 : f32
    %445 = vector.broadcast %cst_101 : f32 to vector<16x1xf32>
    %446 = arith.cmpf ogt, %444, %445 : vector<16x1xf32>
    %447 = arith.truncf %394 : vector<16x128xf32> to vector<16x128xbf16>
    %cst_102 = arith.constant dense<0.000000e+00> : vector<16x384xf32>
    %448 = tpu.matmul %447, %8, %cst_102 {dimension_numbers = #tpu.dot_dimension_numbers<[1], [0], [0], [1], [0, 0, 1, 1], [], []>} : vector<16x128xbf16>, vector<128x384xbf16>, vector<16x384xf32> -> vector<16x384xf32>
    %449 = vector.broadcast %10 : vector<1x384xf32> to vector<16x384xf32>
    %450 = arith.addf %448, %449 : vector<16x384xf32>
    %451 = vector.extract_strided_slice %442 {offsets = [0, 0], sizes = [16, 128], strides = [1, 1]} : vector<16x384xf32> to vector<16x128xf32>
    %452 = vector.extract_strided_slice %450 {offsets = [0, 0], sizes = [16, 128], strides = [1, 1]} : vector<16x384xf32> to vector<16x128xf32>
    %453 = arith.addf %451, %452 : vector<16x128xf32>
    %454 = arith.negf %453 : vector<16x128xf32>
    %455 = math.exp %454 : vector<16x128xf32>
    %cst_103 = arith.constant 1.000000e+00 : f32
    %456 = vector.broadcast %cst_103 : f32 to vector<16x128xf32>
    %457 = arith.addf %456, %455 : vector<16x128xf32>
    %458 = arith.divf %456, %457 : vector<16x128xf32>
    %459 = vector.extract_strided_slice %442 {offsets = [0, 128], sizes = [16, 128], strides = [1, 1]} : vector<16x384xf32> to vector<16x128xf32>
    %460 = vector.extract_strided_slice %450 {offsets = [0, 128], sizes = [16, 128], strides = [1, 1]} : vector<16x384xf32> to vector<16x128xf32>
    %461 = arith.addf %459, %460 : vector<16x128xf32>
    %462 = arith.negf %461 : vector<16x128xf32>
    %463 = math.exp %462 : vector<16x128xf32>
    %cst_104 = arith.constant 1.000000e+00 : f32
    %464 = vector.broadcast %cst_104 : f32 to vector<16x128xf32>
    %465 = arith.addf %464, %463 : vector<16x128xf32>
    %466 = arith.divf %464, %465 : vector<16x128xf32>
    %467 = vector.extract_strided_slice %442 {offsets = [0, 256], sizes = [16, 128], strides = [1, 1]} : vector<16x384xf32> to vector<16x128xf32>
    %468 = vector.extract_strided_slice %450 {offsets = [0, 256], sizes = [16, 128], strides = [1, 1]} : vector<16x384xf32> to vector<16x128xf32>
    %469 = arith.mulf %458, %468 : vector<16x128xf32>
    %470 = arith.addf %467, %469 : vector<16x128xf32>
    %471 = math.tanh %470 : vector<16x128xf32>
    %cst_105 = arith.constant 1.000000e+00 : f32
    %472 = vector.broadcast %cst_105 : f32 to vector<16x128xf32>
    %473 = arith.subf %472, %466 : vector<16x128xf32>
    %474 = arith.mulf %473, %471 : vector<16x128xf32>
    %475 = arith.mulf %466, %394 : vector<16x128xf32>
    %476 = arith.addf %474, %475 : vector<16x128xf32>
    %477 = vector.shape_cast %446 : vector<16x1xi1> to vector<16x1xi1>
    %478 = vector.broadcast %477 : vector<16x1xi1> to vector<16x128xi1>
    %479 = arith.select %478, %476, %394 : vector<16x128xi1>, vector<16x128xf32>
    %c7_i32_106 = arith.constant 7 : i32
    %480 = arith.subi %c7_i32_106, %c5_i32 : i32
    %c16_i32_107 = arith.constant 16 : i32
    %481 = arith.muli %480, %c16_i32_107 : i32
    %482 = tpu.assume_multiple %481, 16 : i32
    %483 = arith.index_cast %482 : i32 to index
    %c384_108 = arith.constant 384 : index
    %484 = vector.load %arg19[%483, %c384_108] : memref<128x768xbf16, #tpu.memory_space<vmem>>, vector<16x384xbf16>
    %485 = arith.extf %484 : vector<16x384xbf16> to vector<16x384xf32>
    %486 = arith.index_cast %482 : i32 to index
    %c0_109 = arith.constant 0 : index
    %487 = vector.load %arg1[%486, %c0_109] : memref<128x1xf32, #tpu.memory_space<vmem>>, vector<16x1xf32>
    %cst_110 = arith.constant 0.000000e+00 : f32
    %488 = vector.broadcast %cst_110 : f32 to vector<16x1xf32>
    %489 = arith.cmpf ogt, %487, %488 : vector<16x1xf32>
    %490 = arith.truncf %437 : vector<16x128xf32> to vector<16x128xbf16>
    %cst_111 = arith.constant dense<0.000000e+00> : vector<16x384xf32>
    %491 = tpu.matmul %490, %9, %cst_111 {dimension_numbers = #tpu.dot_dimension_numbers<[1], [0], [0], [1], [0, 0, 1, 1], [], []>} : vector<16x128xbf16>, vector<128x384xbf16>, vector<16x384xf32> -> vector<16x384xf32>
    %492 = vector.broadcast %11 : vector<1x384xf32> to vector<16x384xf32>
    %493 = arith.addf %491, %492 : vector<16x384xf32>
    %494 = vector.extract_strided_slice %485 {offsets = [0, 0], sizes = [16, 128], strides = [1, 1]} : vector<16x384xf32> to vector<16x128xf32>
    %495 = vector.extract_strided_slice %493 {offsets = [0, 0], sizes = [16, 128], strides = [1, 1]} : vector<16x384xf32> to vector<16x128xf32>
    %496 = arith.addf %494, %495 : vector<16x128xf32>
    %497 = arith.negf %496 : vector<16x128xf32>
    %498 = math.exp %497 : vector<16x128xf32>
    %cst_112 = arith.constant 1.000000e+00 : f32
    %499 = vector.broadcast %cst_112 : f32 to vector<16x128xf32>
    %500 = arith.addf %499, %498 : vector<16x128xf32>
    %501 = arith.divf %499, %500 : vector<16x128xf32>
    %502 = vector.extract_strided_slice %485 {offsets = [0, 128], sizes = [16, 128], strides = [1, 1]} : vector<16x384xf32> to vector<16x128xf32>
    %503 = vector.extract_strided_slice %493 {offsets = [0, 128], sizes = [16, 128], strides = [1, 1]} : vector<16x384xf32> to vector<16x128xf32>
    %504 = arith.addf %502, %503 : vector<16x128xf32>
    %505 = arith.negf %504 : vector<16x128xf32>
    %506 = math.exp %505 : vector<16x128xf32>
    %cst_113 = arith.constant 1.000000e+00 : f32
    %507 = vector.broadcast %cst_113 : f32 to vector<16x128xf32>
    %508 = arith.addf %507, %506 : vector<16x128xf32>
    %509 = arith.divf %507, %508 : vector<16x128xf32>
    %510 = vector.extract_strided_slice %485 {offsets = [0, 256], sizes = [16, 128], strides = [1, 1]} : vector<16x384xf32> to vector<16x128xf32>
    %511 = vector.extract_strided_slice %493 {offsets = [0, 256], sizes = [16, 128], strides = [1, 1]} : vector<16x384xf32> to vector<16x128xf32>
    %512 = arith.mulf %501, %511 : vector<16x128xf32>
    %513 = arith.addf %510, %512 : vector<16x128xf32>
    %514 = math.tanh %513 : vector<16x128xf32>
    %cst_114 = arith.constant 1.000000e+00 : f32
    %515 = vector.broadcast %cst_114 : f32 to vector<16x128xf32>
    %516 = arith.subf %515, %509 : vector<16x128xf32>
    %517 = arith.mulf %516, %514 : vector<16x128xf32>
    %518 = arith.mulf %509, %437 : vector<16x128xf32>
    %519 = arith.addf %517, %518 : vector<16x128xf32>
    %520 = vector.shape_cast %489 : vector<16x1xi1> to vector<16x1xi1>
    %521 = vector.broadcast %520 : vector<16x1xi1> to vector<16x128xi1>
    %522 = arith.select %521, %519, %437 : vector<16x128xi1>, vector<16x128xf32>
    %c6_i32 = arith.constant 6 : i32
    %c16_i32_115 = arith.constant 16 : i32
    %523 = arith.muli %c6_i32, %c16_i32_115 : i32
    %524 = tpu.assume_multiple %523, 16 : i32
    %525 = arith.index_cast %524 : i32 to index
    %c0_116 = arith.constant 0 : index
    %526 = vector.load %arg19[%525, %c0_116] : memref<128x768xbf16, #tpu.memory_space<vmem>>, vector<16x384xbf16>
    %527 = arith.extf %526 : vector<16x384xbf16> to vector<16x384xf32>
    %528 = arith.index_cast %524 : i32 to index
    %c0_117 = arith.constant 0 : index
    %529 = vector.load %arg1[%528, %c0_117] : memref<128x1xf32, #tpu.memory_space<vmem>>, vector<16x1xf32>
    %cst_118 = arith.constant 0.000000e+00 : f32
    %530 = vector.broadcast %cst_118 : f32 to vector<16x1xf32>
    %531 = arith.cmpf ogt, %529, %530 : vector<16x1xf32>
    %532 = arith.truncf %479 : vector<16x128xf32> to vector<16x128xbf16>
    %cst_119 = arith.constant dense<0.000000e+00> : vector<16x384xf32>
    %533 = tpu.matmul %532, %8, %cst_119 {dimension_numbers = #tpu.dot_dimension_numbers<[1], [0], [0], [1], [0, 0, 1, 1], [], []>} : vector<16x128xbf16>, vector<128x384xbf16>, vector<16x384xf32> -> vector<16x384xf32>
    %534 = vector.broadcast %10 : vector<1x384xf32> to vector<16x384xf32>
    %535 = arith.addf %533, %534 : vector<16x384xf32>
    %536 = vector.extract_strided_slice %527 {offsets = [0, 0], sizes = [16, 128], strides = [1, 1]} : vector<16x384xf32> to vector<16x128xf32>
    %537 = vector.extract_strided_slice %535 {offsets = [0, 0], sizes = [16, 128], strides = [1, 1]} : vector<16x384xf32> to vector<16x128xf32>
    %538 = arith.addf %536, %537 : vector<16x128xf32>
    %539 = arith.negf %538 : vector<16x128xf32>
    %540 = math.exp %539 : vector<16x128xf32>
    %cst_120 = arith.constant 1.000000e+00 : f32
    %541 = vector.broadcast %cst_120 : f32 to vector<16x128xf32>
    %542 = arith.addf %541, %540 : vector<16x128xf32>
    %543 = arith.divf %541, %542 : vector<16x128xf32>
    %544 = vector.extract_strided_slice %527 {offsets = [0, 128], sizes = [16, 128], strides = [1, 1]} : vector<16x384xf32> to vector<16x128xf32>
    %545 = vector.extract_strided_slice %535 {offsets = [0, 128], sizes = [16, 128], strides = [1, 1]} : vector<16x384xf32> to vector<16x128xf32>
    %546 = arith.addf %544, %545 : vector<16x128xf32>
    %547 = arith.negf %546 : vector<16x128xf32>
    %548 = math.exp %547 : vector<16x128xf32>
    %cst_121 = arith.constant 1.000000e+00 : f32
    %549 = vector.broadcast %cst_121 : f32 to vector<16x128xf32>
    %550 = arith.addf %549, %548 : vector<16x128xf32>
    %551 = arith.divf %549, %550 : vector<16x128xf32>
    %552 = vector.extract_strided_slice %527 {offsets = [0, 256], sizes = [16, 128], strides = [1, 1]} : vector<16x384xf32> to vector<16x128xf32>
    %553 = vector.extract_strided_slice %535 {offsets = [0, 256], sizes = [16, 128], strides = [1, 1]} : vector<16x384xf32> to vector<16x128xf32>
    %554 = arith.mulf %543, %553 : vector<16x128xf32>
    %555 = arith.addf %552, %554 : vector<16x128xf32>
    %556 = math.tanh %555 : vector<16x128xf32>
    %cst_122 = arith.constant 1.000000e+00 : f32
    %557 = vector.broadcast %cst_122 : f32 to vector<16x128xf32>
    %558 = arith.subf %557, %551 : vector<16x128xf32>
    %559 = arith.mulf %558, %556 : vector<16x128xf32>
    %560 = arith.mulf %551, %479 : vector<16x128xf32>
    %561 = arith.addf %559, %560 : vector<16x128xf32>
    %562 = vector.shape_cast %531 : vector<16x1xi1> to vector<16x1xi1>
    %563 = vector.broadcast %562 : vector<16x1xi1> to vector<16x128xi1>
    %564 = arith.select %563, %561, %479 : vector<16x128xi1>, vector<16x128xf32>
    %c7_i32_123 = arith.constant 7 : i32
    %565 = arith.subi %c7_i32_123, %c6_i32 : i32
    %c16_i32_124 = arith.constant 16 : i32
    %566 = arith.muli %565, %c16_i32_124 : i32
    %567 = tpu.assume_multiple %566, 16 : i32
    %568 = arith.index_cast %567 : i32 to index
    %c384_125 = arith.constant 384 : index
    %569 = vector.load %arg19[%568, %c384_125] : memref<128x768xbf16, #tpu.memory_space<vmem>>, vector<16x384xbf16>
    %570 = arith.extf %569 : vector<16x384xbf16> to vector<16x384xf32>
    %571 = arith.index_cast %567 : i32 to index
    %c0_126 = arith.constant 0 : index
    %572 = vector.load %arg1[%571, %c0_126] : memref<128x1xf32, #tpu.memory_space<vmem>>, vector<16x1xf32>
    %cst_127 = arith.constant 0.000000e+00 : f32
    %573 = vector.broadcast %cst_127 : f32 to vector<16x1xf32>
    %574 = arith.cmpf ogt, %572, %573 : vector<16x1xf32>
    %575 = arith.truncf %522 : vector<16x128xf32> to vector<16x128xbf16>
    %cst_128 = arith.constant dense<0.000000e+00> : vector<16x384xf32>
    %576 = tpu.matmul %575, %9, %cst_128 {dimension_numbers = #tpu.dot_dimension_numbers<[1], [0], [0], [1], [0, 0, 1, 1], [], []>} : vector<16x128xbf16>, vector<128x384xbf16>, vector<16x384xf32> -> vector<16x384xf32>
    %577 = vector.broadcast %11 : vector<1x384xf32> to vector<16x384xf32>
    %578 = arith.addf %576, %577 : vector<16x384xf32>
    %579 = vector.extract_strided_slice %570 {offsets = [0, 0], sizes = [16, 128], strides = [1, 1]} : vector<16x384xf32> to vector<16x128xf32>
    %580 = vector.extract_strided_slice %578 {offsets = [0, 0], sizes = [16, 128], strides = [1, 1]} : vector<16x384xf32> to vector<16x128xf32>
    %581 = arith.addf %579, %580 : vector<16x128xf32>
    %582 = arith.negf %581 : vector<16x128xf32>
    %583 = math.exp %582 : vector<16x128xf32>
    %cst_129 = arith.constant 1.000000e+00 : f32
    %584 = vector.broadcast %cst_129 : f32 to vector<16x128xf32>
    %585 = arith.addf %584, %583 : vector<16x128xf32>
    %586 = arith.divf %584, %585 : vector<16x128xf32>
    %587 = vector.extract_strided_slice %570 {offsets = [0, 128], sizes = [16, 128], strides = [1, 1]} : vector<16x384xf32> to vector<16x128xf32>
    %588 = vector.extract_strided_slice %578 {offsets = [0, 128], sizes = [16, 128], strides = [1, 1]} : vector<16x384xf32> to vector<16x128xf32>
    %589 = arith.addf %587, %588 : vector<16x128xf32>
    %590 = arith.negf %589 : vector<16x128xf32>
    %591 = math.exp %590 : vector<16x128xf32>
    %cst_130 = arith.constant 1.000000e+00 : f32
    %592 = vector.broadcast %cst_130 : f32 to vector<16x128xf32>
    %593 = arith.addf %592, %591 : vector<16x128xf32>
    %594 = arith.divf %592, %593 : vector<16x128xf32>
    %595 = vector.extract_strided_slice %570 {offsets = [0, 256], sizes = [16, 128], strides = [1, 1]} : vector<16x384xf32> to vector<16x128xf32>
    %596 = vector.extract_strided_slice %578 {offsets = [0, 256], sizes = [16, 128], strides = [1, 1]} : vector<16x384xf32> to vector<16x128xf32>
    %597 = arith.mulf %586, %596 : vector<16x128xf32>
    %598 = arith.addf %595, %597 : vector<16x128xf32>
    %599 = math.tanh %598 : vector<16x128xf32>
    %cst_131 = arith.constant 1.000000e+00 : f32
    %600 = vector.broadcast %cst_131 : f32 to vector<16x128xf32>
    %601 = arith.subf %600, %594 : vector<16x128xf32>
    %602 = arith.mulf %601, %599 : vector<16x128xf32>
    %603 = arith.mulf %594, %522 : vector<16x128xf32>
    %604 = arith.addf %602, %603 : vector<16x128xf32>
    %605 = vector.shape_cast %574 : vector<16x1xi1> to vector<16x1xi1>
    %606 = vector.broadcast %605 : vector<16x1xi1> to vector<16x128xi1>
    %607 = arith.select %606, %604, %522 : vector<16x128xi1>, vector<16x128xf32>
    %c7_i32_132 = arith.constant 7 : i32
    %c16_i32_133 = arith.constant 16 : i32
    %608 = arith.muli %c7_i32_132, %c16_i32_133 : i32
    %609 = tpu.assume_multiple %608, 16 : i32
    %610 = arith.index_cast %609 : i32 to index
    %c0_134 = arith.constant 0 : index
    %611 = vector.load %arg19[%610, %c0_134] : memref<128x768xbf16, #tpu.memory_space<vmem>>, vector<16x384xbf16>
    %612 = arith.extf %611 : vector<16x384xbf16> to vector<16x384xf32>
    %613 = arith.index_cast %609 : i32 to index
    %c0_135 = arith.constant 0 : index
    %614 = vector.load %arg1[%613, %c0_135] : memref<128x1xf32, #tpu.memory_space<vmem>>, vector<16x1xf32>
    %cst_136 = arith.constant 0.000000e+00 : f32
    %615 = vector.broadcast %cst_136 : f32 to vector<16x1xf32>
    %616 = arith.cmpf ogt, %614, %615 : vector<16x1xf32>
    %617 = arith.truncf %564 : vector<16x128xf32> to vector<16x128xbf16>
    %cst_137 = arith.constant dense<0.000000e+00> : vector<16x384xf32>
    %618 = tpu.matmul %617, %8, %cst_137 {dimension_numbers = #tpu.dot_dimension_numbers<[1], [0], [0], [1], [0, 0, 1, 1], [], []>} : vector<16x128xbf16>, vector<128x384xbf16>, vector<16x384xf32> -> vector<16x384xf32>
    %619 = vector.broadcast %10 : vector<1x384xf32> to vector<16x384xf32>
    %620 = arith.addf %618, %619 : vector<16x384xf32>
    %621 = vector.extract_strided_slice %612 {offsets = [0, 0], sizes = [16, 128], strides = [1, 1]} : vector<16x384xf32> to vector<16x128xf32>
    %622 = vector.extract_strided_slice %620 {offsets = [0, 0], sizes = [16, 128], strides = [1, 1]} : vector<16x384xf32> to vector<16x128xf32>
    %623 = arith.addf %621, %622 : vector<16x128xf32>
    %624 = arith.negf %623 : vector<16x128xf32>
    %625 = math.exp %624 : vector<16x128xf32>
    %cst_138 = arith.constant 1.000000e+00 : f32
    %626 = vector.broadcast %cst_138 : f32 to vector<16x128xf32>
    %627 = arith.addf %626, %625 : vector<16x128xf32>
    %628 = arith.divf %626, %627 : vector<16x128xf32>
    %629 = vector.extract_strided_slice %612 {offsets = [0, 128], sizes = [16, 128], strides = [1, 1]} : vector<16x384xf32> to vector<16x128xf32>
    %630 = vector.extract_strided_slice %620 {offsets = [0, 128], sizes = [16, 128], strides = [1, 1]} : vector<16x384xf32> to vector<16x128xf32>
    %631 = arith.addf %629, %630 : vector<16x128xf32>
    %632 = arith.negf %631 : vector<16x128xf32>
    %633 = math.exp %632 : vector<16x128xf32>
    %cst_139 = arith.constant 1.000000e+00 : f32
    %634 = vector.broadcast %cst_139 : f32 to vector<16x128xf32>
    %635 = arith.addf %634, %633 : vector<16x128xf32>
    %636 = arith.divf %634, %635 : vector<16x128xf32>
    %637 = vector.extract_strided_slice %612 {offsets = [0, 256], sizes = [16, 128], strides = [1, 1]} : vector<16x384xf32> to vector<16x128xf32>
    %638 = vector.extract_strided_slice %620 {offsets = [0, 256], sizes = [16, 128], strides = [1, 1]} : vector<16x384xf32> to vector<16x128xf32>
    %639 = arith.mulf %628, %638 : vector<16x128xf32>
    %640 = arith.addf %637, %639 : vector<16x128xf32>
    %641 = math.tanh %640 : vector<16x128xf32>
    %cst_140 = arith.constant 1.000000e+00 : f32
    %642 = vector.broadcast %cst_140 : f32 to vector<16x128xf32>
    %643 = arith.subf %642, %636 : vector<16x128xf32>
    %644 = arith.mulf %643, %641 : vector<16x128xf32>
    %645 = arith.mulf %636, %564 : vector<16x128xf32>
    %646 = arith.addf %644, %645 : vector<16x128xf32>
    %647 = vector.shape_cast %616 : vector<16x1xi1> to vector<16x1xi1>
    %648 = vector.broadcast %647 : vector<16x1xi1> to vector<16x128xi1>
    %649 = arith.select %648, %646, %564 : vector<16x128xi1>, vector<16x128xf32>
    %c7_i32_141 = arith.constant 7 : i32
    %650 = arith.subi %c7_i32_141, %c7_i32_132 : i32
    %c16_i32_142 = arith.constant 16 : i32
    %651 = arith.muli %650, %c16_i32_142 : i32
    %652 = tpu.assume_multiple %651, 16 : i32
    %653 = arith.index_cast %652 : i32 to index
    %c384_143 = arith.constant 384 : index
    %654 = vector.load %arg19[%653, %c384_143] : memref<128x768xbf16, #tpu.memory_space<vmem>>, vector<16x384xbf16>
    %655 = arith.extf %654 : vector<16x384xbf16> to vector<16x384xf32>
    %656 = arith.index_cast %652 : i32 to index
    %c0_144 = arith.constant 0 : index
    %657 = vector.load %arg1[%656, %c0_144] : memref<128x1xf32, #tpu.memory_space<vmem>>, vector<16x1xf32>
    %cst_145 = arith.constant 0.000000e+00 : f32
    %658 = vector.broadcast %cst_145 : f32 to vector<16x1xf32>
    %659 = arith.cmpf ogt, %657, %658 : vector<16x1xf32>
    %660 = arith.truncf %607 : vector<16x128xf32> to vector<16x128xbf16>
    %cst_146 = arith.constant dense<0.000000e+00> : vector<16x384xf32>
    %661 = tpu.matmul %660, %9, %cst_146 {dimension_numbers = #tpu.dot_dimension_numbers<[1], [0], [0], [1], [0, 0, 1, 1], [], []>} : vector<16x128xbf16>, vector<128x384xbf16>, vector<16x384xf32> -> vector<16x384xf32>
    %662 = vector.broadcast %11 : vector<1x384xf32> to vector<16x384xf32>
    %663 = arith.addf %661, %662 : vector<16x384xf32>
    %664 = vector.extract_strided_slice %655 {offsets = [0, 0], sizes = [16, 128], strides = [1, 1]} : vector<16x384xf32> to vector<16x128xf32>
    %665 = vector.extract_strided_slice %663 {offsets = [0, 0], sizes = [16, 128], strides = [1, 1]} : vector<16x384xf32> to vector<16x128xf32>
    %666 = arith.addf %664, %665 : vector<16x128xf32>
    %667 = arith.negf %666 : vector<16x128xf32>
    %668 = math.exp %667 : vector<16x128xf32>
    %cst_147 = arith.constant 1.000000e+00 : f32
    %669 = vector.broadcast %cst_147 : f32 to vector<16x128xf32>
    %670 = arith.addf %669, %668 : vector<16x128xf32>
    %671 = arith.divf %669, %670 : vector<16x128xf32>
    %672 = vector.extract_strided_slice %655 {offsets = [0, 128], sizes = [16, 128], strides = [1, 1]} : vector<16x384xf32> to vector<16x128xf32>
    %673 = vector.extract_strided_slice %663 {offsets = [0, 128], sizes = [16, 128], strides = [1, 1]} : vector<16x384xf32> to vector<16x128xf32>
    %674 = arith.addf %672, %673 : vector<16x128xf32>
    %675 = arith.negf %674 : vector<16x128xf32>
    %676 = math.exp %675 : vector<16x128xf32>
    %cst_148 = arith.constant 1.000000e+00 : f32
    %677 = vector.broadcast %cst_148 : f32 to vector<16x128xf32>
    %678 = arith.addf %677, %676 : vector<16x128xf32>
    %679 = arith.divf %677, %678 : vector<16x128xf32>
    %680 = vector.extract_strided_slice %655 {offsets = [0, 256], sizes = [16, 128], strides = [1, 1]} : vector<16x384xf32> to vector<16x128xf32>
    %681 = vector.extract_strided_slice %663 {offsets = [0, 256], sizes = [16, 128], strides = [1, 1]} : vector<16x384xf32> to vector<16x128xf32>
    %682 = arith.mulf %671, %681 : vector<16x128xf32>
    %683 = arith.addf %680, %682 : vector<16x128xf32>
    %684 = math.tanh %683 : vector<16x128xf32>
    %cst_149 = arith.constant 1.000000e+00 : f32
    %685 = vector.broadcast %cst_149 : f32 to vector<16x128xf32>
    %686 = arith.subf %685, %679 : vector<16x128xf32>
    %687 = arith.mulf %686, %684 : vector<16x128xf32>
    %688 = arith.mulf %679, %607 : vector<16x128xf32>
    %689 = arith.addf %687, %688 : vector<16x128xf32>
    %690 = vector.shape_cast %659 : vector<16x1xi1> to vector<16x1xi1>
    %691 = vector.broadcast %690 : vector<16x1xi1> to vector<16x128xi1>
    %692 = arith.select %691, %689, %607 : vector<16x128xi1>, vector<16x128xf32>
    %c8_i32 = arith.constant 8 : i32
    %693 = arith.truncf %649 : vector<16x128xf32> to vector<16x128xbf16>
    %c0_150 = arith.constant 0 : index
    %c0_151 = arith.constant 0 : index
    %694 = vector.load %arg8[%c0_150, %c0_151] : memref<256x128xbf16, #tpu.memory_space<vmem>>, vector<128x128xbf16>
    %cst_152 = arith.constant dense<0.000000e+00> : vector<16x128xf32>
    %695 = tpu.matmul %693, %694, %cst_152 {dimension_numbers = #tpu.dot_dimension_numbers<[1], [0], [0], [1], [0, 0, 1, 1], [], []>} : vector<16x128xbf16>, vector<128x128xbf16>, vector<16x128xf32> -> vector<16x128xf32>
    %696 = arith.truncf %692 : vector<16x128xf32> to vector<16x128xbf16>
    %c128 = arith.constant 128 : index
    %c0_153 = arith.constant 0 : index
    %697 = vector.load %arg8[%c128, %c0_153] : memref<256x128xbf16, #tpu.memory_space<vmem>>, vector<128x128xbf16>
    %cst_154 = arith.constant dense<0.000000e+00> : vector<16x128xf32>
    %698 = tpu.matmul %696, %697, %cst_154 {dimension_numbers = #tpu.dot_dimension_numbers<[1], [0], [0], [1], [0, 0, 1, 1], [], []>} : vector<16x128xbf16>, vector<128x128xbf16>, vector<16x128xf32> -> vector<16x128xf32>
    %699 = arith.addf %695, %698 : vector<16x128xf32>
    %c0_155 = arith.constant 0 : index
    %c0_156 = arith.constant 0 : index
    %700 = vector.load %arg9[%c0_155, %c0_156] : memref<1x128xf32, #tpu.memory_space<vmem>>, vector<1x128xf32>
    %701 = vector.broadcast %700 : vector<1x128xf32> to vector<16x128xf32>
    %702 = arith.addf %699, %701 : vector<16x128xf32>
    %c0_157 = arith.constant 0 : index
    %c0_158 = arith.constant 0 : index
    %703 = vector.load %arg10[%c0_157, %c0_158] : memref<128x32xbf16, #tpu.memory_space<vmem>>, vector<128x32xbf16>
    %c0_159 = arith.constant 0 : index
    %c0_160 = arith.constant 0 : index
    %704 = vector.load %arg12[%c0_159, %c0_160] : memref<32x384xbf16, #tpu.memory_space<vmem>>, vector<32x384xbf16>
    %cst_161 = arith.constant dense<0.000000e+00> : vector<128x384xf32>
    %705 = tpu.matmul %703, %704, %cst_161 {dimension_numbers = #tpu.dot_dimension_numbers<[1], [0], [0], [1], [0, 0, 1, 1], [], []>} : vector<128x32xbf16>, vector<32x384xbf16>, vector<128x384xf32> -> vector<128x384xf32>
    %c0_162 = arith.constant 0 : index
    %c0_163 = arith.constant 0 : index
    %706 = vector.load %arg13[%c0_162, %c0_163] : memref<1x384xf32, #tpu.memory_space<vmem>>, vector<1x384xf32>
    %707 = vector.broadcast %706 : vector<1x384xf32> to vector<128x384xf32>
    %708 = arith.addf %705, %707 : vector<128x384xf32>
    %709 = arith.truncf %708 : vector<128x384xf32> to vector<128x384xbf16>
    %c0_164 = arith.constant 0 : index
    %c0_165 = arith.constant 0 : index
    %710 = vector.load %arg20[%c0_164, %c0_165] : memref<128x384xbf16, #tpu.memory_space<vmem>>, vector<128x384xbf16>
    tpu.vector_store %arg20[%c0_164, %c0_165], %709 {strides = array<i32>} : memref<128x384xbf16, #tpu.memory_space<vmem>>, vector<128x384xbf16>,
    %c0_166 = arith.constant 0 : index
    %c0_167 = arith.constant 0 : index
    %711 = vector.load %arg14[%c0_166, %c0_167] : memref<128x384xbf16, #tpu.memory_space<vmem>>, vector<128x384xbf16>
    %c0_168 = arith.constant 0 : index
    %c0_169 = arith.constant 0 : index
    %712 = vector.load %arg15[%c0_168, %c0_169] : memref<1x384xf32, #tpu.memory_space<vmem>>, vector<1x384xf32>
    %c0_i32_170 = arith.constant 0 : i32
    %c16_i32_171 = arith.constant 16 : i32
    %713 = arith.muli %c0_i32_170, %c16_i32_171 : i32
    %714 = tpu.assume_multiple %713, 16 : i32
    %715 = arith.index_cast %714 : i32 to index
    %c0_172 = arith.constant 0 : index
    %716 = vector.load %arg20[%715, %c0_172] : memref<128x384xbf16, #tpu.memory_space<vmem>>, vector<16x384xbf16>
    %717 = arith.extf %716 : vector<16x384xbf16> to vector<16x384xf32>
    %718 = arith.truncf %702 : vector<16x128xf32> to vector<16x128xbf16>
    %cst_173 = arith.constant dense<0.000000e+00> : vector<16x384xf32>
    %719 = tpu.matmul %718, %711, %cst_173 {dimension_numbers = #tpu.dot_dimension_numbers<[1], [0], [0], [1], [0, 0, 1, 1], [], []>} : vector<16x128xbf16>, vector<128x384xbf16>, vector<16x384xf32> -> vector<16x384xf32>
    %720 = vector.broadcast %712 : vector<1x384xf32> to vector<16x384xf32>
    %721 = arith.addf %719, %720 : vector<16x384xf32>
    %722 = vector.extract_strided_slice %717 {offsets = [0, 0], sizes = [16, 128], strides = [1, 1]} : vector<16x384xf32> to vector<16x128xf32>
    %723 = vector.extract_strided_slice %721 {offsets = [0, 0], sizes = [16, 128], strides = [1, 1]} : vector<16x384xf32> to vector<16x128xf32>
    %724 = arith.addf %722, %723 : vector<16x128xf32>
    %725 = arith.negf %724 : vector<16x128xf32>
    %726 = math.exp %725 : vector<16x128xf32>
    %cst_174 = arith.constant 1.000000e+00 : f32
    %727 = vector.broadcast %cst_174 : f32 to vector<16x128xf32>
    %728 = arith.addf %727, %726 : vector<16x128xf32>
    %729 = arith.divf %727, %728 : vector<16x128xf32>
    %730 = vector.extract_strided_slice %717 {offsets = [0, 128], sizes = [16, 128], strides = [1, 1]} : vector<16x384xf32> to vector<16x128xf32>
    %731 = vector.extract_strided_slice %721 {offsets = [0, 128], sizes = [16, 128], strides = [1, 1]} : vector<16x384xf32> to vector<16x128xf32>
    %732 = arith.addf %730, %731 : vector<16x128xf32>
    %733 = arith.negf %732 : vector<16x128xf32>
    %734 = math.exp %733 : vector<16x128xf32>
    %cst_175 = arith.constant 1.000000e+00 : f32
    %735 = vector.broadcast %cst_175 : f32 to vector<16x128xf32>
    %736 = arith.addf %735, %734 : vector<16x128xf32>
    %737 = arith.divf %735, %736 : vector<16x128xf32>
    %738 = vector.extract_strided_slice %717 {offsets = [0, 256], sizes = [16, 128], strides = [1, 1]} : vector<16x384xf32> to vector<16x128xf32>
    %739 = vector.extract_strided_slice %721 {offsets = [0, 256], sizes = [16, 128], strides = [1, 1]} : vector<16x384xf32> to vector<16x128xf32>
    %740 = arith.mulf %729, %739 : vector<16x128xf32>
    %741 = arith.addf %738, %740 : vector<16x128xf32>
    %742 = math.tanh %741 : vector<16x128xf32>
    %cst_176 = arith.constant 1.000000e+00 : f32
    %743 = vector.broadcast %cst_176 : f32 to vector<16x128xf32>
    %744 = arith.subf %743, %737 : vector<16x128xf32>
    %745 = arith.mulf %744, %742 : vector<16x128xf32>
    %746 = arith.mulf %737, %702 : vector<16x128xf32>
    %747 = arith.addf %745, %746 : vector<16x128xf32>
    %748 = arith.truncf %747 : vector<16x128xf32> to vector<16x128xbf16>
    %749 = arith.index_cast %714 : i32 to index
    %c0_177 = arith.constant 0 : index
    %750 = vector.load %arg21[%749, %c0_177] : memref<128x128xbf16, #tpu.memory_space<vmem>>, vector<16x128xbf16>
    tpu.vector_store %arg21[%749, %c0_177], %748 {strides = array<i32>} : memref<128x128xbf16, #tpu.memory_space<vmem>>, vector<16x128xbf16>,
    %c1_i32_178 = arith.constant 1 : i32
    %c16_i32_179 = arith.constant 16 : i32
    %751 = arith.muli %c1_i32_178, %c16_i32_179 : i32
    %752 = tpu.assume_multiple %751, 16 : i32
    %753 = arith.index_cast %752 : i32 to index
    %c0_180 = arith.constant 0 : index
    %754 = vector.load %arg20[%753, %c0_180] : memref<128x384xbf16, #tpu.memory_space<vmem>>, vector<16x384xbf16>
    %755 = arith.extf %754 : vector<16x384xbf16> to vector<16x384xf32>
    %756 = arith.truncf %747 : vector<16x128xf32> to vector<16x128xbf16>
    %cst_181 = arith.constant dense<0.000000e+00> : vector<16x384xf32>
    %757 = tpu.matmul %756, %711, %cst_181 {dimension_numbers = #tpu.dot_dimension_numbers<[1], [0], [0], [1], [0, 0, 1, 1], [], []>} : vector<16x128xbf16>, vector<128x384xbf16>, vector<16x384xf32> -> vector<16x384xf32>
    %758 = vector.broadcast %712 : vector<1x384xf32> to vector<16x384xf32>
    %759 = arith.addf %757, %758 : vector<16x384xf32>
    %760 = vector.extract_strided_slice %755 {offsets = [0, 0], sizes = [16, 128], strides = [1, 1]} : vector<16x384xf32> to vector<16x128xf32>
    %761 = vector.extract_strided_slice %759 {offsets = [0, 0], sizes = [16, 128], strides = [1, 1]} : vector<16x384xf32> to vector<16x128xf32>
    %762 = arith.addf %760, %761 : vector<16x128xf32>
    %763 = arith.negf %762 : vector<16x128xf32>
    %764 = math.exp %763 : vector<16x128xf32>
    %cst_182 = arith.constant 1.000000e+00 : f32
    %765 = vector.broadcast %cst_182 : f32 to vector<16x128xf32>
    %766 = arith.addf %765, %764 : vector<16x128xf32>
    %767 = arith.divf %765, %766 : vector<16x128xf32>
    %768 = vector.extract_strided_slice %755 {offsets = [0, 128], sizes = [16, 128], strides = [1, 1]} : vector<16x384xf32> to vector<16x128xf32>
    %769 = vector.extract_strided_slice %759 {offsets = [0, 128], sizes = [16, 128], strides = [1, 1]} : vector<16x384xf32> to vector<16x128xf32>
    %770 = arith.addf %768, %769 : vector<16x128xf32>
    %771 = arith.negf %770 : vector<16x128xf32>
    %772 = math.exp %771 : vector<16x128xf32>
    %cst_183 = arith.constant 1.000000e+00 : f32
    %773 = vector.broadcast %cst_183 : f32 to vector<16x128xf32>
    %774 = arith.addf %773, %772 : vector<16x128xf32>
    %775 = arith.divf %773, %774 : vector<16x128xf32>
    %776 = vector.extract_strided_slice %755 {offsets = [0, 256], sizes = [16, 128], strides = [1, 1]} : vector<16x384xf32> to vector<16x128xf32>
    %777 = vector.extract_strided_slice %759 {offsets = [0, 256], sizes = [16, 128], strides = [1, 1]} : vector<16x384xf32> to vector<16x128xf32>
    %778 = arith.mulf %767, %777 : vector<16x128xf32>
    %779 = arith.addf %776, %778 : vector<16x128xf32>
    %780 = math.tanh %779 : vector<16x128xf32>
    %cst_184 = arith.constant 1.000000e+00 : f32
    %781 = vector.broadcast %cst_184 : f32 to vector<16x128xf32>
    %782 = arith.subf %781, %775 : vector<16x128xf32>
    %783 = arith.mulf %782, %780 : vector<16x128xf32>
    %784 = arith.mulf %775, %747 : vector<16x128xf32>
    %785 = arith.addf %783, %784 : vector<16x128xf32>
    %786 = arith.truncf %785 : vector<16x128xf32> to vector<16x128xbf16>
    %787 = arith.index_cast %752 : i32 to index
    %c0_185 = arith.constant 0 : index
    %788 = vector.load %arg21[%787, %c0_185] : memref<128x128xbf16, #tpu.memory_space<vmem>>, vector<16x128xbf16>
    tpu.vector_store %arg21[%787, %c0_185], %786 {strides = array<i32>} : memref<128x128xbf16, #tpu.memory_space<vmem>>, vector<16x128xbf16>,
    %c2_i32_186 = arith.constant 2 : i32
    %c16_i32_187 = arith.constant 16 : i32
    %789 = arith.muli %c2_i32_186, %c16_i32_187 : i32
    %790 = tpu.assume_multiple %789, 16 : i32
    %791 = arith.index_cast %790 : i32 to index
    %c0_188 = arith.constant 0 : index
    %792 = vector.load %arg20[%791, %c0_188] : memref<128x384xbf16, #tpu.memory_space<vmem>>, vector<16x384xbf16>
    %793 = arith.extf %792 : vector<16x384xbf16> to vector<16x384xf32>
    %794 = arith.truncf %785 : vector<16x128xf32> to vector<16x128xbf16>
    %cst_189 = arith.constant dense<0.000000e+00> : vector<16x384xf32>
    %795 = tpu.matmul %794, %711, %cst_189 {dimension_numbers = #tpu.dot_dimension_numbers<[1], [0], [0], [1], [0, 0, 1, 1], [], []>} : vector<16x128xbf16>, vector<128x384xbf16>, vector<16x384xf32> -> vector<16x384xf32>
    %796 = vector.broadcast %712 : vector<1x384xf32> to vector<16x384xf32>
    %797 = arith.addf %795, %796 : vector<16x384xf32>
    %798 = vector.extract_strided_slice %793 {offsets = [0, 0], sizes = [16, 128], strides = [1, 1]} : vector<16x384xf32> to vector<16x128xf32>
    %799 = vector.extract_strided_slice %797 {offsets = [0, 0], sizes = [16, 128], strides = [1, 1]} : vector<16x384xf32> to vector<16x128xf32>
    %800 = arith.addf %798, %799 : vector<16x128xf32>
    %801 = arith.negf %800 : vector<16x128xf32>
    %802 = math.exp %801 : vector<16x128xf32>
    %cst_190 = arith.constant 1.000000e+00 : f32
    %803 = vector.broadcast %cst_190 : f32 to vector<16x128xf32>
    %804 = arith.addf %803, %802 : vector<16x128xf32>
    %805 = arith.divf %803, %804 : vector<16x128xf32>
    %806 = vector.extract_strided_slice %793 {offsets = [0, 128], sizes = [16, 128], strides = [1, 1]} : vector<16x384xf32> to vector<16x128xf32>
    %807 = vector.extract_strided_slice %797 {offsets = [0, 128], sizes = [16, 128], strides = [1, 1]} : vector<16x384xf32> to vector<16x128xf32>
    %808 = arith.addf %806, %807 : vector<16x128xf32>
    %809 = arith.negf %808 : vector<16x128xf32>
    %810 = math.exp %809 : vector<16x128xf32>
    %cst_191 = arith.constant 1.000000e+00 : f32
    %811 = vector.broadcast %cst_191 : f32 to vector<16x128xf32>
    %812 = arith.addf %811, %810 : vector<16x128xf32>
    %813 = arith.divf %811, %812 : vector<16x128xf32>
    %814 = vector.extract_strided_slice %793 {offsets = [0, 256], sizes = [16, 128], strides = [1, 1]} : vector<16x384xf32> to vector<16x128xf32>
    %815 = vector.extract_strided_slice %797 {offsets = [0, 256], sizes = [16, 128], strides = [1, 1]} : vector<16x384xf32> to vector<16x128xf32>
    %816 = arith.mulf %805, %815 : vector<16x128xf32>
    %817 = arith.addf %814, %816 : vector<16x128xf32>
    %818 = math.tanh %817 : vector<16x128xf32>
    %cst_192 = arith.constant 1.000000e+00 : f32
    %819 = vector.broadcast %cst_192 : f32 to vector<16x128xf32>
    %820 = arith.subf %819, %813 : vector<16x128xf32>
    %821 = arith.mulf %820, %818 : vector<16x128xf32>
    %822 = arith.mulf %813, %785 : vector<16x128xf32>
    %823 = arith.addf %821, %822 : vector<16x128xf32>
    %824 = arith.truncf %823 : vector<16x128xf32> to vector<16x128xbf16>
    %825 = arith.index_cast %790 : i32 to index
    %c0_193 = arith.constant 0 : index
    %826 = vector.load %arg21[%825, %c0_193] : memref<128x128xbf16, #tpu.memory_space<vmem>>, vector<16x128xbf16>
    tpu.vector_store %arg21[%825, %c0_193], %824 {strides = array<i32>} : memref<128x128xbf16, #tpu.memory_space<vmem>>, vector<16x128xbf16>,
    %c3_i32_194 = arith.constant 3 : i32
    %c16_i32_195 = arith.constant 16 : i32
    %827 = arith.muli %c3_i32_194, %c16_i32_195 : i32
    %828 = tpu.assume_multiple %827, 16 : i32
    %829 = arith.index_cast %828 : i32 to index
    %c0_196 = arith.constant 0 : index
    %830 = vector.load %arg20[%829, %c0_196] : memref<128x384xbf16, #tpu.memory_space<vmem>>, vector<16x384xbf16>
    %831 = arith.extf %830 : vector<16x384xbf16> to vector<16x384xf32>
    %832 = arith.truncf %823 : vector<16x128xf32> to vector<16x128xbf16>
    %cst_197 = arith.constant dense<0.000000e+00> : vector<16x384xf32>
    %833 = tpu.matmul %832, %711, %cst_197 {dimension_numbers = #tpu.dot_dimension_numbers<[1], [0], [0], [1], [0, 0, 1, 1], [], []>} : vector<16x128xbf16>, vector<128x384xbf16>, vector<16x384xf32> -> vector<16x384xf32>
    %834 = vector.broadcast %712 : vector<1x384xf32> to vector<16x384xf32>
    %835 = arith.addf %833, %834 : vector<16x384xf32>
    %836 = vector.extract_strided_slice %831 {offsets = [0, 0], sizes = [16, 128], strides = [1, 1]} : vector<16x384xf32> to vector<16x128xf32>
    %837 = vector.extract_strided_slice %835 {offsets = [0, 0], sizes = [16, 128], strides = [1, 1]} : vector<16x384xf32> to vector<16x128xf32>
    %838 = arith.addf %836, %837 : vector<16x128xf32>
    %839 = arith.negf %838 : vector<16x128xf32>
    %840 = math.exp %839 : vector<16x128xf32>
    %cst_198 = arith.constant 1.000000e+00 : f32
    %841 = vector.broadcast %cst_198 : f32 to vector<16x128xf32>
    %842 = arith.addf %841, %840 : vector<16x128xf32>
    %843 = arith.divf %841, %842 : vector<16x128xf32>
    %844 = vector.extract_strided_slice %831 {offsets = [0, 128], sizes = [16, 128], strides = [1, 1]} : vector<16x384xf32> to vector<16x128xf32>
    %845 = vector.extract_strided_slice %835 {offsets = [0, 128], sizes = [16, 128], strides = [1, 1]} : vector<16x384xf32> to vector<16x128xf32>
    %846 = arith.addf %844, %845 : vector<16x128xf32>
    %847 = arith.negf %846 : vector<16x128xf32>
    %848 = math.exp %847 : vector<16x128xf32>
    %cst_199 = arith.constant 1.000000e+00 : f32
    %849 = vector.broadcast %cst_199 : f32 to vector<16x128xf32>
    %850 = arith.addf %849, %848 : vector<16x128xf32>
    %851 = arith.divf %849, %850 : vector<16x128xf32>
    %852 = vector.extract_strided_slice %831 {offsets = [0, 256], sizes = [16, 128], strides = [1, 1]} : vector<16x384xf32> to vector<16x128xf32>
    %853 = vector.extract_strided_slice %835 {offsets = [0, 256], sizes = [16, 128], strides = [1, 1]} : vector<16x384xf32> to vector<16x128xf32>
    %854 = arith.mulf %843, %853 : vector<16x128xf32>
    %855 = arith.addf %852, %854 : vector<16x128xf32>
    %856 = math.tanh %855 : vector<16x128xf32>
    %cst_200 = arith.constant 1.000000e+00 : f32
    %857 = vector.broadcast %cst_200 : f32 to vector<16x128xf32>
    %858 = arith.subf %857, %851 : vector<16x128xf32>
    %859 = arith.mulf %858, %856 : vector<16x128xf32>
    %860 = arith.mulf %851, %823 : vector<16x128xf32>
    %861 = arith.addf %859, %860 : vector<16x128xf32>
    %862 = arith.truncf %861 : vector<16x128xf32> to vector<16x128xbf16>
    %863 = arith.index_cast %828 : i32 to index
    %c0_201 = arith.constant 0 : index
    %864 = vector.load %arg21[%863, %c0_201] : memref<128x128xbf16, #tpu.memory_space<vmem>>, vector<16x128xbf16>
    tpu.vector_store %arg21[%863, %c0_201], %862 {strides = array<i32>} : memref<128x128xbf16, #tpu.memory_space<vmem>>, vector<16x128xbf16>,
    %c4_i32_202 = arith.constant 4 : i32
    %c16_i32_203 = arith.constant 16 : i32
    %865 = arith.muli %c4_i32_202, %c16_i32_203 : i32
    %866 = tpu.assume_multiple %865, 16 : i32
    %867 = arith.index_cast %866 : i32 to index
    %c0_204 = arith.constant 0 : index
    %868 = vector.load %arg20[%867, %c0_204] : memref<128x384xbf16, #tpu.memory_space<vmem>>, vector<16x384xbf16>
    %869 = arith.extf %868 : vector<16x384xbf16> to vector<16x384xf32>
    %870 = arith.truncf %861 : vector<16x128xf32> to vector<16x128xbf16>
    %cst_205 = arith.constant dense<0.000000e+00> : vector<16x384xf32>
    %871 = tpu.matmul %870, %711, %cst_205 {dimension_numbers = #tpu.dot_dimension_numbers<[1], [0], [0], [1], [0, 0, 1, 1], [], []>} : vector<16x128xbf16>, vector<128x384xbf16>, vector<16x384xf32> -> vector<16x384xf32>
    %872 = vector.broadcast %712 : vector<1x384xf32> to vector<16x384xf32>
    %873 = arith.addf %871, %872 : vector<16x384xf32>
    %874 = vector.extract_strided_slice %869 {offsets = [0, 0], sizes = [16, 128], strides = [1, 1]} : vector<16x384xf32> to vector<16x128xf32>
    %875 = vector.extract_strided_slice %873 {offsets = [0, 0], sizes = [16, 128], strides = [1, 1]} : vector<16x384xf32> to vector<16x128xf32>
    %876 = arith.addf %874, %875 : vector<16x128xf32>
    %877 = arith.negf %876 : vector<16x128xf32>
    %878 = math.exp %877 : vector<16x128xf32>
    %cst_206 = arith.constant 1.000000e+00 : f32
    %879 = vector.broadcast %cst_206 : f32 to vector<16x128xf32>
    %880 = arith.addf %879, %878 : vector<16x128xf32>
    %881 = arith.divf %879, %880 : vector<16x128xf32>
    %882 = vector.extract_strided_slice %869 {offsets = [0, 128], sizes = [16, 128], strides = [1, 1]} : vector<16x384xf32> to vector<16x128xf32>
    %883 = vector.extract_strided_slice %873 {offsets = [0, 128], sizes = [16, 128], strides = [1, 1]} : vector<16x384xf32> to vector<16x128xf32>
    %884 = arith.addf %882, %883 : vector<16x128xf32>
    %885 = arith.negf %884 : vector<16x128xf32>
    %886 = math.exp %885 : vector<16x128xf32>
    %cst_207 = arith.constant 1.000000e+00 : f32
    %887 = vector.broadcast %cst_207 : f32 to vector<16x128xf32>
    %888 = arith.addf %887, %886 : vector<16x128xf32>
    %889 = arith.divf %887, %888 : vector<16x128xf32>
    %890 = vector.extract_strided_slice %869 {offsets = [0, 256], sizes = [16, 128], strides = [1, 1]} : vector<16x384xf32> to vector<16x128xf32>
    %891 = vector.extract_strided_slice %873 {offsets = [0, 256], sizes = [16, 128], strides = [1, 1]} : vector<16x384xf32> to vector<16x128xf32>
    %892 = arith.mulf %881, %891 : vector<16x128xf32>
    %893 = arith.addf %890, %892 : vector<16x128xf32>
    %894 = math.tanh %893 : vector<16x128xf32>
    %cst_208 = arith.constant 1.000000e+00 : f32
    %895 = vector.broadcast %cst_208 : f32 to vector<16x128xf32>
    %896 = arith.subf %895, %889 : vector<16x128xf32>
    %897 = arith.mulf %896, %894 : vector<16x128xf32>
    %898 = arith.mulf %889, %861 : vector<16x128xf32>
    %899 = arith.addf %897, %898 : vector<16x128xf32>
    %900 = arith.truncf %899 : vector<16x128xf32> to vector<16x128xbf16>
    %901 = arith.index_cast %866 : i32 to index
    %c0_209 = arith.constant 0 : index
    %902 = vector.load %arg21[%901, %c0_209] : memref<128x128xbf16, #tpu.memory_space<vmem>>, vector<16x128xbf16>
    tpu.vector_store %arg21[%901, %c0_209], %900 {strides = array<i32>} : memref<128x128xbf16, #tpu.memory_space<vmem>>, vector<16x128xbf16>,
    %c5_i32_210 = arith.constant 5 : i32
    %c16_i32_211 = arith.constant 16 : i32
    %903 = arith.muli %c5_i32_210, %c16_i32_211 : i32
    %904 = tpu.assume_multiple %903, 16 : i32
    %905 = arith.index_cast %904 : i32 to index
    %c0_212 = arith.constant 0 : index
    %906 = vector.load %arg20[%905, %c0_212] : memref<128x384xbf16, #tpu.memory_space<vmem>>, vector<16x384xbf16>
    %907 = arith.extf %906 : vector<16x384xbf16> to vector<16x384xf32>
    %908 = arith.truncf %899 : vector<16x128xf32> to vector<16x128xbf16>
    %cst_213 = arith.constant dense<0.000000e+00> : vector<16x384xf32>
    %909 = tpu.matmul %908, %711, %cst_213 {dimension_numbers = #tpu.dot_dimension_numbers<[1], [0], [0], [1], [0, 0, 1, 1], [], []>} : vector<16x128xbf16>, vector<128x384xbf16>, vector<16x384xf32> -> vector<16x384xf32>
    %910 = vector.broadcast %712 : vector<1x384xf32> to vector<16x384xf32>
    %911 = arith.addf %909, %910 : vector<16x384xf32>
    %912 = vector.extract_strided_slice %907 {offsets = [0, 0], sizes = [16, 128], strides = [1, 1]} : vector<16x384xf32> to vector<16x128xf32>
    %913 = vector.extract_strided_slice %911 {offsets = [0, 0], sizes = [16, 128], strides = [1, 1]} : vector<16x384xf32> to vector<16x128xf32>
    %914 = arith.addf %912, %913 : vector<16x128xf32>
    %915 = arith.negf %914 : vector<16x128xf32>
    %916 = math.exp %915 : vector<16x128xf32>
    %cst_214 = arith.constant 1.000000e+00 : f32
    %917 = vector.broadcast %cst_214 : f32 to vector<16x128xf32>
    %918 = arith.addf %917, %916 : vector<16x128xf32>
    %919 = arith.divf %917, %918 : vector<16x128xf32>
    %920 = vector.extract_strided_slice %907 {offsets = [0, 128], sizes = [16, 128], strides = [1, 1]} : vector<16x384xf32> to vector<16x128xf32>
    %921 = vector.extract_strided_slice %911 {offsets = [0, 128], sizes = [16, 128], strides = [1, 1]} : vector<16x384xf32> to vector<16x128xf32>
    %922 = arith.addf %920, %921 : vector<16x128xf32>
    %923 = arith.negf %922 : vector<16x128xf32>
    %924 = math.exp %923 : vector<16x128xf32>
    %cst_215 = arith.constant 1.000000e+00 : f32
    %925 = vector.broadcast %cst_215 : f32 to vector<16x128xf32>
    %926 = arith.addf %925, %924 : vector<16x128xf32>
    %927 = arith.divf %925, %926 : vector<16x128xf32>
    %928 = vector.extract_strided_slice %907 {offsets = [0, 256], sizes = [16, 128], strides = [1, 1]} : vector<16x384xf32> to vector<16x128xf32>
    %929 = vector.extract_strided_slice %911 {offsets = [0, 256], sizes = [16, 128], strides = [1, 1]} : vector<16x384xf32> to vector<16x128xf32>
    %930 = arith.mulf %919, %929 : vector<16x128xf32>
    %931 = arith.addf %928, %930 : vector<16x128xf32>
    %932 = math.tanh %931 : vector<16x128xf32>
    %cst_216 = arith.constant 1.000000e+00 : f32
    %933 = vector.broadcast %cst_216 : f32 to vector<16x128xf32>
    %934 = arith.subf %933, %927 : vector<16x128xf32>
    %935 = arith.mulf %934, %932 : vector<16x128xf32>
    %936 = arith.mulf %927, %899 : vector<16x128xf32>
    %937 = arith.addf %935, %936 : vector<16x128xf32>
    %938 = arith.truncf %937 : vector<16x128xf32> to vector<16x128xbf16>
    %939 = arith.index_cast %904 : i32 to index
    %c0_217 = arith.constant 0 : index
    %940 = vector.load %arg21[%939, %c0_217] : memref<128x128xbf16, #tpu.memory_space<vmem>>, vector<16x128xbf16>
    tpu.vector_store %arg21[%939, %c0_217], %938 {strides = array<i32>} : memref<128x128xbf16, #tpu.memory_space<vmem>>, vector<16x128xbf16>,
    %c6_i32_218 = arith.constant 6 : i32
    %c16_i32_219 = arith.constant 16 : i32
    %941 = arith.muli %c6_i32_218, %c16_i32_219 : i32
    %942 = tpu.assume_multiple %941, 16 : i32
    %943 = arith.index_cast %942 : i32 to index
    %c0_220 = arith.constant 0 : index
    %944 = vector.load %arg20[%943, %c0_220] : memref<128x384xbf16, #tpu.memory_space<vmem>>, vector<16x384xbf16>
    %945 = arith.extf %944 : vector<16x384xbf16> to vector<16x384xf32>
    %946 = arith.truncf %937 : vector<16x128xf32> to vector<16x128xbf16>
    %cst_221 = arith.constant dense<0.000000e+00> : vector<16x384xf32>
    %947 = tpu.matmul %946, %711, %cst_221 {dimension_numbers = #tpu.dot_dimension_numbers<[1], [0], [0], [1], [0, 0, 1, 1], [], []>} : vector<16x128xbf16>, vector<128x384xbf16>, vector<16x384xf32> -> vector<16x384xf32>
    %948 = vector.broadcast %712 : vector<1x384xf32> to vector<16x384xf32>
    %949 = arith.addf %947, %948 : vector<16x384xf32>
    %950 = vector.extract_strided_slice %945 {offsets = [0, 0], sizes = [16, 128], strides = [1, 1]} : vector<16x384xf32> to vector<16x128xf32>
    %951 = vector.extract_strided_slice %949 {offsets = [0, 0], sizes = [16, 128], strides = [1, 1]} : vector<16x384xf32> to vector<16x128xf32>
    %952 = arith.addf %950, %951 : vector<16x128xf32>
    %953 = arith.negf %952 : vector<16x128xf32>
    %954 = math.exp %953 : vector<16x128xf32>
    %cst_222 = arith.constant 1.000000e+00 : f32
    %955 = vector.broadcast %cst_222 : f32 to vector<16x128xf32>
    %956 = arith.addf %955, %954 : vector<16x128xf32>
    %957 = arith.divf %955, %956 : vector<16x128xf32>
    %958 = vector.extract_strided_slice %945 {offsets = [0, 128], sizes = [16, 128], strides = [1, 1]} : vector<16x384xf32> to vector<16x128xf32>
    %959 = vector.extract_strided_slice %949 {offsets = [0, 128], sizes = [16, 128], strides = [1, 1]} : vector<16x384xf32> to vector<16x128xf32>
    %960 = arith.addf %958, %959 : vector<16x128xf32>
    %961 = arith.negf %960 : vector<16x128xf32>
    %962 = math.exp %961 : vector<16x128xf32>
    %cst_223 = arith.constant 1.000000e+00 : f32
    %963 = vector.broadcast %cst_223 : f32 to vector<16x128xf32>
    %964 = arith.addf %963, %962 : vector<16x128xf32>
    %965 = arith.divf %963, %964 : vector<16x128xf32>
    %966 = vector.extract_strided_slice %945 {offsets = [0, 256], sizes = [16, 128], strides = [1, 1]} : vector<16x384xf32> to vector<16x128xf32>
    %967 = vector.extract_strided_slice %949 {offsets = [0, 256], sizes = [16, 128], strides = [1, 1]} : vector<16x384xf32> to vector<16x128xf32>
    %968 = arith.mulf %957, %967 : vector<16x128xf32>
    %969 = arith.addf %966, %968 : vector<16x128xf32>
    %970 = math.tanh %969 : vector<16x128xf32>
    %cst_224 = arith.constant 1.000000e+00 : f32
    %971 = vector.broadcast %cst_224 : f32 to vector<16x128xf32>
    %972 = arith.subf %971, %965 : vector<16x128xf32>
    %973 = arith.mulf %972, %970 : vector<16x128xf32>
    %974 = arith.mulf %965, %937 : vector<16x128xf32>
    %975 = arith.addf %973, %974 : vector<16x128xf32>
    %976 = arith.truncf %975 : vector<16x128xf32> to vector<16x128xbf16>
    %977 = arith.index_cast %942 : i32 to index
    %c0_225 = arith.constant 0 : index
    %978 = vector.load %arg21[%977, %c0_225] : memref<128x128xbf16, #tpu.memory_space<vmem>>, vector<16x128xbf16>
    tpu.vector_store %arg21[%977, %c0_225], %976 {strides = array<i32>} : memref<128x128xbf16, #tpu.memory_space<vmem>>, vector<16x128xbf16>,
    %c7_i32_226 = arith.constant 7 : i32
    %c16_i32_227 = arith.constant 16 : i32
    %979 = arith.muli %c7_i32_226, %c16_i32_227 : i32
    %980 = tpu.assume_multiple %979, 16 : i32
    %981 = arith.index_cast %980 : i32 to index
    %c0_228 = arith.constant 0 : index
    %982 = vector.load %arg20[%981, %c0_228] : memref<128x384xbf16, #tpu.memory_space<vmem>>, vector<16x384xbf16>
    %983 = arith.extf %982 : vector<16x384xbf16> to vector<16x384xf32>
    %984 = arith.truncf %975 : vector<16x128xf32> to vector<16x128xbf16>
    %cst_229 = arith.constant dense<0.000000e+00> : vector<16x384xf32>
    %985 = tpu.matmul %984, %711, %cst_229 {dimension_numbers = #tpu.dot_dimension_numbers<[1], [0], [0], [1], [0, 0, 1, 1], [], []>} : vector<16x128xbf16>, vector<128x384xbf16>, vector<16x384xf32> -> vector<16x384xf32>
    %986 = vector.broadcast %712 : vector<1x384xf32> to vector<16x384xf32>
    %987 = arith.addf %985, %986 : vector<16x384xf32>
    %988 = vector.extract_strided_slice %983 {offsets = [0, 0], sizes = [16, 128], strides = [1, 1]} : vector<16x384xf32> to vector<16x128xf32>
    %989 = vector.extract_strided_slice %987 {offsets = [0, 0], sizes = [16, 128], strides = [1, 1]} : vector<16x384xf32> to vector<16x128xf32>
    %990 = arith.addf %988, %989 : vector<16x128xf32>
    %991 = arith.negf %990 : vector<16x128xf32>
    %992 = math.exp %991 : vector<16x128xf32>
    %cst_230 = arith.constant 1.000000e+00 : f32
    %993 = vector.broadcast %cst_230 : f32 to vector<16x128xf32>
    %994 = arith.addf %993, %992 : vector<16x128xf32>
    %995 = arith.divf %993, %994 : vector<16x128xf32>
    %996 = vector.extract_strided_slice %983 {offsets = [0, 128], sizes = [16, 128], strides = [1, 1]} : vector<16x384xf32> to vector<16x128xf32>
    %997 = vector.extract_strided_slice %987 {offsets = [0, 128], sizes = [16, 128], strides = [1, 1]} : vector<16x384xf32> to vector<16x128xf32>
    %998 = arith.addf %996, %997 : vector<16x128xf32>
    %999 = arith.negf %998 : vector<16x128xf32>
    %1000 = math.exp %999 : vector<16x128xf32>
    %cst_231 = arith.constant 1.000000e+00 : f32
    %1001 = vector.broadcast %cst_231 : f32 to vector<16x128xf32>
    %1002 = arith.addf %1001, %1000 : vector<16x128xf32>
    %1003 = arith.divf %1001, %1002 : vector<16x128xf32>
    %1004 = vector.extract_strided_slice %983 {offsets = [0, 256], sizes = [16, 128], strides = [1, 1]} : vector<16x384xf32> to vector<16x128xf32>
    %1005 = vector.extract_strided_slice %987 {offsets = [0, 256], sizes = [16, 128], strides = [1, 1]} : vector<16x384xf32> to vector<16x128xf32>
    %1006 = arith.mulf %995, %1005 : vector<16x128xf32>
    %1007 = arith.addf %1004, %1006 : vector<16x128xf32>
    %1008 = math.tanh %1007 : vector<16x128xf32>
    %cst_232 = arith.constant 1.000000e+00 : f32
    %1009 = vector.broadcast %cst_232 : f32 to vector<16x128xf32>
    %1010 = arith.subf %1009, %1003 : vector<16x128xf32>
    %1011 = arith.mulf %1010, %1008 : vector<16x128xf32>
    %1012 = arith.mulf %1003, %975 : vector<16x128xf32>
    %1013 = arith.addf %1011, %1012 : vector<16x128xf32>
    %1014 = arith.truncf %1013 : vector<16x128xf32> to vector<16x128xbf16>
    %1015 = arith.index_cast %980 : i32 to index
    %c0_233 = arith.constant 0 : index
    %1016 = vector.load %arg21[%1015, %c0_233] : memref<128x128xbf16, #tpu.memory_space<vmem>>, vector<16x128xbf16>
    tpu.vector_store %arg21[%1015, %c0_233], %1014 {strides = array<i32>} : memref<128x128xbf16, #tpu.memory_space<vmem>>, vector<16x128xbf16>,
    %c8_i32_234 = arith.constant 8 : i32
    %c0_235 = arith.constant 0 : index
    %c0_236 = arith.constant 0 : index
    %1017 = vector.load %arg21[%c0_235, %c0_236] : memref<128x128xbf16, #tpu.memory_space<vmem>>, vector<128x128xbf16>
    %c0_237 = arith.constant 0 : index
    %c0_238 = arith.constant 0 : index
    %1018 = vector.load %arg16[%c0_237, %c0_238] : memref<128x128xbf16, #tpu.memory_space<vmem>>, vector<128x128xbf16>
    %cst_239 = arith.constant dense<0.000000e+00> : vector<128x128xf32>
    %1019 = tpu.matmul %1017, %1018, %cst_239 {dimension_numbers = #tpu.dot_dimension_numbers<[1], [0], [0], [1], [0, 0, 1, 1], [], []>} : vector<128x128xbf16>, vector<128x128xbf16>, vector<128x128xf32> -> vector<128x128xf32>
    %c0_240 = arith.constant 0 : index
    %c0_241 = arith.constant 0 : index
    %1020 = vector.load %arg17[%c0_240, %c0_241] : memref<1x128xf32, #tpu.memory_space<vmem>>, vector<1x128xf32>
    %1021 = vector.broadcast %1020 : vector<1x128xf32> to vector<128x128xf32>
    %1022 = arith.addf %1019, %1021 : vector<128x128xf32>
    %cst_242 = arith.constant dense<0xFF800000> : vector<128xf32>
    %1023 = vector.multi_reduction <maximumf>, %1022, %cst_242 [1] : vector<128x128xf32> to vector<128xf32>
    %1024 = vector.shape_cast %1023 : vector<128xf32> to vector<128x1xf32>
    %1025 = vector.broadcast %1024 : vector<128x1xf32> to vector<128x128xf32>
    %1026 = arith.subf %1022, %1025 : vector<128x128xf32>
    %1027 = math.exp %1026 : vector<128x128xf32>
    %cst_243 = arith.constant dense<0.000000e+00> : vector<128xf32>
    %1028 = vector.multi_reduction <add>, %1027, %cst_243 [1] : vector<128x128xf32> to vector<128xf32>
    %1029 = vector.shape_cast %1028 : vector<128xf32> to vector<128x1xf32>
    %1030 = math.log %1029 : vector<128x1xf32>
    %1031 = arith.addf %1024, %1030 : vector<128x1xf32>
    %c0_244 = arith.constant 0 : index
    %c0_245 = arith.constant 0 : index
    %1032 = vector.load %arg11[%c0_244, %c0_245] : memref<128x1xi32, #tpu.memory_space<vmem>>, vector<128x1xi32>
    %1033 = tpu.iota {dimensions = array<i32: 1>} : vector<128x128xi32>
    %1034 = vector.broadcast %1032 : vector<128x1xi32> to vector<128x128xi32>
    %1035 = arith.cmpi eq, %1033, %1034 : vector<128x128xi32>
    %cst_246 = arith.constant 0.000000e+00 : f32
    %1036 = vector.broadcast %cst_246 : f32 to vector<128x128xf32>
    %1037 = arith.select %1035, %1022, %1036 : vector<128x128xi1>, vector<128x128xf32>
    %cst_247 = arith.constant dense<0.000000e+00> : vector<128xf32>
    %1038 = vector.multi_reduction <add>, %1037, %cst_247 [1] : vector<128x128xf32> to vector<128xf32>
    %1039 = vector.shape_cast %1038 : vector<128xf32> to vector<128x1xf32>
    %c0_i32_248 = arith.constant 0 : i32
    %1040 = vector.broadcast %c0_i32_248 : i32 to vector<128x1xi32>
    %1041 = arith.cmpi ne, %1032, %1040 : vector<128x1xi32>
    %1042 = arith.extui %1041 : vector<128x1xi1> to vector<128x1xi32>
    %1043 = arith.sitofp %1042 : vector<128x1xi32> to vector<128x1xf32>
    %1044 = arith.subf %1031, %1039 : vector<128x1xf32>
    %1045 = arith.mulf %1044, %1043 : vector<128x1xf32>
    %1046 = vector.shape_cast %1045 : vector<128x1xf32> to vector<1x128x1xf32>
    %cst_249 = arith.constant dense<0.000000e+00> : vector<1xf32>
    %1047 = vector.multi_reduction <add>, %1046, %cst_249 [1, 2] : vector<1x128x1xf32> to vector<1xf32>
    %1048 = vector.shape_cast %1047 : vector<1xf32> to vector<1x1x1xf32>
    %1049 = vector.extract %1048[0, 0, 0] : f32 from vector<1x1x1xf32>
    %1050 = vector.broadcast %1049 : f32 to vector<1x1xf32>
    %cst_250 = arith.constant 2.000000e+00 : f32
    %1051 = vector.broadcast %cst_250 : f32 to vector<1x1xf32>
    %1052 = arith.divf %1050, %1051 : vector<1x1xf32>
    %c0_251 = arith.constant 0 : index
    %c0_252 = arith.constant 0 : index
    %1053 = vector.load %arg18[%c0_251, %c0_252] : memref<1x1xf32, #tpu.memory_space<vmem>>, vector<1x1xf32>
    tpu.vector_store %arg18[%c0_251, %c0_252], %1052 {strides = array<i32>} : memref<1x1xf32, #tpu.memory_space<vmem>>, vector<1x1xf32>,
    return
  }
}

</mosaic_0001>

<bundles_post_ra>
// kernel: tpu_custom_call.1
= control target key start
LH: loop header
LB: loop body
LE: loop exit
PB: predicated region body
PF: predicated region fallthrough
CT: control target
= control target key end

     0   :  { %s12160_s0 = inlined_call_operand.vmem [shape: bf16[128,32], index: 0, kind: input, shape index: {}]   ;;  %s12161_s1 = inlined_call_operand.vmem [shape: f32[128,1], index: 1, kind: input, shape index: {}]   ;;  %s12162_s2 = inlined_call_operand.hbm [shape: bf16[32,768], index: 2, kind: input, shape index: {}]   ;;  %s12163_s3 = inlined_call_operand.hbm [shape: f32[1,768], index: 3, kind: input, shape index: {}]   ;;  %s12164_s4 = inlined_call_operand.vmem [shape: bf16[128,384], index: 4, kind: input, shape index: {}]   ;;  %s12165_s5 = inlined_call_operand.hbm [shape: f32[1,384], index: 5, kind: input, shape index: {}]   ;;  %s12166_s6 = inlined_call_operand.vmem [shape: bf16[128,384], index: 6, kind: input, shape index: {}]   ;;  %s12167_s7 = inlined_call_operand.hbm [shape: f32[1,384], index: 7, kind: input, shape index: {}]   ;;  %s12168_s8 = inlined_call_operand.hbm [shape: bf16[256,128], index: 8, kind: input, shape index: {}]   ;;  %s12169_s9 = inlined_call_operand.vmem [shape: f32[1,128], index: 9, kind: input, shape index: {}]   ;;  %s12170_s10 = inlined_call_operand.vmem [shape: bf16[128,32], index: 10, kind: input, shape index: {}]   ;;  %s12171_s11 = inlined_call_operand.vmem [shape: s32[128,1], index: 11, kind: input, shape index: {}]   ;;  %s12172_s12 = inlined_call_operand.vmem [shape: bf16[32,384], index: 12, kind: input, shape index: {}]   ;;  %s12173_s13 = inlined_call_operand.vmem [shape: f32[1,384], index: 13, kind: input, shape index: {}]   ;;  %s12174_s14 = inlined_call_operand.hbm [shape: bf16[128,384], index: 14, kind: input, shape index: {}]   ;;  %s12175_s15 = inlined_call_operand.vmem [shape: f32[1,384], index: 15, kind: input, shape index: {}]   ;;  %s12176_s16 = inlined_call_operand.hbm [shape: bf16[128,128], index: 16, kind: input, shape index: {}]   ;;  %s12177_s17 = inlined_call_operand.vmem [shape: f32[1,128], index: 17, kind: input, shape index: {}]   ;;  %s12178_s18 = inlined_call_operand.hbm [shape: f32[1,1], index: 18, kind: output, shape index: {}]  }
   0x1   :  { %12277 = sst [smem:[#allocation57_spill]] %s12160_s0 }
   0x2   :  { %12278 = sst [smem:[#allocation58_spill]] %s12161_s1 }
   0x3   :  { %12279 = sst [smem:[#allocation59_spill]] %s12162_s2 }
   0x4   :  { %23 = vsyncpa [#allocation6], 0 }
   0x5   :  { %24 = vsyncpa [#allocation9], 0 }
   0x6   :  { %25 = vsyncpa [#allocation12], 0 }
   0x7   :  { %26 = vsyncpa [#allocation15], 0 }
   0x8   :  { %27 = vsyncpa [#allocation7], 0  ;;  %s8986_s27 = smov [#allocation8]   ;;  %s8987_s29 = smov [#allocation11]  }
   0x9   :  { %s50_s28 = sshll.u32 %s8986_s27, 4  ;;  %s74_s30 = sshll.u32 %s8987_s29, 4  ;;  %s51_s28 = int_to_ptr.vmem [resolvable:$true] %s50_s28  ;;  %s75_s30 = int_to_ptr.vmem [resolvable:$true] %s74_s30 }
   0xa   :  { %s8824_s0 = scalar_lea.vmem %s51_s28, 96  ;;  %p8829_p1 = scmp.lt.s32.totalorder %s51_s28, %s51_s28 }
   0xb   :  { %p8825_p0 = scmp.ne.s32.totalorder %s51_s28, %s8824_s0  ;;  %p8830_p2 = scmp.lt.s32.totalorder %s8824_s0, %s8824_s0 }
   0xd   :  { %p8831_p3 = por %p8830_p2, %p8829_p1 }
   0xf   :  { %p8832_p4 = pnand %p8831_p3, %p8825_p0 }
  0x11   :  { %8835 = shalt.err (!%p8832_p4)
}
  0x12   :  { %53 = dma.hbm_to_vmem [thread:$0]  %s12163_s3, 96, %s51_s28, [#allocation9]  }
  0x13   :  { %s8844_s20 = scalar_lea.vmem %s75_s30, 48  ;;  %s8848_s21 = scalar_lea.vmem %s75_s30, 64 }
  0x14   :  { %p8845_p5 = scmp.ne.s32.totalorder %s75_s30, %s8844_s20  ;;  %p8849_p6 = scmp.lt.s32.totalorder %s75_s30, %s75_s30 }
  0x15   :  { %p8850_p7 = scmp.lt.s32.totalorder %s8848_s21, %s8844_s20 }
  0x17   :  { %p8851_p8 = por %p8850_p7, %p8849_p6 }
  0x19   :  { %p8852_p9 = pnand %p8851_p8, %p8845_p5 }
  0x1b   :  { %8855 = shalt.err (!%p8852_p9)
}
  0x1c   :  { %77 = dma.hbm_to_vmem [thread:$0]  %s12167_s7, 48, %s75_s30, [#allocation12]  }
  0x1d   :  { %s8988_s23 = smov [#allocation14]  }
  0x1e   :  { %s105_s24 = sshll.u32 %s8988_s23, 4  ;;  %s106_s24 = int_to_ptr.vmem [resolvable:$true] %s105_s24 }
  0x1f   :  { %s8864_s25 = scalar_lea.vmem %s106_s24, 3072  ;;  %p8869_p11 = scmp.lt.s32.totalorder %s106_s24, %s106_s24 }
  0x20   :  { %p8865_p10 = scmp.ne.s32.totalorder %s106_s24, %s8864_s25  ;;  %p8870_p12 = scmp.lt.s32.totalorder %s8864_s25, %s8864_s25 }
  0x22   :  { %p8871_p13 = por %p8870_p12, %p8869_p11 }
  0x24   :  { %p8872_p0 = pnand %p8871_p13, %p8865_p10 }
  0x26   :  { %8875 = shalt.err (!%p8872_p0)
}
  0x27   :  { %s8989_s3 = smov 192   ;;  %s8990_s26 = smov 12  }
  0x28   :  { %111 = dma.hbm_to_vmem [thread:$0]  %s12174_s14, 3072, %s106_s24, [#allocation15], %s8989_s3, %s8989_s3, %s8990_s26  }
  0x29   :  { %s8991_s29 = smov [#allocation5]  }
  0x2a   :  { %s37_s0 = sshll.u32 %s8991_s29, 4  ;;  %s38_s0 = int_to_ptr.vmem [resolvable:$true] %s37_s0 }
  0x2b   :  { %s8884_s7 = scalar_lea.vmem %s38_s0, 1536  ;;  %p8889_p2 = scmp.lt.s32.totalorder %s38_s0, %s38_s0 }
  0x2c   :  { %p8885_p1 = scmp.ne.s32.totalorder %s38_s0, %s8884_s7  ;;  %p8890_p3 = scmp.lt.s32.totalorder %s8884_s7, %s8884_s7 }
  0x2e   :  { %p8891_p4 = por %p8890_p3, %p8889_p2 }
  0x30   :  { %p8892_p5 = pnand %p8891_p4, %p8885_p1 }
  0x32   :  { %8895 = shalt.err (!%p8892_p5)
}
  0x33   :  { %s8992_s30 = smov 384   ;;  %s8993_s19 = smov 24  }
  0x34   :  { %s12280_s21 = sld [smem:[#allocation59_spill]]  ;;  %s8994_s22 = smov [#allocation10]  }
  0x35   :  { %s62_s2 = sshll.u32 %s8994_s22, 4  ;;  %s8995_s23 = smov [#allocation13]   ;;  %s63_s2 = int_to_ptr.vmem [resolvable:$true] %s62_s2 }
  0x36   :  { %s83_s14 = sshll.u32 %s8995_s23, 4  ;;  %s8904_s24 = scalar_lea.vmem %s63_s2, 48  ;;  %s84_s14 = int_to_ptr.vmem [resolvable:$true] %s83_s14 }
  0x37   :  { %p8905_p6 = scmp.ne.s32.totalorder %s63_s2, %s8904_s24  ;;  %s8908_s25 = scalar_lea.vmem %s63_s2, 64 }
  0x38   :  { %p8909_p7 = scmp.lt.s32.totalorder %s63_s2, %s63_s2  ;;  %p8910_p8 = scmp.lt.s32.totalorder %s8908_s25, %s8904_s24 }
  0x3a   :  { %43 = dma.hbm_to_vmem [thread:$0]  %s12280_s21, 1536, %s38_s0, [#allocation6], %s8992_s30, %s8992_s30, %s8993_s19  }
  0x3b   :  { %p8911_p9 = por %p8910_p8, %p8909_p7 }
  0x3d   :  { %p8912_p10 = pnand %p8911_p9, %p8905_p6 }
  0x3f   :  { %8915 = shalt.err (!%p8912_p10)
}
  0x40   :  { %65 = dma.hbm_to_vmem [thread:$0]  %s12165_s5, 48, %s63_s2, [#allocation9]  }
  0x41   :  { %s8924_s27 = scalar_lea.vmem %s84_s14, 2048  ;;  %p8929_p12 = scmp.lt.s32.totalorder %s84_s14, %s84_s14 }
  0x42   :  { %p8925_p11 = scmp.ne.s32.totalorder %s84_s14, %s8924_s27  ;;  %p8930_p13 = scmp.lt.s32.totalorder %s8924_s27, %s8924_s27 }
  0x44   :  { %p8931_p0 = por %p8930_p13, %p8929_p12 }
  0x46   :  { %p8932_p1 = pnand %p8931_p0, %p8925_p11 }
  0x48   :  { %8935 = shalt.err (!%p8932_p1)
}
  0x49   :  { %s8996_s28 = smov 64   ;;  %s8997_s29 = smov 4  }
  0x4a   :  { %89 = dma.hbm_to_vmem [thread:$0]  %s12168_s8, 2048, %s84_s14, [#allocation12], %s8996_s28, %s8996_s28, %s8997_s29  }
  0x4b   :  { %s8998_s30 = smov [#allocation16]  }
  0x4c   :  { %s119_s19 = sshll.u32 %s8998_s30, 4  ;;  %s120_s19 = int_to_ptr.vmem [resolvable:$true] %s119_s19 }
  0x4d   :  { %s8944_s1 = scalar_lea.vmem %s120_s19, 1024  ;;  %p8949_p3 = scmp.lt.s32.totalorder %s120_s19, %s120_s19 }
  0x4e   :  { %p8945_p2 = scmp.ne.s32.totalorder %s120_s19, %s8944_s1  ;;  %p8950_p4 = scmp.lt.s32.totalorder %s8944_s1, %s8944_s1 }
  0x50   :  { %p8951_p5 = por %p8950_p4, %p8949_p3 }
  0x52   :  { %p8952_p6 = pnand %p8951_p5, %p8945_p2 }
  0x54   :  { %8955 = shalt.err (!%p8952_p6)
}
  0x55   :  { %125 = dma.hbm_to_vmem [thread:$0]  %s12176_s16, 1024, %s120_s19, [#allocation15], %s8996_s28, %s8996_s28, %s8997_s29  }
  0x56   :  { %8976 = dma.done.wait [#allocation6], 1536  }
  0x57   :  { %8977 = vsyncadd [#allocation6], 4294965760 }
  0x58   :  { %8978 = dma.done.wait [#allocation9], 144  }
  0x59   :  { %8979 = vsyncadd [#allocation9], 4294967152 }
  0x5a   :  { %8980 = dma.done.wait [#allocation12], 2096  }
  0x5b   :  { %8981 = vsyncadd [#allocation12], 4294965200 }
  0x5c   :  { %8982 = dma.done.wait [#allocation15], 4096  }
  0x5d   :  { %8983 = vsyncadd [#allocation15], 4294963200  ;;  %v12182_v0 = vmov 0   ;;  %v7953_v1 = vld [vmem:[#allocation5 + $0x34] ss:$24 sps:$4 sm:$0xff]   ;;  %s12281_s21 = sld [smem:[#allocation57_spill]] }
  0x5e   :  { %367 = vmatprep.mubr.bf16.mxu0 %v12182_v0  ;;  %490 = vmatprep.mubr.bf16.mxu1 %v12182_v0  ;;  %v7955_v2 = vld [vmem:[#allocation5 + $0x3c] ss:$24 sps:$4 sm:$0xff]   ;;  %v7957_v3 = vld [vmem:[#allocation5 + $0x30] ss:$24 sps:$4 sm:$0xff]   ;;  %v7961_v6 = vld [vmem:[#allocation5 + $0xc] ss:$24 sps:$4 sm:$0xff]  }
  0x5f   :  { %7951 = vset.pattern.permute.xlu0 %v12182_v0  ;;  %7952 = vset.pattern.permute.xlu1 %v12182_v0  ;;  %v7958_v4 = vld [vmem:[#allocation5 + $0x38] ss:$24 sps:$4 sm:$0xff]   ;;  %v7959_v5 = vld [vmem:[#allocation5 + $0x4] ss:$24 sps:$4 sm:$0xff]   ;;  %v7964_v8 = vld [vmem:[#allocation5 + $0x8] ss:$24 sps:$4 sm:$0xff]  }
  0x60   :  { %347 = vmatprep.subr.bf16.mxu0 %v7953_v1  ;;  %7928 = vmatprep.subr.bf16.mxu1 %v7955_v2  ;;  %v7963_v7 = vld [vmem:[#allocation5] ss:$24 sps:$4 sm:$0xff]   ;;  %vm310_vm0 = vcmask 261120   ;;  %v9140_v11 = vld [vmem:[%s12164_s4 + $0xac] ss:$12 sps:$4 sm:$0xff]   ;;  %v12206_v32 = vmov 0.0  }
  0x61   :  { %348 = vmatpush1.bf16.msra.mxu0 %v7957_v3  ;;  %7930 = vmatpush1.bf16.msra.mxu1 %v7958_v4  ;;  %v9145_v12 = vld [vmem:[%s12164_s4 + $0xa8] ss:$12 sps:$4 sm:$0xff]   ;;  %v9159_v14 = vld [vmem:[%s12164_s4 + $0x90] ss:$12 sps:$4 sm:$0xff]   ;;  %v9176_v17 = vld [vmem:[%s12164_s4 + $0x78] ss:$12 sps:$4 sm:$0xff]  }
  0x62   :  { %349 = vmatprep.subr.bf16.mxu0 %v7959_v5  ;;  %7929 = vmatprep.subr.bf16.mxu1 %v7961_v6  ;;  %v9151_v13 = vld [vmem:[%s12164_s4 + $0x94] ss:$12 sps:$4 sm:$0xff]   ;;  %v9170_v16 = vld [vmem:[%s12164_s4 + $0x7c] ss:$12 sps:$4 sm:$0xff]   ;;  %v9185_v18 = vld [vmem:[%s12164_s4 + $0x64] ss:$12 sps:$4 sm:$0xff]  }
  0x63   :  { %v9126_v9 = vld [vmem:[%s12281_s21] sm:$0xff]   ;;  %v9131_v10 = vld [vmem:[%s12281_s21 + $0x8] sm:$0xff]   ;;  %v9164_v15 = vld [vmem:[%s12281_s21 + $0x10] sm:$0xff]   ;;  %s12282_s3 = sld [smem:[#allocation58_spill]]  ;;  %vm9001_vm3 = vmmov 0  }
  0x64   :  { %v9194_v19 = vld [vmem:[%s12164_s4 + $0x60] ss:$12 sps:$4 sm:$0xff]   ;;  %v9199_v20 = vld [vmem:[%s12281_s21 + $0x18] sm:$0xff]   ;;  %v9210_v22 = vld [vmem:[%s12164_s4 + $0x48] ss:$12 sps:$4 sm:$0xff]  }
  0x65   :  { %350 = vmatpush1.bf16.msra.mxu0 %v7963_v7  ;;  %7931 = vmatpush1.bf16.msra.mxu1 %v7964_v8  ;;  %v9205_v21 = vld [vmem:[%s12164_s4 + $0x4c] ss:$12 sps:$4 sm:$0xff]   ;;  %v9216_v23 = vld [vmem:[%s12164_s4 + $0x34] ss:$12 sps:$4 sm:$0xff]   ;;  %v9229_v25 = vld [vmem:[%s12164_s4 + $0x30] ss:$12 sps:$4 sm:$0xff]  }
  0x66   :  { %460 = vmatprep.subr.bf16.mxu0 %v7955_v2  ;;  %1237 = vmatprep.subr.bf16.mxu1 %v9140_v11  ;;  %v8001_v24 = vld [vmem:[#allocation5 + $0x44] ss:$24 sps:$4 sm:$0xff]   ;;  %v9234_v26 = vld [vmem:[%s12281_s21 + $0x20] sm:$0xff]   ;;  %v9240_v27 = vld [vmem:[%s12164_s4 + $0x1c] ss:$12 sps:$4 sm:$0xff]  }
  0x67   :  { %v9246_v28 = vld [vmem:[%s12164_s4 + $0x18] ss:$12 sps:$4 sm:$0xff]   ;;  %v9264_v30 = vld [vmem:[%s12164_s4] ss:$12 sps:$4 sm:$0xff]   ;;  %v9283_v33 = vld [vmem:[%s12281_s21 + $0x30] sm:$0xff]  }
  0x68   :  { %6566 = vmatmul.mubr.msk.bf16.vlgmr.msra.gmra.mxu0 %vm310_vm0, %v9126_v9  ;;  %6575 = vmatmul.mubr.msk.bf16.vlgmr.msra.gmra.mxu1 %vm310_vm0, %v9131_v10  ;;  %v9255_v29 = vld [vmem:[%s12164_s4 + $0x4] ss:$12 sps:$4 sm:$0xff]   ;;  %v9269_v31 = vld [vmem:[%s12281_s21 + $0x28] sm:$0xff]   ;;  %v9300_v36 = vld [vmem:[%s12281_s21 + $0x38] sm:$0xff]  }
  0x69   :  { %461 = vmatpush1.bf16.msra.mxu0 %v7958_v4  ;;  %377 = vmatprep.mubr.bf16.mxu0 %v12182_v0  ;;  %v1089_v34 = vld [vmem:[%s12282_s3] sm:$0xff]  ;;  %v1090_v35 = vld [vmem:[%s12282_s3 + $0x8] sm:$0xff]  ;;  %v9313_v39 = vld [vmem:[%s12164_s4 + $0xb0] ss:$12 sps:$4 sm:$0xff]  }
  0x6a   :  { %500 = vmatprep.mubr.bf16.mxu1 %v12182_v0  ;;  %1238 = vmatpush1.bf16.msra.mxu1 %v9145_v12  ;;  %vm1091_vm1 = vcmp.gt.f32.partialorder %v1089_v34, 0.0  ;;  %vm1092_vm2 = vcmp.gt.f32.partialorder %v1090_v35, 0.0  ;;  %v9318_v40 = vld [vmem:[%s12164_s4 + $0x98] ss:$12 sps:$4 sm:$0xff]   ;;  %v7999_v41 = vld [vmem:[#allocation5 + $0x40] ss:$24 sps:$4 sm:$0xff]  }
  0x6b   :  { %462 = vmatprep.subr.bf16.mxu0 %v7961_v6  ;;  %1239 = vmatprep.subr.bf16.mxu1 %v9151_v13  ;;  %v1363_v37 = vsel %vm1091_vm1, 1, %v12182_v0  ;;  %v1364_v38 = vsel %vm1092_vm2, 1, %v12182_v0  ;;  %v9331_v42 = vld [vmem:[%s12164_s4 + $0x80] ss:$12 sps:$4 sm:$0xff]   ;;  %v8005_v43 = vld [vmem:[#allocation5 + $0x14] ss:$24 sps:$4 sm:$0xff]  }
  0x6c   :  { %1366 = vperm.xlu0 %7951, %v1363_v37   ;;  %v8003_v44 = vld [vmem:[#allocation5 + $0x10] ss:$24 sps:$4 sm:$0xff]   ;;  %v9338_v45 = vld [vmem:[%s12164_s4 + $0x68] ss:$12 sps:$4 sm:$0xff]   ;;  %v9357_v49 = vld [vmem:[%s12164_s4 + $0x50] ss:$12 sps:$4 sm:$0xff]  }
  0x6d   :  { %463 = vmatpush1.bf16.msra.mxu0 %v7964_v8  ;;  %v6696_v46 = vld [vmem:[%s12282_s3 + $0x10] sm:$0xff]  ;;  %v9348_v47 = vld [vmem:[%s12166_s6 + $0xac] ss:$12 sps:$4 sm:$0xff]   ;;  %v6708_v50 = vld [vmem:[%s12282_s3 + $0x60] sm:$0xff] }
  0x6e   :  { %1240 = vmatpush1.bf16.msra.mxu1 %v9159_v14  ;;  %573 = vmatprep.subr.bf16.mxu0 %v8001_v24  ;;  %vm1691_vm4 = vcmp.gt.f32.partialorder %v6696_v46, 0.0  ;;  %v8011_v51 = vld [vmem:[%s12166_s6 + $0xa8] ss:$12 sps:$4 sm:$0xff]   ;;  %vm1848_vm5 = vcmp.gt.f32.partialorder %v6708_v50, 0.0  ;;  %v9375_v54 = vld [vmem:[%s12164_s4 + $0x38] ss:$12 sps:$4 sm:$0xff]  }
  0x6f   :  { %1241 = vmatprep.subr.bf16.mxu1 %v9170_v16  ;;  %v1820_v48 = vsel %vm1691_vm4, 1, %v12182_v0  ;;  %v8013_v52 = vld [vmem:[%s12166_s6 + $0x94] ss:$12 sps:$4 sm:$0xff]   ;;  %v1977_v53 = vsel %vm1848_vm5, 1, %v12182_v0  ;;  %v8016_v56 = vld [vmem:[%s12166_s6 + $0x90] ss:$12 sps:$4 sm:$0xff]  }
  0x70   :  { %6567 = vmatmul.mubr.msk.bf16.gmra.mxu0 %vm310_vm0, %v9131_v10  ;;  %6576 = vmatmul.mubr.msk.bf16.gmra.mxu1 %vm310_vm0, %v9164_v15  ;;  %v6720_v55 = vld [vmem:[%s12282_s3 + $0x20] sm:$0xff]  ;;  %v8017_v57 = vld [vmem:[%s12166_s6 + $0x7c] ss:$12 sps:$4 sm:$0xff]   ;;  %v6726_v60 = vld [vmem:[%s12282_s3 + $0x50] sm:$0xff] }
  0x71   :  { %387 = vmatprep.mubr.bf16.mxu0 %v12182_v0  ;;  %510 = vmatprep.mubr.bf16.mxu1 %v12182_v0  ;;  %vm2005_vm6 = vcmp.gt.f32.partialorder %v6720_v55, 0.0  ;;  %v9395_v59 = vld [vmem:[%s12164_s4 + $0x20] ss:$12 sps:$4 sm:$0xff]   ;;  %v8019_v61 = vld [vmem:[%s12166_s6 + $0x78] ss:$12 sps:$4 sm:$0xff]   ;;  %vm2162_vm7 = vcmp.gt.f32.partialorder %v6726_v60, 0.0 }
  0x72   :  { %1242 = vmatpush1.bf16.msra.mxu1 %v9176_v17  ;;  %1369 = vperm.xlu0 %7951, %v1364_v38   ;;  %v2134_v58 = vsel %vm2005_vm6, 1, %v12182_v0  ;;  %v8020_v62 = vld [vmem:[%s12166_s6 + $0x64] ss:$12 sps:$4 sm:$0xff]   ;;  %v2291_v63 = vsel %vm2162_vm7, 1, %v12182_v0  ;;  %v9412_v1 = vld [vmem:[%s12164_s4 + $0x8] ss:$12 sps:$4 sm:$0xff]  }
  0x73   :  { %1243 = vmatprep.subr.bf16.mxu1 %v9185_v18  ;;  %v6732_v2 = vld [vmem:[%s12282_s3 + $0x30] sm:$0xff]  ;;  %v8022_v4 = vld [vmem:[%s12166_s6 + $0x60] ss:$12 sps:$4 sm:$0xff]   ;;  %v6667_v34 = vld [vmem:[%s12282_s3 + $0x78] sm:$0xff] }
  0x74   :  { %vm2319_vm8 = vcmp.gt.f32.partialorder %v6732_v2, 0.0  ;;  %v6666_v5 = vld [vmem:[%s12282_s3 + $0x70] sm:$0xff]  ;;  %v8023_v6 = vld [vmem:[%s12166_s6 + $0x4c] ss:$12 sps:$4 sm:$0xff]   ;;  %v6738_v7 = vld [vmem:[%s12282_s3 + $0x40] sm:$0xff]  ;;  %vm1392_vm11 = vcmp.gt.f32.partialorder %v6667_v34, 0.0 }
  0x75   :  { %v2448_v3 = vsel %vm2319_vm8, 1, %v12182_v0  ;;  %vm1391_vm9 = vcmp.gt.f32.partialorder %v6666_v5, 0.0  ;;  %vm2476_vm10 = vcmp.gt.f32.partialorder %v6738_v7, 0.0  ;;  %v8025_v24 = vld [vmem:[%s12166_s6 + $0x48] ss:$12 sps:$4 sm:$0xff]   ;;  %v1664_v38 = vsel %vm1392_vm11, 1, %v12182_v0 }
  0x76   :  { %1244 = vmatpush1.bf16.msra.mxu1 %v9194_v19  ;;  %1823 = vperm.xlu0 %7951, %v1820_v48   ;;  %v1663_v8 = vsel %vm1391_vm9, 1, %v12182_v0  ;;  %v8026_v35 = vld [vmem:[%s12166_s6 + $0x34] ss:$12 sps:$4 sm:$0xff]   ;;  %v9458_v37 = vld [vmem:[%s12166_s6 + $0x98] ss:$12 sps:$4 sm:$0xff]  }
  0x77   :  { %1245 = vmatprep.subr.bf16.mxu1 %v9205_v21  ;;  %1666 = vperm.xlu1 %7952, %v1663_v8   ;;  %v9480_v46 = vld [vmem:[%s12166_s6 + $0x80] ss:$12 sps:$4 sm:$0xff]   ;;  %v8031_v50 = vld [vmem:[%s12166_s6 + $0x18] ss:$12 sps:$4 sm:$0xff]   ;;  %v9503_v55 = vld [vmem:[%s12166_s6 + $0x68] ss:$12 sps:$4 sm:$0xff]  }
  0x78   :  { %6568 = vmatmul.mubr.msk.bf16.gmra.mxu0 %vm310_vm0, %v9164_v15  ;;  %6577 = vmatmul.mubr.msk.bf16.gmra.mxu1 %vm310_vm0, %v9199_v20  ;;  %v9520_v60 = vld [vmem:[%s12166_s6 + $0x50] ss:$12 sps:$4 sm:$0xff]   ;;  %v9538_v2 = vld [vmem:[%s12166_s6 + $0x38] ss:$12 sps:$4 sm:$0xff]   ;;  %v9569_v8 = vld [vmem:[%s12166_s6 + $0x8] ss:$12 sps:$4 sm:$0xff]  }
  0x79   :  { %397 = vmatprep.mubr.bf16.mxu0 %v12182_v0  ;;  %520 = vmatprep.mubr.bf16.mxu1 %v12182_v0  ;;  %v6270_v7 = vld [vmem:[%s12171_s11 + $0x60] sm:$0xff] }
  0x7a   :  { %1246 = vmatpush1.bf16.msra.mxu1 %v9210_v22  ;;  %1980 = vperm.xlu0 %7951, %v1977_v53   ;;  %v6262_v53 = vld [vmem:[%s12171_s11 + $0x20] sm:$0xff] }
  0x7b   :  { %1247 = vmatprep.subr.bf16.mxu1 %v9216_v23  ;;  %1669 = vperm.xlu1 %7952, %v1664_v38  }
  0x7e   :  { %1248 = vmatpush1.bf16.msra.mxu1 %v9229_v25  ;;  %2137 = vperm.xlu0 %7951, %v2134_v58   ;;  %v6264_v58 = vld [vmem:[%s12171_s11 + $0x30] sm:$0xff] }
  0x7f   :  { %1249 = vmatprep.subr.bf16.mxu1 %v9240_v27 }
  0x80   :  { %6569 = vmatmul.mubr.msk.bf16.gmra.mxu0 %vm310_vm0, %v9199_v20  ;;  %6578 = vmatmul.mubr.msk.bf16.gmra.mxu1 %vm310_vm0, %v9234_v26 }
  0x81   :  { %407 = vmatprep.mubr.bf16.mxu0 %v12182_v0  ;;  %530 = vmatprep.mubr.bf16.mxu1 %v12182_v0 }
  0x82   :  { %1250 = vmatpush1.bf16.msra.mxu1 %v9246_v28  ;;  %2294 = vperm.xlu0 %7951, %v2291_v63   ;;  %v6266_v63 = vld [vmem:[%s12171_s11 + $0x40] sm:$0xff] }
  0x83   :  { %1251 = vmatprep.subr.bf16.mxu1 %v9255_v29 }
  0x86   :  { %1252 = vmatpush1.bf16.msra.mxu1 %v9264_v30  ;;  %2451 = vperm.xlu0 %7951, %v2448_v3  }
  0x87   :  { %7356 = vmatprep.subr.bf16.mxu1 %v12206_v32 }
  0x88   :  { %6570 = vmatmul.mubr.msk.bf16.gmra.mxu0 %vm310_vm0, %v9234_v26  ;;  %6579 = vmatmul.mubr.msk.bf16.gmra.mxu1 %vm310_vm0, %v9269_v31 }
  0x89   :  { %417 = vmatprep.mubr.bf16.mxu0 %v12182_v0  ;;  %540 = vmatprep.mubr.bf16.mxu1 %v12182_v0 }
  0x90   :  { %6571 = vmatmul.mubr.msk.bf16.gmra.mxu0 %vm310_vm0, %v9269_v31  ;;  %6580 = vmatmul.mubr.msk.bf16.gmra.mxu1 %vm310_vm0, %v9283_v33 }
  0x91   :  { %427 = vmatprep.mubr.bf16.mxu0 %v12182_v0  ;;  %550 = vmatprep.mubr.bf16.mxu1 %v12182_v0 }
  0x98   :  { %6572 = vmatmul.mubr.msk.bf16.gmra.mxu0 %vm310_vm0, %v9283_v33  ;;  %6581 = vmatmul.mubr.msk.bf16.gmra.mxu1 %vm310_vm0, %v9300_v36 }
  0x99   :  { %437 = vmatprep.mubr.bf16.mxu0 %v12182_v0  ;;  %1269 = vmatprep.mubr.bf16.mxu1 %v12182_v0 }
  0xa0   :  { %6573 = vmatmul.mubr.msk.bf16.gmra.mxu0 %vm310_vm0, %v9300_v36  ;;  %1270 = vmatmul.mubr.bf16.vlgmr.msra.gmra.mxu1 %v12182_v0 }
  0xa1   :  { %7357 = vmatpush3.bf16.msra.mxu1 %v9313_v39  ;;  %480 = vmatprep.mubr.bf16.mxu0 %v12182_v0 }
  0xa2   :  { %7358 = vmatprep.subr.bf16.mxu1 %v12206_v32  ;;  %7372 = vmatprep.mubr.msk.bf16.mxu1 %vm9001_vm3, %v12206_v32 }
  0xa5   :  { %7359 = vmatpush3.bf16.msra.mxu1 %v9318_v40 }
  0xa6   :  { %7360 = vmatprep.subr.bf16.mxu1 %v12206_v32 }
  0xa8   :  { %6574 = vmatmul.mubr.msk.bf16.vlgmr.msra.gmra.mxu0 %vm310_vm0, %v9126_v9 }
  0xa9   :  { %574 = vmatpush1.bf16.msra.mxu0 %v7999_v41  ;;  %7361 = vmatpush3.bf16.msra.mxu1 %v9331_v42  ;;  %v6259_v41 = vld [vmem:[%s12171_s11 + $0x8] sm:$0xff] }
  0xaa   :  { %575 = vmatprep.subr.bf16.mxu0 %v8005_v43  ;;  %7362 = vmatprep.subr.bf16.mxu1 %v12206_v32  ;;  %v6697_v43 = vld [vmem:[%s12282_s3 + $0x18] sm:$0xff] }
  0xab   :  { %593 = vmatprep.mubr.bf16.mxu0 %v12182_v0  ;;  %vm1692_vm12 = vcmp.gt.f32.partialorder %v6697_v43, 0.0 }
  0xac   :  { %v1821_v48 = vsel %vm1692_vm12, 1, %v12182_v0 }
  0xad   :  { %576 = vmatpush1.bf16.msra.mxu0 %v8003_v44  ;;  %7363 = vmatpush3.bf16.msra.mxu1 %v9338_v45  ;;  %v8029_v44 = vld [vmem:[%s12166_s6 + $0x1c] ss:$12 sps:$4 sm:$0xff]  }
  0xae   :  { %7364 = vmatprep.subr.bf16.mxu1 %v12206_v32  ;;  %1537 = vmatprep.subr.bf16.mxu0 %v9348_v47 }
  0xaf   :  { %1826 = vperm.xlu1 %7952, %v1821_v48  }
  0xb0   :  { %6582 = vmatmul.mubr.msk.bf16.vlgmr.msra.gmra.mxu0 %vm310_vm0, %v9126_v9  ;;  %v8035_v9 = vld [vmem:[%s12166_s6 + $0xb0] ss:$12 sps:$4 sm:$0xff]  }
  0xb1   :  { %7365 = vmatpush3.bf16.msra.mxu1 %v9357_v49  ;;  %603 = vmatprep.mubr.bf16.mxu0 %v12182_v0 }
  0xb2   :  { %7366 = vmatprep.subr.bf16.mxu1 %v12206_v32  ;;  %1538 = vmatpush1.bf16.msra.mxu0 %v8011_v51  ;;  %v6709_v51 = vld [vmem:[%s12282_s3 + $0x68] sm:$0xff] }
  0xb3   :  { %1539 = vmatprep.subr.bf16.mxu0 %v8013_v52  ;;  %v8032_v52 = vld [vmem:[%s12166_s6 + $0x4] ss:$12 sps:$4 sm:$0xff]   ;;  %vm1849_vm13 = vcmp.gt.f32.partialorder %v6709_v51, 0.0 }
  0xb5   :  { %7367 = vmatpush3.bf16.msra.mxu1 %v9375_v54 }
  0xb6   :  { %7368 = vmatprep.subr.bf16.mxu1 %v12206_v32  ;;  %1540 = vmatpush1.bf16.msra.mxu0 %v8016_v56  ;;  %v1978_v56 = vsel %vm1849_vm13, 1, %v12182_v0 }
  0xb7   :  { %1541 = vmatprep.subr.bf16.mxu0 %v8017_v57  ;;  %v6721_v57 = vld [vmem:[%s12282_s3 + $0x28] sm:$0xff]  ;;  %1983 = vperm.xlu1 %7952, %v1978_v56  }
  0xb8   :  { %6583 = vmatmul.mubr.msk.bf16.gmra.mxu0 %vm310_vm0, %v9131_v10  ;;  %v2605_v10 = vsel %vm2476_vm10, 1, %v12182_v0  ;;  %vm2006_vm14 = vcmp.gt.f32.partialorder %v6721_v57, 0.0 }
  0xb9   :  { %7369 = vmatpush3.bf16.msra.mxu1 %v9395_v59  ;;  %613 = vmatprep.mubr.bf16.mxu0 %v12182_v0 }
  0xba   :  { %7370 = vmatprep.subr.bf16.mxu1 %v12206_v32  ;;  %1542 = vmatpush1.bf16.msra.mxu0 %v8019_v61  ;;  %v2135_v61 = vsel %vm2006_vm14, 1, %v12182_v0 }
  0xbb   :  { %1543 = vmatprep.subr.bf16.mxu0 %v8020_v62  ;;  %2608 = vperm.xlu0 %7951, %v2605_v10   ;;  %v6727_v62 = vld [vmem:[%s12282_s3 + $0x58] sm:$0xff]  ;;  %v6260_v10 = vld [vmem:[%s12171_s11 + $0x10] sm:$0xff] }
  0xbc   :  { %vm2163_vm15 = vcmp.gt.f32.partialorder %v6727_v62, 0.0  ;;  %2140 = vperm.xlu1 %7952, %v2135_v61  }
  0xbd   :  { %7371 = vmatpush3.bf16.msra.mxu1 %v9412_v1  ;;  %v2292_v3 = vsel %vm2163_vm15, 1, %v12182_v0 }
  0xbe   :  { %1544 = vmatpush1.bf16.msra.mxu0 %v8022_v4  ;;  %7376 = vmatprep.subr.bf16.mxu1 %v12206_v32  ;;  %v9552_v4 = vld [vmem:[%s12166_s6 + $0x20] ss:$12 sps:$4 sm:$0xff]  }
  0xbf   :  { %1545 = vmatprep.subr.bf16.mxu0 %v8023_v6  ;;  %6280 = vperm.xlu0 %7951, %v6259_v41   ;;  %v6739_v6 = vld [vmem:[%s12282_s3 + $0x48] sm:$0xff] }
  0xc0   :  { %6584 = vmatmul.mubr.msk.bf16.gmra.mxu0 %vm310_vm0, %v9164_v15  ;;  %7373 = vmatmul.mubr.bf16.vlgmr.msra.gmra.mxu1 %v12182_v0  ;;  %v8028_v15 = vld [vmem:[%s12166_s6 + $0x30] ss:$12 sps:$4 sm:$0xff]   ;;  %vm2477_vm2 = vcmp.gt.f32.partialorder %v6739_v6, 0.0 }
  0xc1   :  { %623 = vmatprep.mubr.bf16.mxu0 %v12182_v0  ;;  %7377 = vmatpush3.bf16.msra.mxu1 %v8035_v9  ;;  %v2606_v9 = vsel %vm2477_vm2, 1, %v12182_v0 }
  0xc2   :  { %1546 = vmatpush1.bf16.msra.mxu0 %v8025_v24  ;;  %7378 = vmatprep.subr.bf16.mxu1 %v12206_v32 }
  0xc3   :  { %1547 = vmatprep.subr.bf16.mxu0 %v8026_v35  ;;  %7392 = vmatprep.mubr.msk.bf16.mxu1 %vm9001_vm3, %v12206_v32 }
  0xc4   :  { %6289 = vperm.xlu0 %7951, %v6262_v53   ;;  %2297 = vperm.xlu1 %7952, %v2292_v3  }
  0xc5   :  { %7379 = vmatpush3.bf16.msra.mxu1 %v9458_v37 }
  0xc6   :  { %1548 = vmatpush1.bf16.msra.mxu0 %v8028_v15  ;;  %7380 = vmatprep.subr.bf16.mxu1 %v12206_v32 }
  0xc7   :  { %1549 = vmatprep.subr.bf16.mxu0 %v8029_v44 }
  0xc8   :  { %6585 = vmatmul.mubr.msk.bf16.gmra.mxu0 %vm310_vm0, %v9199_v20  ;;  %v8034_v20 = vld [vmem:[%s12166_s6] ss:$12 sps:$4 sm:$0xff]   ;;  %6295 = vperm.xlu0 %7951, %v6264_v58  }
  0xc9   :  { %633 = vmatprep.mubr.bf16.mxu0 %v12182_v0  ;;  %7381 = vmatpush3.bf16.msra.mxu1 %v9480_v46 }
  0xca   :  { %1550 = vmatpush1.bf16.msra.mxu0 %v8031_v50  ;;  %7382 = vmatprep.subr.bf16.mxu1 %v12206_v32 }
  0xcb   :  { %1551 = vmatprep.subr.bf16.mxu0 %v8032_v52 }
  0xcc   :  { %6301 = vperm.xlu0 %7951, %v6266_v63  }
  0xcd   :  { %7383 = vmatpush3.bf16.msra.mxu1 %v9503_v55 }
  0xce   :  { %1552 = vmatpush1.bf16.msra.mxu0 %v8034_v20  ;;  %7384 = vmatprep.subr.bf16.mxu1 %v12206_v32 }
  0xcf   :  { %1694 = vmatprep.subr.bf16.mxu0 %v9140_v11  ;;  %v6733_v11 = vld [vmem:[%s12282_s3 + $0x38] sm:$0xff] }
  0xd0   :  { %6586 = vmatmul.mubr.msk.bf16.gmra.mxu0 %vm310_vm0, %v9234_v26  ;;  %vm2320_vm1 = vcmp.gt.f32.partialorder %v6733_v11, 0.0  ;;  %v6268_v26 = vld [vmem:[%s12171_s11 + $0x50] sm:$0xff] }
  0xd1   :  { %643 = vmatprep.mubr.bf16.mxu0 %v12182_v0  ;;  %7385 = vmatpush3.bf16.msra.mxu1 %v9520_v60  ;;  %v2449_v5 = vsel %vm2320_vm1, 1, %v12182_v0 }
  0xd2   :  { %7386 = vmatprep.subr.bf16.mxu1 %v12206_v32  ;;  %6307 = vperm.xlu0 %7951, %v6268_v26  }
  0xd3   :  { %2454 = vperm.xlu1 %7952, %v2449_v5  }
  0xd5   :  { %7387 = vmatpush3.bf16.msra.mxu1 %v9538_v2 }
  0xd6   :  { %7388 = vmatprep.subr.bf16.mxu1 %v12206_v32  ;;  %6313 = vperm.xlu0 %7951, %v6270_v7  }
  0xd7   :  { %2611 = vperm.xlu1 %7952, %v2606_v9  }
  0xd8   :  { %6587 = vmatmul.mubr.msk.bf16.gmra.mxu0 %vm310_vm0, %v9269_v31  ;;  %v6258_v31 = vld [vmem:[%s12171_s11] sm:$0xff] }
  0xd9   :  { %653 = vmatprep.mubr.bf16.mxu0 %v12182_v0  ;;  %7389 = vmatpush3.bf16.msra.mxu1 %v9552_v4 }
  0xda   :  { %7390 = vmatprep.subr.bf16.mxu1 %v12206_v32 }
  0xdb   :  { %6277 = vperm.xlu1 %7952, %v6258_v31  }
  0xdd   :  { %7391 = vmatpush3.bf16.msra.mxu1 %v9569_v8 }
  0xde   :  { %7396 = vmatprep.subr.bf16.mxu1 %v12206_v32 }
  0xdf   :  { %6283 = vperm.xlu1 %7952, %v6260_v10  }
  0xe0   :  { %6588 = vmatmul.mubr.msk.bf16.gmra.mxu0 %vm310_vm0, %v9283_v33  ;;  %7393 = vmatmul.mubr.bf16.vlgmr.msra.gmra.mxu1 %v12182_v0  ;;  %v6261_v33 = vld [vmem:[%s12171_s11 + $0x18] sm:$0xff] }
  0xe1   :  { %663 = vmatprep.mubr.bf16.mxu0 %v12182_v0  ;;  %7397 = vmatpush3.bf16.msra.mxu1 %v9313_v39  ;;  %v6263_v39 = vld [vmem:[%s12171_s11 + $0x28] sm:$0xff] }
  0xe2   :  { %7412 = vmatprep.mubr.msk.bf16.mxu1 %vm9001_vm3, %v12206_v32  ;;  %7398 = vmatprep.subr.bf16.mxu1 %v12206_v32 }
  0xe3   :  { %6286 = vperm.xlu1 %7952, %v6261_v33  }
  0xe5   :  { %7399 = vmatpush3.bf16.msra.mxu1 %v9318_v40  ;;  %v6265_v40 = vld [vmem:[%s12171_s11 + $0x38] sm:$0xff] }
  0xe6   :  { %7400 = vmatprep.subr.bf16.mxu1 %v12206_v32 }
  0xe7   :  { %6292 = vperm.xlu1 %7952, %v6263_v39  }
  0xe8   :  { %6589 = vmatmul.mubr.msk.bf16.gmra.mxu0 %vm310_vm0, %v9300_v36  ;;  %v6267_v36 = vld [vmem:[%s12171_s11 + $0x48] sm:$0xff] }
  0xe9   :  { %1569 = vmatprep.mubr.bf16.mxu0 %v12182_v0  ;;  %7401 = vmatpush3.bf16.msra.mxu1 %v9331_v42  ;;  %v6269_v42 = vld [vmem:[%s12171_s11 + $0x58] sm:$0xff] }
  0xea   :  { %7402 = vmatprep.subr.bf16.mxu1 %v12206_v32 }
  0xeb   :  { %6298 = vperm.xlu1 %7952, %v6265_v40  }
  0xed   :  { %7403 = vmatpush3.bf16.msra.mxu1 %v9338_v45 }
  0xee   :  { %7404 = vmatprep.subr.bf16.mxu1 %v12206_v32 }
  0xef   :  { %6304 = vperm.xlu1 %7952, %v6267_v36  }
  0xf0   :  { %1570 = vmatmul.mubr.bf16.vlgmr.msra.gmra.mxu0 %v12182_v0 }
  0xf1   :  { %1695 = vmatpush1.bf16.msra.mxu0 %v9145_v12  ;;  %7405 = vmatpush3.bf16.msra.mxu1 %v9357_v49  ;;  %v12181_v12 = vlaneseq }
  0xf2   :  { %1696 = vmatprep.subr.bf16.mxu0 %v9151_v13  ;;  %7406 = vmatprep.subr.bf16.mxu1 %v12206_v32 }
  0xf3   :  { %1726 = vmatprep.mubr.bf16.mxu0 %v12182_v0  ;;  %6310 = vperm.xlu1 %7952, %v6269_v42   ;;  %v9640_v13 = vshrl.u32 %v12181_v12, 7 }
  0xf5   :  { %1697 = vmatpush1.bf16.msra.mxu0 %v9159_v14  ;;  %7407 = vmatpush3.bf16.msra.mxu1 %v9375_v54  ;;  %v9643_v14 = vsub.s32 2, %v9640_v13 }
  0xf6   :  { %1698 = vmatprep.subr.bf16.mxu0 %v9170_v16  ;;  %7408 = vmatprep.subr.bf16.mxu1 %v12206_v32  ;;  %v9646_v16 = vsub.s32 0, %v9640_v13 }
  0xf7   :  { %12283 = vst [vmem:[#allocation23_spill] sm:$0xff] %v9643_v14 }
  0xf8   :  { %12284 = vst [vmem:[#allocation24_spill] sm:$0xff] %v9646_v16 }
  0xf9   :  { %1699 = vmatpush1.bf16.msra.mxu0 %v9176_v17  ;;  %7409 = vmatpush3.bf16.msra.mxu1 %v9395_v59  ;;  %v9649_v17 = vsub.s32 1, %v9640_v13 }
  0xfa   :  { %1700 = vmatprep.subr.bf16.mxu0 %v9185_v18  ;;  %7410 = vmatprep.subr.bf16.mxu1 %v12206_v32  ;;  %v194_v18 = vsub.s32 3, %v9640_v13 }
  0xfb   :  { %12285 = vst [vmem:[#allocation25_spill] sm:$0xff] %v9649_v17 }
  0xfd   :  { %1701 = vmatpush1.bf16.msra.mxu0 %v9194_v19  ;;  %7411 = vmatpush3.bf16.msra.mxu1 %v9412_v1  ;;  %v9652_v19 = vld [vmem:[#allocation8] sm:$0x3f] }
  0xfe   :  { %1702 = vmatprep.subr.bf16.mxu0 %v9205_v21  ;;  %7416 = vmatprep.subr.bf16.mxu1 %v12206_v32  ;;  %v9656_v21 = vrot.slane %v9652_v19, %v9643_v14 }
 0x101   :  { %1703 = vmatpush1.bf16.msra.mxu0 %v9210_v22  ;;  %v9660_v22 = vrot.slane %v9652_v19, %v9646_v16 }
 0x102   :  { %1704 = vmatprep.subr.bf16.mxu0 %v9216_v23  ;;  %v9664_v23 = vrot.slane %v9652_v19, %v9649_v17 }
 0x105   :  { %1705 = vmatpush1.bf16.msra.mxu0 %v9229_v25  ;;  %v9667_v25 = vrot.slane %v9652_v19, %v194_v18 }
 0x106   :  { %1706 = vmatprep.subr.bf16.mxu0 %v9240_v27 }
 0x109   :  { %1707 = vmatpush1.bf16.msra.mxu0 %v9246_v28 }
 0x10a   :  { %1708 = vmatprep.subr.bf16.mxu0 %v9255_v29 }
 0x10d   :  { %1709 = vmatpush1.bf16.msra.mxu0 %v9264_v30 }
 0x10e   :  { %1851 = vmatprep.subr.bf16.mxu0 %v9348_v47 }
 0x128   :  { %v369_v27 = vpop.f32.mrf.mxu0  ;;  %v492_v28 = vpop.f32.mrf.mxu1 }
 0x129   :  { %v493_v29 = vadd.f32 %v492_v28, %v9656_v21  ;;  %v370_v47 = vadd.f32 %v369_v27, %v9660_v22 }
 0x12a   :  { %v371_v30 = vpop.f32.mrf.mxu0  ;;  %v494_v45 = vpop.f32.mrf.mxu1 }
 0x12b   :  { %v372_v49 = vadd.f32 %v371_v30, %v9664_v23  ;;  %v495_v54 = vadd.f32 %v494_v45, %v9667_v25 }
 0x12c   :  { %v373_v59 = vpop.f32.mrf.mxu0  ;;  %v496_v1 = vpop.f32.mrf.mxu1 }
 0x12d   :  { %v9673_v24 = vpack.c.bf16 %v372_v49, %v370_v47  ;;  %v6967_v34 = vpack.c.bf16 %v495_v54, %v493_v29  ;;  %v497_v35 = vadd.f32 %v496_v1, %v9656_v21  ;;  %v374_v15 = vadd.f32 %v373_v59, %v9660_v22 }
 0x12e   :  { %v375_v38 = vpop.f32.mrf.mxu0  ;;  %v498_v41 = vpop.f32.mrf.mxu1 }
 0x12f   :  { %969 = vst [vmem:[#allocation2 + $0x38] sm:$0xff] %v6967_v34  ;;  %v376_v43 = vadd.f32 %v375_v38, %v9664_v23  ;;  %v499_v44 = vadd.f32 %v498_v41, %v9667_v25 }
 0x130   :  { %v379_v48 = vpop.f32.mrf.mxu0  ;;  %v502_v50 = vpop.f32.mrf.mxu1 }
 0x131   :  { %v9679_v51 = vpack.c.bf16 %v376_v43, %v374_v15  ;;  %v6970_v52 = vpack.c.bf16 %v499_v44, %v497_v35  ;;  %v503_v53 = vadd.f32 %v502_v50, %v9656_v21  ;;  %v380_v57 = vadd.f32 %v379_v48, %v9660_v22 }
 0x132   :  { %v381_v56 = vpop.f32.mrf.mxu0  ;;  %v504_v20 = vpop.f32.mrf.mxu1 }
 0x133   :  { %972 = vst [vmem:[#allocation2 + $0x50] sm:$0xff] %v6970_v52  ;;  %v382_v58 = vadd.f32 %v381_v56, %v9664_v23  ;;  %v505_v61 = vadd.f32 %v504_v20, %v9667_v25 }
 0x134   :  { %v383_v62 = vpop.f32.mrf.mxu0  ;;  %v506_v63 = vpop.f32.mrf.mxu1 }
 0x135   :  { %v6966_v3 = vpack.c.bf16 %v382_v58, %v380_v57  ;;  %v6973_v11 = vpack.c.bf16 %v505_v61, %v503_v53  ;;  %v507_v26 = vadd.f32 %v506_v63, %v9656_v21  ;;  %v384_v7 = vadd.f32 %v383_v62, %v9660_v22 }
 0x136   :  { %v385_v5 = vpop.f32.mrf.mxu0  ;;  %v508_v6 = vpop.f32.mrf.mxu1 }
 0x137   :  { %968 = vst [vmem:[#allocation2 + $0x30] sm:$0xff] %v6966_v3  ;;  %975 = vst [vmem:[#allocation2 + $0x68] sm:$0xff] %v6973_v11  ;;  %v386_v9 = vadd.f32 %v385_v5, %v9664_v23  ;;  %v509_v31 = vadd.f32 %v508_v6, %v9667_v25 }
 0x138   :  { %v389_v10 = vpop.f32.mrf.mxu0  ;;  %v512_v33 = vpop.f32.mrf.mxu1 }
 0x139   :  { %v6969_v39 = vpack.c.bf16 %v386_v9, %v384_v7  ;;  %v6976_v40 = vpack.c.bf16 %v509_v31, %v507_v26  ;;  %v513_v36 = vadd.f32 %v512_v33, %v9656_v21  ;;  %v390_v27 = vadd.f32 %v389_v10, %v9660_v22 }
 0x13a   :  { %v391_v42 = vpop.f32.mrf.mxu0  ;;  %v514_v18 = vpop.f32.mrf.mxu1 }
 0x13b   :  { %971 = vst [vmem:[#allocation2 + $0x48] sm:$0xff] %v6969_v39  ;;  %978 = vst [vmem:[#allocation2 + $0x80] sm:$0xff] %v6976_v40  ;;  %v392_v28 = vadd.f32 %v391_v42, %v9664_v23  ;;  %v515_v29 = vadd.f32 %v514_v18, %v9667_v25 }
 0x13c   :  { %v393_v30 = vpop.f32.mrf.mxu0  ;;  %v516_v45 = vpop.f32.mrf.mxu1 }
 0x13d   :  { %v6972_v47 = vpack.c.bf16 %v392_v28, %v390_v27  ;;  %v6979_v49 = vpack.c.bf16 %v515_v29, %v513_v36  ;;  %v517_v54 = vadd.f32 %v516_v45, %v9656_v21  ;;  %v394_v34 = vadd.f32 %v393_v30, %v9660_v22 }
 0x13e   :  { %v395_v59 = vpop.f32.mrf.mxu0  ;;  %v518_v1 = vpop.f32.mrf.mxu1 }
 0x13f   :  { %974 = vst [vmem:[#allocation2 + $0x60] sm:$0xff] %v6972_v47  ;;  %981 = vst [vmem:[#allocation2 + $0x98] sm:$0xff] %v6979_v49  ;;  %v396_v35 = vadd.f32 %v395_v59, %v9664_v23  ;;  %v519_v38 = vadd.f32 %v518_v1, %v9667_v25 }
 0x140   :  { %v399_v41 = vpop.f32.mrf.mxu0  ;;  %v522_v15 = vpop.f32.mrf.mxu1 }
 0x141   :  { %v6975_v43 = vpack.c.bf16 %v396_v35, %v394_v34  ;;  %v6982_v44 = vpack.c.bf16 %v519_v38, %v517_v54  ;;  %v523_v48 = vadd.f32 %v522_v15, %v9656_v21  ;;  %v400_v53 = vadd.f32 %v399_v41, %v9660_v22 }
 0x142   :  { %v401_v50 = vpop.f32.mrf.mxu0  ;;  %v524_v52 = vpop.f32.mrf.mxu1 }
 0x143   :  { %977 = vst [vmem:[#allocation2 + $0x78] sm:$0xff] %v6975_v43  ;;  %984 = vst [vmem:[#allocation2 + $0xb0] sm:$0xff] %v6982_v44  ;;  %v402_v56 = vadd.f32 %v401_v50, %v9664_v23  ;;  %v525_v20 = vadd.f32 %v524_v52, %v9667_v25 }
 0x144   :  { %v403_v57 = vpop.f32.mrf.mxu0  ;;  %v526_v58 = vpop.f32.mrf.mxu1 }
 0x145   :  { %v6978_v61 = vpack.c.bf16 %v402_v56, %v400_v53  ;;  %v6985_v62 = vpack.c.bf16 %v525_v20, %v523_v48  ;;  %v527_v63 = vadd.f32 %v526_v58, %v9656_v21  ;;  %v404_v26 = vadd.f32 %v403_v57, %v9660_v22 }
 0x146   :  { %v405_v3 = vpop.f32.mrf.mxu0  ;;  %v528_v11 = vpop.f32.mrf.mxu1 }
 0x147   :  { %980 = vst [vmem:[#allocation2 + $0x90] sm:$0xff] %v6978_v61  ;;  %987 = vst [vmem:[#allocation2 + $0xc8] sm:$0xff] %v6985_v62  ;;  %v406_v5 = vadd.f32 %v405_v3, %v9664_v23  ;;  %v529_v6 = vadd.f32 %v528_v11, %v9667_v25 }
 0x148   :  { %v409_v7 = vpop.f32.mrf.mxu0  ;;  %v532_v9 = vpop.f32.mrf.mxu1 }
 0x149   :  { %v6981_v31 = vpack.c.bf16 %v406_v5, %v404_v26  ;;  %v6988_v10 = vpack.c.bf16 %v529_v6, %v527_v63  ;;  %v533_v33 = vadd.f32 %v532_v9, %v9656_v21  ;;  %v410_v36 = vadd.f32 %v409_v7, %v9660_v22 }
 0x14a   :  { %v411_v39 = vpop.f32.mrf.mxu0  ;;  %v534_v40 = vpop.f32.mrf.mxu1 }
 0x14b   :  { %983 = vst [vmem:[#allocation2 + $0xa8] sm:$0xff] %v6981_v31  ;;  %990 = vst [vmem:[#allocation2 + $0xe0] sm:$0xff] %v6988_v10  ;;  %v412_v42 = vadd.f32 %v411_v39, %v9664_v23  ;;  %v535_v18 = vadd.f32 %v534_v40, %v9667_v25 }
 0x14c   :  { %v413_v27 = vpop.f32.mrf.mxu0  ;;  %v536_v28 = vpop.f32.mrf.mxu1 }
 0x14d   :  { %v6984_v29 = vpack.c.bf16 %v412_v42, %v410_v36  ;;  %v6991_v30 = vpack.c.bf16 %v535_v18, %v533_v33  ;;  %v537_v45 = vadd.f32 %v536_v28, %v9656_v21  ;;  %v414_v54 = vadd.f32 %v413_v27, %v9660_v22  ;;  %v9722_v33 = vld [vmem:[#allocation10] sm:$0x7] }
 0x14e   :  { %v415_v47 = vpop.f32.mrf.mxu0  ;;  %v538_v49 = vpop.f32.mrf.mxu1 }
 0x14f   :  { %986 = vst [vmem:[#allocation2 + $0xc0] sm:$0xff] %v6984_v29  ;;  %993 = vst [vmem:[#allocation2 + $0xf8] sm:$0xff] %v6991_v30  ;;  %v416_v59 = vadd.f32 %v415_v47, %v9664_v23  ;;  %v539_v1 = vadd.f32 %v538_v49, %v9667_v25  ;;  %v9730_v30 = vrot.slane %v9722_v33, %v9646_v16 }
 0x150   :  { %v419_v34 = vpop.f32.mrf.mxu0  ;;  %v542_v35 = vpop.f32.mrf.mxu1 }
 0x151   :  { %v6987_v38 = vpack.c.bf16 %v416_v59, %v414_v54  ;;  %v6994_v41 = vpack.c.bf16 %v539_v1, %v537_v45  ;;  %v543_v15 = vadd.f32 %v542_v35, %v9656_v21  ;;  %v420_v48 = vadd.f32 %v419_v34, %v9660_v22  ;;  %12286 = vst [vmem:[#allocation26_spill] sm:$0xff] %v9730_v30 }
 0x152   :  { %v421_v43 = vpop.f32.mrf.mxu0  ;;  %v544_v44 = vpop.f32.mrf.mxu1 }
 0x153   :  { %989 = vst [vmem:[#allocation2 + $0xd8] sm:$0xff] %v6987_v38  ;;  %996 = vst [vmem:[#allocation2 + $0x110] sm:$0xff] %v6994_v41  ;;  %v422_v50 = vadd.f32 %v421_v43, %v9664_v23  ;;  %v545_v52 = vadd.f32 %v544_v44, %v9667_v25  ;;  %v1083_v41 = vunpack.c.l.bf16 %v9673_v24 }
 0x154   :  { %v423_v53 = vpop.f32.mrf.mxu0  ;;  %v546_v56 = vpop.f32.mrf.mxu1 }
 0x155   :  { %v6990_v20 = vpack.c.bf16 %v422_v50, %v420_v48  ;;  %v6997_v57 = vpack.c.bf16 %v545_v52, %v543_v15  ;;  %v547_v58 = vadd.f32 %v546_v56, %v9656_v21  ;;  %v424_v63 = vadd.f32 %v423_v53, %v9660_v22 }
 0x156   :  { %v425_v61 = vpop.f32.mrf.mxu0  ;;  %v548_v62 = vpop.f32.mrf.mxu1  ;;  %v9741_v53 = vrot.slane %v9722_v33, %v9649_v17 }
 0x157   :  { %992 = vst [vmem:[#allocation2 + $0xf0] sm:$0xff] %v6990_v20  ;;  %999 = vst [vmem:[#allocation2 + $0x128] sm:$0xff] %v6997_v57  ;;  %v426_v3 = vadd.f32 %v425_v61, %v9664_v23  ;;  %v549_v11 = vadd.f32 %v548_v62, %v9667_v25  ;;  %v1086_v61 = vunpack.c.l.bf16 %v9679_v51 }
 0x158   :  { %v429_v26 = vpop.f32.mrf.mxu0  ;;  %v552_v5 = vpop.f32.mrf.mxu1 }
 0x159   :  { %v6993_v6 = vpack.c.bf16 %v426_v3, %v424_v63  ;;  %v7000_v7 = vpack.c.bf16 %v549_v11, %v547_v58  ;;  %v553_v9 = vadd.f32 %v552_v5, %v9656_v21  ;;  %v430_v39 = vadd.f32 %v429_v26, %v9660_v22 }
 0x15a   :  { %v431_v31 = vpop.f32.mrf.mxu0  ;;  %v554_v10 = vpop.f32.mrf.mxu1 }
 0x15b   :  { %995 = vst [vmem:[#allocation2 + $0x108] sm:$0xff] %v6993_v6  ;;  %1002 = vst [vmem:[#allocation2 + $0x140] sm:$0xff] %v7000_v7  ;;  %v432_v40 = vadd.f32 %v431_v31, %v9664_v23  ;;  %v555_v36 = vadd.f32 %v554_v10, %v9667_v25  ;;  %v1084_v10 = vunpack.c.h.bf16 %v9673_v24 }
 0x15c   :  { %v433_v42 = vpop.f32.mrf.mxu0  ;;  %v556_v18 = vpop.f32.mrf.mxu1 }
 0x15d   :  { %v6996_v27 = vpack.c.bf16 %v432_v40, %v430_v39  ;;  %v7003_v28 = vpack.c.bf16 %v555_v36, %v553_v9  ;;  %v557_v29 = vadd.f32 %v556_v18, %v9656_v21  ;;  %v434_v49 = vadd.f32 %v433_v42, %v9660_v22 }
 0x15e   :  { %v435_v45 = vpop.f32.mrf.mxu0  ;;  %v558_v47 = vpop.f32.mrf.mxu1  ;;  %v198_v36 = vsub.s32 4, %v9640_v13  ;;  %v1087_v42 = vunpack.c.h.bf16 %v9679_v51  ;;  %v202_v18 = vsub.s32 5, %v9640_v13 }
 0x15f   :  { %998 = vst [vmem:[#allocation2 + $0x120] sm:$0xff] %v6996_v27  ;;  %1005 = vst [vmem:[#allocation2 + $0x158] sm:$0xff] %v7003_v28  ;;  %v436_v54 = vadd.f32 %v435_v45, %v9664_v23  ;;  %v559_v59 = vadd.f32 %v558_v47, %v9667_v25 }
 0x160   :  { %v439_v1 = vpop.f32.mrf.mxu0  ;;  %v1271_v34 = vpop.f32.mrf.mxu1  ;;  %v9761_v51 = vrot.slane %v9652_v19, %v202_v18 }
 0x161   :  { %v6999_v35 = vpack.c.bf16 %v436_v54, %v434_v49  ;;  %v7006_v38 = vpack.c.bf16 %v559_v59, %v557_v29  ;;  %v1272_v15 = vadd.f32 %v1271_v34, %v9730_v30  ;;  %v440_v48 = vadd.f32 %v439_v1, %v9660_v22 }
 0x162   :  { %v441_v43 = vpop.f32.mrf.mxu0  ;;  %v1273_v44 = vpop.f32.mrf.mxu1  ;;  %v9758_v54 = vrot.slane %v9652_v19, %v198_v36 }
 0x163   :  { %1001 = vst [vmem:[#allocation2 + $0x138] sm:$0xff] %v6999_v35  ;;  %1008 = vst [vmem:[#allocation2 + $0x170] sm:$0xff] %v7006_v38  ;;  %v1321_v50 = vadd.f32 %v1272_v15, %v1083_v41  ;;  %v442_v52 = vadd.f32 %v441_v43, %v9664_v23  ;;  %v1274_v5 = vadd.f32 %v1273_v44, %v9741_v53 }
 0x164   :  { %v443_v56 = vpop.f32.mrf.mxu0  ;;  %v1275_v20 = vpop.f32.mrf.mxu1 }
 0x165   :  { %v6662_v57 = vmul.f32 -1.442695, %v1321_v50  ;;  %v7002_v58 = vpack.c.bf16 %v442_v52, %v440_v48  ;;  %v1276_v62 = vadd.f32 %v1275_v20, %v9730_v30  ;;  %v444_v11 = vadd.f32 %v443_v56, %v9660_v22 }
 0x166   :  { %v445_v63 = vpop.f32.mrf.mxu0  ;;  %v1277_v3 = vpop.f32.mrf.mxu1  ;;  %v1335_v27 = vadd.f32 %v1274_v5, %v1084_v10 }
 0x167   :  { %8123 = vpow2.f32 %v6662_v57  ;;  %1004 = vst [vmem:[#allocation2 + $0x150] sm:$0xff] %v7002_v58  ;;  %v446_v26 = vadd.f32 %v445_v63, %v9664_v23  ;;  %v1322_v6 = vadd.f32 %v1276_v62, %v1086_v61  ;;  %v1278_v31 = vadd.f32 %v1277_v3, %v9741_v53 }
 0x168   :  { %v482_v7 = vpop.f32.mrf.mxu0  ;;  %v6664_v59 = vmul.f32 -1.442695, %v1335_v27  ;;  %v9771_v3 = vrot.slane %v9722_v33, %v9643_v14 }
 0x169   :  { %v7005_v9 = vpack.c.bf16 %v446_v26, %v444_v11  ;;  %v6663_v39 = vmul.f32 -1.442695, %v1322_v6  ;;  %v483_v22 = vadd.f32 %v482_v7, %v9656_v21  ;;  %v1336_v29 = vadd.f32 %v1278_v31, %v1087_v42 }
 0x16a   :  { %v484_v40 = vpop.f32.mrf.mxu0 }
 0x16b   :  { %1007 = vst [vmem:[#allocation2 + $0x168] sm:$0xff] %v7005_v9  ;;  %v485_v23 = vadd.f32 %v484_v40, %v9667_v25  ;;  %8125 = vpow2.f32 %v6663_v39  ;;  %v6665_v13 = vmul.f32 -1.442695, %v1336_v29 }
 0x16c   :  { %v486_v28 = vpop.f32.mrf.mxu0  ;;  %8127 = vpow2.f32 %v6664_v59 }
 0x16d   :  { %v6961_v45 = vpack.c.bf16 %v485_v23, %v483_v22  ;;  %v487_v24 = vadd.f32 %v486_v28, %v9656_v21  ;;  %8129 = vpow2.f32 %v6665_v13 }
 0x16e   :  { %v488_v47 = vpop.f32.mrf.mxu0 }
 0x16f   :  { %963 = vst [vmem:[#allocation2 + $0x8] sm:$0xff] %v6961_v45  ;;  %v489_v49 = vadd.f32 %v488_v47, %v9667_v25 }
 0x170   :  { %v595_v1 = vpop.f32.mrf.mxu0 }
 0x171   :  { %v6964_v34 = vpack.c.bf16 %v489_v49, %v487_v24  ;;  %v596_v38 = vadd.f32 %v595_v1, %v9758_v54 }
 0x172   :  { %v597_v35 = vpop.f32.mrf.mxu0 }
 0x173   :  { %966 = vst [vmem:[#allocation2 + $0x20] sm:$0xff] %v6964_v34  ;;  %v598_v41 = vadd.f32 %v597_v35, %v9761_v51 }
 0x174   :  { %v8124_v15 = vpop.eup %8123  ;;  %v599_v21 = vpop.f32.mrf.mxu0 }
 0x175   :  { %v1329_v25 = vadd.f32 1.0, %v8124_v15  ;;  %v6962_v43 = vpack.c.bf16 %v598_v41, %v596_v38  ;;  %v600_v19 = vadd.f32 %v599_v21, %v9758_v54 }
 0x176   :  { %v601_v44 = vpop.f32.mrf.mxu0 }
 0x177   :  { %8131 = vrcp.f32 %v1329_v25  ;;  %964 = vst [vmem:[#allocation2 + $0x10] sm:$0xff] %v6962_v43  ;;  %v602_v48 = vadd.f32 %v601_v44, %v9761_v51 }
 0x178   :  { %v605_v50 = vpop.f32.mrf.mxu0  ;;  %v8126_v52 = vpop.eup %8125 }
 0x179   :  { %v6965_v56 = vpack.c.bf16 %v602_v48, %v600_v19  ;;  %v1330_v20 = vadd.f32 1.0, %v8126_v52  ;;  %v606_v58 = vadd.f32 %v605_v50, %v9758_v54  ;;  %v8128_v9 = vpop.eup %8127 }
 0x17a   :  { %v607_v57 = vpop.f32.mrf.mxu0  ;;  %v8130_v39 = vpop.eup %8129  ;;  %v1080_v36 = vld [vmem:[#allocation2 + $0x8] ss:$24 sps:$4 sm:$0xff]   ;;  %v1343_v18 = vadd.f32 1.0, %v8128_v9 }
 0x17b   :  { %967 = vst [vmem:[#allocation2 + $0x28] sm:$0xff] %v6965_v56  ;;  %v608_v61 = vadd.f32 %v607_v57, %v9761_v51  ;;  %8133 = vrcp.f32 %v1330_v20  ;;  %v1344_v29 = vadd.f32 1.0, %v8130_v39  ;;  %v1085_v47 = vunpack.c.l.bf16 %v1080_v36 }
 0x17c   :  { %v609_v62 = vpop.f32.mrf.mxu0  ;;  %8135 = vrcp.f32 %v1343_v18  ;;  %v1088_v21 = vunpack.c.h.bf16 %v1080_v36 }
 0x17d   :  { %v6968_v63 = vpack.c.bf16 %v608_v61, %v606_v58  ;;  %v610_v26 = vadd.f32 %v609_v62, %v9758_v54  ;;  %8137 = vrcp.f32 %v1344_v29 }
 0x17e   :  { %v611_v11 = vpop.f32.mrf.mxu0 }
 0x17f   :  { %970 = vst [vmem:[#allocation2 + $0x40] sm:$0xff] %v6968_v63  ;;  %v612_v5 = vadd.f32 %v611_v11, %v9761_v51 }
 0x180   :  { %v615_v6 = vpop.f32.mrf.mxu0  ;;  %v1314_v7 = vpop.f32.mrf.mxu1 }
 0x181   :  { %v6971_v31 = vpack.c.bf16 %v612_v5, %v610_v26  ;;  %v1315_v10 = vadd.f32 %v1314_v7, %v9771_v3  ;;  %v616_v33 = vadd.f32 %v615_v6, %v9758_v54  ;;  %v9787_v26 = vpop.permute.xlu0 %1366 }
 0x182   :  { %v617_v40 = vpop.f32.mrf.mxu0  ;;  %v7374_v42 = vpop.f32.mrf.mxu1  ;;  %12287 = vst [vmem:[#allocation27_spill] sm:$0xff] %v9787_v26  ;;  %vm12236_vm5 = vcmp.eq.s32.totalorder %v9787_v26, 1 }
 0x183   :  { %973 = vst [vmem:[#allocation2 + $0x58] sm:$0xff] %v6971_v31  ;;  %v618_v22 = vadd.f32 %v617_v40, %v9761_v51 }
 0x184   :  { %v8132_v23 = vpop.eup %8131  ;;  %v619_v27 = vpop.f32.mrf.mxu0 }
 0x185   :  { %v1317_v28 = vpop.f32.mrf.mxu1  ;;  %v6974_v45 = vpack.c.bf16 %v618_v22, %v616_v33  ;;  %v1349_v24 = vmul.f32 %v8132_v23, %v1315_v10  ;;  %v620_v34 = vadd.f32 %v619_v27, %v9758_v54  ;;  %v9791_v22 = vpop.permute.xlu0 %1369 }
 0x186   :  { %v621_v49 = vpop.f32.mrf.mxu0  ;;  %v1318_v59 = vadd.f32 %v1317_v28, %v9771_v3  ;;  %12288 = vst [vmem:[#allocation28_spill] sm:$0xff] %v9791_v22  ;;  %vm12235_vm4 = vcmp.eq.s32.totalorder %v9791_v22, 1 }
 0x187   :  { %v7375_v1 = vpop.f32.mrf.mxu1  ;;  %976 = vst [vmem:[#allocation2 + $0x70] sm:$0xff] %v6974_v45  ;;  %v1351_v13 = vadd.f32 %v1349_v24, %v1085_v47  ;;  %v622_v35 = vadd.f32 %v621_v49, %v9761_v51  ;;  %vm6698_vm6 = vmpackc.low %vm12235_vm4, %vm12236_vm5 }
 0x188   :  { %v625_v38 = vpop.f32.mrf.mxu0  ;;  %v8134_v41 = vpop.eup %8133 }
 0x189   :  { %v6977_v15 = vpack.c.bf16 %v622_v35, %v620_v34  ;;  %8139 = vtanh.f32 %v1351_v13  ;;  %v1350_v25 = vmul.f32 %v8134_v41, %v1318_v59  ;;  %v626_v44 = vadd.f32 %v625_v38, %v9758_v54  ;;  %v8136_v6 = vpop.eup %8135 }
 0x18a   :  { %v627_v43 = vpop.f32.mrf.mxu0  ;;  %v8138_v9 = vpop.eup %8137  ;;  %v1355_v42 = vsub.f32 1.0, %v8136_v6  ;;  %v1359_v47 = vmul.f32 0.0, %v8136_v6  ;;  %v9842_v6 = vld [vmem:[%s12166_s6 + $0x90] ss:$12 sps:$4 sm:$0xff]  }
 0x18b   :  { %979 = vst [vmem:[#allocation2 + $0x88] sm:$0xff] %v6977_v15  ;;  %v628_v19 = vadd.f32 %v627_v43, %v9761_v51  ;;  %v1352_v48 = vadd.f32 %v1350_v25, %v1088_v21  ;;  %v1356_v27 = vsub.f32 1.0, %v8138_v9  ;;  %v1360_v59 = vmul.f32 0.0, %v8138_v9  ;;  %v9849_v9 = vld [vmem:[%s12166_s6 + $0x7c] ss:$12 sps:$4 sm:$0xff]  }
 0x18c   :  { %v629_v50 = vpop.f32.mrf.mxu0 }
 0x18d   :  { %v6980_v52 = vpack.c.bf16 %v628_v19, %v626_v44  ;;  %8141 = vtanh.f32 %v1352_v48  ;;  %v630_v20 = vadd.f32 %v629_v50, %v9758_v54 }
 0x18e   :  { %v631_v56 = vpop.f32.mrf.mxu0 }
 0x18f   :  { %982 = vst [vmem:[#allocation2 + $0xa0] sm:$0xff] %v6980_v52  ;;  %v632_v57 = vadd.f32 %v631_v56, %v9761_v51  ;;  %v9816_v52 = vld [vmem:[%s12166_s6 + $0xa8] ss:$12 sps:$4 sm:$0xff]   ;;  %v9822_v56 = vld [vmem:[%s12166_s6 + $0xb0] ss:$12 sps:$4 sm:$0xff]  }
 0x190   :  { %v635_v58 = vpop.f32.mrf.mxu0 }
 0x191   :  { %v6983_v61 = vpack.c.bf16 %v632_v57, %v630_v20  ;;  %v636_v63 = vadd.f32 %v635_v58, %v9758_v54  ;;  %v9830_v58 = vld [vmem:[%s12166_s6 + $0x94] ss:$12 sps:$4 sm:$0xff]  }
 0x192   :  { %v637_v62 = vpop.f32.mrf.mxu0 }
 0x193   :  { %985 = vst [vmem:[#allocation2 + $0xb8] sm:$0xff] %v6983_v61  ;;  %v638_v11 = vadd.f32 %v637_v62, %v9761_v51 }
 0x194   :  { %v639_v5 = vpop.f32.mrf.mxu0 }
 0x195   :  { %v6986_v7 = vpack.c.bf16 %v638_v11, %v636_v63  ;;  %v640_v39 = vadd.f32 %v639_v5, %v9758_v54 }
 0x196   :  { %v641_v31 = vpop.f32.mrf.mxu0  ;;  %v8140_v10 = vpop.eup %8139 }
 0x197   :  { %988 = vst [vmem:[#allocation2 + $0xd0] sm:$0xff] %v6986_v7  ;;  %v642_v40 = vadd.f32 %v641_v31, %v9761_v51  ;;  %v1357_v23 = vmul.f32 %v8140_v10, %v1355_v42  ;;  %v9865_v42 = vld [vmem:[%s12166_s6 + $0x64] ss:$12 sps:$4 sm:$0xff]  }
 0x198   :  { %v645_v36 = vpop.f32.mrf.mxu0 }
 0x199   :  { %v6989_v33 = vpack.c.bf16 %v642_v40, %v640_v39  ;;  %v646_v29 = vadd.f32 %v645_v36, %v9758_v54  ;;  %v9796_v13 = vadd.f32 %v1359_v47, %v1357_v23  ;;  %v9901_v47 = vld [vmem:[%s12166_s6 + $0x34] ss:$12 sps:$4 sm:$0xff]  }
 0x19a   :  { %v647_v18 = vpop.f32.mrf.mxu0  ;;  %v8142_v28 = vpop.eup %8141 }
 0x19b   :  { %991 = vst [vmem:[#allocation2 + $0xe8] sm:$0xff] %v6989_v33  ;;  %v648_v45 = vadd.f32 %v647_v18, %v9761_v51  ;;  %v1358_v49 = vmul.f32 %v8142_v28, %v1356_v27  ;;  %v9869_v18 = vld [vmem:[#allocation11] sm:$0x7] }
 0x19c   :  { %v649_v24 = vpop.f32.mrf.mxu0 }
 0x19d   :  { %v6992_v1 = vpack.c.bf16 %v648_v45, %v646_v29  ;;  %v9799_v34 = vadd.f32 %v1360_v59, %v1358_v49  ;;  %v650_v38 = vadd.f32 %v649_v24, %v9758_v54  ;;  %v9883_v29 = vld [vmem:[%s12166_s6 + $0x4c] ss:$12 sps:$4 sm:$0xff]  }
 0x19e   :  { %v651_v35 = vpop.f32.mrf.mxu0 }
 0x19f   :  { %994 = vst [vmem:[#allocation2 + $0x100] sm:$0xff] %v6992_v1  ;;  %v652_v41 = vadd.f32 %v651_v35, %v9761_v51  ;;  %v6699_v15 = vpack.c.bf16 %v9799_v34, %v9796_v13  ;;  %v9909_v35 = vld [vmem:[%s12166_s6 + $0x30] ss:$12 sps:$4 sm:$0xff]  }
 0x1a0   :  { %v655_v21 = vpop.f32.mrf.mxu0  ;;  %v9809_v25 = vpop.f32.mrf.mxu1 }
 0x1a1   :  { %v6995_v43 = vpack.c.bf16 %v652_v41, %v650_v38  ;;  %6700 = vmatmul.mubr.msk.bf16.vlgmr.msra.gmra.mxu0 %vm6698_vm6, %v6699_v15  ;;  %7413 = vmatmul.mubr.msk.bf16.vlgmr.msra.gmra.mxu1 %vm6698_vm6, %v6699_v15  ;;  %v656_v48 = vadd.f32 %v655_v21, %v9758_v54  ;;  %v9922_v41 = vrot.slane %v9869_v18, %v9649_v17 }
 0x1a2   :  { %v657_v44 = vpop.f32.mrf.mxu0  ;;  %v7394_v19 = vpop.f32.mrf.mxu1  ;;  %1852 = vmatpush1.bf16.msra.mxu0 %v9816_v52  ;;  %7417 = vmatpush3.bf16.msra.mxu1 %v9822_v56 }
 0x1a3   :  { %997 = vst [vmem:[#allocation2 + $0x118] sm:$0xff] %v6995_v43  ;;  %v658_v50 = vadd.f32 %v657_v44, %v9761_v51  ;;  %1853 = vmatprep.subr.bf16.mxu0 %v9830_v58  ;;  %7418 = vmatprep.subr.bf16.mxu1 %v12206_v32  ;;  %v9928_v19 = vld [vmem:[%s12166_s6 + $0x18] ss:$12 sps:$4 sm:$0xff]  }
 0x1a4   :  { %v659_v20 = vpop.f32.mrf.mxu0  ;;  %v9825_v57 = vpop.f32.mrf.mxu1  ;;  %1883 = vmatprep.mubr.bf16.mxu0 %v12182_v0  ;;  %7432 = vmatprep.mubr.msk.bf16.mxu1 %vm9001_vm3, %v12206_v32 }
 0x1a5   :  { %v6998_v61 = vpack.c.bf16 %v658_v50, %v656_v48  ;;  %v660_v11 = vadd.f32 %v659_v20, %v9758_v54  ;;  %v9935_v48 = vld [vmem:[%s12166_s6 + $0x4] ss:$12 sps:$4 sm:$0xff]  }
 0x1a6   :  { %v661_v62 = vpop.f32.mrf.mxu0  ;;  %v7395_v63 = vpop.f32.mrf.mxu1  ;;  %1854 = vmatpush1.bf16.msra.mxu0 %v9842_v6  ;;  %7419 = vmatpush3.bf16.msra.mxu1 %v9458_v37  ;;  %v9858_v37 = vld [vmem:[%s12166_s6 + $0x78] ss:$12 sps:$4 sm:$0xff]   ;;  %12289 = vst [vmem:[#allocation29_spill] sm:$0xff] %v9935_v48 }
 0x1a7   :  { %1000 = vst [vmem:[#allocation2 + $0x130] sm:$0xff] %v6998_v61  ;;  %v662_v5 = vadd.f32 %v661_v62, %v9761_v51  ;;  %1855 = vmatprep.subr.bf16.mxu0 %v9849_v9  ;;  %7420 = vmatprep.subr.bf16.mxu1 %v12206_v32 }
 0x1a8   :  { %v665_v7 = vpop.f32.mrf.mxu0 }
 0x1a9   :  { %v7001_v31 = vpack.c.bf16 %v662_v5, %v660_v11  ;;  %v666_v39 = vadd.f32 %v665_v7, %v9758_v54  ;;  %v9951_v7 = vld [vmem:[%s12164_s4 + $0xac] ss:$12 sps:$4 sm:$0xff]  }
 0x1aa   :  { %v667_v10 = vpop.f32.mrf.mxu0  ;;  %1856 = vmatpush1.bf16.msra.mxu0 %v9858_v37  ;;  %7421 = vmatpush3.bf16.msra.mxu1 %v9480_v46  ;;  %v9876_v46 = vld [vmem:[%s12166_s6 + $0x60] ss:$12 sps:$4 sm:$0xff]   ;;  %12291 = vst [vmem:[#allocation31_spill] sm:$0xff] %v9951_v7 }
 0x1ab   :  { %1003 = vst [vmem:[#allocation2 + $0x148] sm:$0xff] %v7001_v31  ;;  %v668_v40 = vadd.f32 %v667_v10, %v9761_v51  ;;  %1857 = vmatprep.subr.bf16.mxu0 %v9865_v42  ;;  %7422 = vmatprep.subr.bf16.mxu1 %v12206_v32 }
 0x1ac   :  { %v669_v36 = vpop.f32.mrf.mxu0 }
 0x1ad   :  { %v7004_v33 = vpack.c.bf16 %v668_v40, %v666_v39  ;;  %v670_v27 = vadd.f32 %v669_v36, %v9758_v54 }
 0x1ae   :  { %v671_v23 = vpop.f32.mrf.mxu0  ;;  %1858 = vmatpush1.bf16.msra.mxu0 %v9876_v46  ;;  %7423 = vmatpush3.bf16.msra.mxu1 %v9503_v55  ;;  %v9894_v55 = vld [vmem:[%s12166_s6 + $0x48] ss:$12 sps:$4 sm:$0xff]  }
 0x1af   :  { %1006 = vst [vmem:[#allocation2 + $0x160] sm:$0xff] %v7004_v33  ;;  %v672_v28 = vadd.f32 %v671_v23, %v9761_v51  ;;  %1859 = vmatprep.subr.bf16.mxu0 %v9883_v29  ;;  %7424 = vmatprep.subr.bf16.mxu1 %v12206_v32  ;;  %v9889_v51 = vrot.slane %v9869_v18, %v9646_v16 }
 0x1b0   :  { %v1571_v45 = vpop.f32.mrf.mxu0 }
 0x1b1   :  { %v7007_v54 = vpack.c.bf16 %v672_v28, %v670_v27  ;;  %v1572_v24 = vadd.f32 %v1571_v45, %v9889_v51  ;;  %v9957_v27 = vrot.slane %v9869_v18, %v9643_v14  ;;  %v1680_v14 = vld [vmem:[#allocation2 + $0x48] sm:$0xff] }
 0x1b2   :  { %1860 = vmatpush1.bf16.msra.mxu0 %v9894_v55  ;;  %7425 = vmatpush3.bf16.msra.mxu1 %v9520_v60  ;;  %v1573_v49 = vpop.f32.mrf.mxu0  ;;  %v9916_v60 = vld [vmem:[%s12166_s6 + $0x1c] ss:$12 sps:$4 sm:$0xff]  }
 0x1b3   :  { %1009 = vst [vmem:[#allocation2 + $0x178] sm:$0xff] %v7007_v54  ;;  %1861 = vmatprep.subr.bf16.mxu0 %v9901_v47  ;;  %7426 = vmatprep.subr.bf16.mxu1 %v12206_v32  ;;  %v1574_v20 = vadd.f32 %v1573_v49, %v9922_v41  ;;  %v1615_v45 = vadd.f32 %v9809_v25, %v9957_v27 }
 0x1b4   :  { %v1575_v15 = vpop.f32.mrf.mxu0 }
 0x1b6   :  { %v1378_v59 = vld [vmem:[#allocation2 + $0x15c] sm:$0xff]  ;;  %1862 = vmatpush1.bf16.msra.mxu0 %v9909_v35  ;;  %7427 = vmatpush3.bf16.msra.mxu1 %v9538_v2  ;;  %v1576_v2 = vadd.f32 %v1575_v15, %v9889_v51  ;;  %v1577_v62 = vpop.f32.mrf.mxu0 }
 0x1b7   :  { %v1382_v1 = vunpack.c.l.bf16 %v1378_v59  ;;  %1863 = vmatprep.subr.bf16.mxu0 %v9916_v60  ;;  %7428 = vmatprep.subr.bf16.mxu1 %v12206_v32  ;;  %v1383_v50 = vunpack.c.h.bf16 %v1378_v59  ;;  %v1578_v5 = vadd.f32 %v1577_v62, %v9922_v41  ;;  %v9963_v62 = vpop.permute.xlu1 %1666 }
 0x1b8   :  { %12292 = vst [vmem:[#allocation32_spill] sm:$0xff] %v9963_v62  ;;  %vm1671_vm7 = vcmp.eq.s32.totalorder %v9963_v62, 1 }
 0x1b9   :  { %v1621_v38 = vadd.f32 %v1572_v24, %v1382_v1  ;;  %v1635_v31 = vadd.f32 %v1574_v20, %v1383_v50 }
 0x1ba   :  { %v1380_v21 = vld [vmem:[#allocation2 + $0x174] sm:$0xff]  ;;  %1864 = vmatpush1.bf16.msra.mxu0 %v9928_v19  ;;  %7429 = vmatpush3.bf16.msra.mxu1 %v9552_v4  ;;  %v9943_v4 = vld [vmem:[%s12166_s6] ss:$12 sps:$4 sm:$0xff]  }
 0x1bb   :  { %v6692_v43 = vmul.f32 -1.442695, %v1621_v38  ;;  %v1385_v44 = vunpack.c.l.bf16 %v1380_v21  ;;  %1865 = vmatprep.subr.bf16.mxu0 %v9935_v48  ;;  %7430 = vmatprep.subr.bf16.mxu1 %v12206_v32  ;;  %v1386_v63 = vunpack.c.h.bf16 %v1380_v21  ;;  %12290 = vst [vmem:[#allocation30_spill] sm:$0xff] %v9943_v4  ;;  %v6694_v39 = vmul.f32 -1.442695, %v1635_v31 }
 0x1bc   :  { %v1379_v24 = vld [vmem:[#allocation2 + $0x164] ss:$24 sps:$4 sm:$0xff]  }
 0x1bd   :  { %8143 = vpow2.f32 %v6692_v43  ;;  %v1622_v61 = vadd.f32 %v1576_v2, %v1385_v44  ;;  %v1636_v10 = vadd.f32 %v1578_v5, %v1386_v63  ;;  %v1384_v38 = vunpack.c.l.bf16 %v1379_v24 }
 0x1be   :  { %1866 = vmatpush1.bf16.msra.mxu0 %v9943_v4  ;;  %7431 = vmatpush3.bf16.msra.mxu1 %v9569_v8  ;;  %v1618_v43 = vadd.f32 %v9825_v57, %v9957_v27  ;;  %v1387_v18 = vunpack.c.h.bf16 %v1379_v24  ;;  %v9965_v57 = vpop.permute.xlu1 %1669  ;;  %v10010_v24 = vld [vmem:[%s12164_s4 + $0x98] ss:$12 sps:$4 sm:$0xff]  }
 0x1bf   :  { %v6693_v11 = vmul.f32 -1.442695, %v1622_v61  ;;  %2008 = vmatprep.subr.bf16.mxu0 %v9951_v7  ;;  %7436 = vmatprep.subr.bf16.mxu1 %v12206_v32  ;;  %v6695_v40 = vmul.f32 -1.442695, %v1636_v10  ;;  %12293 = vst [vmem:[#allocation33_spill] sm:$0xff] %v9965_v57  ;;  %vm1672_vm8 = vcmp.eq.s32.totalorder %v9965_v57, 1 }
 0x1c0   :  { %vm6710_vm9 = vmpackc.low %vm1672_vm8, %vm1671_vm7 }
 0x1c1   :  { %8145 = vpow2.f32 %v6693_v11 }
 0x1c2   :  { %8147 = vpow2.f32 %v6694_v39 }
 0x1c3   :  { %8149 = vpow2.f32 %v6695_v40 }
 0x1ca   :  { %v8144_v36 = vpop.eup %8143 }
 0x1cb   :  { %v1629_v8 = vadd.f32 1.0, %v8144_v36 }
 0x1cd   :  { %8151 = vrcp.f32 %v1629_v8 }
 0x1ce   :  { %v8146_v33 = vpop.eup %8145 }
 0x1cf   :  { %v1630_v23 = vadd.f32 1.0, %v8146_v33  ;;  %v8148_v28 = vpop.eup %8147 }
 0x1d0   :  { %v8150_v54 = vpop.eup %8149  ;;  %v1643_v49 = vadd.f32 1.0, %v8148_v28  ;;  %v9988_v28 = vld [vmem:[%s12164_s4 + $0xb0] ss:$12 sps:$4 sm:$0xff]  }
 0x1d1   :  { %8153 = vrcp.f32 %v1630_v23  ;;  %v1644_v1 = vadd.f32 1.0, %v8150_v54  ;;  %v9982_v23 = vld [vmem:[%s12164_s4 + $0xa8] ss:$12 sps:$4 sm:$0xff]  }
 0x1d2   :  { %8155 = vrcp.f32 %v1643_v49  ;;  %v9994_v54 = vld [vmem:[%s12164_s4 + $0x94] ss:$12 sps:$4 sm:$0xff]   ;;  %v10016_v49 = vld [vmem:[%s12164_s4 + $0x7c] ss:$12 sps:$4 sm:$0xff]  }
 0x1d3   :  { %8157 = vrcp.f32 %v1644_v1  ;;  %v10029_v1 = vld [vmem:[%s12164_s4 + $0x80] ss:$12 sps:$4 sm:$0xff]  }
 0x1da   :  { %v8152_v59 = vpop.eup %8151 }
 0x1db   :  { %v1649_v15 = vmul.f32 %v8152_v59, %v1615_v45  ;;  %v10004_v45 = vld [vmem:[%s12164_s4 + $0x90] ss:$12 sps:$4 sm:$0xff]   ;;  %v10023_v59 = vld [vmem:[%s12164_s4 + $0x78] ss:$12 sps:$4 sm:$0xff]  }
 0x1dd   :  { %v1651_v21 = vadd.f32 %v1649_v15, %v1384_v38  ;;  %v10035_v38 = vld [vmem:[%s12164_s4 + $0x64] ss:$12 sps:$4 sm:$0xff]   ;;  %v10042_v15 = vld [vmem:[%s12164_s4 + $0x60] ss:$12 sps:$4 sm:$0xff]  }
 0x1de   :  { %v8154_v44 = vpop.eup %8153 }
 0x1df   :  { %8159 = vtanh.f32 %v1651_v21  ;;  %v1650_v2 = vmul.f32 %v8154_v44, %v1618_v43  ;;  %v8156_v20 = vpop.eup %8155  ;;  %v10048_v21 = vld [vmem:[%s12164_s4 + $0x68] ss:$12 sps:$4 sm:$0xff]   ;;  %v10054_v43 = vld [vmem:[%s12164_s4 + $0x4c] ss:$12 sps:$4 sm:$0xff]  }
 0x1e0   :  { %v8158_v25 = vpop.eup %8157  ;;  %v1655_v63 = vsub.f32 1.0, %v8156_v20  ;;  %v1659_v39 = vmul.f32 0.0, %v8156_v20  ;;  %12294 = vst [vmem:[#allocation34_spill] sm:$0xff] %v10048_v21  ;;  %12295 = vst [vmem:[#allocation35_spill] sm:$0xff] %v10054_v43  ;;  %v10061_v44 = vld [vmem:[%s12164_s4 + $0x48] ss:$12 sps:$4 sm:$0xff]  }
 0x1e1   :  { %v1652_v50 = vadd.f32 %v1650_v2, %v1387_v18  ;;  %v1656_v11 = vsub.f32 1.0, %v8158_v25  ;;  %v1660_v40 = vmul.f32 0.0, %v8158_v25  ;;  %12296 = vst [vmem:[#allocation36_spill] sm:$0xff] %v10061_v44  ;;  %v10067_v18 = vld [vmem:[%s12164_s4 + $0x50] ss:$12 sps:$4 sm:$0xff]  }
 0x1e2   :  { %12297 = vst [vmem:[#allocation37_spill] sm:$0xff] %v10067_v18  ;;  %v10073_v2 = vld [vmem:[%s12164_s4 + $0x34] ss:$12 sps:$4 sm:$0xff]   ;;  %v10086_v20 = vld [vmem:[%s12164_s4 + $0x38] ss:$12 sps:$4 sm:$0xff]  }
 0x1e3   :  { %8161 = vtanh.f32 %v1652_v50  ;;  %12298 = vst [vmem:[#allocation38_spill] sm:$0xff] %v10073_v2  ;;  %v10080_v50 = vld [vmem:[%s12164_s4 + $0x30] ss:$12 sps:$4 sm:$0xff]   ;;  %12300 = vst [vmem:[#allocation40_spill] sm:$0xff] %v10086_v20 }
 0x1e4   :  { %12299 = vst [vmem:[#allocation39_spill] sm:$0xff] %v10080_v50  ;;  %v10092_v25 = vld [vmem:[%s12164_s4 + $0x1c] ss:$12 sps:$4 sm:$0xff]  }
 0x1e5   :  { %12301 = vst [vmem:[#allocation41_spill] sm:$0xff] %v10092_v25 }
 0x1ec   :  { %v8160_v61 = vpop.eup %8159 }
 0x1ed   :  { %v1657_v5 = vmul.f32 %v8160_v61, %v1655_v63  ;;  %v10099_v61 = vld [vmem:[%s12164_s4 + $0x18] ss:$12 sps:$4 sm:$0xff]   ;;  %v10105_v63 = vld [vmem:[%s12164_s4 + $0x20] ss:$12 sps:$4 sm:$0xff]  }
 0x1ee   :  { %12302 = vst [vmem:[#allocation42_spill] sm:$0xff] %v10099_v61  ;;  %12303 = vst [vmem:[#allocation43_spill] sm:$0xff] %v10105_v63 }
 0x1ef   :  { %v9969_v36 = vadd.f32 %v1659_v39, %v1657_v5  ;;  %v10118_v5 = vld [vmem:[%s12164_s4] ss:$12 sps:$4 sm:$0xff]  }
 0x1f0   :  { %v8162_v31 = vpop.eup %8161  ;;  %12305 = vst [vmem:[#allocation45_spill] sm:$0xff] %v10118_v5  ;;  %v1678_v39 = vld [vmem:[#allocation2 + $0x30] sm:$0xff] }
 0x1f1   :  { %v1658_v10 = vmul.f32 %v8162_v31, %v1656_v11  ;;  %v10111_v11 = vld [vmem:[%s12164_s4 + $0x4] ss:$12 sps:$4 sm:$0xff]   ;;  %v10124_v31 = vld [vmem:[%s12164_s4 + $0x8] ss:$12 sps:$4 sm:$0xff]   ;;  %v1682_v12 = vunpack.c.l.bf16 %v1678_v39 }
 0x1f2   :  { %12304 = vst [vmem:[#allocation44_spill] sm:$0xff] %v10111_v11  ;;  %12306 = vst [vmem:[#allocation46_spill] sm:$0xff] %v10124_v31 }
 0x1f3   :  { %v9971_v8 = vadd.f32 %v1660_v40, %v1658_v10  ;;  %v10130_v10 = vld [vmem:[%s12166_s6 + $0xac] ss:$12 sps:$4 sm:$0xff]  }
 0x1f4   :  { %12307 = vst [vmem:[#allocation47_spill] sm:$0xff] %v10130_v10 }
 0x1f5   :  { %v6711_v33 = vpack.c.bf16 %v9971_v8, %v9969_v36 }
 0x1f7   :  { %6712 = vmatmul.mubr.msk.bf16.vlgmr.msra.gmra.mxu0 %vm6710_vm9, %v6711_v33  ;;  %7433 = vmatmul.mubr.msk.bf16.vlgmr.msra.gmra.mxu1 %vm6710_vm9, %v6711_v33 }
 0x1f8   :  { %2009 = vmatpush1.bf16.msra.mxu0 %v9982_v23  ;;  %7437 = vmatpush3.bf16.msra.mxu1 %v9988_v28 }
 0x1f9   :  { %2010 = vmatprep.subr.bf16.mxu0 %v9994_v54  ;;  %7438 = vmatprep.subr.bf16.mxu1 %v12206_v32 }
 0x1fa   :  { %2040 = vmatprep.mubr.bf16.mxu0 %v12182_v0  ;;  %7452 = vmatprep.mubr.msk.bf16.mxu1 %vm9001_vm3, %v12206_v32 }
 0x1fc   :  { %2011 = vmatpush1.bf16.msra.mxu0 %v10004_v45  ;;  %7439 = vmatpush3.bf16.msra.mxu1 %v10010_v24 }
 0x1fd   :  { %2012 = vmatprep.subr.bf16.mxu0 %v10016_v49  ;;  %7440 = vmatprep.subr.bf16.mxu1 %v12206_v32 }
 0x200   :  { %2013 = vmatpush1.bf16.msra.mxu0 %v10023_v59  ;;  %7441 = vmatpush3.bf16.msra.mxu1 %v10029_v1 }
 0x201   :  { %2014 = vmatprep.subr.bf16.mxu0 %v10035_v38  ;;  %7442 = vmatprep.subr.bf16.mxu1 %v12206_v32 }
 0x204   :  { %2015 = vmatpush1.bf16.msra.mxu0 %v10042_v15  ;;  %7443 = vmatpush3.bf16.msra.mxu1 %v10048_v21 }
 0x205   :  { %2016 = vmatprep.subr.bf16.mxu0 %v10054_v43  ;;  %7444 = vmatprep.subr.bf16.mxu1 %v12206_v32 }
 0x208   :  { %2017 = vmatpush1.bf16.msra.mxu0 %v10061_v44  ;;  %7445 = vmatpush3.bf16.msra.mxu1 %v10067_v18 }
 0x209   :  { %2018 = vmatprep.subr.bf16.mxu0 %v10073_v2  ;;  %7446 = vmatprep.subr.bf16.mxu1 %v12206_v32 }
 0x20c   :  { %2019 = vmatpush1.bf16.msra.mxu0 %v10080_v50  ;;  %7447 = vmatpush3.bf16.msra.mxu1 %v10086_v20  ;;  %v1683_v50 = vunpack.c.h.bf16 %v1678_v39 }
 0x20d   :  { %2020 = vmatprep.subr.bf16.mxu0 %v10092_v25  ;;  %7448 = vmatprep.subr.bf16.mxu1 %v12206_v32  ;;  %v1685_v25 = vunpack.c.l.bf16 %v1680_v14 }
 0x210   :  { %2021 = vmatpush1.bf16.msra.mxu0 %v10099_v61  ;;  %7449 = vmatpush3.bf16.msra.mxu1 %v10105_v63 }
 0x211   :  { %2022 = vmatprep.subr.bf16.mxu0 %v10111_v11  ;;  %7450 = vmatprep.subr.bf16.mxu1 %v12206_v32 }
 0x214   :  { %2023 = vmatpush1.bf16.msra.mxu0 %v10118_v5  ;;  %7451 = vmatpush3.bf16.msra.mxu1 %v10124_v31 }
 0x215   :  { %2165 = vmatprep.subr.bf16.mxu0 %v10130_v10  ;;  %7456 = vmatprep.subr.bf16.mxu1 %v12206_v32 }
 0x261   :  { %v1728_v40 = vpop.f32.mrf.mxu0  ;;  %v1771_v33 = vpop.f32.mrf.mxu1 }
 0x262   :  { %v1729_v0 = vadd.f32 %v1728_v40, %v9730_v30 }
 0x263   :  { %v1730_v17 = vpop.f32.mrf.mxu0  ;;  %v7414_v16 = vpop.f32.mrf.mxu1 }
 0x264   :  { %v1778_v5 = vadd.f32 %v1729_v0, %v1682_v12  ;;  %v1731_v61 = vadd.f32 %v1730_v17, %v9741_v53  ;;  %v1686_v16 = vunpack.c.h.bf16 %v1680_v14 }
 0x265   :  { %v1732_v31 = vpop.f32.mrf.mxu0  ;;  %v1774_v11 = vpop.f32.mrf.mxu1 }
 0x266   :  { %v6704_v63 = vmul.f32 -1.442695, %v1778_v5  ;;  %v1733_v10 = vadd.f32 %v1732_v31, %v9730_v30  ;;  %v1792_v40 = vadd.f32 %v1731_v61, %v1683_v50  ;;  %v1772_v50 = vadd.f32 %v1771_v33, %v9771_v3 }
 0x267   :  { %v1734_v20 = vpop.f32.mrf.mxu0  ;;  %v7415_v32 = vpop.f32.mrf.mxu1  ;;  %v1775_v61 = vadd.f32 %v1774_v11, %v9771_v3  ;;  %v1374_v11 = vsel %vm12235_vm4, %v9799_v34, 0.0 }
 0x268   :  { %8163 = vpow2.f32 %v6704_v63  ;;  %v1779_v2 = vadd.f32 %v1733_v10, %v1685_v25  ;;  %v1735_v18 = vadd.f32 %v1734_v20, %v9741_v53  ;;  %v6706_v12 = vmul.f32 -1.442695, %v1792_v40  ;;  %v1679_v10 = vld [vmem:[#allocation2 + $0x38] ss:$24 sps:$4 sm:$0xff]  }
 0x269   :  { %v1687_v39 = vunpack.c.h.bf16 %v1679_v10 }
 0x26a   :  { %v6705_v44 = vmul.f32 -1.442695, %v1779_v2  ;;  %v1793_v0 = vadd.f32 %v1735_v18, %v1686_v16 }
 0x26c   :  { %8165 = vpow2.f32 %v6705_v44  ;;  %v6707_v43 = vmul.f32 -1.442695, %v1793_v0  ;;  %v1684_v44 = vunpack.c.l.bf16 %v1679_v10 }
 0x26d   :  { %8167 = vpow2.f32 %v6706_v12 }
 0x26e   :  { %8169 = vpow2.f32 %v6707_v43 }
 0x275   :  { %v8164_v5 = vpop.eup %8163 }
 0x276   :  { %v1786_v17 = vadd.f32 1.0, %v8164_v5 }
 0x278   :  { %8171 = vrcp.f32 %v1786_v17  ;;  %v1373_v17 = vsel %vm12236_vm5, %v9796_v13, 0.0 }
 0x279   :  { %v8166_v31 = vpop.eup %8165 }
 0x27a   :  { %v1787_v30 = vadd.f32 1.0, %v8166_v31  ;;  %v8168_v32 = vpop.eup %8167 }
 0x27b   :  { %v8170_v63 = vpop.eup %8169  ;;  %v1800_v25 = vadd.f32 1.0, %v8168_v32 }
 0x27c   :  { %8173 = vrcp.f32 %v1787_v30  ;;  %v1801_v14 = vadd.f32 1.0, %v8170_v63 }
 0x27d   :  { %8175 = vrcp.f32 %v1800_v25 }
 0x27e   :  { %8177 = vrcp.f32 %v1801_v14  ;;  %v10148_v14 = vpop.permute.xlu1 %1826 }
 0x27f   :  { %12309 = vst [vmem:[#allocation49_spill] sm:$0xff] %v10148_v14  ;;  %vm1829_vm11 = vcmp.eq.s32.totalorder %v10148_v14, 1  ;;  %v10231_v14 = vld [vmem:[%s12166_s6 + $0x8] ss:$12 sps:$4 sm:$0xff]  }
 0x280   :  { %12312 = vst [vmem:[#allocation50_spill] sm:$0xff] %v10231_v14 }
 0x285   :  { %v8172_v2 = vpop.eup %8171 }
 0x286   :  { %v1806_v18 = vmul.f32 %v8172_v2, %v1772_v50  ;;  %v10146_v2 = vpop.permute.xlu0 %1823 }
 0x287   :  { %12308 = vst [vmem:[#allocation48_spill] sm:$0xff] %v10146_v2  ;;  %vm1828_vm10 = vcmp.eq.s32.totalorder %v10146_v2, 1 }
 0x288   :  { %v1808_v20 = vadd.f32 %v1806_v18, %v1684_v44 }
 0x289   :  { %v8174_v43 = vpop.eup %8173 }
 0x28a   :  { %8179 = vtanh.f32 %v1808_v20  ;;  %v1807_v40 = vmul.f32 %v8174_v43, %v1775_v61  ;;  %v8176_v16 = vpop.eup %8175  ;;  %v12310_v20 = vmov 0.0   ;;  %v12311_v61 = vmov 0   ;;  %v10173_v43 = vld [vmem:[%s12166_s6 + $0x98] ss:$12 sps:$4 sm:$0xff]  }
 0x28b   :  { %v8178_v0 = vpop.eup %8177  ;;  %v1812_v12 = vsub.f32 1.0, %v8176_v16  ;;  %v1816_v32 = vmul.f32 %v8176_v16, %v1373_v17  ;;  %v10200_v16 = vld [vmem:[%s12166_s6 + $0x50] ss:$12 sps:$4 sm:$0xff]  }
 0x28c   :  { %v1809_v30 = vadd.f32 %v1807_v40, %v1687_v39  ;;  %v1813_v31 = vsub.f32 1.0, %v8178_v0  ;;  %v1817_v10 = vmul.f32 %v8178_v0, %v1374_v11  ;;  %v10182_v39 = vld [vmem:[%s12166_s6 + $0x80] ss:$12 sps:$4 sm:$0xff]   ;;  %v10191_v40 = vld [vmem:[%s12166_s6 + $0x68] ss:$12 sps:$4 sm:$0xff]  }
 0x28e   :  { %8181 = vtanh.f32 %v1809_v30  ;;  %v1835_v30 = vld [vmem:[#allocation2 + $0x12c] sm:$0xff] }
 0x297   :  { %v8180_v5 = vpop.eup %8179 }
 0x298   :  { %v1814_v33 = vmul.f32 %v8180_v5, %v1812_v12  ;;  %v1839_v5 = vunpack.c.l.bf16 %v1835_v30 }
 0x29a   :  { %v1818_v50 = vadd.f32 %v1816_v32, %v1814_v33  ;;  %v1837_v32 = vld [vmem:[#allocation2 + $0x144] sm:$0xff] }
 0x29b   :  { %v8182_v63 = vpop.eup %8181 }
 0x29c   :  { %v1815_v25 = vmul.f32 %v8182_v63, %v1813_v31  ;;  %v10154_v13 = vsel %vm1828_vm10, %v1818_v50, %v1373_v17  ;;  %v10210_v63 = vld [vmem:[%s12166_s6 + $0x38] ss:$12 sps:$4 sm:$0xff]  }
 0x29e   :  { %v1819_v44 = vadd.f32 %v1817_v10, %v1815_v25 }
 0x2a0   :  { %v10158_v18 = vsel %vm1829_vm11, %v1819_v44, %v1374_v11 }
 0x2a1   :  { %v2007_v34 = vpack.c.bf16 %v10158_v18, %v10154_v13 }
 0x2a3   :  { %2041 = vmatmul.mubr.bf16.vlgmr.msra.gmra.mxu0 %v2007_v34  ;;  %7453 = vmatmul.mubr.bf16.vlgmr.msra.gmra.mxu1 %v2007_v34  ;;  %v1842_v34 = vunpack.c.l.bf16 %v1837_v32 }
 0x2a4   :  { %2166 = vmatpush1.bf16.msra.mxu0 %v9816_v52  ;;  %7457 = vmatpush3.bf16.msra.mxu1 %v9822_v56 }
 0x2a5   :  { %2167 = vmatprep.subr.bf16.mxu0 %v9830_v58  ;;  %7458 = vmatprep.subr.bf16.mxu1 %v12310_v20 }
 0x2a6   :  { %2197 = vmatprep.mubr.bf16.mxu0 %v12311_v61  ;;  %7472 = vmatprep.mubr.msk.bf16.mxu1 %vm9001_vm3, %v12310_v20 }
 0x2a8   :  { %2168 = vmatpush1.bf16.msra.mxu0 %v9842_v6  ;;  %7459 = vmatpush3.bf16.msra.mxu1 %v10173_v43 }
 0x2a9   :  { %2169 = vmatprep.subr.bf16.mxu0 %v9849_v9  ;;  %7460 = vmatprep.subr.bf16.mxu1 %v12310_v20 }
 0x2ac   :  { %2170 = vmatpush1.bf16.msra.mxu0 %v9858_v37  ;;  %7461 = vmatpush3.bf16.msra.mxu1 %v10182_v39 }
 0x2ad   :  { %2171 = vmatprep.subr.bf16.mxu0 %v9865_v42  ;;  %7462 = vmatprep.subr.bf16.mxu1 %v12310_v20 }
 0x2b0   :  { %2172 = vmatpush1.bf16.msra.mxu0 %v9876_v46  ;;  %7463 = vmatpush3.bf16.msra.mxu1 %v10191_v40 }
 0x2b1   :  { %2173 = vmatprep.subr.bf16.mxu0 %v9883_v29  ;;  %7464 = vmatprep.subr.bf16.mxu1 %v12310_v20 }
 0x2b4   :  { %2174 = vmatpush1.bf16.msra.mxu0 %v9894_v55  ;;  %7465 = vmatpush3.bf16.msra.mxu1 %v10200_v16 }
 0x2b5   :  { %2175 = vmatprep.subr.bf16.mxu0 %v9901_v47  ;;  %7466 = vmatprep.subr.bf16.mxu1 %v12310_v20 }
 0x2b7   :  { %v1885_v0 = vpop.f32.mrf.mxu0  ;;  %v1928_v12 = vpop.f32.mrf.mxu1 }
 0x2b8   :  { %v1886_v33 = vadd.f32 %v1885_v0, %v9889_v51  ;;  %2176 = vmatpush1.bf16.msra.mxu0 %v9909_v35  ;;  %7467 = vmatpush3.bf16.msra.mxu1 %v10210_v63 }
 0x2b9   :  { %v1887_v17 = vpop.f32.mrf.mxu0  ;;  %v7434_v31 = vpop.f32.mrf.mxu1  ;;  %2177 = vmatprep.subr.bf16.mxu0 %v9916_v60  ;;  %7468 = vmatprep.subr.bf16.mxu1 %v12310_v20 }
 0x2ba   :  { %v1935_v11 = vadd.f32 %v1886_v33, %v1839_v5  ;;  %v1888_v44 = vadd.f32 %v1887_v17, %v9922_v41  ;;  %v10221_v5 = vld [vmem:[%s12166_s6 + $0x20] ss:$12 sps:$4 sm:$0xff]   ;;  %v1840_v33 = vunpack.c.h.bf16 %v1835_v30 }
 0x2bb   :  { %v1889_v25 = vpop.f32.mrf.mxu0  ;;  %v1931_v10 = vpop.f32.mrf.mxu1 }
 0x2bc   :  { %v6716_v50 = vmul.f32 -1.442695, %v1935_v11  ;;  %v1890_v0 = vadd.f32 %v1889_v25, %v9889_v51  ;;  %2178 = vmatpush1.bf16.msra.mxu0 %v9928_v19  ;;  %7469 = vmatpush3.bf16.msra.mxu1 %v10221_v5  ;;  %v1949_v11 = vadd.f32 %v1888_v44, %v1840_v33  ;;  %v1843_v25 = vunpack.c.h.bf16 %v1837_v32 }
 0x2bd   :  { %v1891_v31 = vpop.f32.mrf.mxu0  ;;  %v7435_v22 = vpop.f32.mrf.mxu1  ;;  %2179 = vmatprep.subr.bf16.mxu0 %v9935_v48  ;;  %7470 = vmatprep.subr.bf16.mxu1 %v12310_v20 }
 0x2be   :  { %8183 = vpow2.f32 %v6716_v50  ;;  %v1936_v26 = vadd.f32 %v1890_v0, %v1842_v34  ;;  %v1892_v17 = vadd.f32 %v1891_v31, %v9922_v41  ;;  %v6718_v50 = vmul.f32 -1.442695, %v1949_v11 }
 0x2c0   :  { %v6717_v22 = vmul.f32 -1.442695, %v1936_v26  ;;  %2180 = vmatpush1.bf16.msra.mxu0 %v9943_v4  ;;  %7471 = vmatpush3.bf16.msra.mxu1 %v10231_v14  ;;  %v1950_v30 = vadd.f32 %v1892_v17, %v1843_v25  ;;  %v1836_v14 = vld [vmem:[#allocation2 + $0x134] ss:$24 sps:$4 sm:$0xff]   ;;  %v1932_v25 = vadd.f32 %v1931_v10, %v9957_v27 }
 0x2c1   :  { %2322 = vmatprep.subr.bf16.mxu0 %v9951_v7  ;;  %7476 = vmatprep.subr.bf16.mxu1 %v12310_v20  ;;  %v1841_v48 = vunpack.c.l.bf16 %v1836_v14 }
 0x2c2   :  { %8185 = vpow2.f32 %v6717_v22  ;;  %v6719_v34 = vmul.f32 -1.442695, %v1950_v30  ;;  %v1929_v22 = vadd.f32 %v1928_v12, %v9957_v27 }
 0x2c3   :  { %8187 = vpow2.f32 %v6718_v50  ;;  %v1844_v50 = vunpack.c.h.bf16 %v1836_v14 }
 0x2c4   :  { %8189 = vpow2.f32 %v6719_v34 }
 0x2cb   :  { %v8184_v26 = vpop.eup %8183 }
 0x2cc   :  { %v1943_v32 = vadd.f32 1.0, %v8184_v26 }
 0x2ce   :  { %8191 = vrcp.f32 %v1943_v32 }
 0x2cf   :  { %v8186_v44 = vpop.eup %8185 }
 0x2d0   :  { %v1944_v0 = vadd.f32 1.0, %v8186_v44  ;;  %v8188_v31 = vpop.eup %8187 }
 0x2d1   :  { %v8190_v33 = vpop.eup %8189  ;;  %v1957_v2 = vadd.f32 1.0, %v8188_v31 }
 0x2d2   :  { %8193 = vrcp.f32 %v1944_v0  ;;  %v1958_v4 = vadd.f32 1.0, %v8190_v33 }
 0x2d3   :  { %8195 = vrcp.f32 %v1957_v2 }
 0x2d4   :  { %8197 = vrcp.f32 %v1958_v4  ;;  %v1674_v4 = vsel %vm1672_vm8, %v9971_v8, 0.0 }
 0x2db   :  { %v8192_v7 = vpop.eup %8191 }
 0x2dc   :  { %v1963_v17 = vmul.f32 %v8192_v7, %v1929_v22  ;;  %v1673_v7 = vsel %vm1671_vm7, %v9969_v36, 0.0 }
 0x2de   :  { %v1965_v11 = vadd.f32 %v1963_v17, %v1841_v48  ;;  %v10244_v17 = vpop.permute.xlu0 %1980 }
 0x2df   :  { %v8194_v30 = vpop.eup %8193  ;;  %12313 = vst [vmem:[#allocation51_spill] sm:$0xff] %v10244_v17  ;;  %vm1985_vm12 = vcmp.eq.s32.totalorder %v10244_v17, 1  ;;  %v1994_v17 = vld [vmem:[#allocation2 + $0x78] sm:$0xff] }
 0x2e0   :  { %8199 = vtanh.f32 %v1965_v11  ;;  %v1964_v34 = vmul.f32 %v8194_v30, %v1932_v25  ;;  %v8196_v32 = vpop.eup %8195  ;;  %v10246_v11 = vpop.permute.xlu1 %1983 }
 0x2e1   :  { %v8198_v44 = vpop.eup %8197  ;;  %v1969_v0 = vsub.f32 1.0, %v8196_v32  ;;  %v1973_v48 = vmul.f32 %v8196_v32, %v1673_v7  ;;  %12314 = vst [vmem:[#allocation52_spill] sm:$0xff] %v10246_v11  ;;  %vm1986_vm13 = vcmp.eq.s32.totalorder %v10246_v11, 1  ;;  %v12318_v32 = vld [vmem:[#allocation38_spill] sm:$0xff] }
 0x2e2   :  { %v1966_v26 = vadd.f32 %v1964_v34, %v1844_v50  ;;  %v1970_v2 = vsub.f32 1.0, %v8198_v44  ;;  %v1974_v10 = vmul.f32 %v8198_v44, %v1674_v4  ;;  %v12315_v50 = vld [vmem:[#allocation35_spill] sm:$0xff]  ;;  %v12316_v34 = vld [vmem:[#allocation36_spill] sm:$0xff] }
 0x2e3   :  { %v12319_v44 = vld [vmem:[#allocation39_spill] sm:$0xff] }
 0x2e4   :  { %8201 = vtanh.f32 %v1966_v26  ;;  %v12317_v26 = vld [vmem:[#allocation37_spill] sm:$0xff] }
 0x2ed   :  { %v8200_v31 = vpop.eup %8199 }
 0x2ee   :  { %v1971_v12 = vmul.f32 %v8200_v31, %v1969_v0  ;;  %v12320_v0 = vld [vmem:[#allocation40_spill] sm:$0xff]  ;;  %v12321_v31 = vld [vmem:[#allocation41_spill] sm:$0xff] }
 0x2f0   :  { %v1975_v22 = vadd.f32 %v1973_v48, %v1971_v12  ;;  %v12322_v12 = vld [vmem:[#allocation42_spill] sm:$0xff]  ;;  %v12325_v48 = vld [vmem:[#allocation45_spill] sm:$0xff] }
 0x2f1   :  { %v8202_v33 = vpop.eup %8201 }
 0x2f2   :  { %v1972_v14 = vmul.f32 %v8202_v33, %v1970_v2  ;;  %v10252_v36 = vsel %vm1985_vm12, %v1975_v22, %v1673_v7  ;;  %v12323_v7 = vld [vmem:[#allocation43_spill] sm:$0xff]  ;;  %v12324_v2 = vld [vmem:[#allocation44_spill] sm:$0xff]  ;;  %v12326_v33 = vld [vmem:[#allocation46_spill] sm:$0xff] }
 0x2f4   :  { %v1976_v25 = vadd.f32 %v1974_v10, %v1972_v14  ;;  %v1992_v14 = vld [vmem:[#allocation2 + $0x60] sm:$0xff] }
 0x2f6   :  { %v10256_v30 = vsel %vm1986_vm13, %v1976_v25, %v1674_v4  ;;  %v12327_v4 = vld [vmem:[#allocation47_spill] sm:$0xff]  ;;  %v1996_v25 = vunpack.c.l.bf16 %v1992_v14 }
 0x2f7   :  { %v2164_v8 = vpack.c.bf16 %v10256_v30, %v10252_v36 }
 0x2f9   :  { %2198 = vmatmul.mubr.bf16.vlgmr.msra.gmra.mxu0 %v2164_v8  ;;  %7473 = vmatmul.mubr.bf16.vlgmr.msra.gmra.mxu1 %v2164_v8  ;;  %v12328_v8 = vld [vmem:[#allocation26_spill] sm:$0xff] }
 0x2fa   :  { %2323 = vmatpush1.bf16.msra.mxu0 %v9982_v23  ;;  %7477 = vmatpush3.bf16.msra.mxu1 %v9988_v28 }
 0x2fb   :  { %2324 = vmatprep.subr.bf16.mxu0 %v9994_v54  ;;  %7478 = vmatprep.subr.bf16.mxu1 %v12310_v20 }
 0x2fc   :  { %2354 = vmatprep.mubr.bf16.mxu0 %v12311_v61  ;;  %7492 = vmatprep.mubr.msk.bf16.mxu1 %vm9001_vm3, %v12310_v20 }
 0x2fe   :  { %2325 = vmatpush1.bf16.msra.mxu0 %v10004_v45  ;;  %7479 = vmatpush3.bf16.msra.mxu1 %v10010_v24 }
 0x2ff   :  { %2326 = vmatprep.subr.bf16.mxu0 %v10016_v49  ;;  %7480 = vmatprep.subr.bf16.mxu1 %v12310_v20 }
 0x302   :  { %2327 = vmatpush1.bf16.msra.mxu0 %v10023_v59  ;;  %7481 = vmatpush3.bf16.msra.mxu1 %v10029_v1 }
 0x303   :  { %2328 = vmatprep.subr.bf16.mxu0 %v10035_v38  ;;  %7482 = vmatprep.subr.bf16.mxu1 %v12310_v20 }
 0x306   :  { %2329 = vmatpush1.bf16.msra.mxu0 %v10042_v15  ;;  %7483 = vmatpush3.bf16.msra.mxu1 %v10048_v21 }
 0x307   :  { %2330 = vmatprep.subr.bf16.mxu0 %v12315_v50  ;;  %7484 = vmatprep.subr.bf16.mxu1 %v12310_v20 }
 0x30a   :  { %2331 = vmatpush1.bf16.msra.mxu0 %v12316_v34  ;;  %7485 = vmatpush3.bf16.msra.mxu1 %v12317_v26 }
 0x30b   :  { %2332 = vmatprep.subr.bf16.mxu0 %v12318_v32  ;;  %7486 = vmatprep.subr.bf16.mxu1 %v12310_v20  ;;  %v1997_v32 = vunpack.c.h.bf16 %v1992_v14 }
 0x30e   :  { %2333 = vmatpush1.bf16.msra.mxu0 %v12319_v44  ;;  %7487 = vmatpush3.bf16.msra.mxu1 %v12320_v0 }
 0x30f   :  { %2334 = vmatprep.subr.bf16.mxu0 %v12321_v31  ;;  %7488 = vmatprep.subr.bf16.mxu1 %v12310_v20 }
 0x312   :  { %2335 = vmatpush1.bf16.msra.mxu0 %v12322_v12  ;;  %7489 = vmatpush3.bf16.msra.mxu1 %v12323_v7 }
 0x313   :  { %2336 = vmatprep.subr.bf16.mxu0 %v12324_v2  ;;  %7490 = vmatprep.subr.bf16.mxu1 %v12310_v20 }
 0x316   :  { %2337 = vmatpush1.bf16.msra.mxu0 %v12325_v48  ;;  %7491 = vmatpush3.bf16.msra.mxu1 %v12326_v33  ;;  %v1999_v33 = vunpack.c.l.bf16 %v1994_v17 }
 0x317   :  { %2479 = vmatprep.subr.bf16.mxu0 %v12327_v4  ;;  %7496 = vmatprep.subr.bf16.mxu1 %v12310_v20 }
 0x363   :  { %v2042_v10 = vpop.f32.mrf.mxu0  ;;  %v2085_v22 = vpop.f32.mrf.mxu1 }
 0x364   :  { %v2043_v57 = vadd.f32 %v2042_v10, %v12328_v8 }
 0x365   :  { %v2044_v62 = vpop.f32.mrf.mxu0  ;;  %v7454_v11 = vpop.f32.mrf.mxu1 }
 0x366   :  { %v2092_v2 = vadd.f32 %v2043_v57, %v1996_v25  ;;  %v2045_v48 = vadd.f32 %v2044_v62, %v9741_v53  ;;  %v2000_v11 = vunpack.c.h.bf16 %v1994_v17 }
 0x367   :  { %v2046_v7 = vpop.f32.mrf.mxu0  ;;  %v2088_v12 = vpop.f32.mrf.mxu1 }
 0x368   :  { %v6722_v31 = vmul.f32 -1.442695, %v2092_v2  ;;  %v2047_v4 = vadd.f32 %v2046_v7, %v12328_v8  ;;  %v2106_v10 = vadd.f32 %v2045_v48, %v1997_v32  ;;  %v2086_v32 = vadd.f32 %v2085_v22, %v9771_v3 }
 0x369   :  { %v2048_v0 = vpop.f32.mrf.mxu0  ;;  %v7455_v44 = vpop.f32.mrf.mxu1  ;;  %v2089_v48 = vadd.f32 %v2088_v12, %v9771_v3 }
 0x36a   :  { %8203 = vpow2.f32 %v6722_v31  ;;  %v2093_v26 = vadd.f32 %v2047_v4, %v1999_v33  ;;  %v2049_v34 = vadd.f32 %v2048_v0, %v9741_v53  ;;  %v6724_v25 = vmul.f32 -1.442695, %v2106_v10  ;;  %v1993_v4 = vld [vmem:[#allocation2 + $0x68] ss:$24 sps:$4 sm:$0xff]  }
 0x36b   :  { %v2001_v14 = vunpack.c.h.bf16 %v1993_v4 }
 0x36c   :  { %v6723_v50 = vmul.f32 -1.442695, %v2093_v26  ;;  %v2107_v57 = vadd.f32 %v2049_v34, %v2000_v11 }
 0x36e   :  { %8205 = vpow2.f32 %v6723_v50  ;;  %v6725_v21 = vmul.f32 -1.442695, %v2107_v57  ;;  %v1998_v50 = vunpack.c.l.bf16 %v1993_v4 }
 0x36f   :  { %8207 = vpow2.f32 %v6724_v25 }
 0x370   :  { %8209 = vpow2.f32 %v6725_v21 }
 0x377   :  { %v8204_v2 = vpop.eup %8203 }
 0x378   :  { %v2100_v62 = vadd.f32 1.0, %v8204_v2 }
 0x37a   :  { %8211 = vrcp.f32 %v2100_v62 }
 0x37b   :  { %v8206_v7 = vpop.eup %8205 }
 0x37c   :  { %v2101_v8 = vadd.f32 1.0, %v8206_v7  ;;  %v8208_v44 = vpop.eup %8207 }
 0x37d   :  { %v8210_v31 = vpop.eup %8209  ;;  %v2114_v33 = vadd.f32 1.0, %v8208_v44 }
 0x37e   :  { %8213 = vrcp.f32 %v2101_v8  ;;  %v2115_v17 = vadd.f32 1.0, %v8210_v31 }
 0x37f   :  { %8215 = vrcp.f32 %v2114_v33 }
 0x380   :  { %8217 = vrcp.f32 %v2115_v17 }
 0x387   :  { %v8212_v26 = vpop.eup %8211 }
 0x388   :  { %v2120_v34 = vmul.f32 %v8212_v26, %v2086_v32  ;;  %v10303_v32 = vpop.permute.xlu0 %2137  ;;  %v10305_v26 = vpop.permute.xlu1 %2140 }
 0x389   :  { %12329 = vst [vmem:[#allocation53_spill] sm:$0xff] %v10303_v32  ;;  %12330 = vst [vmem:[#allocation54_spill] sm:$0xff] %v10305_v26  ;;  %vm2142_vm14 = vcmp.eq.s32.totalorder %v10303_v32, 1  ;;  %vm2143_vm15 = vcmp.eq.s32.totalorder %v10305_v26, 1 }
 0x38a   :  { %v2122_v0 = vadd.f32 %v2120_v34, %v1998_v50 }
 0x38b   :  { %v8214_v21 = vpop.eup %8213 }
 0x38c   :  { %8219 = vtanh.f32 %v2122_v0  ;;  %v2121_v10 = vmul.f32 %v8214_v21, %v2089_v48  ;;  %v8216_v11 = vpop.eup %8215 }
 0x38d   :  { %v8218_v57 = vpop.eup %8217  ;;  %v2126_v25 = vsub.f32 1.0, %v8216_v11  ;;  %v2130_v7 = vmul.f32 %v8216_v11, %v10154_v13 }
 0x38e   :  { %v2123_v8 = vadd.f32 %v2121_v10, %v2001_v14  ;;  %v2127_v62 = vsub.f32 1.0, %v8218_v57  ;;  %v2131_v33 = vmul.f32 %v8218_v57, %v10158_v18 }
 0x390   :  { %8221 = vtanh.f32 %v2123_v8 }
 0x399   :  { %v8220_v2 = vpop.eup %8219 }
 0x39a   :  { %v2128_v22 = vmul.f32 %v8220_v2, %v2126_v25  ;;  %v12332_v2 = vld [vmem:[#allocation30_spill] sm:$0xff] }
 0x39c   :  { %v2132_v12 = vadd.f32 %v2130_v7, %v2128_v22  ;;  %v12333_v22 = vld [vmem:[#allocation50_spill] sm:$0xff] }
 0x39d   :  { %v8222_v44 = vpop.eup %8221 }
 0x39e   :  { %v2129_v31 = vmul.f32 %v8222_v44, %v2127_v62  ;;  %v10312_v17 = vsel %vm2142_vm14, %v2132_v12, %v10154_v13 }
 0x3a0   :  { %v2133_v4 = vadd.f32 %v2131_v33, %v2129_v31 }
 0x3a2   :  { %v10317_v50 = vsel %vm2143_vm15, %v2133_v4, %v10158_v18 }
 0x3a3   :  { %v2321_v34 = vpack.c.bf16 %v10317_v50, %v10312_v17 }
 0x3a5   :  { %2355 = vmatmul.mubr.bf16.vlgmr.msra.gmra.mxu0 %v2321_v34  ;;  %7493 = vmatmul.mubr.bf16.vlgmr.msra.gmra.mxu1 %v2321_v34 }
 0x3a6   :  { %2480 = vmatpush1.bf16.msra.mxu0 %v9816_v52  ;;  %7497 = vmatpush3.bf16.msra.mxu1 %v9822_v56  ;;  %v2149_v52 = vld [vmem:[#allocation2 + $0xfc] sm:$0xff] }
 0x3a7   :  { %2481 = vmatprep.subr.bf16.mxu0 %v9830_v58  ;;  %7498 = vmatprep.subr.bf16.mxu1 %v12310_v20 }
 0x3a8   :  { %2511 = vmatprep.mubr.bf16.mxu0 %v12311_v61  ;;  %7512 = vmatprep.mubr.msk.bf16.mxu1 %vm9001_vm3, %v12310_v20 }
 0x3aa   :  { %2482 = vmatpush1.bf16.msra.mxu0 %v9842_v6  ;;  %7499 = vmatpush3.bf16.msra.mxu1 %v10173_v43  ;;  %v2153_v6 = vunpack.c.l.bf16 %v2149_v52 }
 0x3ab   :  { %2483 = vmatprep.subr.bf16.mxu0 %v9849_v9  ;;  %7500 = vmatprep.subr.bf16.mxu1 %v12310_v20 }
 0x3ae   :  { %2484 = vmatpush1.bf16.msra.mxu0 %v9858_v37  ;;  %7501 = vmatpush3.bf16.msra.mxu1 %v10182_v39 }
 0x3af   :  { %2485 = vmatprep.subr.bf16.mxu0 %v9865_v42  ;;  %7502 = vmatprep.subr.bf16.mxu1 %v12310_v20 }
 0x3b2   :  { %2486 = vmatpush1.bf16.msra.mxu0 %v9876_v46  ;;  %7503 = vmatpush3.bf16.msra.mxu1 %v10191_v40  ;;  %v2151_v46 = vld [vmem:[#allocation2 + $0x114] sm:$0xff] }
 0x3b3   :  { %2487 = vmatprep.subr.bf16.mxu0 %v9883_v29  ;;  %7504 = vmatprep.subr.bf16.mxu1 %v12310_v20  ;;  %v2156_v0 = vunpack.c.l.bf16 %v2151_v46  ;;  %v2157_v25 = vunpack.c.h.bf16 %v2151_v46 }
 0x3b6   :  { %2488 = vmatpush1.bf16.msra.mxu0 %v9894_v55  ;;  %7505 = vmatpush3.bf16.msra.mxu1 %v10200_v16 }
 0x3b7   :  { %2489 = vmatprep.subr.bf16.mxu0 %v9901_v47  ;;  %7506 = vmatprep.subr.bf16.mxu1 %v12310_v20 }
 0x3b9   :  { %v2199_v56 = vpop.f32.mrf.mxu0  ;;  %v2242_v58 = vpop.f32.mrf.mxu1 }
 0x3ba   :  { %v2200_v9 = vadd.f32 %v2199_v56, %v9889_v51  ;;  %2490 = vmatpush1.bf16.msra.mxu0 %v9909_v35  ;;  %7507 = vmatpush3.bf16.msra.mxu1 %v10210_v63  ;;  %v2154_v35 = vunpack.c.h.bf16 %v2149_v52 }
 0x3bb   :  { %v2201_v37 = vpop.f32.mrf.mxu0  ;;  %v7474_v42 = vpop.f32.mrf.mxu1  ;;  %2491 = vmatprep.subr.bf16.mxu0 %v9916_v60  ;;  %7508 = vmatprep.subr.bf16.mxu1 %v12310_v20  ;;  %v12331_v60 = vld [vmem:[#allocation29_spill] sm:$0xff] }
 0x3bc   :  { %v2249_v29 = vadd.f32 %v2200_v9, %v2153_v6  ;;  %v2202_v18 = vadd.f32 %v2201_v37, %v9922_v41  ;;  %v2150_v6 = vld [vmem:[#allocation2 + $0x104] ss:$24 sps:$4 sm:$0xff]   ;;  %v2243_v9 = vadd.f32 %v2242_v58, %v9957_v27 }
 0x3bd   :  { %v2203_v55 = vpop.f32.mrf.mxu0  ;;  %v2245_v47 = vpop.f32.mrf.mxu1  ;;  %v2155_v46 = vunpack.c.l.bf16 %v2150_v6 }
 0x3be   :  { %v6728_v13 = vmul.f32 -1.442695, %v2249_v29  ;;  %v2204_v48 = vadd.f32 %v2203_v55, %v9889_v51  ;;  %2492 = vmatpush1.bf16.msra.mxu0 %v9928_v19  ;;  %7509 = vmatpush3.bf16.msra.mxu1 %v10221_v5  ;;  %v2263_v11 = vadd.f32 %v2202_v18, %v2154_v35  ;;  %v12334_v19 = vld [vmem:[#allocation31_spill] sm:$0xff] }
 0x3bf   :  { %v2205_v21 = vpop.f32.mrf.mxu0  ;;  %v7475_v14 = vpop.f32.mrf.mxu1  ;;  %2493 = vmatprep.subr.bf16.mxu0 %v12331_v60  ;;  %7510 = vmatprep.subr.bf16.mxu1 %v12310_v20 }
 0x3c0   :  { %8223 = vpow2.f32 %v6728_v13  ;;  %v2250_v10 = vadd.f32 %v2204_v48, %v2156_v0  ;;  %v2206_v8 = vadd.f32 %v2205_v21, %v9922_v41  ;;  %v6730_v7 = vmul.f32 -1.442695, %v2263_v11 }
 0x3c1   :  { %v2246_v13 = vadd.f32 %v2245_v47, %v9957_v27  ;;  %v2158_v0 = vunpack.c.h.bf16 %v2150_v6 }
 0x3c2   :  { %v6729_v57 = vmul.f32 -1.442695, %v2250_v10  ;;  %2494 = vmatpush1.bf16.msra.mxu0 %v12332_v2  ;;  %7511 = vmatpush3.bf16.msra.mxu1 %v12333_v22  ;;  %v2264_v62 = vadd.f32 %v2206_v8, %v2157_v25 }
 0x3c3   :  { %2628 = vmatprep.subr.bf16.mxu0 %v12334_v19  ;;  %7516 = vmatprep.subr.bf16.mxu1 %v12310_v20  ;;  %v10364_v19 = vpop.permute.xlu0 %2294 }
 0x3c4   :  { %8225 = vpow2.f32 %v6729_v57  ;;  %v6731_v44 = vmul.f32 -1.442695, %v2264_v62  ;;  %12335 = vst [vmem:[#allocation29_spill] sm:$0xff] %v10364_v19  ;;  %v10366_v62 = vpop.permute.xlu1 %2297  ;;  %vm2299_vm1 = vcmp.eq.s32.totalorder %v10364_v19, 1 }
 0x3c5   :  { %8227 = vpow2.f32 %v6730_v7  ;;  %12336 = vst [vmem:[#allocation30_spill] sm:$0xff] %v10366_v62  ;;  %vm2300_vm2 = vcmp.eq.s32.totalorder %v10366_v62, 1 }
 0x3c6   :  { %8229 = vpow2.f32 %v6731_v44 }
 0x3cd   :  { %v8224_v31 = vpop.eup %8223 }
 0x3ce   :  { %v2257_v33 = vadd.f32 1.0, %v8224_v31 }
 0x3d0   :  { %8231 = vrcp.f32 %v2257_v33 }
 0x3d1   :  { %v8226_v12 = vpop.eup %8225 }
 0x3d2   :  { %v2258_v4 = vadd.f32 1.0, %v8226_v12  ;;  %v8228_v34 = vpop.eup %8227  ;;  %v12349_v12 = vld [vmem:[#allocation46_spill] sm:$0xff] }
 0x3d3   :  { %v8230_v52 = vpop.eup %8229  ;;  %v2271_v56 = vadd.f32 1.0, %v8228_v34  ;;  %v2306_v34 = vld [vmem:[#allocation2 + $0x90] sm:$0xff] }
 0x3d4   :  { %8233 = vrcp.f32 %v2258_v4  ;;  %v2272_v42 = vadd.f32 1.0, %v8230_v52  ;;  %v12350_v4 = vld [vmem:[#allocation47_spill] sm:$0xff]  ;;  %v2310_v6 = vunpack.c.l.bf16 %v2306_v34 }
 0x3d5   :  { %8235 = vrcp.f32 %v2271_v56 }
 0x3d6   :  { %8237 = vrcp.f32 %v2272_v42 }
 0x3dd   :  { %v8232_v37 = vpop.eup %8231 }
 0x3de   :  { %v2277_v29 = vmul.f32 %v8232_v37, %v2243_v9  ;;  %v12351_v9 = vld [vmem:[#allocation26_spill] sm:$0xff] }
 0x3e0   :  { %v2279_v55 = vadd.f32 %v2277_v29, %v2155_v46  ;;  %v2308_v29 = vld [vmem:[#allocation2 + $0xa8] sm:$0xff] }
 0x3e1   :  { %v8234_v18 = vpop.eup %8233 }
 0x3e2   :  { %8239 = vtanh.f32 %v2279_v55  ;;  %v2278_v48 = vmul.f32 %v8234_v18, %v2246_v13  ;;  %v8236_v14 = vpop.eup %8235 }
 0x3e3   :  { %v8238_v35 = vpop.eup %8237  ;;  %v2283_v10 = vsub.f32 1.0, %v8236_v14  ;;  %v2287_v11 = vmul.f32 %v8236_v14, %v10252_v36 }
 0x3e4   :  { %v2280_v21 = vadd.f32 %v2278_v48, %v2158_v0  ;;  %v2284_v8 = vsub.f32 1.0, %v8238_v35  ;;  %v2288_v2 = vmul.f32 %v8238_v35, %v10256_v30 }
 0x3e6   :  { %8241 = vtanh.f32 %v2280_v21  ;;  %v2313_v21 = vunpack.c.l.bf16 %v2308_v29 }
 0x3ef   :  { %v8240_v60 = vpop.eup %8239 }
 0x3f0   :  { %v2285_v58 = vmul.f32 %v8240_v60, %v2283_v10  ;;  %v2311_v60 = vunpack.c.h.bf16 %v2306_v34 }
 0x3f2   :  { %v2289_v47 = vadd.f32 %v2287_v11, %v2285_v58 }
 0x3f3   :  { %v8242_v57 = vpop.eup %8241 }
 0x3f4   :  { %v2286_v25 = vmul.f32 %v8242_v57, %v2284_v8  ;;  %v10373_v44 = vsel %vm2299_vm1, %v2289_v47, %v10252_v36  ;;  %v12347_v36 = vld [vmem:[#allocation44_spill] sm:$0xff] }
 0x3f6   :  { %v2290_v7 = vadd.f32 %v2288_v2, %v2286_v25  ;;  %v2314_v25 = vunpack.c.h.bf16 %v2308_v29 }
 0x3f8   :  { %v10378_v31 = vsel %vm2300_vm2, %v2290_v7, %v10256_v30  ;;  %v12348_v30 = vld [vmem:[#allocation45_spill] sm:$0xff] }
 0x3f9   :  { %v2478_v33 = vpack.c.bf16 %v10378_v31, %v10373_v44 }
 0x3fb   :  { %2512 = vmatmul.mubr.bf16.vlgmr.msra.gmra.mxu0 %v2478_v33  ;;  %7513 = vmatmul.mubr.bf16.vlgmr.msra.gmra.mxu1 %v2478_v33 }
 0x3fc   :  { %2629 = vmatpush1.bf16.msra.mxu0 %v9982_v23  ;;  %7517 = vmatpush3.bf16.msra.mxu1 %v9988_v28  ;;  %v12337_v23 = vld [vmem:[#allocation34_spill] sm:$0xff]  ;;  %v12338_v28 = vld [vmem:[#allocation35_spill] sm:$0xff] }
 0x3fd   :  { %2630 = vmatprep.subr.bf16.mxu0 %v9994_v54  ;;  %7518 = vmatprep.subr.bf16.mxu1 %v12310_v20  ;;  %v12339_v54 = vld [vmem:[#allocation36_spill] sm:$0xff] }
 0x3fe   :  { %2660 = vmatprep.mubr.bf16.mxu0 %v12311_v61  ;;  %7532 = vmatprep.mubr.msk.bf16.mxu1 %vm9001_vm3, %v12310_v20 }
 0x400   :  { %2631 = vmatpush1.bf16.msra.mxu0 %v10004_v45  ;;  %7519 = vmatpush3.bf16.msra.mxu1 %v10010_v24  ;;  %v12340_v45 = vld [vmem:[#allocation37_spill] sm:$0xff]  ;;  %v12341_v24 = vld [vmem:[#allocation38_spill] sm:$0xff] }
 0x401   :  { %2632 = vmatprep.subr.bf16.mxu0 %v10016_v49  ;;  %7520 = vmatprep.subr.bf16.mxu1 %v12310_v20  ;;  %v12342_v49 = vld [vmem:[#allocation39_spill] sm:$0xff] }
 0x404   :  { %2633 = vmatpush1.bf16.msra.mxu0 %v10023_v59  ;;  %7521 = vmatpush3.bf16.msra.mxu1 %v10029_v1  ;;  %v12343_v59 = vld [vmem:[#allocation40_spill] sm:$0xff]  ;;  %v12344_v1 = vld [vmem:[#allocation41_spill] sm:$0xff] }
 0x405   :  { %2634 = vmatprep.subr.bf16.mxu0 %v10035_v38  ;;  %7522 = vmatprep.subr.bf16.mxu1 %v12310_v20  ;;  %v12345_v38 = vld [vmem:[#allocation42_spill] sm:$0xff] }
 0x408   :  { %2635 = vmatpush1.bf16.msra.mxu0 %v10042_v15  ;;  %7523 = vmatpush3.bf16.msra.mxu1 %v12337_v23  ;;  %v12346_v15 = vld [vmem:[#allocation43_spill] sm:$0xff] }
 0x409   :  { %2636 = vmatprep.subr.bf16.mxu0 %v12338_v28  ;;  %7524 = vmatprep.subr.bf16.mxu1 %v12310_v20 }
 0x40c   :  { %2637 = vmatpush1.bf16.msra.mxu0 %v12339_v54  ;;  %7525 = vmatpush3.bf16.msra.mxu1 %v12340_v45 }
 0x40d   :  { %2638 = vmatprep.subr.bf16.mxu0 %v12341_v24  ;;  %7526 = vmatprep.subr.bf16.mxu1 %v12310_v20 }
 0x410   :  { %2639 = vmatpush1.bf16.msra.mxu0 %v12342_v49  ;;  %7527 = vmatpush3.bf16.msra.mxu1 %v12343_v59  ;;  %v2307_v59 = vld [vmem:[#allocation2 + $0x98] ss:$24 sps:$4 sm:$0xff]  }
 0x411   :  { %2640 = vmatprep.subr.bf16.mxu0 %v12344_v1  ;;  %7528 = vmatprep.subr.bf16.mxu1 %v12310_v20 }
 0x414   :  { %2641 = vmatpush1.bf16.msra.mxu0 %v12345_v38  ;;  %7529 = vmatpush3.bf16.msra.mxu1 %v12346_v15 }
 0x415   :  { %2642 = vmatprep.subr.bf16.mxu0 %v12347_v36  ;;  %7530 = vmatprep.subr.bf16.mxu1 %v12310_v20  ;;  %v2312_v36 = vunpack.c.l.bf16 %v2307_v59 }
 0x418   :  { %2643 = vmatpush1.bf16.msra.mxu0 %v12348_v30  ;;  %7531 = vmatpush3.bf16.msra.mxu1 %v12349_v12 }
 0x419   :  { %2767 = vmatprep.subr.bf16.mxu0 %v12350_v4  ;;  %7536 = vmatprep.subr.bf16.mxu1 %v12310_v20 }
 0x465   :  { %v2356_v52 = vpop.f32.mrf.mxu0  ;;  %v2399_v56 = vpop.f32.mrf.mxu1 }
 0x466   :  { %v2357_v37 = vadd.f32 %v2356_v52, %v12351_v9  ;;  %v2400_v1 = vadd.f32 %v2399_v56, %v9771_v3  ;;  %v2315_v52 = vunpack.c.h.bf16 %v2307_v59 }
 0x467   :  { %v2358_v42 = vpop.f32.mrf.mxu0  ;;  %v7494_v46 = vpop.f32.mrf.mxu1 }
 0x468   :  { %v2406_v55 = vadd.f32 %v2357_v37, %v2310_v6  ;;  %v2359_v48 = vadd.f32 %v2358_v42, %v9741_v53 }
 0x469   :  { %v2360_v13 = vpop.f32.mrf.mxu0  ;;  %v2402_v18 = vpop.f32.mrf.mxu1 }
 0x46a   :  { %v6734_v0 = vmul.f32 -1.442695, %v2406_v55  ;;  %v2361_v14 = vadd.f32 %v2360_v13, %v12351_v9  ;;  %v2420_v11 = vadd.f32 %v2359_v48, %v2311_v60  ;;  %v2403_v4 = vadd.f32 %v2402_v18, %v9771_v3 }
 0x46b   :  { %v2362_v35 = vpop.f32.mrf.mxu0  ;;  %v7495_v10 = vpop.f32.mrf.mxu1 }
 0x46c   :  { %8243 = vpow2.f32 %v6734_v0  ;;  %v2407_v58 = vadd.f32 %v2361_v14, %v2313_v21  ;;  %v2363_v8 = vadd.f32 %v2362_v35, %v9741_v53  ;;  %v6736_v47 = vmul.f32 -1.442695, %v2420_v11  ;;  %v10425_v35 = vpop.permute.xlu0 %2451  ;;  %v10427_v10 = vpop.permute.xlu1 %2454 }
 0x46d   :  { %vm2456_vm6 = vcmp.eq.s32.totalorder %v10425_v35, 1  ;;  %vm2457_vm9 = vcmp.eq.s32.totalorder %v10427_v10, 1 }
 0x46e   :  { %v6735_v57 = vmul.f32 -1.442695, %v2407_v58  ;;  %v2421_v2 = vadd.f32 %v2363_v8, %v2314_v25  ;;  %v10468_v25 = vld [vmem:[%s12166_s6 + $0x90] ss:$12 sps:$4 sm:$0xff]  }
 0x470   :  { %8245 = vpow2.f32 %v6735_v57  ;;  %v6737_v7 = vmul.f32 -1.442695, %v2421_v2  ;;  %v10446_v57 = vld [vmem:[%s12166_s6 + $0xa8] ss:$12 sps:$4 sm:$0xff]  }
 0x471   :  { %8247 = vpow2.f32 %v6736_v47  ;;  %v10475_v2 = vld [vmem:[%s12166_s6 + $0x7c] ss:$12 sps:$4 sm:$0xff]   ;;  %v10482_v47 = vld [vmem:[%s12166_s6 + $0x78] ss:$12 sps:$4 sm:$0xff]  }
 0x472   :  { %8249 = vpow2.f32 %v6737_v7  ;;  %v10496_v7 = vld [vmem:[%s12166_s6 + $0x60] ss:$12 sps:$4 sm:$0xff]  }
 0x479   :  { %v8244_v33 = vpop.eup %8243 }
 0x47a   :  { %v2414_v23 = vadd.f32 1.0, %v8244_v33  ;;  %v2463_v33 = vld [vmem:[#allocation2 + $0xcc] sm:$0xff] }
 0x47c   :  { %8251 = vrcp.f32 %v2414_v23  ;;  %v10510_v23 = vld [vmem:[%s12166_s6 + $0x48] ss:$12 sps:$4 sm:$0xff]  }
 0x47d   :  { %v8246_v28 = vpop.eup %8245 }
 0x47e   :  { %v2415_v54 = vadd.f32 1.0, %v8246_v28  ;;  %v8248_v45 = vpop.eup %8247 }
 0x47f   :  { %v8250_v24 = vpop.eup %8249  ;;  %v2428_v49 = vadd.f32 1.0, %v8248_v45  ;;  %v2467_v45 = vunpack.c.l.bf16 %v2463_v33 }
 0x480   :  { %8253 = vrcp.f32 %v2415_v54  ;;  %v2429_v15 = vadd.f32 1.0, %v8250_v24 }
 0x481   :  { %8255 = vrcp.f32 %v2428_v49 }
 0x482   :  { %8257 = vrcp.f32 %v2429_v15  ;;  %v10532_v15 = vld [vmem:[%s12166_s6 + $0x1c] ss:$12 sps:$4 sm:$0xff]  }
 0x489   :  { %v8252_v38 = vpop.eup %8251 }
 0x48a   :  { %v2434_v30 = vmul.f32 %v8252_v38, %v2400_v1  ;;  %v2465_v1 = vld [vmem:[#allocation2 + $0xe4] sm:$0xff] }
 0x48c   :  { %v2436_v12 = vadd.f32 %v2434_v30, %v2312_v36 }
 0x48d   :  { %v8254_v34 = vpop.eup %8253 }
 0x48e   :  { %8259 = vtanh.f32 %v2436_v12  ;;  %v2435_v6 = vmul.f32 %v8254_v34, %v2403_v4  ;;  %v8256_v42 = vpop.eup %8255  ;;  %v2470_v34 = vunpack.c.l.bf16 %v2465_v1 }
 0x48f   :  { %v8258_v46 = vpop.eup %8257  ;;  %v2440_v29 = vsub.f32 1.0, %v8256_v42  ;;  %v2444_v0 = vmul.f32 %v8256_v42, %v10312_v17  ;;  %v2468_v42 = vunpack.c.h.bf16 %v2463_v33 }
 0x490   :  { %v2437_v37 = vadd.f32 %v2435_v6, %v2315_v52  ;;  %v2441_v13 = vsub.f32 1.0, %v8258_v46  ;;  %v2445_v14 = vmul.f32 %v8258_v46, %v10317_v50 }
 0x492   :  { %8261 = vtanh.f32 %v2437_v37  ;;  %v10541_v37 = vld [vmem:[%s12166_s6 + $0x18] ss:$12 sps:$4 sm:$0xff]  }
 0x49b   :  { %v8260_v55 = vpop.eup %8259 }
 0x49c   :  { %v2442_v56 = vmul.f32 %v8260_v55, %v2440_v29  ;;  %v10548_v29 = vld [vmem:[%s12166_s6 + $0x4] ss:$12 sps:$4 sm:$0xff]  }
 0x49e   :  { %v2446_v18 = vadd.f32 %v2444_v0, %v2442_v56  ;;  %v2471_v0 = vunpack.c.h.bf16 %v2465_v1 }
 0x49f   :  { %v8262_v48 = vpop.eup %8261 }
 0x4a0   :  { %v2443_v21 = vmul.f32 %v8262_v48, %v2441_v13  ;;  %v10434_v58 = vsel %vm2456_vm6, %v2446_v18, %v10312_v17  ;;  %v10452_v17 = vld [vmem:[%s12166_s6 + $0xb0] ss:$12 sps:$4 sm:$0xff]   ;;  %v10563_v48 = vld [vmem:[%s12164_s4 + $0xac] ss:$12 sps:$4 sm:$0xff]  }
 0x4a1   :  { %12353 = vst [vmem:[#allocation31_spill] sm:$0xff] %v10563_v48 }
 0x4a2   :  { %v2447_v60 = vadd.f32 %v2445_v14, %v2443_v21 }
 0x4a4   :  { %v10439_v8 = vsel %vm2457_vm9, %v2447_v60, %v10317_v50  ;;  %v10458_v50 = vld [vmem:[%s12166_s6 + $0x94] ss:$12 sps:$4 sm:$0xff]  }
 0x4a5   :  { %v2627_v11 = vpack.c.bf16 %v10439_v8, %v10434_v58 }
 0x4a7   :  { %2661 = vmatmul.mubr.bf16.vlgmr.msra.gmra.mxu0 %v2627_v11  ;;  %7533 = vmatmul.mubr.bf16.vlgmr.msra.gmra.mxu1 %v2627_v11 }
 0x4a8   :  { %2768 = vmatpush1.bf16.msra.mxu0 %v10446_v57  ;;  %7537 = vmatpush3.bf16.msra.mxu1 %v10452_v17 }
 0x4a9   :  { %2769 = vmatprep.subr.bf16.mxu0 %v10458_v50  ;;  %7538 = vmatprep.subr.bf16.mxu1 %v12310_v20 }
 0x4aa   :  { %2799 = vmatprep.mubr.bf16.mxu0 %v12311_v61  ;;  %7552 = vmatprep.mubr.msk.bf16.mxu1 %vm9001_vm3, %v12310_v20 }
 0x4ac   :  { %2770 = vmatpush1.bf16.msra.mxu0 %v10468_v25  ;;  %7539 = vmatpush3.bf16.msra.mxu1 %v10173_v43  ;;  %v10489_v43 = vld [vmem:[%s12166_s6 + $0x64] ss:$12 sps:$4 sm:$0xff]  }
 0x4ad   :  { %2771 = vmatprep.subr.bf16.mxu0 %v10475_v2  ;;  %7540 = vmatprep.subr.bf16.mxu1 %v12310_v20 }
 0x4b0   :  { %2772 = vmatpush1.bf16.msra.mxu0 %v10482_v47  ;;  %7541 = vmatpush3.bf16.msra.mxu1 %v10182_v39  ;;  %v10503_v39 = vld [vmem:[%s12166_s6 + $0x4c] ss:$12 sps:$4 sm:$0xff]  }
 0x4b1   :  { %2773 = vmatprep.subr.bf16.mxu0 %v10489_v43  ;;  %7542 = vmatprep.subr.bf16.mxu1 %v12310_v20 }
 0x4b4   :  { %2774 = vmatpush1.bf16.msra.mxu0 %v10496_v7  ;;  %7543 = vmatpush3.bf16.msra.mxu1 %v10191_v40  ;;  %v10517_v40 = vld [vmem:[%s12166_s6 + $0x34] ss:$12 sps:$4 sm:$0xff]  }
 0x4b5   :  { %2775 = vmatprep.subr.bf16.mxu0 %v10503_v39  ;;  %7544 = vmatprep.subr.bf16.mxu1 %v12310_v20 }
 0x4b8   :  { %2776 = vmatpush1.bf16.msra.mxu0 %v10510_v23  ;;  %7545 = vmatpush3.bf16.msra.mxu1 %v10200_v16  ;;  %v10525_v16 = vld [vmem:[%s12166_s6 + $0x30] ss:$12 sps:$4 sm:$0xff]  }
 0x4b9   :  { %2777 = vmatprep.subr.bf16.mxu0 %v10517_v40  ;;  %7546 = vmatprep.subr.bf16.mxu1 %v12310_v20 }
 0x4bb   :  { %v2513_v28 = vpop.f32.mrf.mxu0  ;;  %v2556_v54 = vpop.f32.mrf.mxu1 }
 0x4bc   :  { %v2514_v24 = vadd.f32 %v2513_v28, %v9889_v51  ;;  %2778 = vmatpush1.bf16.msra.mxu0 %v10525_v16  ;;  %7547 = vmatpush3.bf16.msra.mxu1 %v10210_v63 }
 0x4bd   :  { %v2515_v49 = vpop.f32.mrf.mxu0  ;;  %v7514_v59 = vpop.f32.mrf.mxu1  ;;  %2779 = vmatprep.subr.bf16.mxu0 %v10532_v15  ;;  %7548 = vmatprep.subr.bf16.mxu1 %v12310_v20 }
 0x4be   :  { %v2563_v38 = vadd.f32 %v2514_v24, %v2467_v45  ;;  %v2516_v4 = vadd.f32 %v2515_v49, %v9922_v41  ;;  %v2464_v49 = vld [vmem:[#allocation2 + $0xd4] ss:$24 sps:$4 sm:$0xff]   ;;  %v2557_v59 = vadd.f32 %v2556_v54, %v9957_v27 }
 0x4bf   :  { %v2517_v36 = vpop.f32.mrf.mxu0  ;;  %v2559_v30 = vpop.f32.mrf.mxu1 }
 0x4c0   :  { %v6740_v12 = vmul.f32 -1.442695, %v2563_v38  ;;  %v2518_v52 = vadd.f32 %v2517_v36, %v9889_v51  ;;  %2780 = vmatpush1.bf16.msra.mxu0 %v10541_v37  ;;  %7549 = vmatpush3.bf16.msra.mxu1 %v10221_v5  ;;  %v2577_v56 = vadd.f32 %v2516_v4, %v2468_v42  ;;  %v10556_v5 = vld [vmem:[%s12166_s6] ss:$12 sps:$4 sm:$0xff]   ;;  %v2469_v36 = vunpack.c.l.bf16 %v2464_v49 }
 0x4c1   :  { %v2519_v6 = vpop.f32.mrf.mxu0  ;;  %v7515_v63 = vpop.f32.mrf.mxu1  ;;  %2781 = vmatprep.subr.bf16.mxu0 %v10548_v29  ;;  %7550 = vmatprep.subr.bf16.mxu1 %v12310_v20  ;;  %12352 = vst [vmem:[#allocation50_spill] sm:$0xff] %v10556_v5 }
 0x4c2   :  { %8263 = vpow2.f32 %v6740_v12  ;;  %v2564_v46 = vadd.f32 %v2518_v52, %v2470_v34  ;;  %v2520_v55 = vadd.f32 %v2519_v6, %v9922_v41  ;;  %v6742_v14 = vmul.f32 -1.442695, %v2577_v56 }
 0x4c3   :  { %v2560_v34 = vadd.f32 %v2559_v30, %v9957_v27  ;;  %v2472_v6 = vunpack.c.h.bf16 %v2464_v49  ;;  %v10592_v49 = vld [vmem:[%s12164_s4 + $0xa8] ss:$12 sps:$4 sm:$0xff]  }
 0x4c4   :  { %v6741_v13 = vmul.f32 -1.442695, %v2564_v46  ;;  %2782 = vmatpush1.bf16.msra.mxu0 %v10556_v5  ;;  %7551 = vmatpush3.bf16.msra.mxu1 %v12333_v22  ;;  %v2578_v21 = vadd.f32 %v2520_v55, %v2471_v0 }
 0x4c5   :  { %2906 = vmatprep.subr.bf16.mxu0 %v10563_v48  ;;  %7556 = vmatprep.subr.bf16.mxu1 %v12310_v20 }
 0x4c6   :  { %8265 = vpow2.f32 %v6741_v13  ;;  %v6743_v18 = vmul.f32 -1.442695, %v2578_v21 }
 0x4c7   :  { %8267 = vpow2.f32 %v6742_v14 }
 0x4c8   :  { %8269 = vpow2.f32 %v6743_v18 }
 0x4cf   :  { %v8264_v60 = vpop.eup %8263 }
 0x4d0   :  { %v2571_v11 = vadd.f32 1.0, %v8264_v60 }
 0x4d2   :  { %8271 = vrcp.f32 %v2571_v11  ;;  %v10571_v11 = vpop.permute.xlu0 %2608 }
 0x4d3   :  { %v8266_v33 = vpop.eup %8265  ;;  %vm2613_vm4 = vcmp.eq.s32.totalorder %v10571_v11, 1  ;;  %v10793_v11 = vld [vmem:[%s12166_s6 + $0x68] ss:$12 sps:$4 sm:$0xff]  }
 0x4d4   :  { %v2572_v22 = vadd.f32 1.0, %v8266_v33  ;;  %v8268_v28 = vpop.eup %8267  ;;  %v10573_v33 = vpop.permute.xlu1 %2611 }
 0x4d5   :  { %v8270_v45 = vpop.eup %8269  ;;  %v2585_v24 = vadd.f32 1.0, %v8268_v28  ;;  %vm2614_vm5 = vcmp.eq.s32.totalorder %v10573_v33, 1  ;;  %v2756_v33 = vld [vmem:[#allocation2 + $0x9c] sm:$0xff] }
 0x4d6   :  { %8273 = vrcp.f32 %v2572_v22  ;;  %v2586_v38 = vadd.f32 1.0, %v8270_v45 }
 0x4d7   :  { %8275 = vrcp.f32 %v2585_v24 }
 0x4d8   :  { %8277 = vrcp.f32 %v2586_v38  ;;  %v10626_v38 = vld [vmem:[%s12164_s4 + $0x7c] ss:$12 sps:$4 sm:$0xff]  }
 0x4df   :  { %v8272_v1 = vpop.eup %8271 }
 0x4e0   :  { %v2591_v12 = vmul.f32 %v8272_v1, %v2557_v59  ;;  %v10614_v59 = vld [vmem:[%s12164_s4 + $0x90] ss:$12 sps:$4 sm:$0xff]   ;;  %v10620_v1 = vld [vmem:[%s12164_s4 + $0x98] ss:$12 sps:$4 sm:$0xff]  }
 0x4e2   :  { %v2593_v4 = vadd.f32 %v2591_v12, %v2469_v36  ;;  %v10633_v36 = vld [vmem:[%s12164_s4 + $0x78] ss:$12 sps:$4 sm:$0xff]   ;;  %v10639_v12 = vld [vmem:[%s12164_s4 + $0x80] ss:$12 sps:$4 sm:$0xff]  }
 0x4e3   :  { %v8274_v52 = vpop.eup %8273 }
 0x4e4   :  { %8279 = vtanh.f32 %v2593_v4  ;;  %v2592_v63 = vmul.f32 %v8274_v52, %v2560_v34  ;;  %v8276_v46 = vpop.eup %8275  ;;  %v10645_v4 = vld [vmem:[%s12164_s4 + $0x64] ss:$12 sps:$4 sm:$0xff]   ;;  %v10652_v34 = vld [vmem:[%s12164_s4 + $0x60] ss:$12 sps:$4 sm:$0xff]   ;;  %v10658_v52 = vld [vmem:[%s12164_s4 + $0x68] ss:$12 sps:$4 sm:$0xff]  }
 0x4e5   :  { %v8278_v55 = vpop.eup %8277  ;;  %v2597_v56 = vsub.f32 1.0, %v8276_v46  ;;  %v2601_v21 = vmul.f32 %v8276_v46, %v10373_v44  ;;  %12354 = vst [vmem:[#allocation34_spill] sm:$0xff] %v10652_v34  ;;  %12355 = vst [vmem:[#allocation35_spill] sm:$0xff] %v10658_v52  ;;  %v10683_v46 = vld [vmem:[%s12164_s4 + $0x34] ss:$12 sps:$4 sm:$0xff]  }
 0x4e6   :  { %v2594_v42 = vadd.f32 %v2592_v63, %v2472_v6  ;;  %v2598_v0 = vsub.f32 1.0, %v8278_v55  ;;  %v2602_v60 = vmul.f32 %v8278_v55, %v10378_v31  ;;  %v10664_v6 = vld [vmem:[%s12164_s4 + $0x4c] ss:$12 sps:$4 sm:$0xff]   ;;  %v10671_v63 = vld [vmem:[%s12164_s4 + $0x48] ss:$12 sps:$4 sm:$0xff]   ;;  %12359 = vst [vmem:[#allocation39_spill] sm:$0xff] %v10683_v46 }
 0x4e7   :  { %12356 = vst [vmem:[#allocation36_spill] sm:$0xff] %v10664_v6  ;;  %12357 = vst [vmem:[#allocation37_spill] sm:$0xff] %v10671_v63  ;;  %v10690_v55 = vld [vmem:[%s12164_s4 + $0x30] ss:$12 sps:$4 sm:$0xff]  }
 0x4e8   :  { %8281 = vtanh.f32 %v2594_v42  ;;  %v10677_v42 = vld [vmem:[%s12164_s4 + $0x50] ss:$12 sps:$4 sm:$0xff]   ;;  %12360 = vst [vmem:[#allocation40_spill] sm:$0xff] %v10690_v55 }
 0x4e9   :  { %12358 = vst [vmem:[#allocation38_spill] sm:$0xff] %v10677_v42 }
 0x4ec   :  { %v12370_v35 = vld [vmem:[#allocation34_spill] sm:$0xff]  ;;  %v12371_v10 = vld [vmem:[#allocation35_spill] sm:$0xff] }
 0x4f1   :  { %v8280_v13 = vpop.eup %8279 }
 0x4f2   :  { %v2599_v54 = vmul.f32 %v8280_v13, %v2597_v56  ;;  %v10696_v56 = vld [vmem:[%s12164_s4 + $0x38] ss:$12 sps:$4 sm:$0xff]   ;;  %v10702_v13 = vld [vmem:[%s12164_s4 + $0x1c] ss:$12 sps:$4 sm:$0xff]  }
 0x4f3   :  { %12361 = vst [vmem:[#allocation41_spill] sm:$0xff] %v10696_v56  ;;  %12362 = vst [vmem:[#allocation42_spill] sm:$0xff] %v10702_v13 }
 0x4f4   :  { %v2603_v30 = vadd.f32 %v2601_v21, %v2599_v54  ;;  %v10709_v54 = vld [vmem:[%s12164_s4 + $0x18] ss:$12 sps:$4 sm:$0xff]  }
 0x4f5   :  { %v8282_v14 = vpop.eup %8281  ;;  %12363 = vst [vmem:[#allocation43_spill] sm:$0xff] %v10709_v54  ;;  %v10721_v21 = vld [vmem:[%s12164_s4 + $0x4] ss:$12 sps:$4 sm:$0xff]  }
 0x4f6   :  { %v2600_v18 = vmul.f32 %v8282_v14, %v2598_v0  ;;  %v10580_v28 = vsel %vm2613_vm4, %v2603_v30, %v10373_v44  ;;  %v10598_v44 = vld [vmem:[%s12164_s4 + $0xb0] ss:$12 sps:$4 sm:$0xff]   ;;  %v10715_v0 = vld [vmem:[%s12164_s4 + $0x20] ss:$12 sps:$4 sm:$0xff]   ;;  %12365 = vst [vmem:[#allocation45_spill] sm:$0xff] %v10721_v21 }
 0x4f7   :  { %12364 = vst [vmem:[#allocation44_spill] sm:$0xff] %v10715_v0  ;;  %v10728_v14 = vld [vmem:[%s12164_s4] ss:$12 sps:$4 sm:$0xff]   ;;  %v2617_v30 = vld [vmem:[#allocation2 + $0xc0] sm:$0xff] }
 0x4f8   :  { %v2604_v22 = vadd.f32 %v2602_v60, %v2600_v18  ;;  %12366 = vst [vmem:[#allocation46_spill] sm:$0xff] %v10728_v14  ;;  %v10734_v18 = vld [vmem:[%s12164_s4 + $0x8] ss:$12 sps:$4 sm:$0xff]   ;;  %v10740_v60 = vld [vmem:[%s12166_s6 + $0xac] ss:$12 sps:$4 sm:$0xff]   ;;  %v2621_v26 = vunpack.c.l.bf16 %v2617_v30 }
 0x4f9   :  { %12367 = vst [vmem:[#allocation47_spill] sm:$0xff] %v10734_v18  ;;  %12368 = vst [vmem:[#allocation55_spill] sm:$0xff] %v10740_v60 }
 0x4fa   :  { %v10585_v45 = vsel %vm2614_vm5, %v2604_v22, %v10378_v31  ;;  %v10604_v31 = vld [vmem:[%s12164_s4 + $0x94] ss:$12 sps:$4 sm:$0xff]  }
 0x4fb   :  { %v2766_v24 = vpack.c.bf16 %v10585_v45, %v10580_v28 }
 0x4fd   :  { %2800 = vmatmul.mubr.bf16.vlgmr.msra.gmra.mxu0 %v2766_v24  ;;  %7553 = vmatmul.mubr.bf16.vlgmr.msra.gmra.mxu1 %v2766_v24 }
 0x4fe   :  { %2907 = vmatpush1.bf16.msra.mxu0 %v10592_v49  ;;  %7557 = vmatpush3.bf16.msra.mxu1 %v10598_v44 }
 0x4ff   :  { %2908 = vmatprep.subr.bf16.mxu0 %v10604_v31  ;;  %7558 = vmatprep.subr.bf16.mxu1 %v12310_v20 }
 0x500   :  { %2938 = vmatprep.mubr.bf16.mxu0 %v12311_v61  ;;  %7572 = vmatprep.mubr.msk.bf16.mxu1 %vm9001_vm3, %v12310_v20 }
 0x502   :  { %2909 = vmatpush1.bf16.msra.mxu0 %v10614_v59  ;;  %7559 = vmatpush3.bf16.msra.mxu1 %v10620_v1 }
 0x503   :  { %2910 = vmatprep.subr.bf16.mxu0 %v10626_v38  ;;  %7560 = vmatprep.subr.bf16.mxu1 %v12310_v20 }
 0x506   :  { %2911 = vmatpush1.bf16.msra.mxu0 %v10633_v36  ;;  %7561 = vmatpush3.bf16.msra.mxu1 %v10639_v12 }
 0x507   :  { %2912 = vmatprep.subr.bf16.mxu0 %v10645_v4  ;;  %7562 = vmatprep.subr.bf16.mxu1 %v12310_v20 }
 0x50a   :  { %2913 = vmatpush1.bf16.msra.mxu0 %v10652_v34  ;;  %7563 = vmatpush3.bf16.msra.mxu1 %v10658_v52 }
 0x50b   :  { %2914 = vmatprep.subr.bf16.mxu0 %v10664_v6  ;;  %7564 = vmatprep.subr.bf16.mxu1 %v12310_v20 }
 0x50e   :  { %2915 = vmatpush1.bf16.msra.mxu0 %v10671_v63  ;;  %7565 = vmatpush3.bf16.msra.mxu1 %v10677_v42  ;;  %v2622_v42 = vunpack.c.h.bf16 %v2617_v30 }
 0x50f   :  { %2916 = vmatprep.subr.bf16.mxu0 %v10683_v46  ;;  %7566 = vmatprep.subr.bf16.mxu1 %v12310_v20 }
 0x512   :  { %2917 = vmatpush1.bf16.msra.mxu0 %v10690_v55  ;;  %7567 = vmatpush3.bf16.msra.mxu1 %v10696_v56 }
 0x513   :  { %2918 = vmatprep.subr.bf16.mxu0 %v10702_v13  ;;  %7568 = vmatprep.subr.bf16.mxu1 %v12310_v20 }
 0x516   :  { %2919 = vmatpush1.bf16.msra.mxu0 %v10709_v54  ;;  %7569 = vmatpush3.bf16.msra.mxu1 %v10715_v0 }
 0x517   :  { %2920 = vmatprep.subr.bf16.mxu0 %v10721_v21  ;;  %7570 = vmatprep.subr.bf16.mxu1 %v12310_v20 }
 0x51a   :  { %2921 = vmatpush1.bf16.msra.mxu0 %v10728_v14  ;;  %7571 = vmatpush3.bf16.msra.mxu1 %v10734_v18  ;;  %v2619_v14 = vld [vmem:[#allocation2 + $0xd8] sm:$0xff] }
 0x51b   :  { %3045 = vmatprep.subr.bf16.mxu0 %v10740_v60  ;;  %7576 = vmatprep.subr.bf16.mxu1 %v12310_v20  ;;  %v2624_v56 = vunpack.c.l.bf16 %v2619_v14 }
 0x567   :  { %v2662_v22 = vpop.f32.mrf.mxu0  ;;  %v2705_v24 = vpop.f32.mrf.mxu1 }
 0x568   :  { %v2663_v32 = vadd.f32 %v2662_v22, %v12351_v9 }
 0x569   :  { %v2664_v62 = vpop.f32.mrf.mxu0  ;;  %v7534_v19 = vpop.f32.mrf.mxu1 }
 0x56a   :  { %v2712_v21 = vadd.f32 %v2663_v32, %v2621_v26  ;;  %v2665_v13 = vadd.f32 %v2664_v62, %v9741_v53  ;;  %v2625_v19 = vunpack.c.h.bf16 %v2619_v14 }
 0x56b   :  { %v2666_v18 = vpop.f32.mrf.mxu0  ;;  %v2708_v0 = vpop.f32.mrf.mxu1 }
 0x56c   :  { %v6744_v54 = vmul.f32 -1.442695, %v2712_v21  ;;  %v2667_v60 = vadd.f32 %v2666_v18, %v12351_v9  ;;  %v2726_v22 = vadd.f32 %v2665_v13, %v2622_v42  ;;  %v2706_v42 = vadd.f32 %v2705_v24, %v9771_v3 }
 0x56d   :  { %v2668_v55 = vpop.f32.mrf.mxu0  ;;  %v7535_v46 = vpop.f32.mrf.mxu1  ;;  %v2709_v14 = vadd.f32 %v2708_v0, %v9771_v3 }
 0x56e   :  { %8283 = vpow2.f32 %v6744_v54  ;;  %v2713_v63 = vadd.f32 %v2667_v60, %v2624_v56  ;;  %v2669_v6 = vadd.f32 %v2668_v55, %v9741_v53  ;;  %v6746_v26 = vmul.f32 -1.442695, %v2726_v22  ;;  %v2618_v60 = vld [vmem:[#allocation2 + $0xc8] ss:$24 sps:$4 sm:$0xff]  }
 0x56f   :  { %v2626_v30 = vunpack.c.h.bf16 %v2618_v60 }
 0x570   :  { %v6745_v52 = vmul.f32 -1.442695, %v2713_v63  ;;  %v2727_v32 = vadd.f32 %v2669_v6, %v2625_v19 }
 0x572   :  { %8285 = vpow2.f32 %v6745_v52  ;;  %v6747_v34 = vmul.f32 -1.442695, %v2727_v32  ;;  %v2623_v52 = vunpack.c.l.bf16 %v2618_v60 }
 0x573   :  { %8287 = vpow2.f32 %v6746_v26 }
 0x574   :  { %8289 = vpow2.f32 %v6747_v34 }
 0x57b   :  { %v8284_v21 = vpop.eup %8283 }
 0x57c   :  { %v2720_v62 = vadd.f32 1.0, %v8284_v21 }
 0x57e   :  { %8291 = vrcp.f32 %v2720_v62 }
 0x57f   :  { %v8286_v18 = vpop.eup %8285 }
 0x580   :  { %v2721_v9 = vadd.f32 1.0, %v8286_v18  ;;  %v8288_v46 = vpop.eup %8287 }
 0x581   :  { %v8290_v54 = vpop.eup %8289  ;;  %v2734_v56 = vadd.f32 1.0, %v8288_v46 }
 0x582   :  { %8293 = vrcp.f32 %v2721_v9  ;;  %v2735_v55 = vadd.f32 1.0, %v8290_v54 }
 0x583   :  { %8295 = vrcp.f32 %v2734_v56 }
 0x584   :  { %8297 = vrcp.f32 %v2735_v55 }
 0x58b   :  { %v8292_v63 = vpop.eup %8291 }
 0x58c   :  { %v2740_v6 = vmul.f32 %v8292_v63, %v2706_v42 }
 0x58e   :  { %v2742_v13 = vadd.f32 %v2740_v6, %v2623_v52  ;;  %v10802_v52 = vld [vmem:[%s12166_s6 + $0x50] ss:$12 sps:$4 sm:$0xff]  }
 0x58f   :  { %v8294_v34 = vpop.eup %8293 }
 0x590   :  { %8299 = vtanh.f32 %v2742_v13  ;;  %v2741_v22 = vmul.f32 %v8294_v34, %v2709_v14  ;;  %v8296_v19 = vpop.eup %8295  ;;  %v2760_v14 = vunpack.c.l.bf16 %v2756_v33 }
 0x591   :  { %v8298_v32 = vpop.eup %8297  ;;  %v2746_v26 = vsub.f32 1.0, %v8296_v19  ;;  %v2750_v18 = vmul.f32 %v8296_v19, %v10434_v58  ;;  %v10812_v19 = vld [vmem:[%s12166_s6 + $0x38] ss:$12 sps:$4 sm:$0xff]  }
 0x592   :  { %v2743_v9 = vadd.f32 %v2741_v22, %v2626_v30  ;;  %v2747_v62 = vsub.f32 1.0, %v8298_v32  ;;  %v2751_v56 = vmul.f32 %v8298_v32, %v10439_v8 }
 0x594   :  { %8301 = vtanh.f32 %v2743_v9  ;;  %v2758_v9 = vld [vmem:[#allocation2 + $0xb4] sm:$0xff] }
 0x59d   :  { %v8300_v21 = vpop.eup %8299 }
 0x59e   :  { %v2748_v24 = vmul.f32 %v8300_v21, %v2746_v26 }
 0x5a0   :  { %v2752_v0 = vadd.f32 %v2750_v18, %v2748_v24  ;;  %v2763_v18 = vunpack.c.l.bf16 %v2758_v9 }
 0x5a1   :  { %v8302_v46 = vpop.eup %8301 }
 0x5a2   :  { %v2749_v54 = vmul.f32 %v8302_v46, %v2747_v62  ;;  %v10755_v60 = vsel %vm2613_vm4, %v2752_v0, %v10434_v58  ;;  %v10775_v58 = vld [vmem:[%s12166_s6 + $0x98] ss:$12 sps:$4 sm:$0xff]   ;;  %v10823_v0 = vld [vmem:[%s12166_s6 + $0x20] ss:$12 sps:$4 sm:$0xff]  }
 0x5a4   :  { %v2753_v42 = vadd.f32 %v2751_v56, %v2749_v54 }
 0x5a6   :  { %v10760_v63 = vsel %vm2614_vm5, %v2753_v42, %v10439_v8  ;;  %v10784_v8 = vld [vmem:[%s12166_s6 + $0x80] ss:$12 sps:$4 sm:$0xff]   ;;  %v2761_v42 = vunpack.c.h.bf16 %v2756_v33 }
 0x5a7   :  { %v2905_v55 = vpack.c.bf16 %v10760_v63, %v10755_v60 }
 0x5a9   :  { %2939 = vmatmul.mubr.bf16.vlgmr.msra.gmra.mxu0 %v2905_v55  ;;  %7573 = vmatmul.mubr.bf16.vlgmr.msra.gmra.mxu1 %v2905_v55 }
 0x5aa   :  { %3046 = vmatpush1.bf16.msra.mxu0 %v10446_v57  ;;  %7577 = vmatpush3.bf16.msra.mxu1 %v10452_v17 }
 0x5ab   :  { %3047 = vmatprep.subr.bf16.mxu0 %v10458_v50  ;;  %7578 = vmatprep.subr.bf16.mxu1 %v12310_v20 }
 0x5ac   :  { %3077 = vmatprep.mubr.bf16.mxu0 %v12311_v61  ;;  %7592 = vmatprep.mubr.msk.bf16.mxu1 %vm9001_vm3, %v12310_v20 }
 0x5ae   :  { %3048 = vmatpush1.bf16.msra.mxu0 %v10468_v25  ;;  %7579 = vmatpush3.bf16.msra.mxu1 %v10775_v58 }
 0x5af   :  { %3049 = vmatprep.subr.bf16.mxu0 %v10475_v2  ;;  %7580 = vmatprep.subr.bf16.mxu1 %v12310_v20 }
 0x5b2   :  { %3050 = vmatpush1.bf16.msra.mxu0 %v10482_v47  ;;  %7581 = vmatpush3.bf16.msra.mxu1 %v10784_v8 }
 0x5b3   :  { %3051 = vmatprep.subr.bf16.mxu0 %v10489_v43  ;;  %7582 = vmatprep.subr.bf16.mxu1 %v12310_v20 }
 0x5b6   :  { %3052 = vmatpush1.bf16.msra.mxu0 %v10496_v7  ;;  %7583 = vmatpush3.bf16.msra.mxu1 %v10793_v11 }
 0x5b7   :  { %3053 = vmatprep.subr.bf16.mxu0 %v10503_v39  ;;  %7584 = vmatprep.subr.bf16.mxu1 %v12310_v20 }
 0x5ba   :  { %3054 = vmatpush1.bf16.msra.mxu0 %v10510_v23  ;;  %7585 = vmatpush3.bf16.msra.mxu1 %v10802_v52 }
 0x5bb   :  { %3055 = vmatprep.subr.bf16.mxu0 %v10517_v40  ;;  %7586 = vmatprep.subr.bf16.mxu1 %v12310_v20 }
 0x5bd   :  { %v2801_v6 = vpop.f32.mrf.mxu0  ;;  %v2844_v13 = vpop.f32.mrf.mxu1 }
 0x5be   :  { %v2802_v34 = vadd.f32 %v2801_v6, %v9889_v51  ;;  %3056 = vmatpush1.bf16.msra.mxu0 %v10525_v16  ;;  %7587 = vmatpush3.bf16.msra.mxu1 %v10812_v19 }
 0x5bf   :  { %v2803_v30 = vpop.f32.mrf.mxu0  ;;  %v7554_v22 = vpop.f32.mrf.mxu1  ;;  %3057 = vmatprep.subr.bf16.mxu0 %v10532_v15  ;;  %7588 = vmatprep.subr.bf16.mxu1 %v12310_v20 }
 0x5c0   :  { %v2851_v32 = vadd.f32 %v2802_v34, %v2760_v14  ;;  %v2804_v62 = vadd.f32 %v2803_v30, %v9922_v41  ;;  %v2764_v30 = vunpack.c.h.bf16 %v2758_v9  ;;  %v10833_v22 = vld [vmem:[%s12166_s6 + $0x8] ss:$12 sps:$4 sm:$0xff]  }
 0x5c1   :  { %v2805_v26 = vpop.f32.mrf.mxu0  ;;  %v2847_v21 = vpop.f32.mrf.mxu1  ;;  %12369 = vst [vmem:[#allocation56_spill] sm:$0xff] %v10833_v22 }
 0x5c2   :  { %v6748_v24 = vmul.f32 -1.442695, %v2851_v32  ;;  %v2806_v46 = vadd.f32 %v2805_v26, %v9889_v51  ;;  %3058 = vmatpush1.bf16.msra.mxu0 %v10541_v37  ;;  %7589 = vmatpush3.bf16.msra.mxu1 %v10823_v0  ;;  %v2865_v14 = vadd.f32 %v2804_v62, %v2761_v42  ;;  %v2757_v42 = vld [vmem:[#allocation2 + $0xa4] ss:$24 sps:$4 sm:$0xff]  }
 0x5c3   :  { %v2807_v54 = vpop.f32.mrf.mxu0  ;;  %v7555_v56 = vpop.f32.mrf.mxu1  ;;  %3059 = vmatprep.subr.bf16.mxu0 %v10548_v29  ;;  %7590 = vmatprep.subr.bf16.mxu1 %v12310_v20 }
 0x5c4   :  { %8303 = vpow2.f32 %v6748_v24  ;;  %v2852_v55 = vadd.f32 %v2806_v46, %v2763_v18  ;;  %v2808_v6 = vadd.f32 %v2807_v54, %v9922_v41  ;;  %v6750_v32 = vmul.f32 -1.442695, %v2865_v14 }
 0x5c6   :  { %v6749_v34 = vmul.f32 -1.442695, %v2852_v55  ;;  %3060 = vmatpush1.bf16.msra.mxu0 %v10556_v5  ;;  %7591 = vmatpush3.bf16.msra.mxu1 %v10833_v22  ;;  %v2866_v33 = vadd.f32 %v2808_v6, %v2764_v30  ;;  %v2845_v55 = vadd.f32 %v2844_v13, %v9957_v27  ;;  %v2762_v22 = vunpack.c.l.bf16 %v2757_v42 }
 0x5c7   :  { %3184 = vmatprep.subr.bf16.mxu0 %v10563_v48  ;;  %7596 = vmatprep.subr.bf16.mxu1 %v12310_v20  ;;  %v2848_v30 = vadd.f32 %v2847_v21, %v9957_v27 }
 0x5c8   :  { %8305 = vpow2.f32 %v6749_v34  ;;  %v6751_v26 = vmul.f32 -1.442695, %v2866_v33 }
 0x5c9   :  { %8307 = vpow2.f32 %v6750_v32  ;;  %v2765_v32 = vunpack.c.h.bf16 %v2757_v42 }
 0x5ca   :  { %8309 = vpow2.f32 %v6751_v26 }
 0x5d1   :  { %v8304_v24 = vpop.eup %8303 }
 0x5d2   :  { %v2859_v9 = vadd.f32 1.0, %v8304_v24 }
 0x5d4   :  { %8311 = vrcp.f32 %v2859_v9 }
 0x5d5   :  { %v8306_v62 = vpop.eup %8305 }
 0x5d6   :  { %v2860_v18 = vadd.f32 1.0, %v8306_v62  ;;  %v8308_v46 = vpop.eup %8307 }
 0x5d7   :  { %v8310_v54 = vpop.eup %8309  ;;  %v2873_v56 = vadd.f32 1.0, %v8308_v46 }
 0x5d8   :  { %8313 = vrcp.f32 %v2860_v18  ;;  %v2874_v48 = vadd.f32 1.0, %v8310_v54 }
 0x5d9   :  { %8315 = vrcp.f32 %v2873_v56 }
 0x5da   :  { %8317 = vrcp.f32 %v2874_v48 }
 0x5e1   :  { %v8312_v34 = vpop.eup %8311 }
 0x5e2   :  { %v2879_v6 = vmul.f32 %v8312_v34, %v2845_v55 }
 0x5e4   :  { %v2881_v14 = vadd.f32 %v2879_v6, %v2762_v22 }
 0x5e5   :  { %v8314_v33 = vpop.eup %8313 }
 0x5e6   :  { %8319 = vtanh.f32 %v2881_v14  ;;  %v2880_v26 = vmul.f32 %v8314_v33, %v2848_v30  ;;  %v8316_v9 = vpop.eup %8315  ;;  %v12375_v14 = vld [vmem:[#allocation39_spill] sm:$0xff]  ;;  %v12376_v30 = vld [vmem:[#allocation40_spill] sm:$0xff]  ;;  %v12377_v33 = vld [vmem:[#allocation41_spill] sm:$0xff] }
 0x5e7   :  { %v8318_v62 = vpop.eup %8317  ;;  %v2885_v18 = vsub.f32 1.0, %v8316_v9  ;;  %v2889_v54 = vmul.f32 %v8316_v9, %v10580_v28  ;;  %v12381_v9 = vld [vmem:[#allocation45_spill] sm:$0xff] }
 0x5e8   :  { %v2882_v24 = vadd.f32 %v2880_v26, %v2765_v32  ;;  %v2886_v5 = vsub.f32 1.0, %v8318_v62  ;;  %v2890_v22 = vmul.f32 %v8318_v62, %v10585_v45  ;;  %v12378_v32 = vld [vmem:[#allocation42_spill] sm:$0xff]  ;;  %v12379_v26 = vld [vmem:[#allocation43_spill] sm:$0xff] }
 0x5e9   :  { %v12382_v62 = vld [vmem:[#allocation46_spill] sm:$0xff] }
 0x5ea   :  { %8321 = vtanh.f32 %v2882_v24  ;;  %v12380_v24 = vld [vmem:[#allocation44_spill] sm:$0xff] }
 0x5f3   :  { %v8320_v46 = vpop.eup %8319 }
 0x5f4   :  { %v2887_v13 = vmul.f32 %v8320_v46, %v2885_v18  ;;  %v12383_v18 = vld [vmem:[#allocation47_spill] sm:$0xff] }
 0x5f5   :  { %v12384_v46 = vld [vmem:[#allocation55_spill] sm:$0xff] }
 0x5f6   :  { %v2891_v21 = vadd.f32 %v2889_v54, %v2887_v13  ;;  %v2895_v13 = vld [vmem:[#allocation2 + $0xf0] sm:$0xff] }
 0x5f7   :  { %v8322_v55 = vpop.eup %8321 }
 0x5f8   :  { %v2888_v56 = vmul.f32 %v8322_v55, %v2886_v5  ;;  %v10845_v48 = vsel %vm2456_vm6, %v2891_v21, %v10580_v28  ;;  %v12372_v5 = vld [vmem:[#allocation36_spill] sm:$0xff]  ;;  %v12373_v28 = vld [vmem:[#allocation37_spill] sm:$0xff] }
 0x5fa   :  { %v2892_v34 = vadd.f32 %v2890_v22, %v2888_v56  ;;  %v2899_v56 = vunpack.c.l.bf16 %v2895_v13  ;;  %v12385_v22 = vld [vmem:[#allocation26_spill] sm:$0xff] }
 0x5fc   :  { %v10850_v42 = vsel %vm2457_vm9, %v2892_v34, %v10585_v45  ;;  %v12374_v45 = vld [vmem:[#allocation38_spill] sm:$0xff] }
 0x5fd   :  { %v3044_v6 = vpack.c.bf16 %v10850_v42, %v10845_v48 }
 0x5ff   :  { %3078 = vmatmul.mubr.bf16.vlgmr.msra.gmra.mxu0 %v3044_v6  ;;  %7593 = vmatmul.mubr.bf16.vlgmr.msra.gmra.mxu1 %v3044_v6 }
 0x600   :  { %3185 = vmatpush1.bf16.msra.mxu0 %v10592_v49  ;;  %7597 = vmatpush3.bf16.msra.mxu1 %v10598_v44 }
 0x601   :  { %3186 = vmatprep.subr.bf16.mxu0 %v10604_v31  ;;  %7598 = vmatprep.subr.bf16.mxu1 %v12310_v20 }
 0x602   :  { %3216 = vmatprep.mubr.bf16.mxu0 %v12311_v61  ;;  %7612 = vmatprep.mubr.msk.bf16.mxu1 %vm9001_vm3, %v12310_v20 }
 0x604   :  { %3187 = vmatpush1.bf16.msra.mxu0 %v10614_v59  ;;  %7599 = vmatpush3.bf16.msra.mxu1 %v10620_v1 }
 0x605   :  { %3188 = vmatprep.subr.bf16.mxu0 %v10626_v38  ;;  %7600 = vmatprep.subr.bf16.mxu1 %v12310_v20 }
 0x608   :  { %3189 = vmatpush1.bf16.msra.mxu0 %v10633_v36  ;;  %7601 = vmatpush3.bf16.msra.mxu1 %v10639_v12 }
 0x609   :  { %3190 = vmatprep.subr.bf16.mxu0 %v10645_v4  ;;  %7602 = vmatprep.subr.bf16.mxu1 %v12310_v20 }
 0x60c   :  { %3191 = vmatpush1.bf16.msra.mxu0 %v12370_v35  ;;  %7603 = vmatpush3.bf16.msra.mxu1 %v12371_v10 }
 0x60d   :  { %3192 = vmatprep.subr.bf16.mxu0 %v12372_v5  ;;  %7604 = vmatprep.subr.bf16.mxu1 %v12310_v20 }
 0x610   :  { %3193 = vmatpush1.bf16.msra.mxu0 %v12373_v28  ;;  %7605 = vmatpush3.bf16.msra.mxu1 %v12374_v45  ;;  %v2900_v45 = vunpack.c.h.bf16 %v2895_v13 }
 0x611   :  { %3194 = vmatprep.subr.bf16.mxu0 %v12375_v14  ;;  %7606 = vmatprep.subr.bf16.mxu1 %v12310_v20 }
 0x614   :  { %3195 = vmatpush1.bf16.msra.mxu0 %v12376_v30  ;;  %7607 = vmatpush3.bf16.msra.mxu1 %v12377_v33 }
 0x615   :  { %3196 = vmatprep.subr.bf16.mxu0 %v12378_v32  ;;  %7608 = vmatprep.subr.bf16.mxu1 %v12310_v20 }
 0x618   :  { %3197 = vmatpush1.bf16.msra.mxu0 %v12379_v26  ;;  %7609 = vmatpush3.bf16.msra.mxu1 %v12380_v24  ;;  %v2897_v24 = vld [vmem:[#allocation2 + $0x108] sm:$0xff] }
 0x619   :  { %3198 = vmatprep.subr.bf16.mxu0 %v12381_v9  ;;  %7610 = vmatprep.subr.bf16.mxu1 %v12310_v20 }
 0x61c   :  { %3199 = vmatpush1.bf16.msra.mxu0 %v12382_v62  ;;  %7611 = vmatpush3.bf16.msra.mxu1 %v12383_v18  ;;  %v2902_v18 = vunpack.c.l.bf16 %v2897_v24 }
 0x61d   :  { %3323 = vmatprep.subr.bf16.mxu0 %v12384_v46  ;;  %7616 = vmatprep.subr.bf16.mxu1 %v12310_v20 }
 0x669   :  { %v2940_v54 = vpop.f32.mrf.mxu0  ;;  %v2983_v55 = vpop.f32.mrf.mxu1 }
 0x66a   :  { %v2941_v21 = vadd.f32 %v2940_v54, %v12385_v22 }
 0x66b   :  { %v2942_v34 = vpop.f32.mrf.mxu0  ;;  %v7574_v6 = vpop.f32.mrf.mxu1 }
 0x66c   :  { %v2990_v9 = vadd.f32 %v2941_v21, %v2899_v56  ;;  %v2943_v62 = vadd.f32 %v2942_v34, %v9741_v53  ;;  %v2903_v6 = vunpack.c.h.bf16 %v2897_v24 }
 0x66d   :  { %v2944_v26 = vpop.f32.mrf.mxu0  ;;  %v2986_v32 = vpop.f32.mrf.mxu1 }
 0x66e   :  { %v6752_v33 = vmul.f32 -1.442695, %v2990_v9  ;;  %v2945_v46 = vadd.f32 %v2944_v26, %v12385_v22  ;;  %v3004_v54 = vadd.f32 %v2943_v62, %v2900_v45  ;;  %v2984_v45 = vadd.f32 %v2983_v55, %v9771_v3 }
 0x66f   :  { %v2946_v30 = vpop.f32.mrf.mxu0  ;;  %v7575_v14 = vpop.f32.mrf.mxu1  ;;  %v2987_v62 = vadd.f32 %v2986_v32, %v9771_v3 }
 0x670   :  { %8323 = vpow2.f32 %v6752_v33  ;;  %v2991_v28 = vadd.f32 %v2945_v46, %v2902_v18  ;;  %v2947_v5 = vadd.f32 %v2946_v30, %v9741_v53  ;;  %v6754_v21 = vmul.f32 -1.442695, %v3004_v54  ;;  %v2896_v46 = vld [vmem:[#allocation2 + $0xf8] ss:$24 sps:$4 sm:$0xff]  }
 0x671   :  { %v2904_v13 = vunpack.c.h.bf16 %v2896_v46 }
 0x672   :  { %v6753_v10 = vmul.f32 -1.442695, %v2991_v28  ;;  %v3005_v56 = vadd.f32 %v2947_v5, %v2903_v6 }
 0x674   :  { %8325 = vpow2.f32 %v6753_v10  ;;  %v6755_v35 = vmul.f32 -1.442695, %v3005_v56  ;;  %v2901_v10 = vunpack.c.l.bf16 %v2896_v46 }
 0x675   :  { %8327 = vpow2.f32 %v6754_v21 }
 0x676   :  { %8329 = vpow2.f32 %v6755_v35 }
 0x67d   :  { %v8324_v9 = vpop.eup %8323 }
 0x67e   :  { %v2998_v34 = vadd.f32 1.0, %v8324_v9 }
 0x680   :  { %8331 = vrcp.f32 %v2998_v34 }
 0x681   :  { %v8326_v26 = vpop.eup %8325 }
 0x682   :  { %v2999_v22 = vadd.f32 1.0, %v8326_v26  ;;  %v8328_v14 = vpop.eup %8327 }
 0x683   :  { %v8330_v33 = vpop.eup %8329  ;;  %v3012_v18 = vadd.f32 1.0, %v8328_v14 }
 0x684   :  { %8333 = vrcp.f32 %v2999_v22  ;;  %v3013_v30 = vadd.f32 1.0, %v8330_v33 }
 0x685   :  { %8335 = vrcp.f32 %v3012_v18 }
 0x686   :  { %8337 = vrcp.f32 %v3013_v30  ;;  %v3035_v30 = vld [vmem:[#allocation2 + $0x74] ss:$24 sps:$4 sm:$0xff]  }
 0x68d   :  { %v8332_v28 = vpop.eup %8331 }
 0x68e   :  { %v3018_v5 = vmul.f32 %v8332_v28, %v2984_v45 }
 0x690   :  { %v3020_v24 = vadd.f32 %v3018_v5, %v2901_v10 }
 0x691   :  { %v8334_v35 = vpop.eup %8333 }
 0x692   :  { %8339 = vtanh.f32 %v3020_v24  ;;  %v3019_v54 = vmul.f32 %v8334_v35, %v2987_v62  ;;  %v8336_v6 = vpop.eup %8335 }
 0x693   :  { %v8338_v56 = vpop.eup %8337  ;;  %v3024_v21 = vsub.f32 1.0, %v8336_v6  ;;  %v3028_v26 = vmul.f32 %v8336_v6, %v10755_v60 }
 0x694   :  { %v3021_v22 = vadd.f32 %v3019_v54, %v2904_v13  ;;  %v3025_v34 = vsub.f32 1.0, %v8338_v56  ;;  %v3029_v18 = vmul.f32 %v8338_v56, %v10760_v63 }
 0x696   :  { %8341 = vtanh.f32 %v3021_v22 }
 0x69f   :  { %v8340_v9 = vpop.eup %8339 }
 0x6a0   :  { %v3026_v55 = vmul.f32 %v8340_v9, %v3024_v21  ;;  %v12388_v21 = vld [vmem:[#allocation50_spill] sm:$0xff]  ;;  %v12389_v9 = vld [vmem:[#allocation56_spill] sm:$0xff] }
 0x6a2   :  { %v3030_v32 = vadd.f32 %v3028_v26, %v3026_v55 }
 0x6a3   :  { %v8342_v14 = vpop.eup %8341 }
 0x6a4   :  { %v3027_v33 = vmul.f32 %v8342_v14, %v3025_v34  ;;  %v10900_v46 = vsel %vm2299_vm1, %v3030_v32, %v10755_v60 }
 0x6a6   :  { %v3031_v45 = vadd.f32 %v3029_v18, %v3027_v33 }
 0x6a8   :  { %v10905_v10 = vsel %vm2300_vm2, %v3031_v45, %v10760_v63 }
 0x6a9   :  { %v3183_v5 = vpack.c.bf16 %v10905_v10, %v10900_v46 }
 0x6ab   :  { %3217 = vmatmul.mubr.bf16.vlgmr.msra.gmra.mxu0 %v3183_v5  ;;  %7613 = vmatmul.mubr.bf16.vlgmr.msra.gmra.mxu1 %v3183_v5 }
 0x6ac   :  { %3324 = vmatpush1.bf16.msra.mxu0 %v10446_v57  ;;  %7617 = vmatpush3.bf16.msra.mxu1 %v10452_v17  ;;  %v3034_v57 = vld [vmem:[#allocation2 + $0x6c] sm:$0xff] }
 0x6ad   :  { %3325 = vmatprep.subr.bf16.mxu0 %v10458_v50  ;;  %7618 = vmatprep.subr.bf16.mxu1 %v12310_v20 }
 0x6ae   :  { %3355 = vmatprep.mubr.bf16.mxu0 %v12311_v61  ;;  %7632 = vmatprep.mubr.msk.bf16.mxu1 %vm9001_vm3, %v12310_v20 }
 0x6b0   :  { %3326 = vmatpush1.bf16.msra.mxu0 %v10468_v25  ;;  %7619 = vmatpush3.bf16.msra.mxu1 %v10775_v58  ;;  %v3038_v25 = vunpack.c.l.bf16 %v3034_v57 }
 0x6b1   :  { %3327 = vmatprep.subr.bf16.mxu0 %v10475_v2  ;;  %7620 = vmatprep.subr.bf16.mxu1 %v12310_v20 }
 0x6b4   :  { %3328 = vmatpush1.bf16.msra.mxu0 %v10482_v47  ;;  %7621 = vmatpush3.bf16.msra.mxu1 %v10784_v8 }
 0x6b5   :  { %3329 = vmatprep.subr.bf16.mxu0 %v10489_v43  ;;  %7622 = vmatprep.subr.bf16.mxu1 %v12310_v20 }
 0x6b8   :  { %3330 = vmatpush1.bf16.msra.mxu0 %v10496_v7  ;;  %7623 = vmatpush3.bf16.msra.mxu1 %v10793_v11  ;;  %v3036_v7 = vld [vmem:[#allocation2 + $0x84] sm:$0xff] }
 0x6b9   :  { %3331 = vmatprep.subr.bf16.mxu0 %v10503_v39  ;;  %7624 = vmatprep.subr.bf16.mxu1 %v12310_v20  ;;  %v3041_v24 = vunpack.c.l.bf16 %v3036_v7  ;;  %v3042_v56 = vunpack.c.h.bf16 %v3036_v7 }
 0x6bc   :  { %3332 = vmatpush1.bf16.msra.mxu0 %v10510_v23  ;;  %7625 = vmatpush3.bf16.msra.mxu1 %v10802_v52 }
 0x6bd   :  { %3333 = vmatprep.subr.bf16.mxu0 %v10517_v40  ;;  %7626 = vmatprep.subr.bf16.mxu1 %v12310_v20 }
 0x6bf   :  { %v3079_v17 = vpop.f32.mrf.mxu0  ;;  %v3122_v50 = vpop.f32.mrf.mxu1 }
 0x6c0   :  { %v3080_v2 = vadd.f32 %v3079_v17, %v9889_v51  ;;  %3334 = vmatpush1.bf16.msra.mxu0 %v10525_v16  ;;  %7627 = vmatpush3.bf16.msra.mxu1 %v10812_v19  ;;  %v3039_v16 = vunpack.c.h.bf16 %v3034_v57  ;;  %v3123_v5 = vadd.f32 %v3122_v50, %v9957_v27 }
 0x6c1   :  { %v3081_v47 = vpop.f32.mrf.mxu0  ;;  %v7594_v43 = vpop.f32.mrf.mxu1  ;;  %3335 = vmatprep.subr.bf16.mxu0 %v10532_v15  ;;  %7628 = vmatprep.subr.bf16.mxu1 %v12310_v20 }
 0x6c2   :  { %v3129_v39 = vadd.f32 %v3080_v2, %v3038_v25  ;;  %v3082_v63 = vadd.f32 %v3081_v47, %v9922_v41  ;;  %v3040_v25 = vunpack.c.l.bf16 %v3035_v30 }
 0x6c3   :  { %v3083_v23 = vpop.f32.mrf.mxu0  ;;  %v3125_v40 = vpop.f32.mrf.mxu1 }
 0x6c4   :  { %v6756_v60 = vmul.f32 -1.442695, %v3129_v39  ;;  %v3084_v62 = vadd.f32 %v3083_v23, %v9889_v51  ;;  %3336 = vmatpush1.bf16.msra.mxu0 %v10541_v37  ;;  %7629 = vmatpush3.bf16.msra.mxu1 %v10823_v0  ;;  %v3143_v22 = vadd.f32 %v3082_v63, %v3039_v16  ;;  %v12390_v37 = vld [vmem:[#allocation31_spill] sm:$0xff]  ;;  %v3126_v43 = vadd.f32 %v3125_v40, %v9957_v27 }
 0x6c5   :  { %v3085_v35 = vpop.f32.mrf.mxu0  ;;  %v7595_v13 = vpop.f32.mrf.mxu1  ;;  %3337 = vmatprep.subr.bf16.mxu0 %v10548_v29  ;;  %7630 = vmatprep.subr.bf16.mxu1 %v12310_v20  ;;  %v3043_v39 = vunpack.c.h.bf16 %v3035_v30  ;;  %v12408_v30 = vld [vmem:[#allocation26_spill] sm:$0xff] }
 0x6c6   :  { %8343 = vpow2.f32 %v6756_v60  ;;  %v3130_v54 = vadd.f32 %v3084_v62, %v3041_v24  ;;  %v3086_v15 = vadd.f32 %v3085_v35, %v9922_v41  ;;  %v6758_v34 = vmul.f32 -1.442695, %v3143_v22 }
 0x6c8   :  { %v6757_v6 = vmul.f32 -1.442695, %v3130_v54  ;;  %3338 = vmatpush1.bf16.msra.mxu0 %v12388_v21  ;;  %7631 = vmatpush3.bf16.msra.mxu1 %v12389_v9  ;;  %v3144_v55 = vadd.f32 %v3086_v15, %v3042_v56 }
 0x6c9   :  { %3462 = vmatprep.subr.bf16.mxu0 %v12390_v37  ;;  %7636 = vmatprep.subr.bf16.mxu1 %v12310_v20 }
 0x6ca   :  { %8345 = vpow2.f32 %v6757_v6  ;;  %v6759_v26 = vmul.f32 -1.442695, %v3144_v55 }
 0x6cb   :  { %8347 = vpow2.f32 %v6758_v34 }
 0x6cc   :  { %8349 = vpow2.f32 %v6759_v26  ;;  %v12404_v26 = vld [vmem:[#allocation45_spill] sm:$0xff] }
 0x6d3   :  { %v8344_v29 = vpop.eup %8343 }
 0x6d4   :  { %v3137_v14 = vadd.f32 1.0, %v8344_v29  ;;  %v12405_v29 = vld [vmem:[#allocation46_spill] sm:$0xff] }
 0x6d6   :  { %8351 = vrcp.f32 %v3137_v14  ;;  %v12406_v14 = vld [vmem:[#allocation47_spill] sm:$0xff] }
 0x6d7   :  { %v8346_v33 = vpop.eup %8345 }
 0x6d8   :  { %v3138_v18 = vadd.f32 1.0, %v8346_v33  ;;  %v8348_v32 = vpop.eup %8347  ;;  %v12407_v33 = vld [vmem:[#allocation55_spill] sm:$0xff] }
 0x6d9   :  { %v8350_v45 = vpop.eup %8349  ;;  %v3151_v28 = vadd.f32 1.0, %v8348_v32 }
 0x6da   :  { %8353 = vrcp.f32 %v3138_v18  ;;  %v3152_v17 = vadd.f32 1.0, %v8350_v45  ;;  %v3173_v18 = vld [vmem:[#allocation2 + $0x120] sm:$0xff] }
 0x6db   :  { %8355 = vrcp.f32 %v3151_v28  ;;  %v3177_v28 = vunpack.c.l.bf16 %v3173_v18 }
 0x6dc   :  { %8357 = vrcp.f32 %v3152_v17 }
 0x6e3   :  { %v8352_v57 = vpop.eup %8351 }
 0x6e4   :  { %v3157_v2 = vmul.f32 %v8352_v57, %v3123_v5 }
 0x6e6   :  { %v3159_v47 = vadd.f32 %v3157_v2, %v3040_v25  ;;  %v3175_v25 = vld [vmem:[#allocation2 + $0x138] sm:$0xff] }
 0x6e7   :  { %v8354_v7 = vpop.eup %8353 }
 0x6e8   :  { %8359 = vtanh.f32 %v3159_v47  ;;  %v3158_v23 = vmul.f32 %v8354_v7, %v3126_v43  ;;  %v8356_v63 = vpop.eup %8355 }
 0x6e9   :  { %v8358_v24 = vpop.eup %8357  ;;  %v3163_v62 = vsub.f32 1.0, %v8356_v63  ;;  %v3167_v16 = vmul.f32 %v8356_v63, %v10845_v48 }
 0x6ea   :  { %v3160_v60 = vadd.f32 %v3158_v23, %v3043_v39  ;;  %v3164_v13 = vsub.f32 1.0, %v8358_v24  ;;  %v3168_v22 = vmul.f32 %v8358_v24, %v10850_v42  ;;  %v3180_v23 = vunpack.c.l.bf16 %v3175_v25 }
 0x6ec   :  { %8361 = vtanh.f32 %v3160_v60 }
 0x6f5   :  { %v8360_v35 = vpop.eup %8359 }
 0x6f6   :  { %v3165_v50 = vmul.f32 %v8360_v35, %v3163_v62  ;;  %v3178_v62 = vunpack.c.h.bf16 %v3173_v18 }
 0x6f8   :  { %v3169_v40 = vadd.f32 %v3167_v16, %v3165_v50 }
 0x6f9   :  { %v8362_v54 = vpop.eup %8361 }
 0x6fa   :  { %v3166_v15 = vmul.f32 %v8362_v54, %v3164_v13  ;;  %v10955_v21 = vsel %vm2142_vm14, %v3169_v40, %v10845_v48  ;;  %v12402_v48 = vld [vmem:[#allocation43_spill] sm:$0xff]  ;;  %v3181_v54 = vunpack.c.h.bf16 %v3175_v25 }
 0x6fc   :  { %v3170_v6 = vadd.f32 %v3168_v22, %v3166_v15 }
 0x6fe   :  { %v10960_v55 = vsel %vm2143_vm15, %v3170_v6, %v10850_v42  ;;  %v12403_v42 = vld [vmem:[#allocation44_spill] sm:$0xff] }
 0x6ff   :  { %v3322_v34 = vpack.c.bf16 %v10960_v55, %v10955_v21 }
 0x701   :  { %3356 = vmatmul.mubr.bf16.vlgmr.msra.gmra.mxu0 %v3322_v34  ;;  %7633 = vmatmul.mubr.bf16.vlgmr.msra.gmra.mxu1 %v3322_v34 }
 0x702   :  { %3463 = vmatpush1.bf16.msra.mxu0 %v10592_v49  ;;  %7637 = vmatpush3.bf16.msra.mxu1 %v10598_v44  ;;  %v12393_v49 = vld [vmem:[#allocation34_spill] sm:$0xff]  ;;  %v12394_v44 = vld [vmem:[#allocation35_spill] sm:$0xff] }
 0x703   :  { %3464 = vmatprep.subr.bf16.mxu0 %v10604_v31  ;;  %7638 = vmatprep.subr.bf16.mxu1 %v12310_v20  ;;  %v12395_v31 = vld [vmem:[#allocation36_spill] sm:$0xff] }
 0x704   :  { %3494 = vmatprep.mubr.bf16.mxu0 %v12311_v61  ;;  %7652 = vmatprep.mubr.msk.bf16.mxu1 %vm9001_vm3, %v12310_v20 }
 0x706   :  { %3465 = vmatpush1.bf16.msra.mxu0 %v10614_v59  ;;  %7639 = vmatpush3.bf16.msra.mxu1 %v10620_v1  ;;  %v12396_v59 = vld [vmem:[#allocation37_spill] sm:$0xff]  ;;  %v12397_v1 = vld [vmem:[#allocation38_spill] sm:$0xff] }
 0x707   :  { %3466 = vmatprep.subr.bf16.mxu0 %v10626_v38  ;;  %7640 = vmatprep.subr.bf16.mxu1 %v12310_v20  ;;  %v12398_v38 = vld [vmem:[#allocation39_spill] sm:$0xff] }
 0x70a   :  { %3467 = vmatpush1.bf16.msra.mxu0 %v10633_v36  ;;  %7641 = vmatpush3.bf16.msra.mxu1 %v10639_v12  ;;  %v12399_v36 = vld [vmem:[#allocation40_spill] sm:$0xff]  ;;  %v12400_v12 = vld [vmem:[#allocation41_spill] sm:$0xff] }
 0x70b   :  { %3468 = vmatprep.subr.bf16.mxu0 %v10645_v4  ;;  %7642 = vmatprep.subr.bf16.mxu1 %v12310_v20  ;;  %v12401_v4 = vld [vmem:[#allocation42_spill] sm:$0xff] }
 0x70e   :  { %3469 = vmatpush1.bf16.msra.mxu0 %v12393_v49  ;;  %7643 = vmatpush3.bf16.msra.mxu1 %v12394_v44 }
 0x70f   :  { %3470 = vmatprep.subr.bf16.mxu0 %v12395_v31  ;;  %7644 = vmatprep.subr.bf16.mxu1 %v12310_v20 }
 0x712   :  { %3471 = vmatpush1.bf16.msra.mxu0 %v12396_v59  ;;  %7645 = vmatpush3.bf16.msra.mxu1 %v12397_v1  ;;  %v3174_v59 = vld [vmem:[#allocation2 + $0x128] ss:$24 sps:$4 sm:$0xff]  }
 0x713   :  { %3472 = vmatprep.subr.bf16.mxu0 %v12398_v38  ;;  %7646 = vmatprep.subr.bf16.mxu1 %v12310_v20 }
 0x716   :  { %3473 = vmatpush1.bf16.msra.mxu0 %v12399_v36  ;;  %7647 = vmatpush3.bf16.msra.mxu1 %v12400_v12  ;;  %v3179_v12 = vunpack.c.l.bf16 %v3174_v59 }
 0x717   :  { %3474 = vmatprep.subr.bf16.mxu0 %v12401_v4  ;;  %7648 = vmatprep.subr.bf16.mxu1 %v12310_v20 }
 0x71a   :  { %3475 = vmatpush1.bf16.msra.mxu0 %v12402_v48  ;;  %7649 = vmatpush3.bf16.msra.mxu1 %v12403_v42 }
 0x71b   :  { %3476 = vmatprep.subr.bf16.mxu0 %v12404_v26  ;;  %7650 = vmatprep.subr.bf16.mxu1 %v12310_v20 }
 0x71e   :  { %3477 = vmatpush1.bf16.msra.mxu0 %v12405_v29  ;;  %7651 = vmatpush3.bf16.msra.mxu1 %v12406_v14  ;;  %v3182_v29 = vunpack.c.h.bf16 %v3174_v59 }
 0x71f   :  { %3601 = vmatprep.subr.bf16.mxu0 %v12407_v33  ;;  %7656 = vmatprep.subr.bf16.mxu1 %v12310_v20 }
 0x76b   :  { %v3218_v32 = vpop.f32.mrf.mxu0  ;;  %v3261_v45 = vpop.f32.mrf.mxu1 }
 0x76c   :  { %v3219_v5 = vadd.f32 %v3218_v32, %v12408_v30  ;;  %v3262_v1 = vadd.f32 %v3261_v45, %v9771_v3 }
 0x76d   :  { %v3220_v57 = vpop.f32.mrf.mxu0  ;;  %v7614_v17 = vpop.f32.mrf.mxu1 }
 0x76e   :  { %v3268_v2 = vadd.f32 %v3219_v5, %v3177_v28  ;;  %v3221_v39 = vadd.f32 %v3220_v57, %v9741_v53 }
 0x76f   :  { %v3222_v47 = vpop.f32.mrf.mxu0  ;;  %v3264_v43 = vpop.f32.mrf.mxu1 }
 0x770   :  { %v6760_v7 = vmul.f32 -1.442695, %v3268_v2  ;;  %v3223_v60 = vadd.f32 %v3222_v47, %v12408_v30  ;;  %v3282_v13 = vadd.f32 %v3221_v39, %v3178_v62  ;;  %v3265_v42 = vadd.f32 %v3264_v43, %v9771_v3  ;;  %v8763_v62 = vld [vmem:[%s12166_s6 + $0xa8] ss:$12 sps:$4 sm:$0xff]  }
 0x771   :  { %v3224_v63 = vpop.f32.mrf.mxu0  ;;  %v7615_v24 = vpop.f32.mrf.mxu1 }
 0x772   :  { %8363 = vpow2.f32 %v6760_v7  ;;  %v3269_v35 = vadd.f32 %v3223_v60, %v3180_v23  ;;  %v3225_v50 = vadd.f32 %v3224_v63, %v9741_v53  ;;  %v6762_v22 = vmul.f32 -1.442695, %v3282_v13  ;;  %v8768_v13 = vld [vmem:[%s12166_s6 + $0x78] ss:$12 sps:$4 sm:$0xff]  }
 0x774   :  { %v6761_v16 = vmul.f32 -1.442695, %v3269_v35  ;;  %v3283_v15 = vadd.f32 %v3225_v50, %v3181_v54  ;;  %v8766_v35 = vld [vmem:[%s12166_s6 + $0x90] ss:$12 sps:$4 sm:$0xff]   ;;  %v8771_v54 = vld [vmem:[%s12166_s6 + $0x4c] ss:$12 sps:$4 sm:$0xff]  }
 0x775   :  { %v8767_v50 = vld [vmem:[%s12166_s6 + $0x7c] ss:$12 sps:$4 sm:$0xff]  }
 0x776   :  { %8365 = vpow2.f32 %v6761_v16  ;;  %v6763_v40 = vmul.f32 -1.442695, %v3283_v15  ;;  %v8769_v16 = vld [vmem:[%s12166_s6 + $0x64] ss:$12 sps:$4 sm:$0xff]   ;;  %v8772_v15 = vld [vmem:[%s12166_s6 + $0x48] ss:$12 sps:$4 sm:$0xff]  }
 0x777   :  { %8367 = vpow2.f32 %v6762_v22  ;;  %v8773_v22 = vld [vmem:[%s12166_s6 + $0x34] ss:$12 sps:$4 sm:$0xff]  }
 0x778   :  { %8369 = vpow2.f32 %v6763_v40 }
 0x77f   :  { %v8364_v6 = vpop.eup %8363 }
 0x780   :  { %v3276_v56 = vadd.f32 1.0, %v8364_v6 }
 0x782   :  { %8371 = vrcp.f32 %v3276_v56 }
 0x783   :  { %v8366_v37 = vpop.eup %8365 }
 0x784   :  { %v3277_v34 = vadd.f32 1.0, %v8366_v37  ;;  %v8368_v49 = vpop.eup %8367 }
 0x785   :  { %v8370_v44 = vpop.eup %8369  ;;  %v3290_v31 = vadd.f32 1.0, %v8368_v49  ;;  %v3314_v49 = vld [vmem:[#allocation2 + $0x54] sm:$0xff] }
 0x786   :  { %8373 = vrcp.f32 %v3277_v34  ;;  %v3291_v36 = vadd.f32 1.0, %v8370_v44  ;;  %v8774_v44 = vld [vmem:[%s12166_s6 + $0x30] ss:$12 sps:$4 sm:$0xff]  }
 0x787   :  { %8375 = vrcp.f32 %v3290_v31  ;;  %v8775_v31 = vld [vmem:[%s12166_s6 + $0x1c] ss:$12 sps:$4 sm:$0xff]  }
 0x788   :  { %8377 = vrcp.f32 %v3291_v36 }
 0x78f   :  { %v8372_v38 = vpop.eup %8371 }
 0x790   :  { %v3296_v4 = vmul.f32 %v8372_v38, %v3262_v1 }
 0x792   :  { %v3298_v48 = vadd.f32 %v3296_v4, %v3179_v12  ;;  %v3319_v12 = vunpack.c.l.bf16 %v3314_v49 }
 0x793   :  { %v8374_v26 = vpop.eup %8373 }
 0x794   :  { %8379 = vtanh.f32 %v3298_v48  ;;  %v3297_v14 = vmul.f32 %v8374_v26, %v3265_v42  ;;  %v8376_v18 = vpop.eup %8375 }
 0x795   :  { %v8378_v32 = vpop.eup %8377  ;;  %v3302_v28 = vsub.f32 1.0, %v8376_v18  ;;  %v3306_v17 = vmul.f32 %v8376_v18, %v10900_v46 }
 0x796   :  { %v3299_v33 = vadd.f32 %v3297_v14, %v3182_v29  ;;  %v3303_v57 = vsub.f32 1.0, %v8378_v32  ;;  %v3307_v47 = vmul.f32 %v8378_v32, %v10905_v10  ;;  %v8777_v14 = vld [vmem:[%s12166_s6 + $0x4] ss:$12 sps:$4 sm:$0xff]  }
 0x798   :  { %8381 = vtanh.f32 %v3299_v33 }
 0x7a1   :  { %v8380_v5 = vpop.eup %8379 }
 0x7a2   :  { %v3304_v45 = vmul.f32 %v8380_v5, %v3302_v28  ;;  %v3320_v28 = vunpack.c.h.bf16 %v3314_v49  ;;  %v8778_v5 = vld [vmem:[%s12166_s6] ss:$12 sps:$4 sm:$0xff]  }
 0x7a4   :  { %v3308_v43 = vadd.f32 %v3306_v17, %v3304_v45 }
 0x7a5   :  { %v8382_v25 = vpop.eup %8381 }
 0x7a6   :  { %v3305_v2 = vmul.f32 %v8382_v25, %v3303_v57  ;;  %v11010_v23 = vsel %vm1985_vm12, %v3308_v43, %v10900_v46  ;;  %v8764_v46 = vld [vmem:[%s12166_s6 + $0xb0] ss:$12 sps:$4 sm:$0xff]  }
 0x7a8   :  { %v3309_v7 = vadd.f32 %v3307_v47, %v3305_v2 }
 0x7aa   :  { %v11015_v63 = vsel %vm1986_vm13, %v3309_v7, %v10905_v10  ;;  %v8765_v10 = vld [vmem:[%s12166_s6 + $0x94] ss:$12 sps:$4 sm:$0xff]  }
 0x7ab   :  { %v3461_v24 = vpack.c.bf16 %v11015_v63, %v11010_v23 }
 0x7ad   :  { %3495 = vmatmul.mubr.bf16.vlgmr.msra.gmra.mxu0 %v3461_v24  ;;  %7653 = vmatmul.mubr.bf16.vlgmr.msra.gmra.mxu1 %v3461_v24 }
 0x7ae   :  { %3602 = vmatpush1.bf16.msra.mxu0 %v8763_v62  ;;  %7657 = vmatpush3.bf16.msra.mxu1 %v8764_v46 }
 0x7af   :  { %3603 = vmatprep.subr.bf16.mxu0 %v8765_v10  ;;  %7658 = vmatprep.subr.bf16.mxu1 %v12310_v20 }
 0x7b0   :  { %3633 = vmatprep.mubr.bf16.mxu0 %v12311_v61  ;;  %7672 = vmatprep.mubr.msk.bf16.mxu1 %vm9001_vm3, %v12310_v20 }
 0x7b2   :  { %3604 = vmatpush1.bf16.msra.mxu0 %v8766_v35  ;;  %7659 = vmatpush3.bf16.msra.mxu1 %v10775_v58  ;;  %v8770_v58 = vld [vmem:[%s12166_s6 + $0x60] ss:$12 sps:$4 sm:$0xff]  }
 0x7b3   :  { %3605 = vmatprep.subr.bf16.mxu0 %v8767_v50  ;;  %7660 = vmatprep.subr.bf16.mxu1 %v12310_v20 }
 0x7b6   :  { %3606 = vmatpush1.bf16.msra.mxu0 %v8768_v13  ;;  %7661 = vmatpush3.bf16.msra.mxu1 %v10784_v8  ;;  %v3312_v8 = vld [vmem:[#allocation2 + $0x3c] sm:$0xff] }
 0x7b7   :  { %3607 = vmatprep.subr.bf16.mxu0 %v8769_v16  ;;  %7662 = vmatprep.subr.bf16.mxu1 %v12310_v20  ;;  %v3316_v6 = vunpack.c.l.bf16 %v3312_v8  ;;  %v3317_v26 = vunpack.c.h.bf16 %v3312_v8 }
 0x7ba   :  { %3608 = vmatpush1.bf16.msra.mxu0 %v8770_v58  ;;  %7663 = vmatpush3.bf16.msra.mxu1 %v10793_v11 }
 0x7bb   :  { %3609 = vmatprep.subr.bf16.mxu0 %v8771_v54  ;;  %7664 = vmatprep.subr.bf16.mxu1 %v12310_v20 }
 0x7be   :  { %3610 = vmatpush1.bf16.msra.mxu0 %v8772_v15  ;;  %7665 = vmatpush3.bf16.msra.mxu1 %v10802_v52 }
 0x7bf   :  { %3611 = vmatprep.subr.bf16.mxu0 %v8773_v22  ;;  %7666 = vmatprep.subr.bf16.mxu1 %v12310_v20 }
 0x7c1   :  { %v3357_v11 = vpop.f32.mrf.mxu0  ;;  %v3400_v40 = vpop.f32.mrf.mxu1 }
 0x7c2   :  { %v3358_v56 = vadd.f32 %v3357_v11, %v9889_v51  ;;  %3612 = vmatpush1.bf16.msra.mxu0 %v8774_v44  ;;  %7667 = vmatpush3.bf16.msra.mxu1 %v10812_v19  ;;  %v8776_v19 = vld [vmem:[%s12166_s6 + $0x18] ss:$12 sps:$4 sm:$0xff]   ;;  %v3401_v60 = vadd.f32 %v3400_v40, %v9957_v27 }
 0x7c3   :  { %v3359_v37 = vpop.f32.mrf.mxu0  ;;  %v7634_v34 = vpop.f32.mrf.mxu1  ;;  %3613 = vmatprep.subr.bf16.mxu0 %v8775_v31  ;;  %7668 = vmatprep.subr.bf16.mxu1 %v12310_v20 }
 0x7c4   :  { %v3407_v52 = vadd.f32 %v3358_v56, %v3316_v6  ;;  %v3360_v36 = vadd.f32 %v3359_v37, %v9922_v41 }
 0x7c5   :  { %v3361_v59 = vpop.f32.mrf.mxu0  ;;  %v3403_v1 = vpop.f32.mrf.mxu1 }
 0x7c6   :  { %v6764_v38 = vmul.f32 -1.442695, %v3407_v52  ;;  %v3362_v4 = vadd.f32 %v3361_v59, %v9889_v51  ;;  %3614 = vmatpush1.bf16.msra.mxu0 %v8776_v19  ;;  %7669 = vmatpush3.bf16.msra.mxu1 %v10823_v0  ;;  %v3421_v18 = vadd.f32 %v3360_v36, %v3317_v26  ;;  %v3404_v50 = vadd.f32 %v3403_v1, %v9957_v27  ;;  %v8049_v19 = vld [vmem:[#allocation13 + $0x8] sm:$0xff]   ;;  %v8050_v26 = vld [vmem:[#allocation13] sm:$0xff]  }
 0x7c7   :  { %v3363_v48 = vpop.f32.mrf.mxu0  ;;  %v7635_v42 = vpop.f32.mrf.mxu1  ;;  %3615 = vmatprep.subr.bf16.mxu0 %v8777_v14  ;;  %7670 = vmatprep.subr.bf16.mxu1 %v12310_v20  ;;  %v3451_v14 = vld [vmem:[#allocation2 + $0x150] sm:$0xff] }
 0x7c8   :  { %8383 = vpow2.f32 %v6764_v38  ;;  %v3408_v29 = vadd.f32 %v3362_v4, %v3319_v12  ;;  %v3364_v33 = vadd.f32 %v3363_v48, %v9922_v41  ;;  %v6766_v45 = vmul.f32 -1.442695, %v3421_v18  ;;  %v8043_v12 = vld [vmem:[#allocation13 + $0x38] sm:$0xff]   ;;  %v8046_v4 = vld [vmem:[#allocation13 + $0x20] sm:$0xff]   ;;  %v8048_v42 = vld [vmem:[#allocation13 + $0x10] sm:$0xff]  }
 0x7c9   :  { %v8047_v48 = vld [vmem:[#allocation13 + $0x18] sm:$0xff]  }
 0x7ca   :  { %v6765_v32 = vmul.f32 -1.442695, %v3408_v29  ;;  %3616 = vmatpush1.bf16.msra.mxu0 %v8778_v5  ;;  %7671 = vmatpush3.bf16.msra.mxu1 %v12389_v9  ;;  %v3422_v0 = vadd.f32 %v3364_v33, %v3320_v28  ;;  %v3313_v9 = vld [vmem:[#allocation2 + $0x44] ss:$24 sps:$4 sm:$0xff]   ;;  %v3455_v28 = vunpack.c.l.bf16 %v3451_v14 }
 0x7cb   :  { %7696 = vmatprep.subr.bf16.mxu1 %v12310_v20  ;;  %7676 = vmatprep.subr.bf16.mxu0 %v12310_v20  ;;  %v3318_v46 = vunpack.c.l.bf16 %v3313_v9  ;;  %v3321_v16 = vunpack.c.h.bf16 %v3313_v9  ;;  %v8051_v29 = vld [vmem:[#allocation13 + $0x78] sm:$0xff]   ;;  %v8052_v33 = vld [vmem:[#allocation13 + $0x70] sm:$0xff]  }
 0x7cc   :  { %8385 = vpow2.f32 %v6765_v32  ;;  %v6767_v57 = vmul.f32 -1.442695, %v3422_v0 }
 0x7cd   :  { %8387 = vpow2.f32 %v6766_v45 }
 0x7ce   :  { %8389 = vpow2.f32 %v6767_v57  ;;  %v3453_v57 = vld [vmem:[#allocation2 + $0x168] sm:$0xff] }
 0x7d5   :  { %v8384_v17 = vpop.eup %8383 }
 0x7d6   :  { %v3415_v25 = vadd.f32 1.0, %v8384_v17  ;;  %v8053_v17 = vld [vmem:[#allocation13 + $0x68] sm:$0xff]  }
 0x7d8   :  { %8391 = vrcp.f32 %v3415_v25 }
 0x7d9   :  { %v8386_v2 = vpop.eup %8385 }
 0x7da   :  { %v3416_v47 = vadd.f32 1.0, %v8386_v2  ;;  %v8388_v43 = vpop.eup %8387 }
 0x7db   :  { %v8390_v7 = vpop.eup %8389  ;;  %v3429_v39 = vadd.f32 1.0, %v8388_v43 }
 0x7dc   :  { %8393 = vrcp.f32 %v3416_v47  ;;  %v3430_v62 = vadd.f32 1.0, %v8390_v7 }
 0x7dd   :  { %8395 = vrcp.f32 %v3429_v39  ;;  %v3458_v39 = vunpack.c.l.bf16 %v3453_v57 }
 0x7de   :  { %8397 = vrcp.f32 %v3430_v62 }
 0x7e5   :  { %v8392_v24 = vpop.eup %8391 }
 0x7e6   :  { %v3435_v10 = vmul.f32 %v8392_v24, %v3401_v60  ;;  %v8054_v60 = vld [vmem:[#allocation13 + $0x60] sm:$0xff]  }
 0x7e8   :  { %v3437_v35 = vadd.f32 %v3435_v10, %v3318_v46  ;;  %v3456_v46 = vunpack.c.h.bf16 %v3451_v14 }
 0x7e9   :  { %v8394_v13 = vpop.eup %8393 }
 0x7ea   :  { %8399 = vtanh.f32 %v3437_v35  ;;  %v3436_v58 = vmul.f32 %v8394_v13, %v3404_v50  ;;  %v8396_v8 = vpop.eup %8395 }
 0x7eb   :  { %v8398_v15 = vpop.eup %8397  ;;  %v3441_v22 = vsub.f32 1.0, %v8396_v8  ;;  %v3445_v56 = vmul.f32 %v8396_v8, %v10955_v21  ;;  %v8056_v8 = vld [vmem:[#allocation13 + $0x50] sm:$0xff]  }
 0x7ec   :  { %v3438_v54 = vadd.f32 %v3436_v58, %v3321_v16  ;;  %v3442_v6 = vsub.f32 1.0, %v8398_v15  ;;  %v3446_v49 = vmul.f32 %v8398_v15, %v10960_v55  ;;  %v8055_v16 = vld [vmem:[#allocation13 + $0x58] sm:$0xff]   ;;  %v3459_v58 = vunpack.c.h.bf16 %v3453_v57 }
 0x7ee   :  { %8401 = vtanh.f32 %v3438_v54 }
 0x7f7   :  { %v8400_v11 = vpop.eup %8399 }
 0x7f8   :  { %v3443_v40 = vmul.f32 %v8400_v11, %v3441_v22  ;;  %v8057_v22 = vld [vmem:[#allocation13 + $0x48] sm:$0xff]  }
 0x7fa   :  { %v3447_v44 = vadd.f32 %v3445_v56, %v3443_v40  ;;  %v8058_v40 = vld [vmem:[#allocation13 + $0x40] sm:$0xff]  }
 0x7fb   :  { %v8402_v37 = vpop.eup %8401 }
 0x7fc   :  { %v3444_v34 = vmul.f32 %v8402_v37, %v3442_v6  ;;  %v11097_v59 = vsel %vm1828_vm10, %v3447_v44, %v10955_v21  ;;  %v8044_v21 = vld [vmem:[#allocation13 + $0x30] sm:$0xff]   ;;  %v3452_v44 = vld [vmem:[#allocation2 + $0x158] ss:$24 sps:$4 sm:$0xff]  }
 0x7fe   :  { %v3448_v52 = vadd.f32 %v3446_v49, %v3444_v34 }
 0x800   :  { %v11102_v38 = vsel %vm1829_vm11, %v3448_v52, %v10960_v55  ;;  %v8045_v55 = vld [vmem:[#allocation13 + $0x28] sm:$0xff]  }
 0x801   :  { %v3600_v36 = vpack.c.bf16 %v11102_v38, %v11097_v59 }
 0x803   :  { %3634 = vmatmul.mubr.bf16.vlgmr.msra.gmra.mxu0 %v3600_v36  ;;  %7673 = vmatmul.mubr.bf16.vlgmr.msra.gmra.mxu1 %v3600_v36  ;;  %v3457_v36 = vunpack.c.l.bf16 %v3452_v44 }
 0x804   :  { %7712 = vmatprep.mubr.msk.bf16.mxu1 %vm9001_vm3, %v12310_v20  ;;  %7692 = vmatprep.mubr.msk.bf16.mxu0 %vm9001_vm3, %v12310_v20 }
 0x805   :  { %7697 = vmatpush3.bf16.msra.mxu1 %v8043_v12  ;;  %7677 = vmatpush3.bf16.msra.mxu0 %v8051_v29 }
 0x806   :  { %7698 = vmatprep.subr.bf16.mxu1 %v12310_v20  ;;  %7678 = vmatprep.subr.bf16.mxu0 %v12310_v20 }
 0x809   :  { %7699 = vmatpush3.bf16.msra.mxu1 %v8044_v21  ;;  %7679 = vmatpush3.bf16.msra.mxu0 %v8052_v33 }
 0x80a   :  { %7700 = vmatprep.subr.bf16.mxu1 %v12310_v20  ;;  %7680 = vmatprep.subr.bf16.mxu0 %v12310_v20 }
 0x80d   :  { %7701 = vmatpush3.bf16.msra.mxu1 %v8045_v55  ;;  %7681 = vmatpush3.bf16.msra.mxu0 %v8053_v17 }
 0x80e   :  { %7702 = vmatprep.subr.bf16.mxu1 %v12310_v20  ;;  %7682 = vmatprep.subr.bf16.mxu0 %v12310_v20 }
 0x811   :  { %7703 = vmatpush3.bf16.msra.mxu1 %v8046_v4  ;;  %7683 = vmatpush3.bf16.msra.mxu0 %v8054_v60 }
 0x812   :  { %7704 = vmatprep.subr.bf16.mxu1 %v12310_v20  ;;  %7684 = vmatprep.subr.bf16.mxu0 %v12310_v20 }
 0x815   :  { %7705 = vmatpush3.bf16.msra.mxu1 %v8047_v48  ;;  %7685 = vmatpush3.bf16.msra.mxu0 %v8055_v16  ;;  %v3460_v48 = vunpack.c.h.bf16 %v3452_v44 }
 0x816   :  { %7706 = vmatprep.subr.bf16.mxu1 %v12310_v20  ;;  %7686 = vmatprep.subr.bf16.mxu0 %v12310_v20 }
 0x819   :  { %7707 = vmatpush3.bf16.msra.mxu1 %v8048_v42  ;;  %7687 = vmatpush3.bf16.msra.mxu0 %v8056_v8 }
 0x81a   :  { %7708 = vmatprep.subr.bf16.mxu1 %v12310_v20  ;;  %7688 = vmatprep.subr.bf16.mxu0 %v12310_v20 }
 0x81d   :  { %7709 = vmatpush3.bf16.msra.mxu1 %v8049_v19  ;;  %7689 = vmatpush3.bf16.msra.mxu0 %v8057_v22 }
 0x81e   :  { %7710 = vmatprep.subr.bf16.mxu1 %v12310_v20  ;;  %7690 = vmatprep.subr.bf16.mxu0 %v12310_v20 }
 0x821   :  { %7711 = vmatpush3.bf16.msra.mxu1 %v8050_v26  ;;  %7691 = vmatpush3.bf16.msra.mxu0 %v8058_v40 }
 0x86d   :  { %v3496_v18 = vpop.f32.mrf.mxu0  ;;  %v3539_v32 = vpop.f32.mrf.mxu1 }
 0x86e   :  { %v3497_v5 = vadd.f32 %v3496_v18, %v12408_v30  ;;  %v3540_v52 = vadd.f32 %v3539_v32, %v9771_v3 }
 0x86f   :  { %v3498_v0 = vpop.f32.mrf.mxu0  ;;  %v7654_v45 = vpop.f32.mrf.mxu1 }
 0x870   :  { %v3546_v25 = vadd.f32 %v3497_v5, %v3455_v28  ;;  %v3499_v7 = vadd.f32 %v3498_v0, %v9741_v53 }
 0x871   :  { %v3500_v2 = vpop.f32.mrf.mxu0  ;;  %v3542_v47 = vpop.f32.mrf.mxu1 }
 0x872   :  { %v6768_v43 = vmul.f32 -1.442695, %v3546_v25  ;;  %v3501_v9 = vadd.f32 %v3500_v2, %v12408_v30  ;;  %v3560_v50 = vadd.f32 %v3499_v7, %v3456_v46  ;;  %v3543_v55 = vadd.f32 %v3542_v47, %v9771_v3  ;;  %v3590_v7 = vld [vmem:[#allocation2 + $0xc] sm:$0xff] }
 0x873   :  { %v3502_v24 = vpop.f32.mrf.mxu0  ;;  %v7655_v62 = vpop.f32.mrf.mxu1  ;;  %v3594_v60 = vunpack.c.l.bf16 %v3590_v7  ;;  %v3595_v8 = vunpack.c.h.bf16 %v3590_v7 }
 0x874   :  { %8403 = vpow2.f32 %v6768_v43  ;;  %v3547_v10 = vadd.f32 %v3501_v9, %v3458_v39  ;;  %v3503_v35 = vadd.f32 %v3502_v24, %v9741_v53  ;;  %v6770_v54 = vmul.f32 -1.442695, %v3560_v50 }
 0x876   :  { %v6769_v13 = vmul.f32 -1.442695, %v3547_v10  ;;  %v3561_v30 = vadd.f32 %v3503_v35, %v3459_v58  ;;  %v3592_v10 = vld [vmem:[#allocation2 + $0x24] sm:$0xff] }
 0x877   :  { %v3597_v58 = vunpack.c.l.bf16 %v3592_v10  ;;  %v3598_v40 = vunpack.c.h.bf16 %v3592_v10 }
 0x878   :  { %8405 = vpow2.f32 %v6769_v13  ;;  %v6771_v15 = vmul.f32 -1.442695, %v3561_v30 }
 0x879   :  { %8407 = vpow2.f32 %v6770_v54 }
 0x87a   :  { %8409 = vpow2.f32 %v6771_v15 }
 0x881   :  { %v8404_v53 = vpop.eup %8403 }
 0x882   :  { %v3554_v11 = vadd.f32 1.0, %v8404_v53 }
 0x884   :  { %8411 = vrcp.f32 %v3554_v11 }
 0x885   :  { %v8406_v6 = vpop.eup %8405 }
 0x886   :  { %v3555_v56 = vadd.f32 1.0, %v8406_v6  ;;  %v8408_v37 = vpop.eup %8407 }
 0x887   :  { %v8410_v34 = vpop.eup %8409  ;;  %v3568_v49 = vadd.f32 1.0, %v8408_v37 }
 0x888   :  { %8413 = vrcp.f32 %v3555_v56  ;;  %v3569_v1 = vadd.f32 1.0, %v8410_v34 }
 0x889   :  { %8415 = vrcp.f32 %v3568_v49 }
 0x88a   :  { %8417 = vrcp.f32 %v3569_v1 }
 0x891   :  { %v8412_v31 = vpop.eup %8411 }
 0x892   :  { %v3574_v12 = vmul.f32 %v8412_v31, %v3540_v52 }
 0x894   :  { %v3576_v21 = vadd.f32 %v3574_v12, %v3457_v36  ;;  %v3591_v36 = vld [vmem:[#allocation2 + $0x14] ss:$24 sps:$4 sm:$0xff]  }
 0x895   :  { %v8414_v4 = vpop.eup %8413 }
 0x896   :  { %8419 = vtanh.f32 %v3576_v21  ;;  %v3575_v42 = vmul.f32 %v8414_v4, %v3543_v55  ;;  %v8416_v26 = vpop.eup %8415  ;;  %v3596_v55 = vunpack.c.l.bf16 %v3591_v36 }
 0x897   :  { %v8418_v29 = vpop.eup %8417  ;;  %v3580_v14 = vsub.f32 1.0, %v8416_v26  ;;  %v3584_v28 = vmul.f32 %v8416_v26, %v11010_v23  ;;  %v3599_v26 = vunpack.c.h.bf16 %v3591_v36  ;;  %v11285_v36 = vld [vmem:[#allocation14 + $0x18] ss:$12 sps:$4 sm:$0xff]  }
 0x898   :  { %v3577_v19 = vadd.f32 %v3575_v42, %v3460_v48  ;;  %v3581_v32 = vsub.f32 1.0, %v8418_v29  ;;  %v3585_v45 = vmul.f32 %v8418_v29, %v11015_v63 }
 0x89a   :  { %8421 = vtanh.f32 %v3577_v19 }
 0x8a3   :  { %v8420_v33 = vpop.eup %8419 }
 0x8a4   :  { %v3582_v18 = vmul.f32 %v8420_v33, %v3580_v14 }
 0x8a6   :  { %v3586_v3 = vadd.f32 %v3584_v28, %v3582_v18  ;;  %v8061_v18 = vld [vmem:[%s12172_s12 + $0x1c] ss:$12 sps:$4 sm:$0xff]  }
 0x8a7   :  { %v8422_v5 = vpop.eup %8421  ;;  %4099 = vmatprep.subr.bf16.mxu0 %v8061_v18 }
 0x8a8   :  { %v3583_v0 = vmul.f32 %v8422_v5, %v3581_v32  ;;  %v3588_v25 = vsel %vm1671_vm7, %v3586_v3, %v11010_v23  ;;  %v8065_v32 = vld [vmem:[%s12170_s10] sm:$0xff]  }
 0x8aa   :  { %v3587_v57 = vadd.f32 %v3585_v45, %v3583_v0  ;;  %v8069_v0 = vld [vmem:[%s12172_s12 + $0x8] ss:$12 sps:$4 sm:$0xff]  }
 0x8ac   :  { %v3589_v47 = vsel %vm1672_vm8, %v3587_v57, %v11015_v63 }
 0x8ad   :  { %v3729_v43 = vpack.c.bf16 %v3589_v47, %v3588_v25  ;;  %v11158_v25 = vld [vmem:[#allocation14 + $0xac] ss:$12 sps:$4 sm:$0xff]  }
 0x8af   :  { %7713 = vmatmul.mubr.bf16.vlgmr.msra.gmra.mxu1 %v3729_v43 }
 0x8b0   :  { %7720 = vmatprep.mubr.msk.bf16.mxu1 %vm310_vm0, %v8065_v32 }
 0x8c3   :  { %v3635_v39 = vpop.f32.mrf.mxu0  ;;  %v3678_v9 = vpop.f32.mrf.mxu1 }
 0x8c4   :  { %v3636_v24 = vadd.f32 %v3635_v39, %v9889_v51  ;;  %v11161_v39 = vld [vmem:[#allocation14 + $0xa8] ss:$12 sps:$4 sm:$0xff]  }
 0x8c5   :  { %v3637_v62 = vpop.f32.mrf.mxu0  ;;  %v7674_v46 = vpop.f32.mrf.mxu1 }
 0x8c6   :  { %v3685_v35 = vadd.f32 %v3636_v24, %v3594_v60  ;;  %v3638_v23 = vadd.f32 %v3637_v62, %v9922_v41  ;;  %v8066_v60 = vld [vmem:[%s12170_s10 + $0x8] sm:$0xff]   ;;  %v11167_v24 = vld [vmem:[#allocation14 + $0x94] ss:$12 sps:$4 sm:$0xff]  }
 0x8c7   :  { %v3639_v50 = vpop.f32.mrf.mxu0  ;;  %v3681_v13 = vpop.f32.mrf.mxu1  ;;  %v8067_v62 = vld [vmem:[%s12170_s10 + $0x10] sm:$0xff]   ;;  %v12415_v46 = vld [vmem:[#allocation27_spill] sm:$0xff] }
 0x8c8   :  { %v6772_v16 = vmul.f32 -1.442695, %v3685_v35  ;;  %v3640_v63 = vadd.f32 %v3639_v50, %v9889_v51  ;;  %v3699_v53 = vadd.f32 %v3638_v23, %v3595_v8  ;;  %v3682_v42 = vadd.f32 %v3681_v13, %v9957_v27  ;;  %v12417_v35 = vld [vmem:[#allocation28_spill] sm:$0xff]  ;;  %v8059_v13 = vld [vmem:[%s12172_s12 + $0x18] ss:$12 sps:$4 sm:$0xff]  }
 0x8c9   :  { %v3641_v30 = vpop.f32.mrf.mxu0  ;;  %v7675_v54 = vpop.f32.mrf.mxu1  ;;  %vm12416_vm4 = vcmp.eq.s32.totalorder %v12415_v46, 1  ;;  %vm12418_vm5 = vcmp.eq.s32.totalorder %v12417_v35, 1  ;;  %v8064_v23 = vld [vmem:[%s12172_s12 + $0x4] ss:$12 sps:$4 sm:$0xff]  }
 0x8ca   :  { %8423 = vpow2.f32 %v6772_v16  ;;  %v3686_v15 = vadd.f32 %v3640_v63, %v3597_v58  ;;  %v3642_v22 = vadd.f32 %v3641_v30, %v9922_v41  ;;  %v6774_v56 = vmul.f32 -1.442695, %v3699_v53  ;;  %v8062_v58 = vld [vmem:[%s12172_s12] ss:$12 sps:$4 sm:$0xff]   ;;  %v8070_v30 = vld [vmem:[%s12170_s10 + $0x18] sm:$0xff]  }
 0x8cb   :  { %v3679_v41 = vadd.f32 %v3678_v9, %v9957_v27  ;;  %v8068_v27 = vld [vmem:[%s12172_s12 + $0x20] ss:$12 sps:$4 sm:$0xff]  }
 0x8cc   :  { %v6773_v11 = vmul.f32 -1.442695, %v3686_v15  ;;  %v3700_v6 = vadd.f32 %v3642_v22, %v3598_v40  ;;  %7716 = vmatprep.subr.bf16.mxu1 %v8068_v27  ;;  %v11197_v63 = vld [vmem:[#allocation14 + $0x78] ss:$12 sps:$4 sm:$0xff]   ;;  %v11208_v15 = vld [vmem:[#allocation14 + $0xb0] ss:$12 sps:$4 sm:$0xff]  }
 0x8cd   :  { %7717 = vmatpush3.bf16.msra.mxu1 %v8068_v27  ;;  %v11203_v54 = vld [vmem:[#allocation14 + $0x64] ss:$12 sps:$4 sm:$0xff]   ;;  %v11213_v22 = vld [vmem:[#allocation14 + $0x60] ss:$12 sps:$4 sm:$0xff]   ;;  %v11226_v40 = vld [vmem:[#allocation14 + $0x48] ss:$12 sps:$4 sm:$0xff]  }
 0x8ce   :  { %8425 = vpow2.f32 %v6773_v11  ;;  %v6775_v37 = vmul.f32 -1.442695, %v3700_v6  ;;  %7718 = vmatprep.subr.bf16.mxu1 %v8069_v0  ;;  %v8071_v8 = vld [vmem:[%s12170_s10 + $0x20] sm:$0xff]   ;;  %v11217_v53 = vld [vmem:[#allocation14 + $0x4c] ss:$12 sps:$4 sm:$0xff]  }
 0x8cf   :  { %8427 = vpow2.f32 %v6774_v56  ;;  %v11222_v11 = vld [vmem:[#allocation14 + $0x98] ss:$12 sps:$4 sm:$0xff]   ;;  %v8080_v6 = vld [vmem:[%s12170_s10 + $0x28] sm:$0xff]  }
 0x8d0   :  { %8429 = vpow2.f32 %v6775_v37  ;;  %v8089_v56 = vld [vmem:[%s12170_s10 + $0x30] sm:$0xff]  }
 0x8d1   :  { %7719 = vmatpush3.bf16.msra.mxu1 %v8069_v0  ;;  %v11235_v37 = vld [vmem:[#allocation14 + $0x34] ss:$12 sps:$4 sm:$0xff]  }
 0x8d2   :  { %4680 = vmatprep.subr.bf16.mxu1 %v11158_v25 }
 0x8d4   :  { %7721 = vmatmul.mubr.msk.bf16.vlgmr.msra.gmra.mxu1 %vm310_vm0, %v8066_v60 }
 0x8d5   :  { %4681 = vmatpush1.bf16.msra.mxu1 %v11161_v39  ;;  %7724 = vmatprep.mubr.msk.bf16.mxu1 %vm310_vm0, %v8067_v62 }
 0x8d6   :  { %4682 = vmatprep.subr.bf16.mxu1 %v11167_v24 }
 0x8d7   :  { %v8424_v34 = vpop.eup %8423 }
 0x8d8   :  { %v3693_v49 = vadd.f32 1.0, %v8424_v34  ;;  %v11238_v34 = vld [vmem:[#allocation14 + $0x80] ss:$12 sps:$4 sm:$0xff]  }
 0x8da   :  { %8431 = vrcp.f32 %v3693_v49  ;;  %v11248_v49 = vld [vmem:[#allocation14 + $0x68] ss:$12 sps:$4 sm:$0xff]  }
 0x8db   :  { %v8426_v51 = vpop.eup %8425 }
 0x8dc   :  { %v3694_v44 = vadd.f32 1.0, %v8426_v51  ;;  %v8428_v52 = vpop.eup %8427  ;;  %7725 = vmatmul.mubr.msk.bf16.gmra.mxu1 %vm310_vm0, %v8070_v30  ;;  %v8094_v51 = vld [vmem:[%s12170_s10 + $0x38] sm:$0xff]  }
 0x8dd   :  { %v8430_v31 = vpop.eup %8429  ;;  %v3707_v1 = vadd.f32 1.0, %v8428_v52  ;;  %7728 = vmatprep.mubr.msk.bf16.mxu1 %vm310_vm0, %v8071_v8  ;;  %v11275_v52 = vld [vmem:[#allocation14 + $0x30] ss:$12 sps:$4 sm:$0xff]  }
 0x8de   :  { %8433 = vrcp.f32 %v3694_v44  ;;  %v3708_v21 = vadd.f32 1.0, %v8430_v31  ;;  %v11255_v44 = vld [vmem:[#allocation14 + $0x50] ss:$12 sps:$4 sm:$0xff]   ;;  %v11277_v31 = vld [vmem:[#allocation14 + $0x38] ss:$12 sps:$4 sm:$0xff]  }
 0x8df   :  { %8435 = vrcp.f32 %v3707_v1  ;;  %v11279_v1 = vld [vmem:[#allocation14 + $0x1c] ss:$12 sps:$4 sm:$0xff]  }
 0x8e0   :  { %8437 = vrcp.f32 %v3708_v21  ;;  %v11293_v21 = vld [vmem:[#allocation14] ss:$12 sps:$4 sm:$0xff]  }
 0x8e4   :  { %7729 = vmatmul.mubr.msk.bf16.gmra.mxu1 %vm310_vm0, %v8080_v6 }
 0x8e5   :  { %7732 = vmatprep.mubr.msk.bf16.mxu1 %vm310_vm0, %v8089_v56 }
 0x8e7   :  { %v8432_v12 = vpop.eup %8431 }
 0x8e8   :  { %v3713_v4 = vmul.f32 %v8432_v12, %v3679_v41  ;;  %v11287_v41 = vld [vmem:[#allocation14 + $0x20] ss:$12 sps:$4 sm:$0xff]   ;;  %v11291_v12 = vld [vmem:[#allocation14 + $0x4] ss:$12 sps:$4 sm:$0xff]  }
 0x8ea   :  { %v3715_v48 = vadd.f32 %v3713_v4, %v3596_v55  ;;  %v11295_v55 = vld [vmem:[#allocation14 + $0x8] ss:$12 sps:$4 sm:$0xff]  }
 0x8eb   :  { %v8434_v19 = vpop.eup %8433 }
 0x8ec   :  { %8439 = vtanh.f32 %v3715_v48  ;;  %v3714_v29 = vmul.f32 %v8434_v19, %v3682_v42  ;;  %v8436_v33 = vpop.eup %8435  ;;  %7733 = vmatmul.mubr.msk.bf16.gmra.mxu1 %vm310_vm0, %v8094_v51 }
 0x8ed   :  { %v8438_v28 = vpop.eup %8437  ;;  %v3719_v5 = vsub.f32 1.0, %v8436_v33  ;;  %v3723_v17 = vmul.f32 %v8436_v33, %v11097_v59  ;;  %4712 = vmatprep.mubr.bf16.mxu1 %v12311_v61 }
 0x8ee   :  { %v3716_v14 = vadd.f32 %v3714_v29, %v3599_v26  ;;  %v3720_v57 = vsub.f32 1.0, %v8438_v28  ;;  %v3724_v43 = vmul.f32 %v8438_v28, %v11102_v38  ;;  %v3974_v26 = vld [vmem:[%s12173_s13] sm:$0x7] }
 0x8ef   :  { %v12419_v29 = vld [vmem:[#allocation23_spill] sm:$0xff] }
 0x8f0   :  { %8441 = vtanh.f32 %v3716_v14  ;;  %v11307_v14 = vrot.slane %v3974_v26, %v12419_v29 }
 0x8f9   :  { %v8440_v45 = vpop.eup %8439 }
 0x8fa   :  { %v3721_v3 = vmul.f32 %v8440_v45, %v3719_v5 }
 0x8fc   :  { %v3725_v7 = vadd.f32 %v3723_v17, %v3721_v3 }
 0x8fd   :  { %v8442_v2 = vpop.eup %8441 }
 0x8fe   :  { %v3722_v47 = vmul.f32 %v8442_v2, %v3720_v57  ;;  %v3727_v10 = vsel %vm12416_vm4, %v3725_v7, %v11097_v59  ;;  %v11187_v59 = vld [vmem:[#allocation14 + $0x90] ss:$12 sps:$4 sm:$0xff]  }
 0x8ff   :  { %4683 = vmatpush1.bf16.msra.mxu1 %v11187_v59 }
 0x900   :  { %v3726_v9 = vadd.f32 %v3724_v43, %v3722_v47  ;;  %v6792_v47 = vld [vmem:[%s12169_s9] ss:$0 sm:$0xff] }
 0x902   :  { %v3728_v50 = vsel %vm12418_vm5, %v3726_v9, %v11102_v38  ;;  %v11190_v38 = vld [vmem:[#allocation14 + $0x7c] ss:$12 sps:$4 sm:$0xff]  }
 0x903   :  { %v3746_v16 = vpack.c.bf16 %v3728_v50, %v3727_v10  ;;  %4684 = vmatprep.subr.bf16.mxu1 %v11190_v38 }
 0x904   :  { %4685 = vmatpush1.bf16.msra.mxu1 %v11197_v63 }
 0x905   :  { %7693 = vmatmul.mubr.bf16.vlgmr.msra.gmra.mxu0 %v3746_v16  ;;  %4686 = vmatprep.subr.bf16.mxu1 %v11203_v54 }
 0x906   :  { %4100 = vmatpush1.bf16.msra.mxu0 %v8059_v13  ;;  %4119 = vmatprep.mubr.bf16.mxu0 %v12311_v61 }
 0x907   :  { %4101 = vmatprep.subr.bf16.mxu0 %v8064_v23 }
 0x908   :  { %4687 = vmatpush1.bf16.msra.mxu1 %v11213_v22 }
 0x909   :  { %4688 = vmatprep.subr.bf16.mxu1 %v11217_v53 }
 0x90a   :  { %4102 = vmatpush1.bf16.msra.mxu0 %v8062_v58  ;;  %v12421_v58 = vld [vmem:[#allocation25_spill] sm:$0xff] }
 0x90b   :  { %7736 = vmatprep.subr.bf16.mxu0 %v12310_v20 }
 0x90c   :  { %4689 = vmatpush1.bf16.msra.mxu1 %v11226_v40 }
 0x90d   :  { %6807 = vmatmul.mubr.msk.bf16.vlgmr.msra.gmra.mxu0 %vm310_vm0, %v8065_v32  ;;  %4690 = vmatprep.subr.bf16.mxu1 %v11235_v37 }
 0x90e   :  { %4129 = vmatprep.mubr.bf16.mxu0 %v12311_v61  ;;  %7737 = vmatpush3.bf16.msra.mxu0 %v11208_v15 }
 0x90f   :  { %7738 = vmatprep.subr.bf16.mxu0 %v12310_v20 }
 0x910   :  { %4691 = vmatpush1.bf16.msra.mxu1 %v11275_v52 }
 0x911   :  { %4692 = vmatprep.subr.bf16.mxu1 %v11279_v1 }
 0x912   :  { %7739 = vmatpush3.bf16.msra.mxu0 %v11222_v11 }
 0x913   :  { %7740 = vmatprep.subr.bf16.mxu0 %v12310_v20 }
 0x914   :  { %4693 = vmatpush1.bf16.msra.mxu1 %v11285_v36 }
 0x915   :  { %6808 = vmatmul.mubr.msk.bf16.gmra.mxu0 %vm310_vm0, %v8066_v60  ;;  %4694 = vmatprep.subr.bf16.mxu1 %v11291_v12 }
 0x916   :  { %4139 = vmatprep.mubr.bf16.mxu0 %v12311_v61  ;;  %7741 = vmatpush3.bf16.msra.mxu0 %v11238_v34 }
 0x917   :  { %7742 = vmatprep.subr.bf16.mxu0 %v12310_v20 }
 0x918   :  { %4695 = vmatpush1.bf16.msra.mxu1 %v11293_v21 }
 0x919   :  { %4829 = vmatprep.subr.bf16.mxu1 %v11158_v25 }
 0x91a   :  { %7743 = vmatpush3.bf16.msra.mxu0 %v11248_v49 }
 0x91b   :  { %7744 = vmatprep.subr.bf16.mxu0 %v12310_v20 }
 0x91d   :  { %6809 = vmatmul.mubr.msk.bf16.gmra.mxu0 %vm310_vm0, %v8067_v62  ;;  %v12420_v62 = vld [vmem:[#allocation24_spill] sm:$0xff] }
 0x91e   :  { %4149 = vmatprep.mubr.bf16.mxu0 %v12311_v61  ;;  %7745 = vmatpush3.bf16.msra.mxu0 %v11255_v44  ;;  %v11317_v46 = vrot.slane %v3974_v26, %v12420_v62 }
 0x91f   :  { %7746 = vmatprep.subr.bf16.mxu0 %v12310_v20 }
 0x922   :  { %7747 = vmatpush3.bf16.msra.mxu0 %v11277_v31 }
 0x923   :  { %7748 = vmatprep.subr.bf16.mxu0 %v12310_v20 }
 0x925   :  { %6810 = vmatmul.mubr.msk.bf16.gmra.mxu0 %vm310_vm0, %v8070_v30  ;;  %v11325_v30 = vrot.slane %v3974_v26, %v12421_v58 }
 0x926   :  { %4159 = vmatprep.mubr.bf16.mxu0 %v12311_v61  ;;  %7749 = vmatpush3.bf16.msra.mxu0 %v11287_v41 }
 0x927   :  { %7750 = vmatprep.subr.bf16.mxu0 %v12310_v20 }
 0x92a   :  { %7751 = vmatpush3.bf16.msra.mxu0 %v11295_v55 }
 0x92b   :  { %7756 = vmatprep.subr.bf16.mxu0 %v12310_v20 }
 0x92d   :  { %6811 = vmatmul.mubr.msk.bf16.gmra.mxu0 %vm310_vm0, %v8071_v8 }
 0x92e   :  { %4169 = vmatprep.mubr.bf16.mxu0 %v12311_v61 }
 0x935   :  { %6812 = vmatmul.mubr.msk.bf16.gmra.mxu0 %vm310_vm0, %v8080_v6 }
 0x936   :  { %4179 = vmatprep.mubr.bf16.mxu0 %v12311_v61 }
 0x93d   :  { %6813 = vmatmul.mubr.msk.bf16.gmra.mxu0 %vm310_vm0, %v8089_v56 }
 0x93e   :  { %4189 = vmatprep.mubr.bf16.mxu0 %v12311_v61 }
 0x945   :  { %6814 = vmatmul.mubr.msk.bf16.gmra.mxu0 %vm310_vm0, %v8094_v51 }
 0x946   :  { %7752 = vmatprep.mubr.msk.bf16.mxu0 %vm9001_vm3, %v12310_v20 }
 0x96f   :  { %v3934_v4 = vpop.f32.mrf.mxu1 }
 0x971   :  { %v7714_v48 = vpop.f32.mrf.mxu1 }
 0x973   :  { %v3937_v42 = vpop.f32.mrf.mxu1 }
 0x975   :  { %v7715_v19 = vpop.f32.mrf.mxu1 }
 0x994   :  { %v7722_v33 = vpop.f32.mrf.mxu1 }
 0x995   :  { %v4243_v18 = vadd.f32 %v7722_v33, %v11307_v14 }
 0x996   :  { %v4234_v32 = vpop.f32.mrf.mxu1 }
 0x997   :  { %v7013_v5 = vpack.c.bf16 %v4243_v18, %v4243_v18  ;;  %v4235_v27 = vadd.f32 %v4234_v32, %v11307_v14 }
 0x998   :  { %v7723_v0 = vpop.f32.mrf.mxu1 }
 0x999   :  { %4462 = vst [vmem:[#allocation3 + $0x20] sm:$0xf] %v7013_v5  ;;  %v7009_v3 = vpack.c.bf16 %v4235_v27, %v4235_v27  ;;  %v4246_v57 = vadd.f32 %v7723_v0, %v11307_v14 }
 0x99a   :  { %v4237_v2 = vpop.f32.mrf.mxu1 }
 0x99b   :  { %4458 = vst [vmem:[#allocation3 + $0x8] sm:$0xf] %v7009_v3  ;;  %v7015_v7 = vpack.c.bf16 %v4246_v57, %v4246_v57  ;;  %v4238_v9 = vadd.f32 %v4237_v2, %v11307_v14 }
 0x99c   :  { %v7726_v10 = vpop.f32.mrf.mxu1 }
 0x99d   :  { %4464 = vst [vmem:[#allocation3 + $0x2c] sm:$0xf] %v7015_v7  ;;  %v7011_v50 = vpack.c.bf16 %v4238_v9, %v4238_v9  ;;  %v4259_v13 = vadd.f32 %v7726_v10, %v11307_v14 }
 0x99e   :  { %v4250_v8 = vpop.f32.mrf.mxu1 }
 0x99f   :  { %4460 = vst [vmem:[#allocation3 + $0x14] sm:$0xf] %v7011_v50  ;;  %v7021_v56 = vpack.c.bf16 %v4259_v13, %v4259_v13  ;;  %v4251_v51 = vadd.f32 %v4250_v8, %v11307_v14 }
 0x9a1   :  { %4470 = vst [vmem:[#allocation3 + $0x50] sm:$0xf] %v7021_v56  ;;  %v7017_v33 = vpack.c.bf16 %v4251_v51, %v4251_v51 }
 0x9a3   :  { %4466 = vst [vmem:[#allocation3 + $0x38] sm:$0xf] %v7017_v33 }
 0x9c5   :  { %v3845_v28 = vpop.f32.mrf.mxu0 }
 0x9c6   :  { %v3935_v17 = vadd.f32 %v3934_v4, %v3845_v28 }
 0x9c7   :  { %v7694_v45 = vpop.f32.mrf.mxu0 }
 0x9c8   :  { %v11320_v16 = vadd.f32 %v6792_v47, %v3935_v17 }
 0x9c9   :  { %v3848_v43 = vpop.f32.mrf.mxu0 }
 0x9ca   :  { %v3938_v60 = vadd.f32 %v3937_v42, %v3848_v43  ;;  %v7727_v42 = vpop.f32.mrf.mxu1 }
 0x9cb   :  { %v7695_v35 = vpop.f32.mrf.mxu0  ;;  %v4262_v18 = vadd.f32 %v7727_v42, %v11307_v14 }
 0x9cc   :  { %v11322_v23 = vadd.f32 %v6792_v47, %v3938_v60  ;;  %v4253_v32 = vpop.f32.mrf.mxu1 }
 0x9cd   :  { %v4121_v6 = vpop.f32.mrf.mxu0  ;;  %v7023_v5 = vpack.c.bf16 %v4262_v18, %v4262_v18  ;;  %v4254_v27 = vadd.f32 %v4253_v32, %v11307_v14 }
 0x9ce   :  { %v4535_v4 = vpack.c.bf16 %v11322_v23, %v11320_v16  ;;  %v4122_v48 = vadd.f32 %v4121_v6, %v11317_v46  ;;  %v7730_v3 = vpop.f32.mrf.mxu1 }
 0x9cf   :  { %v4123_v19 = vpop.f32.mrf.mxu0  ;;  %4472 = vst [vmem:[#allocation3 + $0x5c] sm:$0xf] %v7023_v5  ;;  %v7019_v17 = vpack.c.bf16 %v4254_v27, %v4254_v27  ;;  %v4275_v2 = vadd.f32 %v7730_v3, %v11307_v14 }
 0x9d0   :  { %4713 = vmatmul.mubr.bf16.vlgmr.msra.gmra.mxu1 %v4535_v4  ;;  %7753 = vmatmul.mubr.bf16.vlgmr.msra.gmra.mxu0 %v4535_v4  ;;  %v4124_v26 = vadd.f32 %v4123_v19, %v11325_v30  ;;  %v4266_v43 = vpop.f32.mrf.mxu1 }
 0x9d1   :  { %v4125_v28 = vpop.f32.mrf.mxu0  ;;  %4830 = vmatpush1.bf16.msra.mxu1 %v11161_v39  ;;  %7757 = vmatpush3.bf16.msra.mxu0 %v11208_v15  ;;  %4468 = vst [vmem:[#allocation3 + $0x44] sm:$0xf] %v7019_v17  ;;  %v7029_v9 = vpack.c.bf16 %v4275_v2, %v4275_v2  ;;  %v4267_v60 = vadd.f32 %v4266_v43, %v11307_v14 }
 0x9d2   :  { %v11336_v0 = vpack.c.bf16 %v4124_v26, %v4122_v48  ;;  %v4126_v45 = vadd.f32 %v4125_v28, %v11317_v46  ;;  %4831 = vmatprep.subr.bf16.mxu1 %v11167_v24  ;;  %7758 = vmatprep.subr.bf16.mxu0 %v12310_v20  ;;  %v7731_v50 = vpop.f32.mrf.mxu1 }
 0x9d3   :  { %v4127_v57 = vpop.f32.mrf.mxu0  ;;  %4861 = vmatprep.mubr.bf16.mxu1 %v12311_v61  ;;  %7772 = vmatprep.mubr.msk.bf16.mxu0 %vm9001_vm3, %v12310_v20  ;;  %4478 = vst [vmem:[#allocation3 + $0x80] sm:$0xf] %v7029_v9  ;;  %v7025_v8 = vpack.c.bf16 %v4267_v60, %v4267_v60  ;;  %v4278_v6 = vadd.f32 %v7731_v50, %v11307_v14 }
 0x9d4   :  { %v4128_v47 = vadd.f32 %v4127_v57, %v11325_v30  ;;  %v4269_v51 = vpop.f32.mrf.mxu1 }
 0x9d5   :  { %v4131_v7 = vpop.f32.mrf.mxu0  ;;  %4832 = vmatpush1.bf16.msra.mxu1 %v11187_v59  ;;  %7759 = vmatpush3.bf16.msra.mxu0 %v11222_v11  ;;  %4474 = vst [vmem:[#allocation3 + $0x68] sm:$0xf] %v7025_v8  ;;  %v7031_v48 = vpack.c.bf16 %v4278_v6, %v4278_v6  ;;  %v4270_v42 = vadd.f32 %v4269_v51, %v11307_v14 }
 0x9d6   :  { %v11349_v10 = vpack.c.bf16 %v4128_v47, %v4126_v45  ;;  %v4132_v35 = vadd.f32 %v4131_v7, %v11317_v46  ;;  %4833 = vmatprep.subr.bf16.mxu1 %v11190_v38  ;;  %7760 = vmatprep.subr.bf16.mxu0 %v12310_v20  ;;  %v7734_v18 = vpop.f32.mrf.mxu1 }
 0x9d7   :  { %v4133_v13 = vpop.f32.mrf.mxu0  ;;  %4480 = vst [vmem:[#allocation3 + $0x8c] sm:$0xf] %v7031_v48  ;;  %v7027_v32 = vpack.c.bf16 %v4270_v42, %v4270_v42  ;;  %v4291_v28 = vadd.f32 %v7734_v18, %v11307_v14 }
 0x9d8   :  { %v4134_v56 = vadd.f32 %v4133_v13, %v11325_v30  ;;  %v4282_v27 = vpop.f32.mrf.mxu1 }
 0x9d9   :  { %v4135_v4 = vpop.f32.mrf.mxu0  ;;  %4834 = vmatpush1.bf16.msra.mxu1 %v11197_v63  ;;  %7761 = vmatpush3.bf16.msra.mxu0 %v11238_v34  ;;  %4476 = vst [vmem:[#allocation3 + $0x74] sm:$0xf] %v7027_v32  ;;  %v7037_v3 = vpack.c.bf16 %v4291_v28, %v4291_v28  ;;  %v4283_v57 = vadd.f32 %v4282_v27, %v11307_v14 }
 0x9da   :  { %v11359_v19 = vpack.c.bf16 %v4134_v56, %v4132_v35  ;;  %v4136_v33 = vadd.f32 %v4135_v4, %v11317_v46  ;;  %4835 = vmatprep.subr.bf16.mxu1 %v11203_v54  ;;  %7762 = vmatprep.subr.bf16.mxu0 %v12310_v20  ;;  %v7735_v47 = vpop.f32.mrf.mxu1 }
 0x9db   :  { %v4137_v26 = vpop.f32.mrf.mxu0  ;;  %4486 = vst [vmem:[#allocation3 + $0xb0] sm:$0xf] %v7037_v3  ;;  %v7033_v7 = vpack.c.bf16 %v4283_v57, %v4283_v57  ;;  %v4294_v9 = vadd.f32 %v7735_v47, %v11307_v14 }
 0x9dc   :  { %v4138_v5 = vadd.f32 %v4137_v26, %v11325_v30  ;;  %v4285_v35 = vpop.f32.mrf.mxu1 }
 0x9dd   :  { %v4141_v45 = vpop.f32.mrf.mxu0  ;;  %4836 = vmatpush1.bf16.msra.mxu1 %v11213_v22  ;;  %7763 = vmatpush3.bf16.msra.mxu0 %v11248_v49  ;;  %4482 = vst [vmem:[#allocation3 + $0x98] sm:$0xf] %v7033_v7  ;;  %v7039_v13 = vpack.c.bf16 %v4294_v9, %v4294_v9  ;;  %v4286_v8 = vadd.f32 %v4285_v35, %v11307_v14 }
 0x9de   :  { %v11369_v17 = vpack.c.bf16 %v4138_v5, %v4136_v33  ;;  %v4142_v2 = vadd.f32 %v4141_v45, %v11317_v46  ;;  %4837 = vmatprep.subr.bf16.mxu1 %v11217_v53  ;;  %7764 = vmatprep.subr.bf16.mxu0 %v12310_v20 }
 0x9df   :  { %v4143_v43 = vpop.f32.mrf.mxu0  ;;  %4488 = vst [vmem:[#allocation3 + $0xbc] sm:$0xf] %v7039_v13  ;;  %v7035_v4 = vpack.c.bf16 %v4286_v8, %v4286_v8 }
 0x9e0   :  { %v4144_v60 = vadd.f32 %v4143_v43, %v11325_v30 }
 0x9e1   :  { %v4145_v50 = vpop.f32.mrf.mxu0  ;;  %4838 = vmatpush1.bf16.msra.mxu1 %v11226_v40  ;;  %7765 = vmatpush3.bf16.msra.mxu0 %v11255_v44  ;;  %4484 = vst [vmem:[#allocation3 + $0xa4] sm:$0xf] %v7035_v4 }
 0x9e2   :  { %v11379_v6 = vpack.c.bf16 %v4144_v60, %v4142_v2  ;;  %v4146_v56 = vadd.f32 %v4145_v50, %v11317_v46  ;;  %4839 = vmatprep.subr.bf16.mxu1 %v11235_v37  ;;  %7766 = vmatprep.subr.bf16.mxu0 %v12310_v20 }
 0x9e3   :  { %v4147_v51 = vpop.f32.mrf.mxu0 }
 0x9e4   :  { %v4148_v48 = vadd.f32 %v4147_v51, %v11325_v30 }
 0x9e5   :  { %v4151_v42 = vpop.f32.mrf.mxu0  ;;  %4840 = vmatpush1.bf16.msra.mxu1 %v11275_v52  ;;  %7767 = vmatpush3.bf16.msra.mxu0 %v11277_v31 }
 0x9e6   :  { %v11387_v14 = vpack.c.bf16 %v4148_v48, %v4146_v56  ;;  %v4152_v33 = vadd.f32 %v4151_v42, %v11317_v46  ;;  %4841 = vmatprep.subr.bf16.mxu1 %v11279_v1  ;;  %7768 = vmatprep.subr.bf16.mxu0 %v12310_v20 }
 0x9e7   :  { %v4153_v18 = vpop.f32.mrf.mxu0 }
 0x9e8   :  { %v4154_v26 = vadd.f32 %v4153_v18, %v11325_v30 }
 0x9e9   :  { %v4155_v32 = vpop.f32.mrf.mxu0  ;;  %4842 = vmatpush1.bf16.msra.mxu1 %v11285_v36  ;;  %7769 = vmatpush3.bf16.msra.mxu0 %v11287_v41 }
 0x9ea   :  { %v11395_v28 = vpack.c.bf16 %v4154_v26, %v4152_v33  ;;  %v4156_v5 = vadd.f32 %v4155_v32, %v11317_v46  ;;  %4843 = vmatprep.subr.bf16.mxu1 %v11291_v12  ;;  %7770 = vmatprep.subr.bf16.mxu0 %v12310_v20 }
 0x9eb   :  { %v4157_v27 = vpop.f32.mrf.mxu0 }
 0x9ec   :  { %v4158_v45 = vadd.f32 %v4157_v27, %v11325_v30 }
 0x9ed   :  { %v4161_v3 = vpop.f32.mrf.mxu0  ;;  %4844 = vmatpush1.bf16.msra.mxu1 %v11293_v21  ;;  %7771 = vmatpush3.bf16.msra.mxu0 %v11295_v55 }
 0x9ee   :  { %v11403_v57 = vpack.c.bf16 %v4158_v45, %v4156_v5  ;;  %v4162_v2 = vadd.f32 %v4161_v3, %v11317_v46  ;;  %4979 = vmatprep.subr.bf16.mxu1 %v11158_v25  ;;  %7776 = vmatprep.subr.bf16.mxu0 %v12310_v20 }
 0x9ef   :  { %v4163_v47 = vpop.f32.mrf.mxu0 }
 0x9f0   :  { %v4164_v43 = vadd.f32 %v4163_v47, %v11325_v30 }
 0x9f1   :  { %v4165_v7 = vpop.f32.mrf.mxu0 }
 0x9f2   :  { %v11409_v9 = vpack.c.bf16 %v4164_v43, %v4162_v2  ;;  %v4166_v60 = vadd.f32 %v4165_v7, %v11317_v46 }
 0x9f3   :  { %v4167_v35 = vpop.f32.mrf.mxu0 }
 0x9f4   :  { %v4168_v50 = vadd.f32 %v4167_v35, %v11325_v30 }
 0x9f5   :  { %v4171_v13 = vpop.f32.mrf.mxu0 }
 0x9f6   :  { %v11413_v8 = vpack.c.bf16 %v4168_v50, %v4166_v60  ;;  %v4172_v56 = vadd.f32 %v4171_v13, %v11317_v46 }
 0x9f7   :  { %v4173_v51 = vpop.f32.mrf.mxu0 }
 0x9f8   :  { %v4174_v4 = vadd.f32 %v4173_v51, %v11325_v30 }
 0x9f9   :  { %v4175_v48 = vpop.f32.mrf.mxu0 }
 0x9fa   :  { %v7028_v42 = vpack.c.bf16 %v4174_v4, %v4172_v56  ;;  %v4176_v33 = vadd.f32 %v4175_v48, %v11317_v46 }
 0x9fb   :  { %v4177_v18 = vpop.f32.mrf.mxu0 }
 0x9fc   :  { %4477 = vst [vmem:[#allocation3 + $0x78] sm:$0xff] %v7028_v42  ;;  %v4178_v26 = vadd.f32 %v4177_v18, %v11325_v30 }
 0x9fd   :  { %v4181_v32 = vpop.f32.mrf.mxu0 }
 0x9fe   :  { %v7030_v5 = vpack.c.bf16 %v4178_v26, %v4176_v33  ;;  %v4182_v27 = vadd.f32 %v4181_v32, %v11317_v46  ;;  %v4521_v32 = vld [vmem:[%s12175_s15] sm:$0x7] }
 0x9ff   :  { %v4183_v45 = vpop.f32.mrf.mxu0 }
 0xa00   :  { %4479 = vst [vmem:[#allocation3 + $0x84] sm:$0xff] %v7030_v5  ;;  %v4184_v3 = vadd.f32 %v4183_v45, %v11325_v30  ;;  %v11431_v5 = vrot.slane %v4521_v32, %v12420_v62 }
 0xa01   :  { %v4185_v2 = vpop.f32.mrf.mxu0 }
 0xa02   :  { %v7032_v47 = vpack.c.bf16 %v4184_v3, %v4182_v27  ;;  %v4186_v43 = vadd.f32 %v4185_v2, %v11317_v46  ;;  %v4529_v3 = vunpack.c.l.bf16 %v11336_v0 }
 0xa03   :  { %v4187_v7 = vpop.f32.mrf.mxu0 }
 0xa04   :  { %4481 = vst [vmem:[#allocation3 + $0x90] sm:$0xff] %v7032_v47  ;;  %v4188_v60 = vadd.f32 %v4187_v7, %v11325_v30 }
 0xa05   :  { %v4191_v35 = vpop.f32.mrf.mxu0 }
 0xa06   :  { %v7034_v50 = vpack.c.bf16 %v4188_v60, %v4186_v43  ;;  %v4192_v13 = vadd.f32 %v4191_v35, %v11317_v46 }
 0xa07   :  { %v4193_v56 = vpop.f32.mrf.mxu0 }
 0xa08   :  { %4483 = vst [vmem:[#allocation3 + $0x9c] sm:$0xff] %v7034_v50  ;;  %v4194_v51 = vadd.f32 %v4193_v56, %v11325_v30  ;;  %v4532_v50 = vunpack.c.l.bf16 %v11349_v10 }
 0xa09   :  { %v4195_v4 = vpop.f32.mrf.mxu0 }
 0xa0a   :  { %v7036_v48 = vpack.c.bf16 %v4194_v51, %v4192_v13  ;;  %v4196_v42 = vadd.f32 %v4195_v4, %v11317_v46 }
 0xa0b   :  { %v4197_v33 = vpop.f32.mrf.mxu0 }
 0xa0c   :  { %4485 = vst [vmem:[#allocation3 + $0xa8] sm:$0xff] %v7036_v48  ;;  %v4198_v18 = vadd.f32 %v4197_v33, %v11325_v30  ;;  %v11436_v30 = vrot.slane %v4521_v32, %v12421_v58  ;;  %v4533_v58 = vunpack.c.h.bf16 %v11349_v10 }
 0xa0e   :  { %v7038_v26 = vpack.c.bf16 %v4198_v18, %v4196_v42  ;;  %v4530_v42 = vunpack.c.h.bf16 %v11336_v0 }
 0xa10   :  { %4487 = vst [vmem:[#allocation3 + $0xb4] sm:$0xff] %v7038_v26 }
 0xa90   :  { %v4714_v27 = vpop.f32.mrf.mxu1  ;;  %v4757_v45 = vpop.f32.mrf.mxu0 }
 0xa91   :  { %v4715_v2 = vadd.f32 %v4714_v27, %v11431_v5 }
 0xa92   :  { %v4716_v46 = vpop.f32.mrf.mxu1  ;;  %v7754_v47 = vpop.f32.mrf.mxu0 }
 0xa93   :  { %v4764_v43 = vadd.f32 %v4715_v2, %v4529_v3  ;;  %v4717_v51 = vadd.f32 %v4716_v46, %v11436_v30 }
 0xa94   :  { %v4718_v7 = vpop.f32.mrf.mxu1  ;;  %v4760_v60 = vpop.f32.mrf.mxu0 }
 0xa95   :  { %v6879_v35 = vmul.f32 -1.442695, %v4764_v43  ;;  %v4719_v62 = vadd.f32 %v4718_v7, %v11431_v5  ;;  %v4778_v18 = vadd.f32 %v4717_v51, %v4530_v42  ;;  %v11445_v7 = vrot.slane %v4521_v32, %v12419_v29 }
 0xa96   :  { %v4720_v13 = vpop.f32.mrf.mxu1  ;;  %v7755_v56 = vpop.f32.mrf.mxu0 }
 0xa97   :  { %8443 = vpow2.f32 %v6879_v35  ;;  %v4765_v4 = vadd.f32 %v4719_v62, %v4532_v50  ;;  %v4721_v48 = vadd.f32 %v4720_v13, %v11436_v30  ;;  %v6881_v27 = vmul.f32 -1.442695, %v4778_v18  ;;  %v4526_v50 = vld [vmem:[#allocation3 + $0x8] ss:$12 sps:$4 sm:$0xff]  }
 0xa98   :  { %v4758_v10 = vadd.f32 %v4757_v45, %v11445_v7  ;;  %v4531_v51 = vunpack.c.l.bf16 %v4526_v50  ;;  %v4761_v42 = vadd.f32 %v4760_v60, %v11445_v7 }
 0xa99   :  { %v6880_v33 = vmul.f32 -1.442695, %v4765_v4  ;;  %v4779_v26 = vadd.f32 %v4721_v48, %v4533_v58  ;;  %v4534_v58 = vunpack.c.h.bf16 %v4526_v50 }
 0xa9b   :  { %8445 = vpow2.f32 %v6880_v33  ;;  %v6882_v3 = vmul.f32 -1.442695, %v4779_v26 }
 0xa9c   :  { %8447 = vpow2.f32 %v6881_v27 }
 0xa9d   :  { %8449 = vpow2.f32 %v6882_v3 }
 0xaa4   :  { %v8444_v2 = vpop.eup %8443 }
 0xaa5   :  { %v4772_v47 = vadd.f32 1.0, %v8444_v2 }
 0xaa7   :  { %8451 = vrcp.f32 %v4772_v47 }
 0xaa8   :  { %v8446_v43 = vpop.eup %8445 }
 0xaa9   :  { %v4773_v46 = vadd.f32 1.0, %v8446_v43  ;;  %v8448_v0 = vpop.eup %8447 }
 0xaaa   :  { %v8450_v35 = vpop.eup %8449  ;;  %v4786_v62 = vadd.f32 1.0, %v8448_v0 }
 0xaab   :  { %8453 = vrcp.f32 %v4773_v46  ;;  %v4787_v56 = vadd.f32 1.0, %v8450_v35 }
 0xaac   :  { %8455 = vrcp.f32 %v4786_v62 }
 0xaad   :  { %8457 = vrcp.f32 %v4787_v56 }
 0xab4   :  { %v8452_v13 = vpop.eup %8451 }
 0xab5   :  { %v4792_v4 = vmul.f32 %v8452_v13, %v4758_v10  ;;  %v4823_v10 = vunpack.c.l.bf16 %v11359_v19 }
 0xab7   :  { %v4794_v48 = vadd.f32 %v4792_v4, %v4531_v51 }
 0xab8   :  { %v8454_v33 = vpop.eup %8453 }
 0xab9   :  { %8459 = vtanh.f32 %v4794_v48  ;;  %v4793_v29 = vmul.f32 %v8454_v33, %v4761_v42  ;;  %v8456_v18 = vpop.eup %8455  ;;  %v4826_v33 = vunpack.c.l.bf16 %v11369_v17 }
 0xaba   :  { %v8458_v26 = vpop.eup %8457  ;;  %v4798_v45 = vsub.f32 1.0, %v8456_v18  ;;  %v4802_v46 = vmul.f32 %v8456_v18, %v11320_v16 }
 0xabb   :  { %v4795_v32 = vadd.f32 %v4793_v29, %v4534_v58  ;;  %v4799_v3 = vsub.f32 1.0, %v8458_v26  ;;  %v4803_v0 = vmul.f32 %v8458_v26, %v11322_v23 }
 0xabd   :  { %8461 = vtanh.f32 %v4795_v32 }
 0xac6   :  { %v8460_v27 = vpop.eup %8459 }
 0xac7   :  { %v4800_v2 = vmul.f32 %v8460_v27, %v4798_v45  ;;  %v4824_v27 = vunpack.c.h.bf16 %v11359_v19 }
 0xac9   :  { %v11451_v60 = vadd.f32 %v4802_v46, %v4800_v2 }
 0xaca   :  { %v8462_v47 = vpop.eup %8461 }
 0xacb   :  { %v4801_v43 = vmul.f32 %v8462_v47, %v4799_v3  ;;  %v4827_v3 = vunpack.c.h.bf16 %v11369_v17 }
 0xacd   :  { %v11453_v35 = vadd.f32 %v4803_v0, %v4801_v43 }
 0xacf   :  { %v4806_v50 = vpack.c.bf16 %v11453_v35, %v11451_v60 }
 0xad1   :  { %7060 = vst [vmem:[#allocation4] sm:$0xff] %v4806_v50   ;;  %4862 = vmatmul.mubr.bf16.vlgmr.msra.gmra.mxu1 %v4806_v50  ;;  %7773 = vmatmul.mubr.bf16.vlgmr.msra.gmra.mxu0 %v4806_v50 }
 0xad2   :  { %4980 = vmatpush1.bf16.msra.mxu1 %v11161_v39  ;;  %7777 = vmatpush3.bf16.msra.mxu0 %v11208_v15 }
 0xad3   :  { %4981 = vmatprep.subr.bf16.mxu1 %v11167_v24  ;;  %7778 = vmatprep.subr.bf16.mxu0 %v12310_v20 }
 0xad4   :  { %5011 = vmatprep.mubr.bf16.mxu1 %v12311_v61  ;;  %7792 = vmatprep.mubr.msk.bf16.mxu0 %vm9001_vm3, %v12310_v20 }
 0xad6   :  { %4982 = vmatpush1.bf16.msra.mxu1 %v11187_v59  ;;  %7779 = vmatpush3.bf16.msra.mxu0 %v11222_v11 }
 0xad7   :  { %4983 = vmatprep.subr.bf16.mxu1 %v11190_v38  ;;  %7780 = vmatprep.subr.bf16.mxu0 %v12310_v20 }
 0xada   :  { %4984 = vmatpush1.bf16.msra.mxu1 %v11197_v63  ;;  %7781 = vmatpush3.bf16.msra.mxu0 %v11238_v34 }
 0xadb   :  { %4985 = vmatprep.subr.bf16.mxu1 %v11203_v54  ;;  %7782 = vmatprep.subr.bf16.mxu0 %v12310_v20 }
 0xade   :  { %4986 = vmatpush1.bf16.msra.mxu1 %v11213_v22  ;;  %7783 = vmatpush3.bf16.msra.mxu0 %v11248_v49 }
 0xadf   :  { %4987 = vmatprep.subr.bf16.mxu1 %v11217_v53  ;;  %7784 = vmatprep.subr.bf16.mxu0 %v12310_v20 }
 0xae2   :  { %4988 = vmatpush1.bf16.msra.mxu1 %v11226_v40  ;;  %7785 = vmatpush3.bf16.msra.mxu0 %v11255_v44 }
 0xae3   :  { %4989 = vmatprep.subr.bf16.mxu1 %v11235_v37  ;;  %7786 = vmatprep.subr.bf16.mxu0 %v12310_v20 }
 0xae6   :  { %4990 = vmatpush1.bf16.msra.mxu1 %v11275_v52  ;;  %7787 = vmatpush3.bf16.msra.mxu0 %v11277_v31 }
 0xae7   :  { %4991 = vmatprep.subr.bf16.mxu1 %v11279_v1  ;;  %7788 = vmatprep.subr.bf16.mxu0 %v12310_v20 }
 0xaea   :  { %4992 = vmatpush1.bf16.msra.mxu1 %v11285_v36  ;;  %7789 = vmatpush3.bf16.msra.mxu0 %v11287_v41 }
 0xaeb   :  { %4993 = vmatprep.subr.bf16.mxu1 %v11291_v12  ;;  %7790 = vmatprep.subr.bf16.mxu0 %v12310_v20 }
 0xaee   :  { %4994 = vmatpush1.bf16.msra.mxu1 %v11293_v21  ;;  %7791 = vmatpush3.bf16.msra.mxu0 %v11295_v55 }
 0xaef   :  { %5129 = vmatprep.subr.bf16.mxu1 %v11158_v25  ;;  %7796 = vmatprep.subr.bf16.mxu0 %v12310_v20 }
 0xb91   :  { %v4863_v16 = vpop.f32.mrf.mxu1  ;;  %v4906_v23 = vpop.f32.mrf.mxu0 }
 0xb92   :  { %v4864_v62 = vadd.f32 %v4863_v16, %v11431_v5  ;;  %v4907_v19 = vadd.f32 %v4906_v23, %v11445_v7 }
 0xb93   :  { %v4865_v13 = vpop.f32.mrf.mxu1  ;;  %v7774_v56 = vpop.f32.mrf.mxu0 }
 0xb94   :  { %v4913_v51 = vadd.f32 %v4864_v62, %v4823_v10  ;;  %v4866_v32 = vadd.f32 %v4865_v13, %v11436_v30  ;;  %v4820_v56 = vld [vmem:[#allocation3 + $0x20] ss:$12 sps:$4 sm:$0xff]  }
 0xb95   :  { %v4867_v4 = vpop.f32.mrf.mxu1  ;;  %v4909_v48 = vpop.f32.mrf.mxu0 }
 0xb96   :  { %v6885_v42 = vmul.f32 -1.442695, %v4913_v51  ;;  %v4868_v58 = vadd.f32 %v4867_v4, %v11431_v5  ;;  %v4927_v2 = vadd.f32 %v4866_v32, %v4824_v27  ;;  %v4828_v32 = vunpack.c.h.bf16 %v4820_v56 }
 0xb97   :  { %v4869_v29 = vpop.f32.mrf.mxu1  ;;  %v7775_v25 = vpop.f32.mrf.mxu0 }
 0xb98   :  { %8463 = vpow2.f32 %v6885_v42  ;;  %v4914_v18 = vadd.f32 %v4868_v58, %v4826_v33  ;;  %v4870_v26 = vadd.f32 %v4869_v29, %v11436_v30  ;;  %v6887_v43 = vmul.f32 -1.442695, %v4927_v2 }
 0xb99   :  { %v4825_v42 = vunpack.c.l.bf16 %v4820_v56  ;;  %v4910_v29 = vadd.f32 %v4909_v48, %v11445_v7 }
 0xb9a   :  { %v6886_v45 = vmul.f32 -1.442695, %v4914_v18  ;;  %v4928_v47 = vadd.f32 %v4870_v26, %v4827_v3 }
 0xb9c   :  { %8465 = vpow2.f32 %v6886_v45  ;;  %v6888_v46 = vmul.f32 -1.442695, %v4928_v47 }
 0xb9d   :  { %8467 = vpow2.f32 %v6887_v43 }
 0xb9e   :  { %8469 = vpow2.f32 %v6888_v46 }
 0xba5   :  { %v8464_v0 = vpop.eup %8463 }
 0xba6   :  { %v4921_v50 = vadd.f32 1.0, %v8464_v0 }
 0xba8   :  { %8471 = vrcp.f32 %v4921_v50 }
 0xba9   :  { %v8466_v16 = vpop.eup %8465 }
 0xbaa   :  { %v4922_v10 = vadd.f32 1.0, %v8466_v16  ;;  %v8468_v62 = vpop.eup %8467 }
 0xbab   :  { %v8470_v13 = vpop.eup %8469  ;;  %v4935_v51 = vadd.f32 1.0, %v8468_v62 }
 0xbac   :  { %8473 = vrcp.f32 %v4922_v10  ;;  %v4936_v4 = vadd.f32 1.0, %v8470_v13 }
 0xbad   :  { %8475 = vrcp.f32 %v4935_v51 }
 0xbae   :  { %8477 = vrcp.f32 %v4936_v4  ;;  %v4970_v4 = vld [vmem:[#allocation3 + $0x38] ss:$12 sps:$4 sm:$0xff]  }
 0xbb5   :  { %v8472_v17 = vpop.eup %8471 }
 0xbb6   :  { %v4941_v33 = vmul.f32 %v8472_v17, %v4907_v19 }
 0xbb8   :  { %v4943_v58 = vadd.f32 %v4941_v33, %v4825_v42 }
 0xbb9   :  { %v8474_v25 = vpop.eup %8473 }
 0xbba   :  { %8479 = vtanh.f32 %v4943_v58  ;;  %v4942_v18 = vmul.f32 %v8474_v25, %v4910_v29  ;;  %v8476_v27 = vpop.eup %8475  ;;  %v4975_v58 = vunpack.c.l.bf16 %v4970_v4 }
 0xbbb   :  { %v8478_v45 = vpop.eup %8477  ;;  %v4947_v23 = vsub.f32 1.0, %v8476_v27  ;;  %v4951_v0 = vmul.f32 %v8476_v27, %v11451_v60 }
 0xbbc   :  { %v4944_v26 = vadd.f32 %v4942_v18, %v4828_v32  ;;  %v4948_v2 = vsub.f32 1.0, %v8478_v45  ;;  %v4952_v50 = vmul.f32 %v8478_v45, %v11453_v35 }
 0xbbe   :  { %8481 = vtanh.f32 %v4944_v26  ;;  %v4978_v26 = vunpack.c.h.bf16 %v4970_v4 }
 0xbc7   :  { %v8480_v3 = vpop.eup %8479 }
 0xbc8   :  { %v4949_v47 = vmul.f32 %v8480_v3, %v4947_v23 }
 0xbca   :  { %v11504_v48 = vadd.f32 %v4951_v0, %v4949_v47 }
 0xbcb   :  { %v8482_v43 = vpop.eup %8481 }
 0xbcc   :  { %v4950_v46 = vmul.f32 %v8482_v43, %v4948_v2 }
 0xbce   :  { %v11506_v16 = vadd.f32 %v4952_v50, %v4950_v46 }
 0xbd0   :  { %v4955_v10 = vpack.c.bf16 %v11506_v16, %v11504_v48 }
 0xbd2   :  { %7065 = vst [vmem:[#allocation4 + $0x8] sm:$0xff] %v4955_v10   ;;  %5012 = vmatmul.mubr.bf16.vlgmr.msra.gmra.mxu1 %v4955_v10  ;;  %7793 = vmatmul.mubr.bf16.vlgmr.msra.gmra.mxu0 %v4955_v10 }
 0xbd3   :  { %5130 = vmatpush1.bf16.msra.mxu1 %v11161_v39  ;;  %7797 = vmatpush3.bf16.msra.mxu0 %v11208_v15  ;;  %v11543_v39 = vld [vmem:[#allocation14 + $0xac] ss:$12 sps:$4 sm:$0xff]  }
 0xbd4   :  { %5131 = vmatprep.subr.bf16.mxu1 %v11167_v24  ;;  %7798 = vmatprep.subr.bf16.mxu0 %v12310_v20 }
 0xbd5   :  { %5161 = vmatprep.mubr.bf16.mxu1 %v12311_v61  ;;  %7812 = vmatprep.mubr.msk.bf16.mxu0 %vm9001_vm3, %v12310_v20 }
 0xbd7   :  { %5132 = vmatpush1.bf16.msra.mxu1 %v11187_v59  ;;  %7799 = vmatpush3.bf16.msra.mxu0 %v11222_v11 }
 0xbd8   :  { %5133 = vmatprep.subr.bf16.mxu1 %v11190_v38  ;;  %7800 = vmatprep.subr.bf16.mxu0 %v12310_v20  ;;  %v4973_v38 = vunpack.c.l.bf16 %v11379_v6 }
 0xbdb   :  { %5134 = vmatpush1.bf16.msra.mxu1 %v11197_v63  ;;  %7801 = vmatpush3.bf16.msra.mxu0 %v11238_v34 }
 0xbdc   :  { %5135 = vmatprep.subr.bf16.mxu1 %v11203_v54  ;;  %7802 = vmatprep.subr.bf16.mxu0 %v12310_v20 }
 0xbdf   :  { %5136 = vmatpush1.bf16.msra.mxu1 %v11213_v22  ;;  %7803 = vmatpush3.bf16.msra.mxu0 %v11248_v49 }
 0xbe0   :  { %5137 = vmatprep.subr.bf16.mxu1 %v11217_v53  ;;  %7804 = vmatprep.subr.bf16.mxu0 %v12310_v20 }
 0xbe3   :  { %5138 = vmatpush1.bf16.msra.mxu1 %v11226_v40  ;;  %7805 = vmatpush3.bf16.msra.mxu0 %v11255_v44 }
 0xbe4   :  { %5139 = vmatprep.subr.bf16.mxu1 %v11235_v37  ;;  %7806 = vmatprep.subr.bf16.mxu0 %v12310_v20  ;;  %v4976_v37 = vunpack.c.l.bf16 %v11387_v14 }
 0xbe7   :  { %5140 = vmatpush1.bf16.msra.mxu1 %v11275_v52  ;;  %7807 = vmatpush3.bf16.msra.mxu0 %v11277_v31 }
 0xbe8   :  { %5141 = vmatprep.subr.bf16.mxu1 %v11279_v1  ;;  %7808 = vmatprep.subr.bf16.mxu0 %v12310_v20 }
 0xbeb   :  { %5142 = vmatpush1.bf16.msra.mxu1 %v11285_v36  ;;  %7809 = vmatpush3.bf16.msra.mxu0 %v11287_v41  ;;  %v4974_v36 = vunpack.c.h.bf16 %v11379_v6 }
 0xbec   :  { %5143 = vmatprep.subr.bf16.mxu1 %v11291_v12  ;;  %7810 = vmatprep.subr.bf16.mxu0 %v12310_v20  ;;  %v4977_v12 = vunpack.c.h.bf16 %v11387_v14 }
 0xbef   :  { %5144 = vmatpush1.bf16.msra.mxu1 %v11293_v21  ;;  %7811 = vmatpush3.bf16.msra.mxu0 %v11295_v55 }
 0xbf0   :  { %5279 = vmatprep.subr.bf16.mxu1 %v11543_v39  ;;  %7816 = vmatprep.subr.bf16.mxu0 %v12310_v20 }
 0xc92   :  { %v5013_v24 = vpop.f32.mrf.mxu1  ;;  %v5056_v59 = vpop.f32.mrf.mxu0 }
 0xc93   :  { %v5014_v63 = vadd.f32 %v5013_v24, %v11431_v5  ;;  %v5057_v6 = vadd.f32 %v5056_v59, %v11445_v7 }
 0xc94   :  { %v5015_v54 = vpop.f32.mrf.mxu1  ;;  %v7794_v15 = vpop.f32.mrf.mxu0 }
 0xc95   :  { %v5063_v22 = vadd.f32 %v5014_v63, %v4973_v38  ;;  %v5016_v52 = vadd.f32 %v5015_v54, %v11436_v30  ;;  %v11565_v54 = vld [vmem:[#allocation14 + $0xa8] ss:$12 sps:$4 sm:$0xff]   ;;  %v11568_v15 = vld [vmem:[#allocation14 + $0xb0] ss:$12 sps:$4 sm:$0xff]  }
 0xc96   :  { %v5017_v53 = vpop.f32.mrf.mxu1  ;;  %v5059_v11 = vpop.f32.mrf.mxu0 }
 0xc97   :  { %v6891_v40 = vmul.f32 -1.442695, %v5063_v22  ;;  %v5018_v34 = vadd.f32 %v5017_v53, %v11431_v5  ;;  %v5077_v21 = vadd.f32 %v5016_v52, %v4974_v36  ;;  %v5060_v32 = vadd.f32 %v5059_v11, %v11445_v7  ;;  %v11581_v22 = vld [vmem:[#allocation14 + $0x98] ss:$12 sps:$4 sm:$0xff]   ;;  %v11584_v53 = vld [vmem:[#allocation14 + $0x7c] ss:$12 sps:$4 sm:$0xff]  }
 0xc98   :  { %v5019_v49 = vpop.f32.mrf.mxu1  ;;  %v7795_v44 = vpop.f32.mrf.mxu0  ;;  %v11588_v11 = vld [vmem:[#allocation14 + $0x78] ss:$12 sps:$4 sm:$0xff]   ;;  %v11608_v52 = vld [vmem:[#allocation14 + $0x48] ss:$12 sps:$4 sm:$0xff]   ;;  %v11618_v36 = vld [vmem:[#allocation14 + $0x30] ss:$12 sps:$4 sm:$0xff]  }
 0xc99   :  { %8483 = vpow2.f32 %v6891_v40  ;;  %v5064_v31 = vadd.f32 %v5018_v34, %v4976_v37  ;;  %v5020_v1 = vadd.f32 %v5019_v49, %v11436_v30  ;;  %v6893_v60 = vmul.f32 -1.442695, %v5077_v21  ;;  %v11591_v40 = vld [vmem:[#allocation14 + $0x80] ss:$12 sps:$4 sm:$0xff]   ;;  %v11594_v37 = vld [vmem:[#allocation14 + $0x64] ss:$12 sps:$4 sm:$0xff]  }
 0xc9a   :  { %v11598_v34 = vld [vmem:[#allocation14 + $0x60] ss:$12 sps:$4 sm:$0xff]   ;;  %v11601_v49 = vld [vmem:[#allocation14 + $0x68] ss:$12 sps:$4 sm:$0xff]   ;;  %v11628_v21 = vld [vmem:[#allocation14 + $0x18] ss:$12 sps:$4 sm:$0xff]  }
 0xc9b   :  { %v6892_v41 = vmul.f32 -1.442695, %v5064_v31  ;;  %v5078_v55 = vadd.f32 %v5020_v1, %v4977_v12  ;;  %v11604_v44 = vld [vmem:[#allocation14 + $0x4c] ss:$12 sps:$4 sm:$0xff]   ;;  %v11611_v31 = vld [vmem:[#allocation14 + $0x50] ss:$12 sps:$4 sm:$0xff]  }
 0xc9c   :  { %v11614_v1 = vld [vmem:[#allocation14 + $0x34] ss:$12 sps:$4 sm:$0xff]   ;;  %v11624_v12 = vld [vmem:[#allocation14 + $0x1c] ss:$12 sps:$4 sm:$0xff]  }
 0xc9d   :  { %8485 = vpow2.f32 %v6892_v41  ;;  %v6894_v35 = vmul.f32 -1.442695, %v5078_v55  ;;  %v11621_v41 = vld [vmem:[#allocation14 + $0x38] ss:$12 sps:$4 sm:$0xff]   ;;  %v11631_v55 = vld [vmem:[#allocation14 + $0x20] ss:$12 sps:$4 sm:$0xff]  }
 0xc9e   :  { %8487 = vpow2.f32 %v6893_v60  ;;  %v11634_v60 = vld [vmem:[#allocation14 + $0x4] ss:$12 sps:$4 sm:$0xff]  }
 0xc9f   :  { %8489 = vpow2.f32 %v6894_v35  ;;  %v11638_v35 = vld [vmem:[#allocation14] ss:$12 sps:$4 sm:$0xff]  }
 0xca6   :  { %v8484_v62 = vpop.eup %8483 }
 0xca7   :  { %v5071_v13 = vadd.f32 1.0, %v8484_v62  ;;  %v11641_v62 = vld [vmem:[#allocation14 + $0x8] ss:$12 sps:$4 sm:$0xff]  }
 0xca9   :  { %8491 = vrcp.f32 %v5071_v13 }
 0xcaa   :  { %v8486_v56 = vpop.eup %8485 }
 0xcab   :  { %v5072_v19 = vadd.f32 1.0, %v8486_v56  ;;  %v8488_v51 = vpop.eup %8487 }
 0xcac   :  { %v8490_v17 = vpop.eup %8489  ;;  %v5085_v42 = vadd.f32 1.0, %v8488_v51 }
 0xcad   :  { %8493 = vrcp.f32 %v5072_v19  ;;  %v5086_v33 = vadd.f32 1.0, %v8490_v17  ;;  %v5123_v19 = vunpack.c.l.bf16 %v11395_v28 }
 0xcae   :  { %8495 = vrcp.f32 %v5085_v42 }
 0xcaf   :  { %8497 = vrcp.f32 %v5086_v33 }
 0xcb6   :  { %v8492_v14 = vpop.eup %8491 }
 0xcb7   :  { %v5091_v29 = vmul.f32 %v8492_v14, %v5057_v6 }
 0xcb9   :  { %v5093_v25 = vadd.f32 %v5091_v29, %v4975_v58  ;;  %v5126_v58 = vunpack.c.l.bf16 %v11403_v57 }
 0xcba   :  { %v8494_v18 = vpop.eup %8493 }
 0xcbb   :  { %8499 = vtanh.f32 %v5093_v25  ;;  %v5092_v27 = vmul.f32 %v8494_v18, %v5060_v32  ;;  %v8496_v3 = vpop.eup %8495 }
 0xcbc   :  { %v8498_v23 = vpop.eup %8497  ;;  %v5097_v47 = vsub.f32 1.0, %v8496_v3  ;;  %v5101_v10 = vmul.f32 %v8496_v3, %v11504_v48  ;;  %v11571_v48 = vld [vmem:[#allocation14 + $0x94] ss:$12 sps:$4 sm:$0xff]  }
 0xcbd   :  { %v5094_v45 = vadd.f32 %v5092_v27, %v4978_v26  ;;  %v5098_v43 = vsub.f32 1.0, %v8498_v23  ;;  %v5102_v24 = vmul.f32 %v8498_v23, %v11506_v16  ;;  %v11578_v16 = vld [vmem:[#allocation14 + $0x90] ss:$12 sps:$4 sm:$0xff]   ;;  %v5127_v23 = vunpack.c.h.bf16 %v11403_v57 }
 0xcbf   :  { %8501 = vtanh.f32 %v5094_v45  ;;  %v5124_v45 = vunpack.c.h.bf16 %v11395_v28 }
 0xcc8   :  { %v8500_v2 = vpop.eup %8499 }
 0xcc9   :  { %v5099_v46 = vmul.f32 %v8500_v2, %v5097_v47 }
 0xccb   :  { %v11559_v59 = vadd.f32 %v5101_v10, %v5099_v46 }
 0xccc   :  { %v8502_v0 = vpop.eup %8501 }
 0xccd   :  { %v5100_v50 = vmul.f32 %v8502_v0, %v5098_v43 }
 0xccf   :  { %v11561_v38 = vadd.f32 %v5102_v24, %v5100_v50 }
 0xcd1   :  { %v5105_v63 = vpack.c.bf16 %v11561_v38, %v11559_v59 }
 0xcd3   :  { %7070 = vst [vmem:[#allocation4 + $0x10] sm:$0xff] %v5105_v63   ;;  %5162 = vmatmul.mubr.bf16.vlgmr.msra.gmra.mxu1 %v5105_v63  ;;  %7813 = vmatmul.mubr.bf16.vlgmr.msra.gmra.mxu0 %v5105_v63 }
 0xcd4   :  { %5280 = vmatpush1.bf16.msra.mxu1 %v11565_v54  ;;  %7817 = vmatpush3.bf16.msra.mxu0 %v11568_v15 }
 0xcd5   :  { %5281 = vmatprep.subr.bf16.mxu1 %v11571_v48  ;;  %7818 = vmatprep.subr.bf16.mxu0 %v12310_v20 }
 0xcd6   :  { %5311 = vmatprep.mubr.bf16.mxu1 %v12311_v61  ;;  %7832 = vmatprep.mubr.msk.bf16.mxu0 %vm9001_vm3, %v12310_v20 }
 0xcd8   :  { %5282 = vmatpush1.bf16.msra.mxu1 %v11578_v16  ;;  %7819 = vmatpush3.bf16.msra.mxu0 %v11581_v22 }
 0xcd9   :  { %5283 = vmatprep.subr.bf16.mxu1 %v11584_v53  ;;  %7820 = vmatprep.subr.bf16.mxu0 %v12310_v20 }
 0xcdc   :  { %5284 = vmatpush1.bf16.msra.mxu1 %v11588_v11  ;;  %7821 = vmatpush3.bf16.msra.mxu0 %v11591_v40 }
 0xcdd   :  { %5285 = vmatprep.subr.bf16.mxu1 %v11594_v37  ;;  %7822 = vmatprep.subr.bf16.mxu0 %v12310_v20 }
 0xce0   :  { %5286 = vmatpush1.bf16.msra.mxu1 %v11598_v34  ;;  %7823 = vmatpush3.bf16.msra.mxu0 %v11601_v49 }
 0xce1   :  { %5287 = vmatprep.subr.bf16.mxu1 %v11604_v44  ;;  %7824 = vmatprep.subr.bf16.mxu0 %v12310_v20 }
 0xce4   :  { %5288 = vmatpush1.bf16.msra.mxu1 %v11608_v52  ;;  %7825 = vmatpush3.bf16.msra.mxu0 %v11611_v31 }
 0xce5   :  { %5289 = vmatprep.subr.bf16.mxu1 %v11614_v1  ;;  %7826 = vmatprep.subr.bf16.mxu0 %v12310_v20 }
 0xce8   :  { %5290 = vmatpush1.bf16.msra.mxu1 %v11618_v36  ;;  %7827 = vmatpush3.bf16.msra.mxu0 %v11621_v41 }
 0xce9   :  { %5291 = vmatprep.subr.bf16.mxu1 %v11624_v12  ;;  %7828 = vmatprep.subr.bf16.mxu0 %v12310_v20 }
 0xcec   :  { %5292 = vmatpush1.bf16.msra.mxu1 %v11628_v21  ;;  %7829 = vmatpush3.bf16.msra.mxu0 %v11631_v55 }
 0xced   :  { %5293 = vmatprep.subr.bf16.mxu1 %v11634_v60  ;;  %7830 = vmatprep.subr.bf16.mxu0 %v12310_v20 }
 0xcf0   :  { %5294 = vmatpush1.bf16.msra.mxu1 %v11638_v35  ;;  %7831 = vmatpush3.bf16.msra.mxu0 %v11641_v62 }
 0xcf1   :  { %5429 = vmatprep.subr.bf16.mxu1 %v11543_v39  ;;  %7836 = vmatprep.subr.bf16.mxu0 %v12310_v20 }
 0xd93   :  { %v5163_v13 = vpop.f32.mrf.mxu1  ;;  %v5206_v56 = vpop.f32.mrf.mxu0 }
 0xd94   :  { %v5164_v51 = vadd.f32 %v5163_v13, %v11431_v5  ;;  %v5207_v28 = vadd.f32 %v5206_v56, %v11445_v7 }
 0xd95   :  { %v5165_v17 = vpop.f32.mrf.mxu1  ;;  %v7814_v4 = vpop.f32.mrf.mxu0 }
 0xd96   :  { %v5213_v6 = vadd.f32 %v5164_v51, %v5123_v19  ;;  %v5166_v18 = vadd.f32 %v5165_v17, %v11436_v30  ;;  %v5120_v19 = vld [vmem:[#allocation3 + $0x50] ss:$12 sps:$4 sm:$0xff]  }
 0xd97   :  { %v5167_v42 = vpop.f32.mrf.mxu1  ;;  %v5209_v14 = vpop.f32.mrf.mxu0  ;;  %v5125_v4 = vunpack.c.l.bf16 %v5120_v19 }
 0xd98   :  { %v6897_v33 = vmul.f32 -1.442695, %v5213_v6  ;;  %v5168_v29 = vadd.f32 %v5167_v42, %v11431_v5  ;;  %v5227_v2 = vadd.f32 %v5166_v18, %v5124_v45 }
 0xd99   :  { %v5169_v25 = vpop.f32.mrf.mxu1  ;;  %v7815_v32 = vpop.f32.mrf.mxu0 }
 0xd9a   :  { %8503 = vpow2.f32 %v6897_v33  ;;  %v5214_v26 = vadd.f32 %v5168_v29, %v5126_v58  ;;  %v5170_v27 = vadd.f32 %v5169_v25, %v11436_v30  ;;  %v6899_v43 = vmul.f32 -1.442695, %v5227_v2 }
 0xd9b   :  { %v5210_v33 = vadd.f32 %v5209_v14, %v11445_v7  ;;  %v5128_v29 = vunpack.c.h.bf16 %v5120_v19 }
 0xd9c   :  { %v6898_v3 = vmul.f32 -1.442695, %v5214_v26  ;;  %v5228_v47 = vadd.f32 %v5170_v27, %v5127_v23 }
 0xd9e   :  { %8505 = vpow2.f32 %v6898_v3  ;;  %v6900_v46 = vmul.f32 -1.442695, %v5228_v47 }
 0xd9f   :  { %8507 = vpow2.f32 %v6899_v43 }
 0xda0   :  { %8509 = vpow2.f32 %v6900_v46 }
 0xda7   :  { %v8504_v0 = vpop.eup %8503 }
 0xda8   :  { %v5221_v50 = vadd.f32 1.0, %v8504_v0 }
 0xdaa   :  { %8511 = vrcp.f32 %v5221_v50  ;;  %v5273_v50 = vunpack.c.l.bf16 %v11409_v9 }
 0xdab   :  { %v8506_v10 = vpop.eup %8505 }
 0xdac   :  { %v5222_v24 = vadd.f32 1.0, %v8506_v10  ;;  %v8508_v63 = vpop.eup %8507 }
 0xdad   :  { %v8510_v13 = vpop.eup %8509  ;;  %v5235_v51 = vadd.f32 1.0, %v8508_v63 }
 0xdae   :  { %8513 = vrcp.f32 %v5222_v24  ;;  %v5236_v17 = vadd.f32 1.0, %v8510_v13 }
 0xdaf   :  { %8515 = vrcp.f32 %v5235_v51 }
 0xdb0   :  { %8517 = vrcp.f32 %v5236_v17 }
 0xdb7   :  { %v8512_v57 = vpop.eup %8511 }
 0xdb8   :  { %v5241_v6 = vmul.f32 %v8512_v57, %v5207_v28  ;;  %v5276_v57 = vunpack.c.l.bf16 %v11413_v8 }
 0xdba   :  { %v5243_v42 = vadd.f32 %v5241_v6, %v5125_v4 }
 0xdbb   :  { %v8514_v58 = vpop.eup %8513 }
 0xdbc   :  { %8519 = vtanh.f32 %v5243_v42  ;;  %v5242_v25 = vmul.f32 %v8514_v58, %v5210_v33  ;;  %v8516_v18 = vpop.eup %8515 }
 0xdbd   :  { %v8518_v26 = vpop.eup %8517  ;;  %v5247_v56 = vsub.f32 1.0, %v8516_v18  ;;  %v5251_v47 = vmul.f32 %v8516_v18, %v11559_v59 }
 0xdbe   :  { %v5244_v32 = vadd.f32 %v5242_v25, %v5128_v29  ;;  %v5248_v45 = vsub.f32 1.0, %v8518_v26  ;;  %v5252_v43 = vmul.f32 %v8518_v26, %v11561_v38  ;;  %v5274_v29 = vunpack.c.h.bf16 %v11409_v9 }
 0xdc0   :  { %8521 = vtanh.f32 %v5244_v32  ;;  %v5277_v32 = vunpack.c.h.bf16 %v11413_v8 }
 0xdc9   :  { %v8520_v27 = vpop.eup %8519 }
 0xdca   :  { %v5249_v3 = vmul.f32 %v8520_v27, %v5247_v56 }
 0xdcc   :  { %v11658_v14 = vadd.f32 %v5251_v47, %v5249_v3 }
 0xdcd   :  { %v8522_v23 = vpop.eup %8521 }
 0xdce   :  { %v5250_v2 = vmul.f32 %v8522_v23, %v5248_v45 }
 0xdd0   :  { %v11660_v46 = vadd.f32 %v5252_v43, %v5250_v2 }
 0xdd2   :  { %v5255_v0 = vpack.c.bf16 %v11660_v46, %v11658_v14 }
 0xdd4   :  { %7075 = vst [vmem:[#allocation4 + $0x18] sm:$0xff] %v5255_v0   ;;  %5312 = vmatmul.mubr.bf16.vlgmr.msra.gmra.mxu1 %v5255_v0  ;;  %7833 = vmatmul.mubr.bf16.vlgmr.msra.gmra.mxu0 %v5255_v0  ;;  %v5270_v0 = vld [vmem:[#allocation3 + $0x68] ss:$12 sps:$4 sm:$0xff]  }
 0xdd5   :  { %5430 = vmatpush1.bf16.msra.mxu1 %v11565_v54  ;;  %7837 = vmatpush3.bf16.msra.mxu0 %v11568_v15 }
 0xdd6   :  { %5431 = vmatprep.subr.bf16.mxu1 %v11571_v48  ;;  %7838 = vmatprep.subr.bf16.mxu0 %v12310_v20 }
 0xdd7   :  { %5461 = vmatprep.mubr.bf16.mxu1 %v12311_v61  ;;  %7852 = vmatprep.mubr.msk.bf16.mxu0 %vm9001_vm3, %v12310_v20 }
 0xdd9   :  { %5432 = vmatpush1.bf16.msra.mxu1 %v11578_v16  ;;  %7839 = vmatpush3.bf16.msra.mxu0 %v11581_v22 }
 0xdda   :  { %5433 = vmatprep.subr.bf16.mxu1 %v11584_v53  ;;  %7840 = vmatprep.subr.bf16.mxu0 %v12310_v20 }
 0xddd   :  { %5434 = vmatpush1.bf16.msra.mxu1 %v11588_v11  ;;  %7841 = vmatpush3.bf16.msra.mxu0 %v11591_v40 }
 0xdde   :  { %5435 = vmatprep.subr.bf16.mxu1 %v11594_v37  ;;  %7842 = vmatprep.subr.bf16.mxu0 %v12310_v20 }
 0xde1   :  { %5436 = vmatpush1.bf16.msra.mxu1 %v11598_v34  ;;  %7843 = vmatpush3.bf16.msra.mxu0 %v11601_v49 }
 0xde2   :  { %5437 = vmatprep.subr.bf16.mxu1 %v11604_v44  ;;  %7844 = vmatprep.subr.bf16.mxu0 %v12310_v20 }
 0xde5   :  { %5438 = vmatpush1.bf16.msra.mxu1 %v11608_v52  ;;  %7845 = vmatpush3.bf16.msra.mxu0 %v11611_v31 }
 0xde6   :  { %5439 = vmatprep.subr.bf16.mxu1 %v11614_v1  ;;  %7846 = vmatprep.subr.bf16.mxu0 %v12310_v20 }
 0xde9   :  { %5440 = vmatpush1.bf16.msra.mxu1 %v11618_v36  ;;  %7847 = vmatpush3.bf16.msra.mxu0 %v11621_v41 }
 0xdea   :  { %5441 = vmatprep.subr.bf16.mxu1 %v11624_v12  ;;  %7848 = vmatprep.subr.bf16.mxu0 %v12310_v20 }
 0xded   :  { %5442 = vmatpush1.bf16.msra.mxu1 %v11628_v21  ;;  %7849 = vmatpush3.bf16.msra.mxu0 %v11631_v55 }
 0xdee   :  { %5443 = vmatprep.subr.bf16.mxu1 %v11634_v60  ;;  %7850 = vmatprep.subr.bf16.mxu0 %v12310_v20 }
 0xdf1   :  { %5444 = vmatpush1.bf16.msra.mxu1 %v11638_v35  ;;  %7851 = vmatpush3.bf16.msra.mxu0 %v11641_v62 }
 0xdf2   :  { %5579 = vmatprep.subr.bf16.mxu1 %v11543_v39  ;;  %7856 = vmatprep.subr.bf16.mxu0 %v12310_v20 }
 0xe94   :  { %v5313_v59 = vpop.f32.mrf.mxu1  ;;  %v5356_v38 = vpop.f32.mrf.mxu0 }
 0xe95   :  { %v5314_v10 = vadd.f32 %v5313_v59, %v11431_v5  ;;  %v5357_v9 = vadd.f32 %v5356_v38, %v11445_v7 }
 0xe96   :  { %v5315_v24 = vpop.f32.mrf.mxu1  ;;  %v7834_v63 = vpop.f32.mrf.mxu0 }
 0xe97   :  { %v5363_v13 = vadd.f32 %v5314_v10, %v5273_v50  ;;  %v5316_v42 = vadd.f32 %v5315_v24, %v11436_v30  ;;  %v5275_v10 = vunpack.c.l.bf16 %v5270_v0 }
 0xe98   :  { %v5317_v19 = vpop.f32.mrf.mxu1  ;;  %v5359_v28 = vpop.f32.mrf.mxu0 }
 0xe99   :  { %v6903_v51 = vmul.f32 -1.442695, %v5363_v13  ;;  %v5318_v17 = vadd.f32 %v5317_v19, %v11431_v5  ;;  %v5377_v18 = vadd.f32 %v5316_v42, %v5274_v29  ;;  %v5360_v13 = vadd.f32 %v5359_v28, %v11445_v7 }
 0xe9a   :  { %v5319_v4 = vpop.f32.mrf.mxu1  ;;  %v7835_v6 = vpop.f32.mrf.mxu0 }
 0xe9b   :  { %8523 = vpow2.f32 %v6903_v51  ;;  %v5364_v33 = vadd.f32 %v5318_v17, %v5276_v57  ;;  %v5320_v58 = vadd.f32 %v5319_v4, %v11436_v30  ;;  %v6905_v27 = vmul.f32 -1.442695, %v5377_v18 }
 0xe9c   :  { %v5278_v51 = vunpack.c.h.bf16 %v5270_v0 }
 0xe9d   :  { %v6904_v25 = vmul.f32 -1.442695, %v5364_v33  ;;  %v5378_v26 = vadd.f32 %v5320_v58, %v5277_v32 }
 0xe9f   :  { %8525 = vpow2.f32 %v6904_v25  ;;  %v6906_v56 = vmul.f32 -1.442695, %v5378_v26 }
 0xea0   :  { %8527 = vpow2.f32 %v6905_v27 }
 0xea1   :  { %8529 = vpow2.f32 %v6906_v56 }
 0xea8   :  { %v8524_v45 = vpop.eup %8523 }
 0xea9   :  { %v5371_v3 = vadd.f32 1.0, %v8524_v45 }
 0xeab   :  { %8531 = vrcp.f32 %v5371_v3 }
 0xeac   :  { %v8526_v23 = vpop.eup %8525 }
 0xead   :  { %v5372_v2 = vadd.f32 1.0, %v8526_v23  ;;  %v8528_v47 = vpop.eup %8527 }
 0xeae   :  { %v8530_v43 = vpop.eup %8529  ;;  %v5385_v59 = vadd.f32 1.0, %v8528_v47  ;;  %v5421_v47 = vld [vmem:[#allocation3 + $0x84] sm:$0xff] }
 0xeaf   :  { %8533 = vrcp.f32 %v5372_v2  ;;  %v5386_v50 = vadd.f32 1.0, %v8530_v43 }
 0xeb0   :  { %8535 = vrcp.f32 %v5385_v59 }
 0xeb1   :  { %8537 = vrcp.f32 %v5386_v50 }
 0xeb8   :  { %v8532_v8 = vpop.eup %8531 }
 0xeb9   :  { %v5391_v24 = vmul.f32 %v8532_v8, %v5357_v9  ;;  %v5426_v8 = vunpack.c.l.bf16 %v5421_v47 }
 0xebb   :  { %v5393_v63 = vadd.f32 %v5391_v24, %v5275_v10 }
 0xebc   :  { %v8534_v19 = vpop.eup %8533 }
 0xebd   :  { %8539 = vtanh.f32 %v5393_v63  ;;  %v5392_v57 = vmul.f32 %v8534_v19, %v5360_v13  ;;  %v8536_v4 = vpop.eup %8535 }
 0xebe   :  { %v8538_v6 = vpop.eup %8537  ;;  %v5397_v38 = vsub.f32 1.0, %v8536_v4  ;;  %v5401_v32 = vmul.f32 %v8536_v4, %v11658_v14  ;;  %v5419_v14 = vld [vmem:[#allocation3 + $0x78] sm:$0xff] }
 0xebf   :  { %v5394_v17 = vadd.f32 %v5392_v57, %v5278_v51  ;;  %v5398_v33 = vsub.f32 1.0, %v8538_v6  ;;  %v5402_v18 = vmul.f32 %v8538_v6, %v11660_v46  ;;  %v5423_v45 = vunpack.c.l.bf16 %v5419_v14 }
 0xec0   :  { %v5424_v19 = vunpack.c.h.bf16 %v5419_v14  ;;  %v5427_v57 = vunpack.c.h.bf16 %v5421_v47 }
 0xec1   :  { %8541 = vtanh.f32 %v5394_v17 }
 0xeca   :  { %v8540_v42 = vpop.eup %8539 }
 0xecb   :  { %v5399_v58 = vmul.f32 %v8540_v42, %v5397_v38 }
 0xecd   :  { %v11711_v28 = vadd.f32 %v5401_v32, %v5399_v58 }
 0xece   :  { %v8542_v29 = vpop.eup %8541 }
 0xecf   :  { %v5400_v25 = vmul.f32 %v8542_v29, %v5398_v33 }
 0xed1   :  { %v11713_v26 = vadd.f32 %v5402_v18, %v5400_v25  ;;  %v5420_v18 = vld [vmem:[#allocation3 + $0x80] ss:$12 sps:$4 sm:$0xff]  }
 0xed3   :  { %v5405_v27 = vpack.c.bf16 %v11713_v26, %v11711_v28 }
 0xed5   :  { %7080 = vst [vmem:[#allocation4 + $0x20] sm:$0xff] %v5405_v27   ;;  %5462 = vmatmul.mubr.bf16.vlgmr.msra.gmra.mxu1 %v5405_v27  ;;  %7853 = vmatmul.mubr.bf16.vlgmr.msra.gmra.mxu0 %v5405_v27 }
 0xed6   :  { %5580 = vmatpush1.bf16.msra.mxu1 %v11565_v54  ;;  %7857 = vmatpush3.bf16.msra.mxu0 %v11568_v15 }
 0xed7   :  { %5581 = vmatprep.subr.bf16.mxu1 %v11571_v48  ;;  %7858 = vmatprep.subr.bf16.mxu0 %v12310_v20 }
 0xed8   :  { %5611 = vmatprep.mubr.bf16.mxu1 %v12311_v61  ;;  %7872 = vmatprep.mubr.msk.bf16.mxu0 %vm9001_vm3, %v12310_v20 }
 0xeda   :  { %5582 = vmatpush1.bf16.msra.mxu1 %v11578_v16  ;;  %7859 = vmatpush3.bf16.msra.mxu0 %v11581_v22 }
 0xedb   :  { %5583 = vmatprep.subr.bf16.mxu1 %v11584_v53  ;;  %7860 = vmatprep.subr.bf16.mxu0 %v12310_v20 }
 0xede   :  { %5584 = vmatpush1.bf16.msra.mxu1 %v11588_v11  ;;  %7861 = vmatpush3.bf16.msra.mxu0 %v11591_v40 }
 0xedf   :  { %5585 = vmatprep.subr.bf16.mxu1 %v11594_v37  ;;  %7862 = vmatprep.subr.bf16.mxu0 %v12310_v20 }
 0xee2   :  { %5586 = vmatpush1.bf16.msra.mxu1 %v11598_v34  ;;  %7863 = vmatpush3.bf16.msra.mxu0 %v11601_v49 }
 0xee3   :  { %5587 = vmatprep.subr.bf16.mxu1 %v11604_v44  ;;  %7864 = vmatprep.subr.bf16.mxu0 %v12310_v20 }
 0xee6   :  { %5588 = vmatpush1.bf16.msra.mxu1 %v11608_v52  ;;  %7865 = vmatpush3.bf16.msra.mxu0 %v11611_v31 }
 0xee7   :  { %5589 = vmatprep.subr.bf16.mxu1 %v11614_v1  ;;  %7866 = vmatprep.subr.bf16.mxu0 %v12310_v20 }
 0xeea   :  { %5590 = vmatpush1.bf16.msra.mxu1 %v11618_v36  ;;  %7867 = vmatpush3.bf16.msra.mxu0 %v11621_v41 }
 0xeeb   :  { %5591 = vmatprep.subr.bf16.mxu1 %v11624_v12  ;;  %7868 = vmatprep.subr.bf16.mxu0 %v12310_v20 }
 0xeee   :  { %5592 = vmatpush1.bf16.msra.mxu1 %v11628_v21  ;;  %7869 = vmatpush3.bf16.msra.mxu0 %v11631_v55 }
 0xeef   :  { %5593 = vmatprep.subr.bf16.mxu1 %v11634_v60  ;;  %7870 = vmatprep.subr.bf16.mxu0 %v12310_v20 }
 0xef2   :  { %5594 = vmatpush1.bf16.msra.mxu1 %v11638_v35  ;;  %7871 = vmatpush3.bf16.msra.mxu0 %v11641_v62 }
 0xef3   :  { %5729 = vmatprep.subr.bf16.mxu1 %v11543_v39  ;;  %7876 = vmatprep.subr.bf16.mxu0 %v12310_v20 }
 0xf95   :  { %v5463_v46 = vpop.f32.mrf.mxu1  ;;  %v5506_v56 = vpop.f32.mrf.mxu0 }
 0xf96   :  { %v5464_v3 = vadd.f32 %v5463_v46, %v11431_v5  ;;  %v5507_v27 = vadd.f32 %v5506_v56, %v11445_v7 }
 0xf97   :  { %v5465_v23 = vpop.f32.mrf.mxu1  ;;  %v7854_v2 = vpop.f32.mrf.mxu0 }
 0xf98   :  { %v5513_v43 = vadd.f32 %v5464_v3, %v5423_v45  ;;  %v5466_v24 = vadd.f32 %v5465_v23, %v11436_v30  ;;  %v5425_v3 = vunpack.c.l.bf16 %v5420_v18 }
 0xf99   :  { %v5467_v0 = vpop.f32.mrf.mxu1  ;;  %v5509_v9 = vpop.f32.mrf.mxu0 }
 0xf9a   :  { %v6909_v59 = vmul.f32 -1.442695, %v5513_v43  ;;  %v5468_v50 = vadd.f32 %v5467_v0, %v11431_v5  ;;  %v5527_v17 = vadd.f32 %v5466_v24, %v5424_v19  ;;  %v5510_v47 = vadd.f32 %v5509_v9, %v11445_v7 }
 0xf9b   :  { %v5469_v10 = vpop.f32.mrf.mxu1  ;;  %v7855_v39 = vpop.f32.mrf.mxu0  ;;  %v5428_v0 = vunpack.c.h.bf16 %v5420_v18 }
 0xf9c   :  { %8543 = vpow2.f32 %v6909_v59  ;;  %v5514_v63 = vadd.f32 %v5468_v50, %v5426_v8  ;;  %v5470_v13 = vadd.f32 %v5469_v10, %v11436_v30  ;;  %v6911_v6 = vmul.f32 -1.442695, %v5527_v17 }
 0xf9e   :  { %v6910_v51 = vmul.f32 -1.442695, %v5514_v63  ;;  %v5528_v4 = vadd.f32 %v5470_v13, %v5427_v57 }
 0xfa0   :  { %8545 = vpow2.f32 %v6910_v51  ;;  %v6912_v42 = vmul.f32 -1.442695, %v5528_v4 }
 0xfa1   :  { %8547 = vpow2.f32 %v6911_v6 }
 0xfa2   :  { %8549 = vpow2.f32 %v6912_v42 }
 0xfa9   :  { %v8544_v38 = vpop.eup %8543 }
 0xfaa   :  { %v5521_v33 = vadd.f32 1.0, %v8544_v38 }
 0xfac   :  { %8551 = vrcp.f32 %v5521_v33 }
 0xfad   :  { %v8546_v58 = vpop.eup %8545 }
 0xfae   :  { %v5522_v29 = vadd.f32 1.0, %v8546_v58  ;;  %v8548_v25 = vpop.eup %8547 }
 0xfaf   :  { %v8550_v32 = vpop.eup %8549  ;;  %v5535_v14 = vadd.f32 1.0, %v8548_v25 }
 0xfb0   :  { %8553 = vrcp.f32 %v5522_v29  ;;  %v5536_v45 = vadd.f32 1.0, %v8550_v32  ;;  %v5570_v32 = vld [vmem:[#allocation3 + $0x98] ss:$12 sps:$4 sm:$0xff]  }
 0xfb1   :  { %8555 = vrcp.f32 %v5535_v14 }
 0xfb2   :  { %8557 = vrcp.f32 %v5536_v45  ;;  %v5575_v45 = vunpack.c.l.bf16 %v5570_v32 }
 0xfb9   :  { %v8552_v46 = vpop.eup %8551 }
 0xfba   :  { %v5541_v23 = vmul.f32 %v8552_v46, %v5507_v27 }
 0xfbc   :  { %v5543_v2 = vadd.f32 %v5541_v23, %v5425_v3 }
 0xfbd   :  { %v8554_v43 = vpop.eup %8553 }
 0xfbe   :  { %8559 = vtanh.f32 %v5543_v2  ;;  %v5542_v59 = vmul.f32 %v8554_v43, %v5510_v47  ;;  %v8556_v50 = vpop.eup %8555  ;;  %v5578_v43 = vunpack.c.h.bf16 %v5570_v32 }
 0xfbf   :  { %v8558_v10 = vpop.eup %8557  ;;  %v5547_v56 = vsub.f32 1.0, %v8556_v50  ;;  %v5551_v51 = vmul.f32 %v8556_v50, %v11711_v28 }
 0xfc0   :  { %v5544_v8 = vadd.f32 %v5542_v59, %v5428_v0  ;;  %v5548_v24 = vsub.f32 1.0, %v8558_v10  ;;  %v5552_v57 = vmul.f32 %v8558_v10, %v11713_v26 }
 0xfc2   :  { %8561 = vtanh.f32 %v5544_v8 }
 0xfcb   :  { %v8560_v39 = vpop.eup %8559 }
 0xfcc   :  { %v5549_v63 = vmul.f32 %v8560_v39, %v5547_v56 }
 0xfce   :  { %v11760_v9 = vadd.f32 %v5551_v51, %v5549_v63 }
 0xfcf   :  { %v8562_v13 = vpop.eup %8561 }
 0xfd0   :  { %v5550_v19 = vmul.f32 %v8562_v13, %v5548_v24 }
 0xfd2   :  { %v11762_v17 = vadd.f32 %v5552_v57, %v5550_v19 }
 0xfd4   :  { %v5555_v4 = vpack.c.bf16 %v11762_v17, %v11760_v9 }
 0xfd6   :  { %7085 = vst [vmem:[#allocation4 + $0x28] sm:$0xff] %v5555_v4   ;;  %5612 = vmatmul.mubr.bf16.vlgmr.msra.gmra.mxu1 %v5555_v4  ;;  %7873 = vmatmul.mubr.bf16.vlgmr.msra.gmra.mxu0 %v5555_v4 }
 0xfd7   :  { %5730 = vmatpush1.bf16.msra.mxu1 %v11565_v54  ;;  %7877 = vmatpush3.bf16.msra.mxu0 %v11568_v15  ;;  %v5569_v54 = vld [vmem:[#allocation3 + $0x90] sm:$0xff] }
 0xfd8   :  { %5731 = vmatprep.subr.bf16.mxu1 %v11571_v48  ;;  %7878 = vmatprep.subr.bf16.mxu0 %v12310_v20 }
 0xfd9   :  { %5761 = vmatprep.mubr.bf16.mxu1 %v12311_v61  ;;  %7892 = vmatprep.mubr.msk.bf16.mxu0 %vm9001_vm3, %v12310_v20  ;;  %v11799_v61 = vld [vmem:[#allocation16 + $0x38] sm:$0xff]  }
 0xfdb   :  { %5732 = vmatpush1.bf16.msra.mxu1 %v11578_v16  ;;  %7879 = vmatpush3.bf16.msra.mxu0 %v11581_v22  ;;  %v5573_v16 = vunpack.c.l.bf16 %v5569_v54 }
 0xfdc   :  { %5733 = vmatprep.subr.bf16.mxu1 %v11584_v53  ;;  %7880 = vmatprep.subr.bf16.mxu0 %v12310_v20 }
 0xfdf   :  { %5734 = vmatpush1.bf16.msra.mxu1 %v11588_v11  ;;  %7881 = vmatpush3.bf16.msra.mxu0 %v11591_v40  ;;  %v5571_v40 = vld [vmem:[#allocation3 + $0x9c] sm:$0xff] }
 0xfe0   :  { %5735 = vmatprep.subr.bf16.mxu1 %v11594_v37  ;;  %7882 = vmatprep.subr.bf16.mxu0 %v12310_v20 }
 0xfe3   :  { %5736 = vmatpush1.bf16.msra.mxu1 %v11598_v34  ;;  %7883 = vmatpush3.bf16.msra.mxu0 %v11601_v49 }
 0xfe4   :  { %5737 = vmatprep.subr.bf16.mxu1 %v11604_v44  ;;  %7884 = vmatprep.subr.bf16.mxu0 %v12310_v20 }
 0xfe7   :  { %5738 = vmatpush1.bf16.msra.mxu1 %v11608_v52  ;;  %7885 = vmatpush3.bf16.msra.mxu0 %v11611_v31  ;;  %v5576_v52 = vunpack.c.l.bf16 %v5571_v40 }
 0xfe8   :  { %5739 = vmatprep.subr.bf16.mxu1 %v11614_v1  ;;  %7886 = vmatprep.subr.bf16.mxu0 %v12310_v20 }
 0xfeb   :  { %5740 = vmatpush1.bf16.msra.mxu1 %v11618_v36  ;;  %7887 = vmatpush3.bf16.msra.mxu0 %v11621_v41 }
 0xfec   :  { %5741 = vmatprep.subr.bf16.mxu1 %v11624_v12  ;;  %7888 = vmatprep.subr.bf16.mxu0 %v12310_v20 }
 0xfef   :  { %5742 = vmatpush1.bf16.msra.mxu1 %v11628_v21  ;;  %7889 = vmatpush3.bf16.msra.mxu0 %v11631_v55  ;;  %v5574_v55 = vunpack.c.h.bf16 %v5569_v54 }
 0xff0   :  { %5743 = vmatprep.subr.bf16.mxu1 %v11634_v60  ;;  %7890 = vmatprep.subr.bf16.mxu0 %v12310_v20 }
 0xff3   :  { %5744 = vmatpush1.bf16.msra.mxu1 %v11638_v35  ;;  %7891 = vmatpush3.bf16.msra.mxu0 %v11641_v62  ;;  %v5577_v35 = vunpack.c.h.bf16 %v5571_v40  ;;  %v8117_v40 = vld [vmem:[#allocation4 + $0x10] sm:$0xff]  }
 0xff4   :  { %7896 = vmatprep.subr.bf16.mxu1 %v11799_v61 }
0x1096   :  { %v5613_v15 = vpop.f32.mrf.mxu1  ;;  %v5656_v48 = vpop.f32.mrf.mxu0 }
0x1097   :  { %v5614_v22 = vadd.f32 %v5613_v15, %v11431_v5  ;;  %v5657_v18 = vadd.f32 %v5656_v48, %v11445_v7  ;;  %v8109_v15 = vld [vmem:[#allocation16 + $0x30] sm:$0xff]  }
0x1098   :  { %v5615_v53 = vpop.f32.mrf.mxu1  ;;  %v7874_v11 = vpop.f32.mrf.mxu0  ;;  %v8108_v48 = vld [vmem:[#allocation4] sm:$0xff]  }
0x1099   :  { %v5663_v37 = vadd.f32 %v5614_v22, %v5573_v16  ;;  %v5616_v41 = vadd.f32 %v5615_v53, %v11436_v30  ;;  %v8110_v16 = vld [vmem:[#allocation16 + $0x28] sm:$0xff]   ;;  %v8113_v22 = vld [vmem:[#allocation16 + $0x10] sm:$0xff]   ;;  %v8115_v11 = vld [vmem:[#allocation16] sm:$0xff]  }
0x109a   :  { %v5617_v34 = vpop.f32.mrf.mxu1  ;;  %v5659_v49 = vpop.f32.mrf.mxu0  ;;  %v8114_v53 = vld [vmem:[#allocation16 + $0x8] sm:$0xff]  }
0x109b   :  { %v6915_v44 = vmul.f32 -1.442695, %v5663_v37  ;;  %v5618_v31 = vadd.f32 %v5617_v34, %v11431_v5  ;;  %v5677_v62 = vadd.f32 %v5616_v41, %v5574_v55  ;;  %v5660_v2 = vadd.f32 %v5659_v49, %v11445_v7  ;;  %v8118_v37 = vld [vmem:[#allocation4 + $0x18] sm:$0xff]   ;;  %v8119_v34 = vld [vmem:[#allocation4 + $0x20] sm:$0xff]   ;;  %v8120_v49 = vld [vmem:[#allocation4 + $0x28] sm:$0xff]  }
0x109c   :  { %v5619_v1 = vpop.f32.mrf.mxu1  ;;  %v7875_v36 = vpop.f32.mrf.mxu0  ;;  %v5721_v55 = vld [vmem:[#allocation3 + $0xb4] sm:$0xff] }
0x109d   :  { %8563 = vpow2.f32 %v6915_v44  ;;  %v5664_v12 = vadd.f32 %v5618_v31, %v5576_v52  ;;  %v5620_v21 = vadd.f32 %v5619_v1, %v11436_v30  ;;  %v6917_v26 = vmul.f32 -1.442695, %v5677_v62  ;;  %v5719_v52 = vld [vmem:[#allocation3 + $0xa8] sm:$0xff] }
0x109e   :  { %v5723_v36 = vunpack.c.l.bf16 %v5719_v52 }
0x109f   :  { %v6916_v60 = vmul.f32 -1.442695, %v5664_v12  ;;  %v5678_v28 = vadd.f32 %v5620_v21, %v5577_v35 }
0x10a1   :  { %8565 = vpow2.f32 %v6916_v60  ;;  %v6918_v6 = vmul.f32 -1.442695, %v5678_v28 }
0x10a2   :  { %8567 = vpow2.f32 %v6917_v26  ;;  %v5726_v26 = vunpack.c.l.bf16 %v5721_v55 }
0x10a3   :  { %8569 = vpow2.f32 %v6918_v6 }
0x10aa   :  { %v8564_v42 = vpop.eup %8563 }
0x10ab   :  { %v5671_v38 = vadd.f32 1.0, %v8564_v42 }
0x10ad   :  { %8571 = vrcp.f32 %v5671_v38 }
0x10ae   :  { %v8566_v33 = vpop.eup %8565 }
0x10af   :  { %v5672_v58 = vadd.f32 1.0, %v8566_v33  ;;  %v8568_v29 = vpop.eup %8567 }
0x10b0   :  { %v8570_v25 = vpop.eup %8569  ;;  %v5685_v27 = vadd.f32 1.0, %v8568_v29 }
0x10b1   :  { %8573 = vrcp.f32 %v5672_v58  ;;  %v5686_v46 = vadd.f32 1.0, %v8570_v25  ;;  %v5724_v25 = vunpack.c.h.bf16 %v5719_v52 }
0x10b2   :  { %8575 = vrcp.f32 %v5685_v27 }
0x10b3   :  { %8577 = vrcp.f32 %v5686_v46 }
0x10ba   :  { %v8572_v14 = vpop.eup %8571 }
0x10bb   :  { %v5691_v3 = vmul.f32 %v8572_v14, %v5657_v18  ;;  %v5727_v18 = vunpack.c.h.bf16 %v5721_v55 }
0x10bd   :  { %v5693_v23 = vadd.f32 %v5691_v3, %v5575_v45 }
0x10be   :  { %v8574_v47 = vpop.eup %8573 }
0x10bf   :  { %8579 = vtanh.f32 %v5693_v23  ;;  %v5692_v0 = vmul.f32 %v8574_v47, %v5660_v2  ;;  %v8576_v8 = vpop.eup %8575 }
0x10c0   :  { %v8578_v50 = vpop.eup %8577  ;;  %v5697_v39 = vsub.f32 1.0, %v8576_v8  ;;  %v5701_v19 = vmul.f32 %v8576_v8, %v11760_v9  ;;  %v8111_v9 = vld [vmem:[#allocation16 + $0x20] sm:$0xff]  }
0x10c1   :  { %v5694_v59 = vadd.f32 %v5692_v0, %v5578_v43  ;;  %v5698_v56 = vsub.f32 1.0, %v8578_v50  ;;  %v5702_v51 = vmul.f32 %v8578_v50, %v11762_v17  ;;  %v8112_v17 = vld [vmem:[#allocation16 + $0x18] sm:$0xff]   ;;  %v5720_v8 = vld [vmem:[#allocation3 + $0xb0] ss:$12 sps:$4 sm:$0xff]  }
0x10c3   :  { %8581 = vtanh.f32 %v5694_v59 }
0x10cc   :  { %v8580_v10 = vpop.eup %8579 }
0x10cd   :  { %v5699_v24 = vmul.f32 %v8580_v10, %v5697_v39 }
0x10cf   :  { %v11810_v57 = vadd.f32 %v5701_v19, %v5699_v24 }
0x10d0   :  { %v8582_v63 = vpop.eup %8581 }
0x10d1   :  { %v5700_v13 = vmul.f32 %v8582_v63, %v5698_v56 }
0x10d3   :  { %v11812_v4 = vadd.f32 %v5702_v51, %v5700_v13  ;;  %v5725_v13 = vunpack.c.l.bf16 %v5720_v8 }
0x10d5   :  { %v5705_v54 = vpack.c.bf16 %v11812_v4, %v11810_v57 }
0x10d7   :  { %7090 = vst [vmem:[#allocation4 + $0x30] sm:$0xff] %v5705_v54   ;;  %5762 = vmatmul.mubr.bf16.vlgmr.msra.gmra.mxu1 %v5705_v54  ;;  %7893 = vmatmul.mubr.bf16.vlgmr.msra.gmra.mxu0 %v5705_v54 }
0x10d8   :  { %7897 = vmatpush3.bf16.msra.mxu1 %v11799_v61  ;;  %7912 = vmatprep.mubr.bf16.mxu1 %v8108_v48  ;;  %v8116_v61 = vld [vmem:[#allocation4 + $0x8] sm:$0xff]  }
0x10d9   :  { %7898 = vmatprep.subr.bf16.mxu1 %v8109_v15 }
0x10dc   :  { %7899 = vmatpush3.bf16.msra.mxu1 %v8109_v15 }
0x10dd   :  { %7900 = vmatprep.subr.bf16.mxu1 %v8110_v16 }
0x10de   :  { %v8121_v44 = vld [vmem:[#allocation4 + $0x30] sm:$0xff]  }
0x10e0   :  { %7901 = vmatpush3.bf16.msra.mxu1 %v8110_v16 }
0x10e1   :  { %7902 = vmatprep.subr.bf16.mxu1 %v8111_v9 }
0x10e4   :  { %7903 = vmatpush3.bf16.msra.mxu1 %v8111_v9 }
0x10e5   :  { %7904 = vmatprep.subr.bf16.mxu1 %v8112_v17 }
0x10e8   :  { %7905 = vmatpush3.bf16.msra.mxu1 %v8112_v17 }
0x10e9   :  { %7906 = vmatprep.subr.bf16.mxu1 %v8113_v22 }
0x10ec   :  { %7907 = vmatpush3.bf16.msra.mxu1 %v8113_v22  ;;  %v5728_v22 = vunpack.c.h.bf16 %v5720_v8 }
0x10ed   :  { %7908 = vmatprep.subr.bf16.mxu1 %v8114_v53 }
0x10f0   :  { %7909 = vmatpush3.bf16.msra.mxu1 %v8114_v53 }
0x10f1   :  { %7910 = vmatprep.subr.bf16.mxu1 %v8115_v11 }
0x10f4   :  { %7911 = vmatpush3.bf16.msra.mxu1 %v8115_v11 }
0x10f7   :  { %7913 = vmatmul.mubr.bf16.vlgmr.msra.gmra.mxu1 %v8116_v61 }
0x10f8   :  { %7916 = vmatprep.mubr.bf16.mxu1 %v8117_v40 }
0x10ff   :  { %7917 = vmatmul.mubr.bf16.gmra.mxu1 %v8118_v37 }
0x1100   :  { %7920 = vmatprep.mubr.bf16.mxu1 %v8119_v34 }
0x1107   :  { %7921 = vmatmul.mubr.bf16.gmra.mxu1 %v8120_v49 }
0x1108   :  { %7924 = vmatprep.mubr.bf16.mxu1 %v8121_v44 }
0x1197   :  { %v5763_v31 = vpop.f32.mrf.mxu1  ;;  %v5806_v1 = vpop.f32.mrf.mxu0 }
0x1198   :  { %v5764_v41 = vadd.f32 %v5763_v31, %v11431_v5  ;;  %v5807_v10 = vadd.f32 %v5806_v1, %v11445_v7 }
0x1199   :  { %v5765_v12 = vpop.f32.mrf.mxu1  ;;  %v7894_v21 = vpop.f32.mrf.mxu0 }
0x119a   :  { %v5813_v60 = vadd.f32 %v5764_v41, %v5723_v36  ;;  %v5766_v33 = vadd.f32 %v5765_v12, %v11436_v30 }
0x119b   :  { %v5767_v35 = vpop.f32.mrf.mxu1  ;;  %v5809_v62 = vpop.f32.mrf.mxu0 }
0x119c   :  { %v6921_v28 = vmul.f32 -1.442695, %v5813_v60  ;;  %v5768_v6 = vadd.f32 %v5767_v35, %v11431_v5  ;;  %v5827_v27 = vadd.f32 %v5766_v33, %v5724_v25  ;;  %v5810_v48 = vadd.f32 %v5809_v62, %v11445_v7 }
0x119d   :  { %v5769_v42 = vpop.f32.mrf.mxu1  ;;  %v7895_v38 = vpop.f32.mrf.mxu0 }
0x119e   :  { %8583 = vpow2.f32 %v6921_v28  ;;  %v5814_v58 = vadd.f32 %v5768_v6, %v5726_v26  ;;  %v5770_v29 = vadd.f32 %v5769_v42, %v11436_v30  ;;  %v6923_v46 = vmul.f32 -1.442695, %v5827_v27  ;;  %v11824_v30 = vld [vmem:[%s12177_s17] ss:$0 sm:$0xff] }
0x11a0   :  { %v6922_v32 = vmul.f32 -1.442695, %v5814_v58  ;;  %v5828_v14 = vadd.f32 %v5770_v29, %v5727_v18 }
0x11a2   :  { %8585 = vpow2.f32 %v6922_v32  ;;  %v6924_v45 = vmul.f32 -1.442695, %v5828_v14  ;;  %v11878_v14 = vpop.permute.xlu1 %6277 }
0x11a3   :  { %8587 = vpow2.f32 %v6923_v46  ;;  %v11880_v46 = vpop.permute.xlu0 %6280 }
0x11a4   :  { %8589 = vpow2.f32 %v6924_v45 }
0x11a6   :  { %v11882_v45 = vpop.permute.xlu1 %6283 }
0x11ab   :  { %v8584_v3 = vpop.eup %8583 }
0x11ac   :  { %v5821_v5 = vadd.f32 1.0, %v8584_v3  ;;  %v11884_v3 = vpop.permute.xlu0 %6289 }
0x11ae   :  { %8591 = vrcp.f32 %v5821_v5 }
0x11af   :  { %v8586_v23 = vpop.eup %8585 }
0x11b0   :  { %v5822_v2 = vadd.f32 1.0, %v8586_v23  ;;  %v8588_v47 = vpop.eup %8587 }
0x11b1   :  { %v8590_v0 = vpop.eup %8589  ;;  %v5835_v39 = vadd.f32 1.0, %v8588_v47 }
0x11b2   :  { %8593 = vrcp.f32 %v5822_v2  ;;  %v5836_v24 = vadd.f32 1.0, %v8590_v0 }
0x11b3   :  { %8595 = vrcp.f32 %v5835_v39 }
0x11b4   :  { %8597 = vrcp.f32 %v5836_v24 }
0x11b7   :  { %v7914_v43 = vpop.f32.mrf.mxu1 }
0x11b8   :  { %v11827_v59 = vadd.f32 %v7914_v43, %v11824_v30 }
0x11b9   :  { %v6035_v50 = vpop.f32.mrf.mxu1 }
0x11ba   :  { %6102 = vmax.xlane.f32.xlu0 %v11827_v59  ;;  %v11832_v51 = vadd.f32 %v11824_v30, %v6035_v50 }
0x11bb   :  { %v8592_v56 = vpop.eup %8591  ;;  %v7915_v63 = vpop.f32.mrf.mxu1 }
0x11bc   :  { %v5841_v19 = vmul.f32 %v8592_v56, %v5807_v10  ;;  %v11840_v11 = vadd.f32 %v7915_v63, %v11824_v30 }
0x11bd   :  { %v6038_v54 = vpop.f32.mrf.mxu1 }
0x11be   :  { %v5843_v15 = vadd.f32 %v5841_v19, %v5725_v13  ;;  %v11836_v16 = vadd.f32 %v11824_v30, %v6038_v54  ;;  %6098 = vmax.xlane.f32.xlu0 %v11832_v51  ;;  %v11921_v19 = vld [vmem:[%s12171_s11 + $0x68] sm:$0xff] }
0x11bf   :  { %v8594_v9 = vpop.eup %8593  ;;  %v7918_v17 = vpop.f32.mrf.mxu1 }
0x11c0   :  { %8599 = vtanh.f32 %v5843_v15  ;;  %v5842_v53 = vmul.f32 %v8594_v9, %v5810_v48  ;;  %6100 = vmax.xlane.f32.xlu1 %v11836_v16  ;;  %v11844_v7 = vadd.f32 %v7918_v17, %v11824_v30  ;;  %v8596_v41 = vpop.eup %8595  ;;  %v11941_v17 = vld [vmem:[%s12171_s11 + $0x70] sm:$0xff] }
0x11c1   :  { %v6051_v61 = vpop.f32.mrf.mxu1  ;;  %v8598_v21 = vpop.eup %8597  ;;  %v5847_v62 = vsub.f32 1.0, %v8596_v41  ;;  %v5851_v33 = vmul.f32 %v8596_v41, %v11810_v57 }
0x11c2   :  { %v5844_v40 = vadd.f32 %v5842_v53, %v5728_v22  ;;  %6104 = vmax.xlane.f32.xlu0 %v11840_v11  ;;  %v11852_v44 = vadd.f32 %v11824_v30, %v6051_v61  ;;  %v5848_v6 = vsub.f32 1.0, %v8598_v21  ;;  %v5852_v29 = vmul.f32 %v8598_v21, %v11812_v4  ;;  %v11886_v57 = vpop.permute.xlu1 %6286  ;;  %v11888_v4 = vpop.permute.xlu0 %6295 }
0x11c3   :  { %v7919_v37 = vpop.f32.mrf.mxu1 }
0x11c4   :  { %8601 = vtanh.f32 %v5844_v40  ;;  %v11848_v34 = vadd.f32 %v7919_v37, %v11824_v30  ;;  %6110 = vmax.xlane.f32.xlu1 %v11844_v7 }
0x11c5   :  { %v6054_v49 = vpop.f32.mrf.mxu1 }
0x11c6   :  { %6112 = vmax.xlane.f32.xlu0 %v11848_v34  ;;  %v11856_v31 = vadd.f32 %v11824_v30, %v6054_v49  ;;  %v11894_v43 = vpop.permute.xlu1 %6292  ;;  %v11902_v10 = vpop.permute.xlu0 %6301 }
0x11c7   :  { %v7922_v52 = vpop.f32.mrf.mxu1 }
0x11c8   :  { %6106 = vmax.xlane.f32.xlu1 %v11852_v44  ;;  %v11860_v36 = vadd.f32 %v7922_v52, %v11824_v30 }
0x11c9   :  { %v6067_v1 = vpop.f32.mrf.mxu1 }
0x11ca   :  { %6108 = vmax.xlane.f32.xlu0 %v11856_v31  ;;  %v11868_v28 = vadd.f32 %v11824_v30, %v6067_v1  ;;  %v11909_v56 = vpop.permute.xlu1 %6298  ;;  %v11912_v24 = vpop.permute.xlu0 %6307 }
0x11cb   :  { %v7923_v12 = vpop.f32.mrf.mxu1 }
0x11cc   :  { %v11864_v55 = vadd.f32 %v7923_v12, %v11824_v30  ;;  %6118 = vmax.xlane.f32.xlu1 %v11860_v36 }
0x11cd   :  { %v8600_v60 = vpop.eup %8599  ;;  %v6070_v35 = vpop.f32.mrf.mxu1 }
0x11ce   :  { %6120 = vmax.xlane.f32.xlu0 %v11864_v55  ;;  %v5849_v26 = vmul.f32 %v8600_v60, %v5847_v62  ;;  %v11872_v42 = vadd.f32 %v11824_v30, %v6070_v35  ;;  %v11914_v63 = vpop.permute.xlu1 %6304  ;;  %v11916_v13 = vpop.permute.xlu0 %6313 }
0x11d0   :  { %6114 = vmax.xlane.f32.xlu1 %v11868_v28  ;;  %v5853_v25 = vadd.f32 %v5851_v33, %v5849_v26 }
0x11d1   :  { %v8602_v38 = vpop.eup %8601 }
0x11d2   :  { %v5850_v58 = vmul.f32 %v8602_v38, %v5848_v6  ;;  %6116 = vmax.xlane.f32.xlu0 %v11872_v42  ;;  %v11923_v54 = vpop.permute.xlu1 %6310 }
0x11d4   :  { %v5854_v32 = vadd.f32 %v5852_v29, %v5850_v58 }
0x11d6   :  { %v7094_v18 = vpack.c.bf16 %v5854_v32, %v5853_v25 }
0x11d8   :  { %7095 = vst [vmem:[#allocation4 + $0x38] sm:$0xff] %v7094_v18  }
0x11df   :  { %v8122_v27 = vld [vmem:[#allocation4 + $0x38] sm:$0xff]  }
0x11e0   :  { %7925 = vmatmul.mubr.bf16.gmra.mxu1 %v8122_v27 }
0x1243   :  { %v11925_v15 = vpop.xlane.xlu0 %6102 }
0x1244   :  { %v6132_v52 = vsub.f32 %v11827_v59, %v11925_v15 }
0x1246   :  { %v6150_v35 = vmul.f32 1.442695, %v6132_v52 }
0x1247   :  { %v11936_v9 = vpop.xlane.xlu0 %6098 }
0x1248   :  { %v6130_v40 = vsub.f32 %v11832_v51, %v11936_v9 }
0x1249   :  { %v11933_v48 = vpop.xlane.xlu1 %6100 }
0x124a   :  { %v6131_v49 = vsub.f32 %v11836_v16, %v11933_v48  ;;  %v6146_v1 = vmul.f32 1.442695, %v6130_v40 }
0x124b   :  { %v11946_v53 = vpop.xlane.xlu0 %6104 }
0x124c   :  { %v6148_v12 = vmul.f32 1.442695, %v6131_v49  ;;  %8603 = vpow2.f32 %v6146_v1  ;;  %v6133_v62 = vsub.f32 %v11840_v11, %v11946_v53 }
0x124d   :  { %v11943_v22 = vpop.xlane.xlu1 %6110 }
0x124e   :  { %8605 = vpow2.f32 %v6148_v12  ;;  %v6136_v26 = vsub.f32 %v11844_v7, %v11943_v22  ;;  %v6152_v33 = vmul.f32 1.442695, %v6133_v62 }
0x124f   :  { %v11952_v37 = vpop.xlane.xlu0 %6112  ;;  %8607 = vpow2.f32 %v6150_v35 }
0x1250   :  { %v6158_v25 = vmul.f32 1.442695, %v6136_v26  ;;  %v6137_v18 = vsub.f32 %v11848_v34, %v11952_v37 }
0x1251   :  { %v11948_v61 = vpop.xlane.xlu1 %6106 }
0x1252   :  { %v6134_v21 = vsub.f32 %v11852_v44, %v11948_v61 }
0x1253   :  { %v11962_v60 = vpop.xlane.xlu0 %6108 }
0x1254   :  { %v6154_v6 = vmul.f32 1.442695, %v6134_v21  ;;  %v6135_v58 = vsub.f32 %v11856_v31, %v11962_v60 }
0x1255   :  { %v11958_v41 = vpop.xlane.xlu1 %6118 }
0x1256   :  { %8609 = vpow2.f32 %v6154_v6  ;;  %v6156_v27 = vmul.f32 1.442695, %v6135_v58 }
0x1257   :  { %v11972_v29 = vpop.xlane.xlu0 %6120  ;;  %8611 = vpow2.f32 %v6152_v33 }
0x1258   :  { %8613 = vpow2.f32 %v6158_v25  ;;  %v6141_v26 = vsub.f32 %v11864_v55, %v11972_v29 }
0x1259   :  { %v11968_v38 = vpop.xlane.xlu1 %6114  ;;  %8615 = vpow2.f32 %v6156_v27  ;;  %v8604_v40 = vpop.eup %8603 }
0x125a   :  { %v6138_v32 = vsub.f32 %v11868_v28, %v11968_v38  ;;  %v6168_v58 = vmul.f32 1.442695, %v6141_v26 }
0x125b   :  { %v8606_v1 = vpop.eup %8605 }
0x125c   :  { %v8608_v12 = vpop.eup %8607 }
0x1263   :  { %v8610_v35 = vpop.eup %8609 }
0x1264   :  { %v8612_v62 = vpop.eup %8611 }
0x1265   :  { %v8614_v6 = vpop.eup %8613 }
0x1266   :  { %v8616_v33 = vpop.eup %8615 }
0x12a0   :  { %v7926_v5 = vpop.f32.mrf.mxu1 }
0x12a1   :  { %v11891_v23 = vadd.f32 %v7926_v5, %v11824_v30  ;;  %v6140_v5 = vsub.f32 %v11860_v36, %v11958_v41 }
0x12a2   :  { %v6083_v2 = vpop.f32.mrf.mxu1 }
0x12a3   :  { %6126 = vmax.xlane.f32.xlu1 %v11891_v23  ;;  %v11897_v0 = vadd.f32 %v11824_v30, %v6083_v2  ;;  %v6162_v2 = vmul.f32 1.442695, %v6138_v32  ;;  %v6166_v49 = vmul.f32 1.442695, %v6140_v5 }
0x12a4   :  { %v7927_v47 = vpop.f32.mrf.mxu1 }
0x12a5   :  { %v11900_v8 = vadd.f32 %v7927_v47, %v11824_v30  ;;  %v11980_v47 = vpop.xlane.xlu0 %6116  ;;  %8617 = vpow2.f32 %v6162_v2 }
0x12a6   :  { %v6086_v50 = vpop.f32.mrf.mxu1  ;;  %v6139_v52 = vsub.f32 %v11872_v42, %v11980_v47 }
0x12a7   :  { %6122 = vmax.xlane.f32.xlu1 %v11897_v0  ;;  %6128 = vmax.xlane.f32.xlu0 %v11900_v8  ;;  %v11907_v39 = vadd.f32 %v11824_v30, %v6086_v50  ;;  %v11931_v30 = vld [vmem:[%s12171_s11 + $0x78] sm:$0xff]  ;;  %v6160_v50 = vmul.f32 1.442695, %v6137_v18  ;;  %v12422_v18 = vlaneseq }
0x12a8   :  { %v6164_v21 = vmul.f32 1.442695, %v6139_v52 }
0x12a9   :  { %8619 = vpow2.f32 %v6160_v50  ;;  %v11987_v27 = vand.u32 127, %v12422_v18 }
0x12aa   :  { %8621 = vpow2.f32 %v6166_v49 }
0x12ab   :  { %6124 = vmax.xlane.f32.xlu0 %v11907_v39  ;;  %8623 = vpow2.f32 %v6164_v21  ;;  %vm6325_vm0 = vcmp.eq.s32.totalorder %v11987_v27, %v11880_v46  ;;  %vm6324_vm3 = vcmp.eq.s32.totalorder %v11987_v27, %v11878_v14  ;;  %vm6326_vm7 = vcmp.eq.s32.totalorder %v11987_v27, %v11882_v45 }
0x12ac   :  { %8625 = vpow2.f32 %v6168_v58  ;;  %v6341_v50 = vsel %vm6325_vm0, %v11836_v16, 0.0  ;;  %v6340_v49 = vsel %vm6324_vm3, %v11832_v51, 0.0  ;;  %vm6327_vm8 = vcmp.eq.s32.totalorder %v11987_v27, %v11886_v57 }
0x12ad   :  { %v6343_v16 = vsel %vm6327_vm8, %v11840_v11, 0.0  ;;  %vm6328_vm10 = vcmp.eq.s32.totalorder %v11987_v27, %v11884_v3  ;;  %vm6329_vm11 = vcmp.eq.s32.totalorder %v11987_v27, %v11894_v43  ;;  %vm6330_vm12 = vcmp.eq.s32.totalorder %v11987_v27, %v11888_v4 }
0x12ae   :  { %v6344_v14 = vsel %vm6328_vm10, %v11852_v44, 0.0  ;;  %v6346_v51 = vsel %vm6330_vm12, %v11844_v7, 0.0  ;;  %vm6332_vm13 = vcmp.eq.s32.totalorder %v11987_v27, %v11902_v10  ;;  %vm6334_vm14 = vcmp.eq.s32.totalorder %v11987_v27, %v11912_v24 }
0x12af   :  { %v6348_v11 = vsel %vm6332_vm13, %v11868_v28, 0.0  ;;  %v6350_v44 = vsel %vm6334_vm14, %v11860_v36, 0.0  ;;  %vm6336_vm15 = vcmp.eq.s32.totalorder %v11987_v27, %v11916_v13  ;;  %vm6331_vm2 = vcmp.eq.s32.totalorder %v11987_v27, %v11909_v56 }
0x12b0   :  { %v6347_v26 = vsel %vm6331_vm2, %v11848_v34, 0.0  ;;  %vm6333_vm6 = vcmp.eq.s32.totalorder %v11987_v27, %v11914_v63  ;;  %vm6335_vm9 = vcmp.eq.s32.totalorder %v11987_v27, %v11923_v54  ;;  %vm6468_vm10 = vcmask 7168  }
0x12b2   :  { %v8618_v25 = vpop.eup %8617 }
0x12b6   :  { %v8620_v32 = vpop.eup %8619 }
0x12b7   :  { %v8622_v5 = vpop.eup %8621 }
0x12b8   :  { %6316 = vperm.xlu1 %7952, %v11921_v19   ;;  %v8624_v2 = vpop.eup %8623 }
0x12b9   :  { %v8626_v46 = vpop.eup %8625 }
0x12bc   :  { %6322 = vperm.xlu1 %7952, %v11931_v30  }
0x12c1   :  { %6319 = vperm.xlu0 %7951, %v11941_v17  }
0x12e0   :  { %6180 = vadd.xlane.f32.xlu1 %v8606_v1  ;;  %6178 = vadd.xlane.f32.xlu0 %v8604_v40  ;;  %v6342_v40 = vsel %vm6326_vm7, %v11827_v59, 0.0  ;;  %v6345_v59 = vsel %vm6329_vm11, %v11856_v31, 0.0  ;;  %v6352_v31 = vsel %vm6336_vm15, %v11897_v0, 0.0 }
0x12e4   :  { %6186 = vadd.xlane.f32.xlu1 %v8610_v35  ;;  %6182 = vadd.xlane.f32.xlu0 %v8608_v12 }
0x12e8   :  { %6190 = vadd.xlane.f32.xlu1 %v8614_v6  ;;  %6184 = vadd.xlane.f32.xlu0 %v8612_v62 }
0x12ec   :  { %6194 = vadd.xlane.f32.xlu1 %v8618_v25  ;;  %6188 = vadd.xlane.f32.xlu0 %v8616_v33  ;;  %v6351_v33 = vsel %vm6335_vm9, %v11864_v55, 0.0 }
0x12f0   :  { %6198 = vadd.xlane.f32.xlu1 %v8622_v5  ;;  %6192 = vadd.xlane.f32.xlu0 %v8620_v32 }
0x12f4   :  { %6358 = vadd.xlane.f32.xlu1 %v6341_v50  ;;  %6196 = vadd.xlane.f32.xlu0 %v8624_v2 }
0x12f8   :  { %6360 = vadd.xlane.f32.xlu1 %v6342_v40  ;;  %6356 = vadd.xlane.f32.xlu0 %v6340_v49  ;;  %v8803_v49 = vld [vmem:[%s12171_s11 + $0x8] sm:$0xff] }
0x12f9   :  { %vm6389_vm0 = vcmp.ne.s32.totalorder %v8803_v49, 0 }
0x12fc   :  { %6362 = vadd.xlane.f32.xlu1 %v6343_v16  ;;  %6200 = vadd.xlane.f32.xlu0 %v8626_v46 }
0x1300   :  { %6364 = vadd.xlane.f32.xlu1 %v6344_v14 }
0x1304   :  { %6366 = vadd.xlane.f32.xlu1 %v6345_v59 }
0x1308   :  { %6368 = vadd.xlane.f32.xlu1 %v6346_v51 }
0x130c   :  { %6372 = vadd.xlane.f32.xlu1 %v6348_v11  ;;  %v8804_v11 = vld [vmem:[%s12171_s11] sm:$0xff] }
0x130d   :  { %vm6388_vm3 = vcmp.ne.s32.totalorder %v8804_v11, 0 }
0x1310   :  { %6376 = vadd.xlane.f32.xlu1 %v6350_v44  ;;  %v8805_v44 = vld [vmem:[%s12171_s11 + $0x10] sm:$0xff] }
0x1311   :  { %vm6390_vm7 = vcmp.ne.s32.totalorder %v8805_v44, 0  ;;  %v8809_v44 = vld [vmem:[%s12171_s11 + $0x30] sm:$0xff] }
0x1312   :  { %vm6394_vm13 = vcmp.ne.s32.totalorder %v8809_v44, 0 }
0x1314   :  { %6380 = vadd.xlane.f32.xlu1 %v6352_v31 }
0x132c   :  { %v12019_v7 = vpop.xlane.xlu1 %6126 }
0x132d   :  { %v6144_v45 = vsub.f32 %v11891_v23, %v12019_v7 }
0x132f   :  { %v6174_v3 = vmul.f32 1.442695, %v6144_v45  ;;  %v6945_v45 = vsel %vm6389_vm0, 1.0, %v12310_v20  ;;  %vm6403_vm0 = vcmp.ne.s32.totalorder %v11931_v30, 0 }
0x1330   :  { %v12023_v28 = vpop.xlane.xlu1 %6122  ;;  %v12025_v57 = vpop.xlane.xlu0 %6128 }
0x1331   :  { %8627 = vpow2.f32 %v6174_v3  ;;  %v6142_v36 = vsub.f32 %v11897_v0, %v12023_v28  ;;  %v6145_v10 = vsub.f32 %v11900_v8, %v12025_v57 }
0x1333   :  { %v6170_v4 = vmul.f32 1.442695, %v6142_v36  ;;  %v6176_v52 = vmul.f32 1.442695, %v6145_v10 }
0x1334   :  { %v12029_v43 = vpop.xlane.xlu0 %6124  ;;  %v6317_v6 = vpop.permute.xlu1 %6316 }
0x1335   :  { %8629 = vpow2.f32 %v6170_v4  ;;  %v6143_v24 = vsub.f32 %v11907_v39, %v12029_v43  ;;  %vm6337_vm4 = vcmp.eq.s32.totalorder %v11987_v27, %v6317_v6 }
0x1336   :  { %v6353_v56 = vsel %vm6337_vm4, %v11907_v39, 0.0  ;;  %vm6401_vm4 = vcmp.ne.s32.totalorder %v11921_v19, 0 }
0x1337   :  { %v6172_v13 = vmul.f32 1.442695, %v6143_v24  ;;  %v6946_v24 = vsel %vm6390_vm7, 1.0, %v12310_v20  ;;  %v6957_v19 = vsel %vm6401_vm4, 1.0, %v12310_v20 }
0x1338   :  { %v6323_v58 = vpop.permute.xlu1 %6322 }
0x1339   :  { %8631 = vpow2.f32 %v6172_v13  ;;  %vm6339_vm5 = vcmp.eq.s32.totalorder %v11987_v27, %v6323_v58  ;;  %v8807_v58 = vld [vmem:[%s12171_s11 + $0x20] sm:$0xff] }
0x133a   :  { %8633 = vpow2.f32 %v6176_v52  ;;  %v6355_v34 = vsel %vm6339_vm5, %v11900_v8, 0.0  ;;  %v6944_v52 = vsel %vm6388_vm3, 1.0, %v12310_v20  ;;  %vm6392_vm11 = vcmp.ne.s32.totalorder %v8807_v58, 0 }
0x133b   :  { %vm6402_vm5 = vcmp.ne.s32.totalorder %v11941_v17, 0  ;;  %vm6512_vm3 = vcmask 0  }
0x133c   :  { %v6320_v1 = vpop.permute.xlu0 %6319 }
0x133d   :  { %vm6338_vm1 = vcmp.eq.s32.totalorder %v11987_v27, %v6320_v1 }
0x133e   :  { %v8628_v12 = vpop.eup %8627  ;;  %v6354_v0 = vsel %vm6338_vm1, %v11891_v23, 0.0  ;;  %v6349_v23 = vsel %vm6333_vm6, %v11872_v42, 0.0 }
0x133f   :  { %6384 = vadd.xlane.f32.xlu1 %v6354_v0  ;;  %6206 = vadd.xlane.f32.xlu0 %v8628_v12  ;;  %v8806_v12 = vld [vmem:[%s12171_s11 + $0x18] sm:$0xff] }
0x1340   :  { %vm6391_vm8 = vcmp.ne.s32.totalorder %v8806_v12, 0 }
0x1342   :  { %v8630_v21 = vpop.eup %8629 }
0x1343   :  { %6202 = vadd.xlane.f32.xlu0 %v8630_v21 }
0x1346   :  { %v8632_v35 = vpop.eup %8631 }
0x1347   :  { %6204 = vadd.xlane.f32.xlu0 %v8632_v35  ;;  %v8634_v62 = vpop.eup %8633 }
0x134b   :  { %6208 = vadd.xlane.f32.xlu0 %v8634_v62 }
0x134f   :  { %6370 = vadd.xlane.f32.xlu0 %v6347_v26 }
0x1353   :  { %6374 = vadd.xlane.f32.xlu0 %v6349_v23  ;;  %v6947_v23 = vsel %vm6391_vm8, 1.0, %v12310_v20 }
0x1357   :  { %6378 = vadd.xlane.f32.xlu0 %v6351_v33 }
0x135b   :  { %6382 = vadd.xlane.f32.xlu0 %v6353_v56 }
0x135f   :  { %6386 = vadd.xlane.f32.xlu0 %v6355_v34 }
0x1369   :  { %v6181_v63 = vpop.xlane.xlu1 %6180  ;;  %v6179_v42 = vpop.xlane.xlu0 %6178 }
0x136a   :  { %8635 = vlog2.f32 %v6181_v63 }
0x136b   :  { %8637 = vlog2.f32 %v6179_v42 }
0x136d   :  { %v6187_v25 = vpop.xlane.xlu1 %6186  ;;  %v6183_v54 = vpop.xlane.xlu0 %6182 }
0x136e   :  { %8639 = vlog2.f32 %v6183_v54 }
0x1371   :  { %v6191_v55 = vpop.xlane.xlu1 %6190  ;;  %v6185_v32 = vpop.xlane.xlu0 %6184 }
0x1372   :  { %8641 = vlog2.f32 %v6185_v32 }
0x1373   :  { %8643 = vlog2.f32 %v6187_v25 }
0x1375   :  { %v12050_v18 = vpop.xlane.xlu1 %6194  ;;  %v6189_v39 = vpop.xlane.xlu0 %6188 }
0x1376   :  { %8645 = vlog2.f32 %v6189_v39 }
0x1377   :  { %v8636_v5 = vpop.eup %8635  ;;  %8647 = vlog2.f32 %v6191_v55 }
0x1378   :  { %v6213_v27 = vmul.f32 0.6931472, %v8636_v5  ;;  %v8638_v2 = vpop.eup %8637  ;;  %v6948_v5 = vsel %vm6392_vm11, 1.0, %v12310_v20  ;;  %8649 = vlog2.f32 %v12050_v18 }
0x1379   :  { %v12052_v8 = vpop.xlane.xlu1 %6198  ;;  %v12054_v50 = vpop.xlane.xlu0 %6192  ;;  %v6211_v46 = vmul.f32 0.6931472, %v8638_v2  ;;  %v8808_v2 = vld [vmem:[%s12171_s11 + $0x28] sm:$0xff] }
0x137a   :  { %v6243_v16 = vadd.f32 %v6213_v27, %v11933_v48  ;;  %vm6393_vm12 = vcmp.ne.s32.totalorder %v8808_v2, 0  ;;  %8651 = vlog2.f32 %v12054_v50 }
0x137b   :  { %v8640_v40 = vpop.eup %8639  ;;  %v6242_v36 = vadd.f32 %v6211_v46, %v11936_v9  ;;  %8653 = vlog2.f32 %v12052_v8  ;;  %v8810_v8 = vld [vmem:[%s12171_s11 + $0x40] sm:$0xff] }
0x137c   :  { %v6215_v14 = vmul.f32 0.6931472, %v8640_v40  ;;  %vm6396_vm14 = vcmp.ne.s32.totalorder %v8810_v8, 0 }
0x137d   :  { %v6359_v59 = vpop.xlane.xlu1 %6358  ;;  %v12060_v51 = vpop.xlane.xlu0 %6196 }
0x137e   :  { %v6437_v31 = vsub.f32 %v6243_v16, %v6359_v59  ;;  %v6244_v48 = vadd.f32 %v6215_v14, %v11925_v15  ;;  %8655 = vlog2.f32 %v12060_v51  ;;  %v8811_v51 = vld [vmem:[%s12171_s11 + $0x38] sm:$0xff] }
0x137f   :  { %v8642_v3 = vpop.eup %8641  ;;  %vm6395_vm15 = vcmp.ne.s32.totalorder %v8811_v51, 0 }
0x1380   :  { %v8644_v4 = vpop.eup %8643  ;;  %v6217_v10 = vmul.f32 0.6931472, %v8642_v3  ;;  %v6453_v0 = vmul.f32 %v6945_v45, %v6437_v31 }
0x1381   :  { %v6361_v13 = vpop.xlane.xlu1 %6360  ;;  %v6357_v1 = vpop.xlane.xlu0 %6356  ;;  %v6219_v15 = vmul.f32 0.6931472, %v8644_v4  ;;  %v6950_v4 = vsel %vm6394_vm13, 1.0, %v12310_v20 }
0x1382   :  { %v6438_v21 = vsub.f32 %v6244_v48, %v6361_v13  ;;  %v6436_v35 = vsub.f32 %v6242_v36, %v6357_v1  ;;  %v6245_v26 = vadd.f32 %v6217_v10, %v11946_v53  ;;  %v6470_v56 = vsel %vm6468_vm10, %v6453_v0, 0.0 }
0x1383   :  { %v8646_v6 = vpop.eup %8645  ;;  %v6246_v53 = vadd.f32 %v6219_v15, %v11948_v61  ;;  %v6949_v61 = vsel %vm6393_vm12, 1.0, %v12310_v20 }
0x1384   :  { %v6454_v62 = vmul.f32 %v6946_v24, %v6438_v21  ;;  %v6452_v9 = vmul.f32 %v6944_v52, %v6436_v35  ;;  %v6221_v25 = vmul.f32 0.6931472, %v8646_v6  ;;  %v8648_v32 = vpop.eup %8647 }
0x1385   :  { %v6363_v33 = vpop.xlane.xlu1 %6362  ;;  %v6223_v16 = vmul.f32 0.6931472, %v8648_v32  ;;  %v6201_v0 = vpop.xlane.xlu0 %6200 }
0x1386   :  { %v6469_v34 = vsel %vm6468_vm10, %v6452_v9, 0.0  ;;  %v6439_v63 = vsub.f32 %v6245_v26, %v6363_v33  ;;  %v6472_v54 = vsel %vm6468_vm10, %v6454_v62, 0.0  ;;  %v6247_v59 = vadd.f32 %v6221_v25, %v11962_v60  ;;  %v8650_v35 = vpop.eup %8649 }
0x1387   :  { %v6471_v42 = vadd.f32 %v6470_v56, %v6469_v34  ;;  %v6248_v36 = vadd.f32 %v6223_v16, %v11943_v22  ;;  %8657 = vlog2.f32 %v6201_v0  ;;  %v8652_v15 = vpop.eup %8651  ;;  %v6227_v26 = vmul.f32 0.6931472, %v8650_v35 }
0x1388   :  { %v6455_v55 = vmul.f32 %v6947_v23, %v6439_v63  ;;  %v8654_v9 = vpop.eup %8653  ;;  %v6225_v18 = vmul.f32 0.6931472, %v8652_v15  ;;  %v8812_v63 = vld [vmem:[%s12171_s11 + $0x50] sm:$0xff] }
0x1389   :  { %v6473_v39 = vadd.f32 %v6472_v54, %v6471_v42  ;;  %v6365_v27 = vpop.xlane.xlu1 %6364  ;;  %v6231_v50 = vmul.f32 0.6931472, %v8654_v9  ;;  %v6250_v58 = vadd.f32 %v6227_v26, %v11968_v38  ;;  %vm6398_vm1 = vcmp.ne.s32.totalorder %v8812_v63, 0 }
0x138a   :  { %v6474_v40 = vsel %vm6468_vm10, %v6455_v55, 0.0  ;;  %v6440_v49 = vsub.f32 %v6246_v53, %v6365_v27  ;;  %v6249_v55 = vadd.f32 %v6225_v18, %v11952_v37  ;;  %v6952_v53 = vsel %vm6396_vm14, 1.0, %v12310_v20 }
0x138b   :  { %v6475_v46 = vadd.f32 %v6474_v40, %v6473_v39  ;;  %v8656_v23 = vpop.eup %8655  ;;  %v6252_v32 = vadd.f32 %v6231_v50, %v11958_v41  ;;  %v6951_v39 = vsel %vm6395_vm15, 1.0, %v12310_v20 }
0x138c   :  { %v6456_v14 = vmul.f32 %v6948_v5, %v6440_v49  ;;  %v6229_v42 = vmul.f32 0.6931472, %v8656_v23  ;;  %v8813_v5 = vld [vmem:[%s12171_s11 + $0x48] sm:$0xff]  ;;  %v6954_v49 = vsel %vm6398_vm1, 1.0, %v12310_v20 }
0x138d   :  { %v6367_v11 = vpop.xlane.xlu1 %6366  ;;  %vm6397_vm2 = vcmp.ne.s32.totalorder %v8813_v5, 0 }
0x138e   :  { %v6476_v31 = vsel %vm6468_vm10, %v6456_v14, 0.0  ;;  %v6441_v45 = vsub.f32 %v6247_v59, %v6367_v11  ;;  %v6251_v41 = vadd.f32 %v6229_v42, %v11980_v47  ;;  %v6953_v11 = vsel %vm6397_vm2, 1.0, %v12310_v20 }
0x138f   :  { %v6477_v3 = vadd.f32 %v6476_v31, %v6475_v46  ;;  %v8815_v31 = vld [vmem:[%s12171_s11 + $0x58] sm:$0xff] }
0x1390   :  { %v6457_v48 = vmul.f32 %v6949_v61, %v6441_v45  ;;  %v8814_v61 = vld [vmem:[%s12171_s11 + $0x60] sm:$0xff]  ;;  %vm6399_vm9 = vcmp.ne.s32.totalorder %v8815_v31, 0  ;;  %s9002_s11 = smov [#allocation17]  }
0x1391   :  { %v6369_v10 = vpop.xlane.xlu1 %6368  ;;  %vm6400_vm6 = vcmp.ne.s32.totalorder %v8814_v61, 0  ;;  %s6520_s26 = sshll.u32 %s9002_s11, 4  ;;  %s6521_s26 = int_to_ptr.vmem [resolvable:$true] %s6520_s26 }
0x1392   :  { %v6478_v60 = vsel %vm6468_vm10, %v6457_v48, 0.0  ;;  %v6442_v24 = vsub.f32 %v6248_v36, %v6369_v10  ;;  %s8956_s28 = scalar_lea.vmem %s6521_s26, 16  ;;  %s8960_s29 = scalar_lea.vmem %s6521_s26, 32 }
0x1393   :  { %v6479_v13 = vadd.f32 %v6478_v60, %v6477_v3  ;;  %p8957_p7 = scmp.ne.s32.totalorder %s6521_s26, %s8956_s28  ;;  %p8961_p8 = scmp.lt.s32.totalorder %s6521_s26, %s6521_s26 }
0x1394   :  { %v6458_v52 = vmul.f32 %v6950_v4, %v6442_v24  ;;  %v8658_v56 = vpop.eup %8657  ;;  %p8962_p9 = scmp.lt.s32.totalorder %s8960_s29, %s8956_s28 }
0x1395   :  { %v6373_v6 = vpop.xlane.xlu1 %6372  ;;  %v6233_v40 = vmul.f32 0.6931472, %v8658_v56 }
0x1396   :  { %v6480_v1 = vsel %vm6468_vm10, %v6458_v52, 0.0  ;;  %v6444_v25 = vsub.f32 %v6250_v58, %v6373_v6  ;;  %p8963_p10 = por %p8962_p9, %p8961_p8 }
0x1397   :  { %v12100_v12 = vadd.f32 %v6480_v1, %v6479_v13  ;;  %v6253_v24 = vadd.f32 %v6233_v40, %v11972_v29 }
0x1398   :  { %v6460_v37 = vmul.f32 %v6952_v53, %v6444_v25  ;;  %p8964_p11 = pnand %p8963_p10, %p8957_p7 }
0x1399   :  { %v6377_v54 = vpop.xlane.xlu1 %6376 }
0x139a   :  { %v6446_v46 = vsub.f32 %v6252_v32, %v6377_v54  ;;  %v6484_v13 = vsel %vm6468_vm10, %v6460_v37, 0.0 }
0x139c   :  { %v6462_v4 = vmul.f32 %v6954_v49, %v6446_v46 }
0x139d   :  { %v6381_v45 = vpop.xlane.xlu1 %6380 }
0x13c8   :  { %v6207_v22 = vpop.xlane.xlu0 %6206 }
0x13c9   :  { %8659 = vlog2.f32 %v6207_v22  ;;  %v6956_v22 = vsel %vm6400_vm6, 1.0, %v12310_v20 }
0x13cc   :  { %v6203_v21 = vpop.xlane.xlu0 %6202 }
0x13cd   :  { %8661 = vlog2.f32 %v6203_v21  ;;  %v6955_v21 = vsel %vm6399_vm9, 1.0, %v12310_v20 }
0x13d0   :  { %v6205_v62 = vpop.xlane.xlu0 %6204 }
0x13d1   :  { %8663 = vlog2.f32 %v6205_v62  ;;  %v6488_v62 = vsel %vm6468_vm10, %v6462_v4, 0.0 }
0x13d4   :  { %v6209_v33 = vpop.xlane.xlu0 %6208 }
0x13d5   :  { %8665 = vlog2.f32 %v6209_v33  ;;  %v6958_v33 = vsel %vm6402_vm5, 1.0, %v12310_v20 }
0x13d6   :  { %v8660_v34 = vpop.eup %8659 }
0x13d7   :  { %v6239_v16 = vmul.f32 0.6931472, %v8660_v34 }
0x13d8   :  { %v6371_v38 = vpop.xlane.xlu0 %6370 }
0x13d9   :  { %v6443_v27 = vsub.f32 %v6249_v55, %v6371_v38  ;;  %v6256_v10 = vadd.f32 %v6239_v16, %v12019_v7  ;;  %v6385_v7 = vpop.xlane.xlu1 %6384 }
0x13da   :  { %v8662_v2 = vpop.eup %8661 }
0x13db   :  { %v6235_v14 = vmul.f32 0.6931472, %v8662_v2  ;;  %v6459_v59 = vmul.f32 %v6951_v39, %v6443_v27  ;;  %v6450_v9 = vsub.f32 %v6256_v10, %v6385_v7 }
0x13dc   :  { %v6375_v44 = vpop.xlane.xlu0 %6374 }
0x13dd   :  { %v6254_v3 = vadd.f32 %v6235_v14, %v12023_v28  ;;  %v6482_v48 = vsel %vm6468_vm10, %v6459_v59, 0.0  ;;  %v6445_v36 = vsub.f32 %v6251_v41, %v6375_v44  ;;  %v6466_v42 = vmul.f32 %v6958_v33, %v6450_v9 }
0x13de   :  { %v8664_v47 = vpop.eup %8663  ;;  %v6483_v60 = vadd.f32 %v6482_v48, %v12100_v12 }
0x13df   :  { %v6448_v52 = vsub.f32 %v6254_v3, %v6381_v45  ;;  %v6237_v1 = vmul.f32 0.6931472, %v8664_v47  ;;  %v6461_v0 = vmul.f32 %v6953_v11, %v6445_v36  ;;  %v6496_v30 = vsel %vm6468_vm10, %v6466_v42, 0.0 }
0x13e0   :  { %v6485_v28 = vadd.f32 %v6484_v13, %v6483_v60  ;;  %v6379_v35 = vpop.xlane.xlu0 %6378 }
0x13e1   :  { %v6486_v29 = vsel %vm6468_vm10, %v6461_v0, 0.0  ;;  %v6447_v12 = vsub.f32 %v6253_v24, %v6379_v35  ;;  %v6464_v6 = vmul.f32 %v6956_v22, %v6448_v52  ;;  %v6255_v50 = vadd.f32 %v6237_v1, %v12029_v43 }
0x13e2   :  { %v8666_v15 = vpop.eup %8665  ;;  %v6487_v26 = vadd.f32 %v6486_v29, %v6485_v28  ;;  %v6959_v43 = vsel %vm6403_vm0, 1.0, %v12310_v20 }
0x13e3   :  { %v6241_v18 = vmul.f32 0.6931472, %v8666_v15  ;;  %v6463_v23 = vmul.f32 %v6955_v21, %v6447_v12  ;;  %v6492_v25 = vsel %vm6468_vm10, %v6464_v6, 0.0 }
0x13e4   :  { %v6489_v8 = vadd.f32 %v6488_v62, %v6487_v26  ;;  %v6383_v17 = vpop.xlane.xlu0 %6382 }
0x13e5   :  { %v6490_v51 = vsel %vm6468_vm10, %v6463_v23, 0.0  ;;  %v6449_v58 = vsub.f32 %v6255_v50, %v6383_v17  ;;  %v6257_v63 = vadd.f32 %v6241_v18, %v12025_v57 }
0x13e6   :  { %v6491_v56 = vadd.f32 %v6490_v51, %v6489_v8 }
0x13e7   :  { %v6465_v34 = vmul.f32 %v6957_v19, %v6449_v58 }
0x13e8   :  { %v6387_v54 = vpop.xlane.xlu0 %6386  ;;  %v6493_v55 = vadd.f32 %v6492_v25, %v6491_v56 }
0x13e9   :  { %v6494_v53 = vsel %vm6468_vm10, %v6465_v34, 0.0  ;;  %v6451_v32 = vsub.f32 %v6257_v63, %v6387_v54 }
0x13ea   :  { %v6495_v39 = vadd.f32 %v6494_v53, %v6493_v55 }
0x13eb   :  { %v6467_v38 = vmul.f32 %v6959_v43, %v6451_v32 }
0x13ec   :  { %v6497_v5 = vadd.f32 %v6496_v30, %v6495_v39 }
0x13ed   :  { %v6498_v27 = vsel %vm6468_vm10, %v6467_v38, 0.0 }
0x13ee   :  { %v6499_v2 = vadd.f32 %v6498_v27, %v6497_v5 }
0x13f0   :  { %6500 = vadd.xlane.f32.xlu1 %v6499_v2 }
0x1479   :  { %v6501_v57 = vpop.xlane.xlu1 %6500 }
0x147a   :  { %v6502_v40 = vrot.slane %v6501_v57, 4 }
0x147c   :  { %v6503_v49 = vadd.f32 %v6502_v40, %v6501_v57 }
0x147e   :  { %v6504_v46 = vrot.slane %v6503_v49, 2 }
0x1480   :  { %v6505_v16 = vadd.f32 %v6504_v46, %v6503_v49 }
0x1482   :  { %v6506_v20 = vrot.slane %v6505_v16, 1 }
0x1484   :  { %v6507_v37 = vadd.f32 %v6506_v20, %v6505_v16 }
0x1486   :  { %7932 = vpush %v6507_v37 }
0x14b7   :  { %s7933_s27 = spop %7932 }
0x14b8   :  { %v6509_v14 = vstv %s7933_s27 }
0x14b9   :  { %v6511_v59 = vmul.f32 0.5, %v6509_v14 }
0x14bb   :  { %6513 = vst.msk [vmem:[#allocation17] sm:$0x1] %vm6512_vm3, %v6511_v59 }
0x14bc   :  { %8967 = shalt.err (!%p8964_p11)
}
0x14bd   :  { %6523 = dma.vmem_to_hbm [thread:$0]  %s6521_s26, 16, %s12178_s18, [#allocation7]  }
0x14be   :  { %8984 = dma.done.wait [#allocation7], 16  }
0x14bf   :  { %8985 = vsyncadd [#allocation7], 4294967280 }
0x14c0   :  { %6527 = vsyncpa [#allocation6], 1 }
0x14c1   :  { %6528 = vsyncpa [#allocation9], 1 }
0x14c2   :  { %6529 = vsyncpa [#allocation12], 1 }
0x14c3   :  { %6530 = vsyncpa [#allocation15], 1 }
0x14c4   :  { %6531 = vsyncpa [#allocation7], 1 }

</bundles_post_ra>
